<compile_context>
chip_gen: v6e
topology: v6e:2x2x1
jax: 0.10.0
libtpu: 0.0.40
codegen_flags: <defaults>
</compile_context>

<pallas_src>
import functools

import jax
import jax.numpy as jnp
from jax.experimental import pallas as pl
from jax.experimental.pallas import tpu as pltpu


def _convt_im2col_kernel(x_ref, w_ref, b_ref, o_ref, cols_ref, *,
                         cin, n_kh, n_kw, wp, tm):
    """One output tile: build im2col columns in VMEM, one MXU matmul, bias+sigmoid."""
    # x_ref:    (1, Cin, Lw)  flattened (row pitch Wp) dilated+padded input window
    #                         covering this tile's output columns + tap halo
    # w_ref:    (Cout, K)     flipped-kernel weight matrix, K = kH*kW*Cin
    # b_ref:    (Cout, 1)     bias
    # o_ref:    (Cout, TM)    lane-dense output tile ("wide" row-major pixels)
    # cols_ref: (K, TM)       VMEM scratch: im2col tile (never touches HBM)
    for t in range(n_kh * n_kw):
        kh, kw = divmod(t, n_kw)
        off = kh * wp + kw                                  # static flat tap offset
        cols_ref[pl.ds(t * cin, cin), :] = x_ref[0, :, off:off + tm]
    acc = jnp.dot(w_ref[...], cols_ref[...], preferred_element_type=jnp.float32)
    acc = acc + b_ref[...]
    # sigmoid via one EUP tanh (numerically stable, frees VPU/EUP slots vs exp+div)
    o_ref[...] = (0.5 * jnp.tanh(0.5 * acc) + 0.5).astype(o_ref.dtype)


def prepare_convt_params(weight, bias):
    """Static weight/bias transform, hoisted out of the per-call path."""
    Cin, Cout, kH, kW = weight.shape
    # w_mat[co, (kh*kW + kw)*Cin + ci] = weight[ci, co, kH-1-kh, kW-1-kw]
    w_mat = (jnp.flip(weight, axis=(2, 3))
             .transpose(1, 2, 3, 0)
             .reshape(Cout, kH * kW * Cin)
             .astype(jnp.float32))
    b_col = bias.reshape(Cout, 1).astype(jnp.float32)
    return w_mat, b_col


@functools.partial(jax.jit, static_argnames=("kernel_size", "stride"))
def conv_transpose2d_sigmoid(x, w_mat, b_col, *, kernel_size, stride):
    """x: (1, Cin, H, W) f32; w_mat/b_col from prepare_convt_params."""
    N, Cin, H, W = x.shape
    kH, kW = kernel_size
    sh, sw = stride
    Cout, K = w_mat.shape
    assert N == 1 and K == kH * kW * Cin

    Hout = (H - 1) * sh + kH
    Wout = (W - 1) * sw + kW
    Hp = Hout + kH - 1              # dilated + padded input height
    Wp = Wout + kW - 1              # dilated + padded input width (= wide row pitch)

    # "wide" output: Hout rows x Wp columns row-major; the kW-1 junk columns per
    # row keep every im2col tap a single contiguous flat window.
    M = Hout * Wp
    lanes = pl.cdiv(M, 128)
    # >=2 grid steps so v7x megacore can shard the pixel axis across both TCs;
    # cap the tile so the (K, TM) im2col scratch stays ~2 MB on every generation.
    n_tiles = max(2, pl.cdiv(lanes, 16)) if lanes >= 2 else 1
    TM = pl.cdiv(lanes, n_tiles) * 128
    Mp = TM * n_tiles

    max_off = (kH - 1) * Wp + (kW - 1)      # largest flat tap offset
    Lw = TM + max_off                       # per-tile input window length
    need = (n_tiles - 1) * TM + Lw          # flat input length required

    # dilate-by-stride + pad(k-1) (+ trailing zero rows) in a single lax.pad.
    extra_rows = pl.cdiv(max(need - Hp * Wp, 0), Wp)
    x_pad = jax.lax.pad(
        x[0].astype(jnp.float32), jnp.float32(0.0),
        ((0, 0, 0),
         (kH - 1, kH - 1 + extra_rows, sh - 1),
         (kW - 1, kW - 1, sw - 1)))
    x_flat = x_pad.reshape(Cin, (Hp + extra_rows) * Wp)

    # tiny static gather: per-tile overlapping windows -> fully static in-kernel
    # addressing (no dynamic lane shifts inside the kernel).
    x_win = jnp.stack([x_flat[:, i * TM: i * TM + Lw] for i in range(n_tiles)],
                      axis=0)

    kernel = functools.partial(_convt_im2col_kernel,
                               cin=Cin, n_kh=kH, n_kw=kW, wp=Wp, tm=TM)
    out = pl.pallas_call(
        kernel,
        out_shape=jax.ShapeDtypeStruct((Cout, Mp), jnp.float32),
        grid_spec=pltpu.PrefetchScalarGridSpec(
            num_scalar_prefetch=0,
            grid=(n_tiles,),
            in_specs=[
                pl.BlockSpec((1, Cin, Lw), lambda i: (i, 0, 0)),   # input window
                pl.BlockSpec((Cout, K), lambda i: (0, 0)),         # weights (resident)
                pl.BlockSpec((Cout, 1), lambda i: (0, 0)),         # bias
            ],
            out_specs=pl.BlockSpec((Cout, TM), lambda i: (0, i)),
            scratch_shapes=[pltpu.VMEM((K, TM), jnp.float32)],
        ),
        compiler_params=pltpu.CompilerParams(
            dimension_semantics=("parallel",)),
    )(x_win, w_mat, b_col)

    # (Cout, Hout*Wp) wide slab -> trim junk columns -> NCHW (no transpose needed)
    y = out[:, :M].reshape(Cout, Hout, Wp)[:, :, :Wout]
    return y[None].astype(x.dtype)


def _reference(x, weight, bias, stride):
    """Pure-JAX reference (ConvTranspose2d + sigmoid) for correctness check."""
    Cin, Cout, kH, kW = weight.shape
    sh, sw = stride
    w_rot = jnp.flip(weight, axis=(2, 3)).transpose(1, 0, 2, 3)  # (Cout, Cin, kH, kW)
    y = jax.lax.conv_general_dilated(
        x, w_rot, window_strides=(1, 1),
        padding=[(kH - 1, kH - 1), (kW - 1, kW - 1)],
        lhs_dilation=(sh, sw),
        dimension_numbers=("NCHW", "OIHW", "NCHW"))
    y = y + bias.reshape(1, -1, 1, 1)
    return jax.nn.sigmoid(y)


if __name__ == "__main__":
    key = jax.random.PRNGKey(0)
    kx, kw_, kb = jax.random.split(key, 3)

    # small shapes consistent with the module (Cin=3, Cout=16, k=9x9, stride=(2,3))
    x = jax.random.normal(kx, (1, 3, 16, 16), dtype=jnp.float32)
    weight = jax.random.normal(kw_, (3, 16, 9, 9), dtype=jnp.float32) * 0.05
    bias = jax.random.normal(kb, (16,), dtype=jnp.float32) * 0.05

    # weight/bias transform hoisted out of the per-call path (weights are static)
    w_mat, b_col = prepare_convt_params(weight, bias)

    out = conv_transpose2d_sigmoid(x, w_mat, b_col,
                                   kernel_size=(9, 9), stride=(2, 3))
    out = jax.block_until_ready(out)

    ref = jax.block_until_ready(_reference(x, weight, bias, stride=(2, 3)))
    assert out.shape == ref.shape == (1, 16, (16 - 1) * 2 + 9, (16 - 1) * 3 + 9)
    if not jnp.allclose(out, ref, atol=1e-5, rtol=1e-5):
        raise AssertionError("Pallas output does not match reference")

    print("KERNEL_OK")
</pallas_src>

<mosaic_0001>
module attributes {stable_mosaic.version = 11 : i64} {
  func.func @_convt_im2col_kernel(%arg0: i32, %arg1: memref<1x3x1784xf32, #tpu.memory_space<vmem>>, %arg2: memref<16x243xf32, #tpu.memory_space<vmem>>, %arg3: memref<16x1xf32, #tpu.memory_space<vmem>>, %arg4: memref<16x1280xf32, #tpu.memory_space<vmem>>, %arg5: memref<243x1280xf32, #tpu.memory_space<vmem>>) attributes {dimension_semantics = [#tpu.dimension_semantics<parallel>], iteration_bounds = array<i64: 2>, scalar_prefetch = 0 : i64, scratch_operands = 1 : i64, tpu.core_type = #tpu.core_type<tc>, window_params = [{transform_indices = @transform_0, window_bounds = array<i64: 1, 3, 1784>}, {pipeline_mode = #tpu.pipeline_mode<synchronous>, transform_indices = @transform_1, window_bounds = array<i64: 16, 243>}, {pipeline_mode = #tpu.pipeline_mode<synchronous>, transform_indices = @transform_2, window_bounds = array<i64: 16, 1>}, {transform_indices = @transform_3, window_bounds = array<i64: 16, 1280>}]} {
    %c0 = arith.constant 0 : index
    %c0_0 = arith.constant 0 : index
    %c0_1 = arith.constant 0 : index
    %0 = vector.load %arg1[%c0, %c0_0, %c0_1] : memref<1x3x1784xf32, #tpu.memory_space<vmem>>, vector<1x3x1280xf32>
    %1 = vector.shape_cast %0 : vector<1x3x1280xf32> to vector<3x1280xf32>
    %c0_2 = arith.constant 0 : index
    %c0_3 = arith.constant 0 : index
    %2 = vector.load %arg5[%c0_2, %c0_3] : memref<243x1280xf32, #tpu.memory_space<vmem>>, vector<3x1280xf32>
    tpu.vector_store %arg5[%c0_2, %c0_3], %1 {strides = array<i32>} : memref<243x1280xf32, #tpu.memory_space<vmem>>, vector<3x1280xf32>,
    %c0_4 = arith.constant 0 : index
    %c0_5 = arith.constant 0 : index
    %c1 = arith.constant 1 : index
    %3 = vector.load %arg1[%c0_4, %c0_5, %c1] : memref<1x3x1784xf32, #tpu.memory_space<vmem>>, vector<1x3x1280xf32>
    %4 = vector.shape_cast %3 : vector<1x3x1280xf32> to vector<3x1280xf32>
    %c3 = arith.constant 3 : index
    %c0_6 = arith.constant 0 : index
    %5 = vector.load %arg5[%c3, %c0_6] : memref<243x1280xf32, #tpu.memory_space<vmem>>, vector<3x1280xf32>
    tpu.vector_store %arg5[%c3, %c0_6], %4 {strides = array<i32>} : memref<243x1280xf32, #tpu.memory_space<vmem>>, vector<3x1280xf32>,
    %c0_7 = arith.constant 0 : index
    %c0_8 = arith.constant 0 : index
    %c2 = arith.constant 2 : index
    %6 = vector.load %arg1[%c0_7, %c0_8, %c2] : memref<1x3x1784xf32, #tpu.memory_space<vmem>>, vector<1x3x1280xf32>
    %7 = vector.shape_cast %6 : vector<1x3x1280xf32> to vector<3x1280xf32>
    %c6 = arith.constant 6 : index
    %c0_9 = arith.constant 0 : index
    %8 = vector.load %arg5[%c6, %c0_9] : memref<243x1280xf32, #tpu.memory_space<vmem>>, vector<3x1280xf32>
    tpu.vector_store %arg5[%c6, %c0_9], %7 {strides = array<i32>} : memref<243x1280xf32, #tpu.memory_space<vmem>>, vector<3x1280xf32>,
    %c0_10 = arith.constant 0 : index
    %c0_11 = arith.constant 0 : index
    %c3_12 = arith.constant 3 : index
    %9 = vector.load %arg1[%c0_10, %c0_11, %c3_12] : memref<1x3x1784xf32, #tpu.memory_space<vmem>>, vector<1x3x1280xf32>
    %10 = vector.shape_cast %9 : vector<1x3x1280xf32> to vector<3x1280xf32>
    %c9 = arith.constant 9 : index
    %c0_13 = arith.constant 0 : index
    %11 = vector.load %arg5[%c9, %c0_13] : memref<243x1280xf32, #tpu.memory_space<vmem>>, vector<3x1280xf32>
    tpu.vector_store %arg5[%c9, %c0_13], %10 {strides = array<i32>} : memref<243x1280xf32, #tpu.memory_space<vmem>>, vector<3x1280xf32>,
    %c0_14 = arith.constant 0 : index
    %c0_15 = arith.constant 0 : index
    %c4 = arith.constant 4 : index
    %12 = vector.load %arg1[%c0_14, %c0_15, %c4] : memref<1x3x1784xf32, #tpu.memory_space<vmem>>, vector<1x3x1280xf32>
    %13 = vector.shape_cast %12 : vector<1x3x1280xf32> to vector<3x1280xf32>
    %c12 = arith.constant 12 : index
    %c0_16 = arith.constant 0 : index
    %14 = vector.load %arg5[%c12, %c0_16] : memref<243x1280xf32, #tpu.memory_space<vmem>>, vector<3x1280xf32>
    tpu.vector_store %arg5[%c12, %c0_16], %13 {strides = array<i32>} : memref<243x1280xf32, #tpu.memory_space<vmem>>, vector<3x1280xf32>,
    %c0_17 = arith.constant 0 : index
    %c0_18 = arith.constant 0 : index
    %c5 = arith.constant 5 : index
    %15 = vector.load %arg1[%c0_17, %c0_18, %c5] : memref<1x3x1784xf32, #tpu.memory_space<vmem>>, vector<1x3x1280xf32>
    %16 = vector.shape_cast %15 : vector<1x3x1280xf32> to vector<3x1280xf32>
    %c15 = arith.constant 15 : index
    %c0_19 = arith.constant 0 : index
    %17 = vector.load %arg5[%c15, %c0_19] : memref<243x1280xf32, #tpu.memory_space<vmem>>, vector<3x1280xf32>
    tpu.vector_store %arg5[%c15, %c0_19], %16 {strides = array<i32>} : memref<243x1280xf32, #tpu.memory_space<vmem>>, vector<3x1280xf32>,
    %c0_20 = arith.constant 0 : index
    %c0_21 = arith.constant 0 : index
    %c6_22 = arith.constant 6 : index
    %18 = vector.load %arg1[%c0_20, %c0_21, %c6_22] : memref<1x3x1784xf32, #tpu.memory_space<vmem>>, vector<1x3x1280xf32>
    %19 = vector.shape_cast %18 : vector<1x3x1280xf32> to vector<3x1280xf32>
    %c18 = arith.constant 18 : index
    %c0_23 = arith.constant 0 : index
    %20 = vector.load %arg5[%c18, %c0_23] : memref<243x1280xf32, #tpu.memory_space<vmem>>, vector<3x1280xf32>
    tpu.vector_store %arg5[%c18, %c0_23], %19 {strides = array<i32>} : memref<243x1280xf32, #tpu.memory_space<vmem>>, vector<3x1280xf32>,
    %c0_24 = arith.constant 0 : index
    %c0_25 = arith.constant 0 : index
    %c7 = arith.constant 7 : index
    %21 = vector.load %arg1[%c0_24, %c0_25, %c7] : memref<1x3x1784xf32, #tpu.memory_space<vmem>>, vector<1x3x1280xf32>
    %22 = vector.shape_cast %21 : vector<1x3x1280xf32> to vector<3x1280xf32>
    %c21 = arith.constant 21 : index
    %c0_26 = arith.constant 0 : index
    %23 = vector.load %arg5[%c21, %c0_26] : memref<243x1280xf32, #tpu.memory_space<vmem>>, vector<3x1280xf32>
    tpu.vector_store %arg5[%c21, %c0_26], %22 {strides = array<i32>} : memref<243x1280xf32, #tpu.memory_space<vmem>>, vector<3x1280xf32>,
    %c0_27 = arith.constant 0 : index
    %c0_28 = arith.constant 0 : index
    %c8 = arith.constant 8 : index
    %24 = vector.load %arg1[%c0_27, %c0_28, %c8] : memref<1x3x1784xf32, #tpu.memory_space<vmem>>, vector<1x3x1280xf32>
    %25 = vector.shape_cast %24 : vector<1x3x1280xf32> to vector<3x1280xf32>
    %c24 = arith.constant 24 : index
    %c0_29 = arith.constant 0 : index
    %26 = vector.load %arg5[%c24, %c0_29] : memref<243x1280xf32, #tpu.memory_space<vmem>>, vector<3x1280xf32>
    tpu.vector_store %arg5[%c24, %c0_29], %25 {strides = array<i32>} : memref<243x1280xf32, #tpu.memory_space<vmem>>, vector<3x1280xf32>,
    %c0_30 = arith.constant 0 : index
    %c0_31 = arith.constant 0 : index
    %c62 = arith.constant 62 : index
    %27 = vector.load %arg1[%c0_30, %c0_31, %c62] : memref<1x3x1784xf32, #tpu.memory_space<vmem>>, vector<1x3x1280xf32>
    %28 = vector.shape_cast %27 : vector<1x3x1280xf32> to vector<3x1280xf32>
    %c27 = arith.constant 27 : index
    %c0_32 = arith.constant 0 : index
    %29 = vector.load %arg5[%c27, %c0_32] : memref<243x1280xf32, #tpu.memory_space<vmem>>, vector<3x1280xf32>
    tpu.vector_store %arg5[%c27, %c0_32], %28 {strides = array<i32>} : memref<243x1280xf32, #tpu.memory_space<vmem>>, vector<3x1280xf32>,
    %c0_33 = arith.constant 0 : index
    %c0_34 = arith.constant 0 : index
    %c63 = arith.constant 63 : index
    %30 = vector.load %arg1[%c0_33, %c0_34, %c63] : memref<1x3x1784xf32, #tpu.memory_space<vmem>>, vector<1x3x1280xf32>
    %31 = vector.shape_cast %30 : vector<1x3x1280xf32> to vector<3x1280xf32>
    %c30 = arith.constant 30 : index
    %c0_35 = arith.constant 0 : index
    %32 = vector.load %arg5[%c30, %c0_35] : memref<243x1280xf32, #tpu.memory_space<vmem>>, vector<3x1280xf32>
    tpu.vector_store %arg5[%c30, %c0_35], %31 {strides = array<i32>} : memref<243x1280xf32, #tpu.memory_space<vmem>>, vector<3x1280xf32>,
    %c0_36 = arith.constant 0 : index
    %c0_37 = arith.constant 0 : index
    %c64 = arith.constant 64 : index
    %33 = vector.load %arg1[%c0_36, %c0_37, %c64] : memref<1x3x1784xf32, #tpu.memory_space<vmem>>, vector<1x3x1280xf32>
    %34 = vector.shape_cast %33 : vector<1x3x1280xf32> to vector<3x1280xf32>
    %c33 = arith.constant 33 : index
    %c0_38 = arith.constant 0 : index
    %35 = vector.load %arg5[%c33, %c0_38] : memref<243x1280xf32, #tpu.memory_space<vmem>>, vector<3x1280xf32>
    tpu.vector_store %arg5[%c33, %c0_38], %34 {strides = array<i32>} : memref<243x1280xf32, #tpu.memory_space<vmem>>, vector<3x1280xf32>,
    %c0_39 = arith.constant 0 : index
    %c0_40 = arith.constant 0 : index
    %c65 = arith.constant 65 : index
    %36 = vector.load %arg1[%c0_39, %c0_40, %c65] : memref<1x3x1784xf32, #tpu.memory_space<vmem>>, vector<1x3x1280xf32>
    %37 = vector.shape_cast %36 : vector<1x3x1280xf32> to vector<3x1280xf32>
    %c36 = arith.constant 36 : index
    %c0_41 = arith.constant 0 : index
    %38 = vector.load %arg5[%c36, %c0_41] : memref<243x1280xf32, #tpu.memory_space<vmem>>, vector<3x1280xf32>
    tpu.vector_store %arg5[%c36, %c0_41], %37 {strides = array<i32>} : memref<243x1280xf32, #tpu.memory_space<vmem>>, vector<3x1280xf32>,
    %c0_42 = arith.constant 0 : index
    %c0_43 = arith.constant 0 : index
    %c66 = arith.constant 66 : index
    %39 = vector.load %arg1[%c0_42, %c0_43, %c66] : memref<1x3x1784xf32, #tpu.memory_space<vmem>>, vector<1x3x1280xf32>
    %40 = vector.shape_cast %39 : vector<1x3x1280xf32> to vector<3x1280xf32>
    %c39 = arith.constant 39 : index
    %c0_44 = arith.constant 0 : index
    %41 = vector.load %arg5[%c39, %c0_44] : memref<243x1280xf32, #tpu.memory_space<vmem>>, vector<3x1280xf32>
    tpu.vector_store %arg5[%c39, %c0_44], %40 {strides = array<i32>} : memref<243x1280xf32, #tpu.memory_space<vmem>>, vector<3x1280xf32>,
    %c0_45 = arith.constant 0 : index
    %c0_46 = arith.constant 0 : index
    %c67 = arith.constant 67 : index
    %42 = vector.load %arg1[%c0_45, %c0_46, %c67] : memref<1x3x1784xf32, #tpu.memory_space<vmem>>, vector<1x3x1280xf32>
    %43 = vector.shape_cast %42 : vector<1x3x1280xf32> to vector<3x1280xf32>
    %c42 = arith.constant 42 : index
    %c0_47 = arith.constant 0 : index
    %44 = vector.load %arg5[%c42, %c0_47] : memref<243x1280xf32, #tpu.memory_space<vmem>>, vector<3x1280xf32>
    tpu.vector_store %arg5[%c42, %c0_47], %43 {strides = array<i32>} : memref<243x1280xf32, #tpu.memory_space<vmem>>, vector<3x1280xf32>,
    %c0_48 = arith.constant 0 : index
    %c0_49 = arith.constant 0 : index
    %c68 = arith.constant 68 : index
    %45 = vector.load %arg1[%c0_48, %c0_49, %c68] : memref<1x3x1784xf32, #tpu.memory_space<vmem>>, vector<1x3x1280xf32>
    %46 = vector.shape_cast %45 : vector<1x3x1280xf32> to vector<3x1280xf32>
    %c45 = arith.constant 45 : index
    %c0_50 = arith.constant 0 : index
    %47 = vector.load %arg5[%c45, %c0_50] : memref<243x1280xf32, #tpu.memory_space<vmem>>, vector<3x1280xf32>
    tpu.vector_store %arg5[%c45, %c0_50], %46 {strides = array<i32>} : memref<243x1280xf32, #tpu.memory_space<vmem>>, vector<3x1280xf32>,
    %c0_51 = arith.constant 0 : index
    %c0_52 = arith.constant 0 : index
    %c69 = arith.constant 69 : index
    %48 = vector.load %arg1[%c0_51, %c0_52, %c69] : memref<1x3x1784xf32, #tpu.memory_space<vmem>>, vector<1x3x1280xf32>
    %49 = vector.shape_cast %48 : vector<1x3x1280xf32> to vector<3x1280xf32>
    %c48 = arith.constant 48 : index
    %c0_53 = arith.constant 0 : index
    %50 = vector.load %arg5[%c48, %c0_53] : memref<243x1280xf32, #tpu.memory_space<vmem>>, vector<3x1280xf32>
    tpu.vector_store %arg5[%c48, %c0_53], %49 {strides = array<i32>} : memref<243x1280xf32, #tpu.memory_space<vmem>>, vector<3x1280xf32>,
    %c0_54 = arith.constant 0 : index
    %c0_55 = arith.constant 0 : index
    %c70 = arith.constant 70 : index
    %51 = vector.load %arg1[%c0_54, %c0_55, %c70] : memref<1x3x1784xf32, #tpu.memory_space<vmem>>, vector<1x3x1280xf32>
    %52 = vector.shape_cast %51 : vector<1x3x1280xf32> to vector<3x1280xf32>
    %c51 = arith.constant 51 : index
    %c0_56 = arith.constant 0 : index
    %53 = vector.load %arg5[%c51, %c0_56] : memref<243x1280xf32, #tpu.memory_space<vmem>>, vector<3x1280xf32>
    tpu.vector_store %arg5[%c51, %c0_56], %52 {strides = array<i32>} : memref<243x1280xf32, #tpu.memory_space<vmem>>, vector<3x1280xf32>,
    %c0_57 = arith.constant 0 : index
    %c0_58 = arith.constant 0 : index
    %c124 = arith.constant 124 : index
    %54 = vector.load %arg1[%c0_57, %c0_58, %c124] : memref<1x3x1784xf32, #tpu.memory_space<vmem>>, vector<1x3x1280xf32>
    %55 = vector.shape_cast %54 : vector<1x3x1280xf32> to vector<3x1280xf32>
    %c54 = arith.constant 54 : index
    %c0_59 = arith.constant 0 : index
    %56 = vector.load %arg5[%c54, %c0_59] : memref<243x1280xf32, #tpu.memory_space<vmem>>, vector<3x1280xf32>
    tpu.vector_store %arg5[%c54, %c0_59], %55 {strides = array<i32>} : memref<243x1280xf32, #tpu.memory_space<vmem>>, vector<3x1280xf32>,
    %c0_60 = arith.constant 0 : index
    %c0_61 = arith.constant 0 : index
    %c125 = arith.constant 125 : index
    %57 = vector.load %arg1[%c0_60, %c0_61, %c125] : memref<1x3x1784xf32, #tpu.memory_space<vmem>>, vector<1x3x1280xf32>
    %58 = vector.shape_cast %57 : vector<1x3x1280xf32> to vector<3x1280xf32>
    %c57 = arith.constant 57 : index
    %c0_62 = arith.constant 0 : index
    %59 = vector.load %arg5[%c57, %c0_62] : memref<243x1280xf32, #tpu.memory_space<vmem>>, vector<3x1280xf32>
    tpu.vector_store %arg5[%c57, %c0_62], %58 {strides = array<i32>} : memref<243x1280xf32, #tpu.memory_space<vmem>>, vector<3x1280xf32>,
    %c0_63 = arith.constant 0 : index
    %c0_64 = arith.constant 0 : index
    %c126 = arith.constant 126 : index
    %60 = vector.load %arg1[%c0_63, %c0_64, %c126] : memref<1x3x1784xf32, #tpu.memory_space<vmem>>, vector<1x3x1280xf32>
    %61 = vector.shape_cast %60 : vector<1x3x1280xf32> to vector<3x1280xf32>
    %c60 = arith.constant 60 : index
    %c0_65 = arith.constant 0 : index
    %62 = vector.load %arg5[%c60, %c0_65] : memref<243x1280xf32, #tpu.memory_space<vmem>>, vector<3x1280xf32>
    tpu.vector_store %arg5[%c60, %c0_65], %61 {strides = array<i32>} : memref<243x1280xf32, #tpu.memory_space<vmem>>, vector<3x1280xf32>,
    %c0_66 = arith.constant 0 : index
    %c0_67 = arith.constant 0 : index
    %c127 = arith.constant 127 : index
    %63 = vector.load %arg1[%c0_66, %c0_67, %c127] : memref<1x3x1784xf32, #tpu.memory_space<vmem>>, vector<1x3x1280xf32>
    %64 = vector.shape_cast %63 : vector<1x3x1280xf32> to vector<3x1280xf32>
    %c63_68 = arith.constant 63 : index
    %c0_69 = arith.constant 0 : index
    %65 = vector.load %arg5[%c63_68, %c0_69] : memref<243x1280xf32, #tpu.memory_space<vmem>>, vector<3x1280xf32>
    tpu.vector_store %arg5[%c63_68, %c0_69], %64 {strides = array<i32>} : memref<243x1280xf32, #tpu.memory_space<vmem>>, vector<3x1280xf32>,
    %c0_70 = arith.constant 0 : index
    %c0_71 = arith.constant 0 : index
    %c128 = arith.constant 128 : index
    %66 = vector.load %arg1[%c0_70, %c0_71, %c128] : memref<1x3x1784xf32, #tpu.memory_space<vmem>>, vector<1x3x1280xf32>
    %67 = vector.shape_cast %66 : vector<1x3x1280xf32> to vector<3x1280xf32>
    %c66_72 = arith.constant 66 : index
    %c0_73 = arith.constant 0 : index
    %68 = vector.load %arg5[%c66_72, %c0_73] : memref<243x1280xf32, #tpu.memory_space<vmem>>, vector<3x1280xf32>
    tpu.vector_store %arg5[%c66_72, %c0_73], %67 {strides = array<i32>} : memref<243x1280xf32, #tpu.memory_space<vmem>>, vector<3x1280xf32>,
    %c0_74 = arith.constant 0 : index
    %c0_75 = arith.constant 0 : index
    %c129 = arith.constant 129 : index
    %69 = vector.load %arg1[%c0_74, %c0_75, %c129] : memref<1x3x1784xf32, #tpu.memory_space<vmem>>, vector<1x3x1280xf32>
    %70 = vector.shape_cast %69 : vector<1x3x1280xf32> to vector<3x1280xf32>
    %c69_76 = arith.constant 69 : index
    %c0_77 = arith.constant 0 : index
    %71 = vector.load %arg5[%c69_76, %c0_77] : memref<243x1280xf32, #tpu.memory_space<vmem>>, vector<3x1280xf32>
    tpu.vector_store %arg5[%c69_76, %c0_77], %70 {strides = array<i32>} : memref<243x1280xf32, #tpu.memory_space<vmem>>, vector<3x1280xf32>,
    %c0_78 = arith.constant 0 : index
    %c0_79 = arith.constant 0 : index
    %c130 = arith.constant 130 : index
    %72 = vector.load %arg1[%c0_78, %c0_79, %c130] : memref<1x3x1784xf32, #tpu.memory_space<vmem>>, vector<1x3x1280xf32>
    %73 = vector.shape_cast %72 : vector<1x3x1280xf32> to vector<3x1280xf32>
    %c72 = arith.constant 72 : index
    %c0_80 = arith.constant 0 : index
    %74 = vector.load %arg5[%c72, %c0_80] : memref<243x1280xf32, #tpu.memory_space<vmem>>, vector<3x1280xf32>
    tpu.vector_store %arg5[%c72, %c0_80], %73 {strides = array<i32>} : memref<243x1280xf32, #tpu.memory_space<vmem>>, vector<3x1280xf32>,
    %c0_81 = arith.constant 0 : index
    %c0_82 = arith.constant 0 : index
    %c131 = arith.constant 131 : index
    %75 = vector.load %arg1[%c0_81, %c0_82, %c131] : memref<1x3x1784xf32, #tpu.memory_space<vmem>>, vector<1x3x1280xf32>
    %76 = vector.shape_cast %75 : vector<1x3x1280xf32> to vector<3x1280xf32>
    %c75 = arith.constant 75 : index
    %c0_83 = arith.constant 0 : index
    %77 = vector.load %arg5[%c75, %c0_83] : memref<243x1280xf32, #tpu.memory_space<vmem>>, vector<3x1280xf32>
    tpu.vector_store %arg5[%c75, %c0_83], %76 {strides = array<i32>} : memref<243x1280xf32, #tpu.memory_space<vmem>>, vector<3x1280xf32>,
    %c0_84 = arith.constant 0 : index
    %c0_85 = arith.constant 0 : index
    %c132 = arith.constant 132 : index
    %78 = vector.load %arg1[%c0_84, %c0_85, %c132] : memref<1x3x1784xf32, #tpu.memory_space<vmem>>, vector<1x3x1280xf32>
    %79 = vector.shape_cast %78 : vector<1x3x1280xf32> to vector<3x1280xf32>
    %c78 = arith.constant 78 : index
    %c0_86 = arith.constant 0 : index
    %80 = vector.load %arg5[%c78, %c0_86] : memref<243x1280xf32, #tpu.memory_space<vmem>>, vector<3x1280xf32>
    tpu.vector_store %arg5[%c78, %c0_86], %79 {strides = array<i32>} : memref<243x1280xf32, #tpu.memory_space<vmem>>, vector<3x1280xf32>,
    %c0_87 = arith.constant 0 : index
    %c0_88 = arith.constant 0 : index
    %c186 = arith.constant 186 : index
    %81 = vector.load %arg1[%c0_87, %c0_88, %c186] : memref<1x3x1784xf32, #tpu.memory_space<vmem>>, vector<1x3x1280xf32>
    %82 = vector.shape_cast %81 : vector<1x3x1280xf32> to vector<3x1280xf32>
    %c81 = arith.constant 81 : index
    %c0_89 = arith.constant 0 : index
    %83 = vector.load %arg5[%c81, %c0_89] : memref<243x1280xf32, #tpu.memory_space<vmem>>, vector<3x1280xf32>
    tpu.vector_store %arg5[%c81, %c0_89], %82 {strides = array<i32>} : memref<243x1280xf32, #tpu.memory_space<vmem>>, vector<3x1280xf32>,
    %c0_90 = arith.constant 0 : index
    %c0_91 = arith.constant 0 : index
    %c187 = arith.constant 187 : index
    %84 = vector.load %arg1[%c0_90, %c0_91, %c187] : memref<1x3x1784xf32, #tpu.memory_space<vmem>>, vector<1x3x1280xf32>
    %85 = vector.shape_cast %84 : vector<1x3x1280xf32> to vector<3x1280xf32>
    %c84 = arith.constant 84 : index
    %c0_92 = arith.constant 0 : index
    %86 = vector.load %arg5[%c84, %c0_92] : memref<243x1280xf32, #tpu.memory_space<vmem>>, vector<3x1280xf32>
    tpu.vector_store %arg5[%c84, %c0_92], %85 {strides = array<i32>} : memref<243x1280xf32, #tpu.memory_space<vmem>>, vector<3x1280xf32>,
    %c0_93 = arith.constant 0 : index
    %c0_94 = arith.constant 0 : index
    %c188 = arith.constant 188 : index
    %87 = vector.load %arg1[%c0_93, %c0_94, %c188] : memref<1x3x1784xf32, #tpu.memory_space<vmem>>, vector<1x3x1280xf32>
    %88 = vector.shape_cast %87 : vector<1x3x1280xf32> to vector<3x1280xf32>
    %c87 = arith.constant 87 : index
    %c0_95 = arith.constant 0 : index
    %89 = vector.load %arg5[%c87, %c0_95] : memref<243x1280xf32, #tpu.memory_space<vmem>>, vector<3x1280xf32>
    tpu.vector_store %arg5[%c87, %c0_95], %88 {strides = array<i32>} : memref<243x1280xf32, #tpu.memory_space<vmem>>, vector<3x1280xf32>,
    %c0_96 = arith.constant 0 : index
    %c0_97 = arith.constant 0 : index
    %c189 = arith.constant 189 : index
    %90 = vector.load %arg1[%c0_96, %c0_97, %c189] : memref<1x3x1784xf32, #tpu.memory_space<vmem>>, vector<1x3x1280xf32>
    %91 = vector.shape_cast %90 : vector<1x3x1280xf32> to vector<3x1280xf32>
    %c90 = arith.constant 90 : index
    %c0_98 = arith.constant 0 : index
    %92 = vector.load %arg5[%c90, %c0_98] : memref<243x1280xf32, #tpu.memory_space<vmem>>, vector<3x1280xf32>
    tpu.vector_store %arg5[%c90, %c0_98], %91 {strides = array<i32>} : memref<243x1280xf32, #tpu.memory_space<vmem>>, vector<3x1280xf32>,
    %c0_99 = arith.constant 0 : index
    %c0_100 = arith.constant 0 : index
    %c190 = arith.constant 190 : index
    %93 = vector.load %arg1[%c0_99, %c0_100, %c190] : memref<1x3x1784xf32, #tpu.memory_space<vmem>>, vector<1x3x1280xf32>
    %94 = vector.shape_cast %93 : vector<1x3x1280xf32> to vector<3x1280xf32>
    %c93 = arith.constant 93 : index
    %c0_101 = arith.constant 0 : index
    %95 = vector.load %arg5[%c93, %c0_101] : memref<243x1280xf32, #tpu.memory_space<vmem>>, vector<3x1280xf32>
    tpu.vector_store %arg5[%c93, %c0_101], %94 {strides = array<i32>} : memref<243x1280xf32, #tpu.memory_space<vmem>>, vector<3x1280xf32>,
    %c0_102 = arith.constant 0 : index
    %c0_103 = arith.constant 0 : index
    %c191 = arith.constant 191 : index
    %96 = vector.load %arg1[%c0_102, %c0_103, %c191] : memref<1x3x1784xf32, #tpu.memory_space<vmem>>, vector<1x3x1280xf32>
    %97 = vector.shape_cast %96 : vector<1x3x1280xf32> to vector<3x1280xf32>
    %c96 = arith.constant 96 : index
    %c0_104 = arith.constant 0 : index
    %98 = vector.load %arg5[%c96, %c0_104] : memref<243x1280xf32, #tpu.memory_space<vmem>>, vector<3x1280xf32>
    tpu.vector_store %arg5[%c96, %c0_104], %97 {strides = array<i32>} : memref<243x1280xf32, #tpu.memory_space<vmem>>, vector<3x1280xf32>,
    %c0_105 = arith.constant 0 : index
    %c0_106 = arith.constant 0 : index
    %c192 = arith.constant 192 : index
    %99 = vector.load %arg1[%c0_105, %c0_106, %c192] : memref<1x3x1784xf32, #tpu.memory_space<vmem>>, vector<1x3x1280xf32>
    %100 = vector.shape_cast %99 : vector<1x3x1280xf32> to vector<3x1280xf32>
    %c99 = arith.constant 99 : index
    %c0_107 = arith.constant 0 : index
    %101 = vector.load %arg5[%c99, %c0_107] : memref<243x1280xf32, #tpu.memory_space<vmem>>, vector<3x1280xf32>
    tpu.vector_store %arg5[%c99, %c0_107], %100 {strides = array<i32>} : memref<243x1280xf32, #tpu.memory_space<vmem>>, vector<3x1280xf32>,
    %c0_108 = arith.constant 0 : index
    %c0_109 = arith.constant 0 : index
    %c193 = arith.constant 193 : index
    %102 = vector.load %arg1[%c0_108, %c0_109, %c193] : memref<1x3x1784xf32, #tpu.memory_space<vmem>>, vector<1x3x1280xf32>
    %103 = vector.shape_cast %102 : vector<1x3x1280xf32> to vector<3x1280xf32>
    %c102 = arith.constant 102 : index
    %c0_110 = arith.constant 0 : index
    %104 = vector.load %arg5[%c102, %c0_110] : memref<243x1280xf32, #tpu.memory_space<vmem>>, vector<3x1280xf32>
    tpu.vector_store %arg5[%c102, %c0_110], %103 {strides = array<i32>} : memref<243x1280xf32, #tpu.memory_space<vmem>>, vector<3x1280xf32>,
    %c0_111 = arith.constant 0 : index
    %c0_112 = arith.constant 0 : index
    %c194 = arith.constant 194 : index
    %105 = vector.load %arg1[%c0_111, %c0_112, %c194] : memref<1x3x1784xf32, #tpu.memory_space<vmem>>, vector<1x3x1280xf32>
    %106 = vector.shape_cast %105 : vector<1x3x1280xf32> to vector<3x1280xf32>
    %c105 = arith.constant 105 : index
    %c0_113 = arith.constant 0 : index
    %107 = vector.load %arg5[%c105, %c0_113] : memref<243x1280xf32, #tpu.memory_space<vmem>>, vector<3x1280xf32>
    tpu.vector_store %arg5[%c105, %c0_113], %106 {strides = array<i32>} : memref<243x1280xf32, #tpu.memory_space<vmem>>, vector<3x1280xf32>,
    %c0_114 = arith.constant 0 : index
    %c0_115 = arith.constant 0 : index
    %c248 = arith.constant 248 : index
    %108 = vector.load %arg1[%c0_114, %c0_115, %c248] : memref<1x3x1784xf32, #tpu.memory_space<vmem>>, vector<1x3x1280xf32>
    %109 = vector.shape_cast %108 : vector<1x3x1280xf32> to vector<3x1280xf32>
    %c108 = arith.constant 108 : index
    %c0_116 = arith.constant 0 : index
    %110 = vector.load %arg5[%c108, %c0_116] : memref<243x1280xf32, #tpu.memory_space<vmem>>, vector<3x1280xf32>
    tpu.vector_store %arg5[%c108, %c0_116], %109 {strides = array<i32>} : memref<243x1280xf32, #tpu.memory_space<vmem>>, vector<3x1280xf32>,
    %c0_117 = arith.constant 0 : index
    %c0_118 = arith.constant 0 : index
    %c249 = arith.constant 249 : index
    %111 = vector.load %arg1[%c0_117, %c0_118, %c249] : memref<1x3x1784xf32, #tpu.memory_space<vmem>>, vector<1x3x1280xf32>
    %112 = vector.shape_cast %111 : vector<1x3x1280xf32> to vector<3x1280xf32>
    %c111 = arith.constant 111 : index
    %c0_119 = arith.constant 0 : index
    %113 = vector.load %arg5[%c111, %c0_119] : memref<243x1280xf32, #tpu.memory_space<vmem>>, vector<3x1280xf32>
    tpu.vector_store %arg5[%c111, %c0_119], %112 {strides = array<i32>} : memref<243x1280xf32, #tpu.memory_space<vmem>>, vector<3x1280xf32>,
    %c0_120 = arith.constant 0 : index
    %c0_121 = arith.constant 0 : index
    %c250 = arith.constant 250 : index
    %114 = vector.load %arg1[%c0_120, %c0_121, %c250] : memref<1x3x1784xf32, #tpu.memory_space<vmem>>, vector<1x3x1280xf32>
    %115 = vector.shape_cast %114 : vector<1x3x1280xf32> to vector<3x1280xf32>
    %c114 = arith.constant 114 : index
    %c0_122 = arith.constant 0 : index
    %116 = vector.load %arg5[%c114, %c0_122] : memref<243x1280xf32, #tpu.memory_space<vmem>>, vector<3x1280xf32>
    tpu.vector_store %arg5[%c114, %c0_122], %115 {strides = array<i32>} : memref<243x1280xf32, #tpu.memory_space<vmem>>, vector<3x1280xf32>,
    %c0_123 = arith.constant 0 : index
    %c0_124 = arith.constant 0 : index
    %c251 = arith.constant 251 : index
    %117 = vector.load %arg1[%c0_123, %c0_124, %c251] : memref<1x3x1784xf32, #tpu.memory_space<vmem>>, vector<1x3x1280xf32>
    %118 = vector.shape_cast %117 : vector<1x3x1280xf32> to vector<3x1280xf32>
    %c117 = arith.constant 117 : index
    %c0_125 = arith.constant 0 : index
    %119 = vector.load %arg5[%c117, %c0_125] : memref<243x1280xf32, #tpu.memory_space<vmem>>, vector<3x1280xf32>
    tpu.vector_store %arg5[%c117, %c0_125], %118 {strides = array<i32>} : memref<243x1280xf32, #tpu.memory_space<vmem>>, vector<3x1280xf32>,
    %c0_126 = arith.constant 0 : index
    %c0_127 = arith.constant 0 : index
    %c252 = arith.constant 252 : index
    %120 = vector.load %arg1[%c0_126, %c0_127, %c252] : memref<1x3x1784xf32, #tpu.memory_space<vmem>>, vector<1x3x1280xf32>
    %121 = vector.shape_cast %120 : vector<1x3x1280xf32> to vector<3x1280xf32>
    %c120 = arith.constant 120 : index
    %c0_128 = arith.constant 0 : index
    %122 = vector.load %arg5[%c120, %c0_128] : memref<243x1280xf32, #tpu.memory_space<vmem>>, vector<3x1280xf32>
    tpu.vector_store %arg5[%c120, %c0_128], %121 {strides = array<i32>} : memref<243x1280xf32, #tpu.memory_space<vmem>>, vector<3x1280xf32>,
    %c0_129 = arith.constant 0 : index
    %c0_130 = arith.constant 0 : index
    %c253 = arith.constant 253 : index
    %123 = vector.load %arg1[%c0_129, %c0_130, %c253] : memref<1x3x1784xf32, #tpu.memory_space<vmem>>, vector<1x3x1280xf32>
    %124 = vector.shape_cast %123 : vector<1x3x1280xf32> to vector<3x1280xf32>
    %c123 = arith.constant 123 : index
    %c0_131 = arith.constant 0 : index
    %125 = vector.load %arg5[%c123, %c0_131] : memref<243x1280xf32, #tpu.memory_space<vmem>>, vector<3x1280xf32>
    tpu.vector_store %arg5[%c123, %c0_131], %124 {strides = array<i32>} : memref<243x1280xf32, #tpu.memory_space<vmem>>, vector<3x1280xf32>,
    %c0_132 = arith.constant 0 : index
    %c0_133 = arith.constant 0 : index
    %c254 = arith.constant 254 : index
    %126 = vector.load %arg1[%c0_132, %c0_133, %c254] : memref<1x3x1784xf32, #tpu.memory_space<vmem>>, vector<1x3x1280xf32>
    %127 = vector.shape_cast %126 : vector<1x3x1280xf32> to vector<3x1280xf32>
    %c126_134 = arith.constant 126 : index
    %c0_135 = arith.constant 0 : index
    %128 = vector.load %arg5[%c126_134, %c0_135] : memref<243x1280xf32, #tpu.memory_space<vmem>>, vector<3x1280xf32>
    tpu.vector_store %arg5[%c126_134, %c0_135], %127 {strides = array<i32>} : memref<243x1280xf32, #tpu.memory_space<vmem>>, vector<3x1280xf32>,
    %c0_136 = arith.constant 0 : index
    %c0_137 = arith.constant 0 : index
    %c255 = arith.constant 255 : index
    %129 = vector.load %arg1[%c0_136, %c0_137, %c255] : memref<1x3x1784xf32, #tpu.memory_space<vmem>>, vector<1x3x1280xf32>
    %130 = vector.shape_cast %129 : vector<1x3x1280xf32> to vector<3x1280xf32>
    %c129_138 = arith.constant 129 : index
    %c0_139 = arith.constant 0 : index
    %131 = vector.load %arg5[%c129_138, %c0_139] : memref<243x1280xf32, #tpu.memory_space<vmem>>, vector<3x1280xf32>
    tpu.vector_store %arg5[%c129_138, %c0_139], %130 {strides = array<i32>} : memref<243x1280xf32, #tpu.memory_space<vmem>>, vector<3x1280xf32>,
    %c0_140 = arith.constant 0 : index
    %c0_141 = arith.constant 0 : index
    %c256 = arith.constant 256 : index
    %132 = vector.load %arg1[%c0_140, %c0_141, %c256] : memref<1x3x1784xf32, #tpu.memory_space<vmem>>, vector<1x3x1280xf32>
    %133 = vector.shape_cast %132 : vector<1x3x1280xf32> to vector<3x1280xf32>
    %c132_142 = arith.constant 132 : index
    %c0_143 = arith.constant 0 : index
    %134 = vector.load %arg5[%c132_142, %c0_143] : memref<243x1280xf32, #tpu.memory_space<vmem>>, vector<3x1280xf32>
    tpu.vector_store %arg5[%c132_142, %c0_143], %133 {strides = array<i32>} : memref<243x1280xf32, #tpu.memory_space<vmem>>, vector<3x1280xf32>,
    %c0_144 = arith.constant 0 : index
    %c0_145 = arith.constant 0 : index
    %c310 = arith.constant 310 : index
    %135 = vector.load %arg1[%c0_144, %c0_145, %c310] : memref<1x3x1784xf32, #tpu.memory_space<vmem>>, vector<1x3x1280xf32>
    %136 = vector.shape_cast %135 : vector<1x3x1280xf32> to vector<3x1280xf32>
    %c135 = arith.constant 135 : index
    %c0_146 = arith.constant 0 : index
    %137 = vector.load %arg5[%c135, %c0_146] : memref<243x1280xf32, #tpu.memory_space<vmem>>, vector<3x1280xf32>
    tpu.vector_store %arg5[%c135, %c0_146], %136 {strides = array<i32>} : memref<243x1280xf32, #tpu.memory_space<vmem>>, vector<3x1280xf32>,
    %c0_147 = arith.constant 0 : index
    %c0_148 = arith.constant 0 : index
    %c311 = arith.constant 311 : index
    %138 = vector.load %arg1[%c0_147, %c0_148, %c311] : memref<1x3x1784xf32, #tpu.memory_space<vmem>>, vector<1x3x1280xf32>
    %139 = vector.shape_cast %138 : vector<1x3x1280xf32> to vector<3x1280xf32>
    %c138 = arith.constant 138 : index
    %c0_149 = arith.constant 0 : index
    %140 = vector.load %arg5[%c138, %c0_149] : memref<243x1280xf32, #tpu.memory_space<vmem>>, vector<3x1280xf32>
    tpu.vector_store %arg5[%c138, %c0_149], %139 {strides = array<i32>} : memref<243x1280xf32, #tpu.memory_space<vmem>>, vector<3x1280xf32>,
    %c0_150 = arith.constant 0 : index
    %c0_151 = arith.constant 0 : index
    %c312 = arith.constant 312 : index
    %141 = vector.load %arg1[%c0_150, %c0_151, %c312] : memref<1x3x1784xf32, #tpu.memory_space<vmem>>, vector<1x3x1280xf32>
    %142 = vector.shape_cast %141 : vector<1x3x1280xf32> to vector<3x1280xf32>
    %c141 = arith.constant 141 : index
    %c0_152 = arith.constant 0 : index
    %143 = vector.load %arg5[%c141, %c0_152] : memref<243x1280xf32, #tpu.memory_space<vmem>>, vector<3x1280xf32>
    tpu.vector_store %arg5[%c141, %c0_152], %142 {strides = array<i32>} : memref<243x1280xf32, #tpu.memory_space<vmem>>, vector<3x1280xf32>,
    %c0_153 = arith.constant 0 : index
    %c0_154 = arith.constant 0 : index
    %c313 = arith.constant 313 : index
    %144 = vector.load %arg1[%c0_153, %c0_154, %c313] : memref<1x3x1784xf32, #tpu.memory_space<vmem>>, vector<1x3x1280xf32>
    %145 = vector.shape_cast %144 : vector<1x3x1280xf32> to vector<3x1280xf32>
    %c144 = arith.constant 144 : index
    %c0_155 = arith.constant 0 : index
    %146 = vector.load %arg5[%c144, %c0_155] : memref<243x1280xf32, #tpu.memory_space<vmem>>, vector<3x1280xf32>
    tpu.vector_store %arg5[%c144, %c0_155], %145 {strides = array<i32>} : memref<243x1280xf32, #tpu.memory_space<vmem>>, vector<3x1280xf32>,
    %c0_156 = arith.constant 0 : index
    %c0_157 = arith.constant 0 : index
    %c314 = arith.constant 314 : index
    %147 = vector.load %arg1[%c0_156, %c0_157, %c314] : memref<1x3x1784xf32, #tpu.memory_space<vmem>>, vector<1x3x1280xf32>
    %148 = vector.shape_cast %147 : vector<1x3x1280xf32> to vector<3x1280xf32>
    %c147 = arith.constant 147 : index
    %c0_158 = arith.constant 0 : index
    %149 = vector.load %arg5[%c147, %c0_158] : memref<243x1280xf32, #tpu.memory_space<vmem>>, vector<3x1280xf32>
    tpu.vector_store %arg5[%c147, %c0_158], %148 {strides = array<i32>} : memref<243x1280xf32, #tpu.memory_space<vmem>>, vector<3x1280xf32>,
    %c0_159 = arith.constant 0 : index
    %c0_160 = arith.constant 0 : index
    %c315 = arith.constant 315 : index
    %150 = vector.load %arg1[%c0_159, %c0_160, %c315] : memref<1x3x1784xf32, #tpu.memory_space<vmem>>, vector<1x3x1280xf32>
    %151 = vector.shape_cast %150 : vector<1x3x1280xf32> to vector<3x1280xf32>
    %c150 = arith.constant 150 : index
    %c0_161 = arith.constant 0 : index
    %152 = vector.load %arg5[%c150, %c0_161] : memref<243x1280xf32, #tpu.memory_space<vmem>>, vector<3x1280xf32>
    tpu.vector_store %arg5[%c150, %c0_161], %151 {strides = array<i32>} : memref<243x1280xf32, #tpu.memory_space<vmem>>, vector<3x1280xf32>,
    %c0_162 = arith.constant 0 : index
    %c0_163 = arith.constant 0 : index
    %c316 = arith.constant 316 : index
    %153 = vector.load %arg1[%c0_162, %c0_163, %c316] : memref<1x3x1784xf32, #tpu.memory_space<vmem>>, vector<1x3x1280xf32>
    %154 = vector.shape_cast %153 : vector<1x3x1280xf32> to vector<3x1280xf32>
    %c153 = arith.constant 153 : index
    %c0_164 = arith.constant 0 : index
    %155 = vector.load %arg5[%c153, %c0_164] : memref<243x1280xf32, #tpu.memory_space<vmem>>, vector<3x1280xf32>
    tpu.vector_store %arg5[%c153, %c0_164], %154 {strides = array<i32>} : memref<243x1280xf32, #tpu.memory_space<vmem>>, vector<3x1280xf32>,
    %c0_165 = arith.constant 0 : index
    %c0_166 = arith.constant 0 : index
    %c317 = arith.constant 317 : index
    %156 = vector.load %arg1[%c0_165, %c0_166, %c317] : memref<1x3x1784xf32, #tpu.memory_space<vmem>>, vector<1x3x1280xf32>
    %157 = vector.shape_cast %156 : vector<1x3x1280xf32> to vector<3x1280xf32>
    %c156 = arith.constant 156 : index
    %c0_167 = arith.constant 0 : index
    %158 = vector.load %arg5[%c156, %c0_167] : memref<243x1280xf32, #tpu.memory_space<vmem>>, vector<3x1280xf32>
    tpu.vector_store %arg5[%c156, %c0_167], %157 {strides = array<i32>} : memref<243x1280xf32, #tpu.memory_space<vmem>>, vector<3x1280xf32>,
    %c0_168 = arith.constant 0 : index
    %c0_169 = arith.constant 0 : index
    %c318 = arith.constant 318 : index
    %159 = vector.load %arg1[%c0_168, %c0_169, %c318] : memref<1x3x1784xf32, #tpu.memory_space<vmem>>, vector<1x3x1280xf32>
    %160 = vector.shape_cast %159 : vector<1x3x1280xf32> to vector<3x1280xf32>
    %c159 = arith.constant 159 : index
    %c0_170 = arith.constant 0 : index
    %161 = vector.load %arg5[%c159, %c0_170] : memref<243x1280xf32, #tpu.memory_space<vmem>>, vector<3x1280xf32>
    tpu.vector_store %arg5[%c159, %c0_170], %160 {strides = array<i32>} : memref<243x1280xf32, #tpu.memory_space<vmem>>, vector<3x1280xf32>,
    %c0_171 = arith.constant 0 : index
    %c0_172 = arith.constant 0 : index
    %c372 = arith.constant 372 : index
    %162 = vector.load %arg1[%c0_171, %c0_172, %c372] : memref<1x3x1784xf32, #tpu.memory_space<vmem>>, vector<1x3x1280xf32>
    %163 = vector.shape_cast %162 : vector<1x3x1280xf32> to vector<3x1280xf32>
    %c162 = arith.constant 162 : index
    %c0_173 = arith.constant 0 : index
    %164 = vector.load %arg5[%c162, %c0_173] : memref<243x1280xf32, #tpu.memory_space<vmem>>, vector<3x1280xf32>
    tpu.vector_store %arg5[%c162, %c0_173], %163 {strides = array<i32>} : memref<243x1280xf32, #tpu.memory_space<vmem>>, vector<3x1280xf32>,
    %c0_174 = arith.constant 0 : index
    %c0_175 = arith.constant 0 : index
    %c373 = arith.constant 373 : index
    %165 = vector.load %arg1[%c0_174, %c0_175, %c373] : memref<1x3x1784xf32, #tpu.memory_space<vmem>>, vector<1x3x1280xf32>
    %166 = vector.shape_cast %165 : vector<1x3x1280xf32> to vector<3x1280xf32>
    %c165 = arith.constant 165 : index
    %c0_176 = arith.constant 0 : index
    %167 = vector.load %arg5[%c165, %c0_176] : memref<243x1280xf32, #tpu.memory_space<vmem>>, vector<3x1280xf32>
    tpu.vector_store %arg5[%c165, %c0_176], %166 {strides = array<i32>} : memref<243x1280xf32, #tpu.memory_space<vmem>>, vector<3x1280xf32>,
    %c0_177 = arith.constant 0 : index
    %c0_178 = arith.constant 0 : index
    %c374 = arith.constant 374 : index
    %168 = vector.load %arg1[%c0_177, %c0_178, %c374] : memref<1x3x1784xf32, #tpu.memory_space<vmem>>, vector<1x3x1280xf32>
    %169 = vector.shape_cast %168 : vector<1x3x1280xf32> to vector<3x1280xf32>
    %c168 = arith.constant 168 : index
    %c0_179 = arith.constant 0 : index
    %170 = vector.load %arg5[%c168, %c0_179] : memref<243x1280xf32, #tpu.memory_space<vmem>>, vector<3x1280xf32>
    tpu.vector_store %arg5[%c168, %c0_179], %169 {strides = array<i32>} : memref<243x1280xf32, #tpu.memory_space<vmem>>, vector<3x1280xf32>,
    %c0_180 = arith.constant 0 : index
    %c0_181 = arith.constant 0 : index
    %c375 = arith.constant 375 : index
    %171 = vector.load %arg1[%c0_180, %c0_181, %c375] : memref<1x3x1784xf32, #tpu.memory_space<vmem>>, vector<1x3x1280xf32>
    %172 = vector.shape_cast %171 : vector<1x3x1280xf32> to vector<3x1280xf32>
    %c171 = arith.constant 171 : index
    %c0_182 = arith.constant 0 : index
    %173 = vector.load %arg5[%c171, %c0_182] : memref<243x1280xf32, #tpu.memory_space<vmem>>, vector<3x1280xf32>
    tpu.vector_store %arg5[%c171, %c0_182], %172 {strides = array<i32>} : memref<243x1280xf32, #tpu.memory_space<vmem>>, vector<3x1280xf32>,
    %c0_183 = arith.constant 0 : index
    %c0_184 = arith.constant 0 : index
    %c376 = arith.constant 376 : index
    %174 = vector.load %arg1[%c0_183, %c0_184, %c376] : memref<1x3x1784xf32, #tpu.memory_space<vmem>>, vector<1x3x1280xf32>
    %175 = vector.shape_cast %174 : vector<1x3x1280xf32> to vector<3x1280xf32>
    %c174 = arith.constant 174 : index
    %c0_185 = arith.constant 0 : index
    %176 = vector.load %arg5[%c174, %c0_185] : memref<243x1280xf32, #tpu.memory_space<vmem>>, vector<3x1280xf32>
    tpu.vector_store %arg5[%c174, %c0_185], %175 {strides = array<i32>} : memref<243x1280xf32, #tpu.memory_space<vmem>>, vector<3x1280xf32>,
    %c0_186 = arith.constant 0 : index
    %c0_187 = arith.constant 0 : index
    %c377 = arith.constant 377 : index
    %177 = vector.load %arg1[%c0_186, %c0_187, %c377] : memref<1x3x1784xf32, #tpu.memory_space<vmem>>, vector<1x3x1280xf32>
    %178 = vector.shape_cast %177 : vector<1x3x1280xf32> to vector<3x1280xf32>
    %c177 = arith.constant 177 : index
    %c0_188 = arith.constant 0 : index
    %179 = vector.load %arg5[%c177, %c0_188] : memref<243x1280xf32, #tpu.memory_space<vmem>>, vector<3x1280xf32>
    tpu.vector_store %arg5[%c177, %c0_188], %178 {strides = array<i32>} : memref<243x1280xf32, #tpu.memory_space<vmem>>, vector<3x1280xf32>,
    %c0_189 = arith.constant 0 : index
    %c0_190 = arith.constant 0 : index
    %c378 = arith.constant 378 : index
    %180 = vector.load %arg1[%c0_189, %c0_190, %c378] : memref<1x3x1784xf32, #tpu.memory_space<vmem>>, vector<1x3x1280xf32>
    %181 = vector.shape_cast %180 : vector<1x3x1280xf32> to vector<3x1280xf32>
    %c180 = arith.constant 180 : index
    %c0_191 = arith.constant 0 : index
    %182 = vector.load %arg5[%c180, %c0_191] : memref<243x1280xf32, #tpu.memory_space<vmem>>, vector<3x1280xf32>
    tpu.vector_store %arg5[%c180, %c0_191], %181 {strides = array<i32>} : memref<243x1280xf32, #tpu.memory_space<vmem>>, vector<3x1280xf32>,
    %c0_192 = arith.constant 0 : index
    %c0_193 = arith.constant 0 : index
    %c379 = arith.constant 379 : index
    %183 = vector.load %arg1[%c0_192, %c0_193, %c379] : memref<1x3x1784xf32, #tpu.memory_space<vmem>>, vector<1x3x1280xf32>
    %184 = vector.shape_cast %183 : vector<1x3x1280xf32> to vector<3x1280xf32>
    %c183 = arith.constant 183 : index
    %c0_194 = arith.constant 0 : index
    %185 = vector.load %arg5[%c183, %c0_194] : memref<243x1280xf32, #tpu.memory_space<vmem>>, vector<3x1280xf32>
    tpu.vector_store %arg5[%c183, %c0_194], %184 {strides = array<i32>} : memref<243x1280xf32, #tpu.memory_space<vmem>>, vector<3x1280xf32>,
    %c0_195 = arith.constant 0 : index
    %c0_196 = arith.constant 0 : index
    %c380 = arith.constant 380 : index
    %186 = vector.load %arg1[%c0_195, %c0_196, %c380] : memref<1x3x1784xf32, #tpu.memory_space<vmem>>, vector<1x3x1280xf32>
    %187 = vector.shape_cast %186 : vector<1x3x1280xf32> to vector<3x1280xf32>
    %c186_197 = arith.constant 186 : index
    %c0_198 = arith.constant 0 : index
    %188 = vector.load %arg5[%c186_197, %c0_198] : memref<243x1280xf32, #tpu.memory_space<vmem>>, vector<3x1280xf32>
    tpu.vector_store %arg5[%c186_197, %c0_198], %187 {strides = array<i32>} : memref<243x1280xf32, #tpu.memory_space<vmem>>, vector<3x1280xf32>,
    %c0_199 = arith.constant 0 : index
    %c0_200 = arith.constant 0 : index
    %c434 = arith.constant 434 : index
    %189 = vector.load %arg1[%c0_199, %c0_200, %c434] : memref<1x3x1784xf32, #tpu.memory_space<vmem>>, vector<1x3x1280xf32>
    %190 = vector.shape_cast %189 : vector<1x3x1280xf32> to vector<3x1280xf32>
    %c189_201 = arith.constant 189 : index
    %c0_202 = arith.constant 0 : index
    %191 = vector.load %arg5[%c189_201, %c0_202] : memref<243x1280xf32, #tpu.memory_space<vmem>>, vector<3x1280xf32>
    tpu.vector_store %arg5[%c189_201, %c0_202], %190 {strides = array<i32>} : memref<243x1280xf32, #tpu.memory_space<vmem>>, vector<3x1280xf32>,
    %c0_203 = arith.constant 0 : index
    %c0_204 = arith.constant 0 : index
    %c435 = arith.constant 435 : index
    %192 = vector.load %arg1[%c0_203, %c0_204, %c435] : memref<1x3x1784xf32, #tpu.memory_space<vmem>>, vector<1x3x1280xf32>
    %193 = vector.shape_cast %192 : vector<1x3x1280xf32> to vector<3x1280xf32>
    %c192_205 = arith.constant 192 : index
    %c0_206 = arith.constant 0 : index
    %194 = vector.load %arg5[%c192_205, %c0_206] : memref<243x1280xf32, #tpu.memory_space<vmem>>, vector<3x1280xf32>
    tpu.vector_store %arg5[%c192_205, %c0_206], %193 {strides = array<i32>} : memref<243x1280xf32, #tpu.memory_space<vmem>>, vector<3x1280xf32>,
    %c0_207 = arith.constant 0 : index
    %c0_208 = arith.constant 0 : index
    %c436 = arith.constant 436 : index
    %195 = vector.load %arg1[%c0_207, %c0_208, %c436] : memref<1x3x1784xf32, #tpu.memory_space<vmem>>, vector<1x3x1280xf32>
    %196 = vector.shape_cast %195 : vector<1x3x1280xf32> to vector<3x1280xf32>
    %c195 = arith.constant 195 : index
    %c0_209 = arith.constant 0 : index
    %197 = vector.load %arg5[%c195, %c0_209] : memref<243x1280xf32, #tpu.memory_space<vmem>>, vector<3x1280xf32>
    tpu.vector_store %arg5[%c195, %c0_209], %196 {strides = array<i32>} : memref<243x1280xf32, #tpu.memory_space<vmem>>, vector<3x1280xf32>,
    %c0_210 = arith.constant 0 : index
    %c0_211 = arith.constant 0 : index
    %c437 = arith.constant 437 : index
    %198 = vector.load %arg1[%c0_210, %c0_211, %c437] : memref<1x3x1784xf32, #tpu.memory_space<vmem>>, vector<1x3x1280xf32>
    %199 = vector.shape_cast %198 : vector<1x3x1280xf32> to vector<3x1280xf32>
    %c198 = arith.constant 198 : index
    %c0_212 = arith.constant 0 : index
    %200 = vector.load %arg5[%c198, %c0_212] : memref<243x1280xf32, #tpu.memory_space<vmem>>, vector<3x1280xf32>
    tpu.vector_store %arg5[%c198, %c0_212], %199 {strides = array<i32>} : memref<243x1280xf32, #tpu.memory_space<vmem>>, vector<3x1280xf32>,
    %c0_213 = arith.constant 0 : index
    %c0_214 = arith.constant 0 : index
    %c438 = arith.constant 438 : index
    %201 = vector.load %arg1[%c0_213, %c0_214, %c438] : memref<1x3x1784xf32, #tpu.memory_space<vmem>>, vector<1x3x1280xf32>
    %202 = vector.shape_cast %201 : vector<1x3x1280xf32> to vector<3x1280xf32>
    %c201 = arith.constant 201 : index
    %c0_215 = arith.constant 0 : index
    %203 = vector.load %arg5[%c201, %c0_215] : memref<243x1280xf32, #tpu.memory_space<vmem>>, vector<3x1280xf32>
    tpu.vector_store %arg5[%c201, %c0_215], %202 {strides = array<i32>} : memref<243x1280xf32, #tpu.memory_space<vmem>>, vector<3x1280xf32>,
    %c0_216 = arith.constant 0 : index
    %c0_217 = arith.constant 0 : index
    %c439 = arith.constant 439 : index
    %204 = vector.load %arg1[%c0_216, %c0_217, %c439] : memref<1x3x1784xf32, #tpu.memory_space<vmem>>, vector<1x3x1280xf32>
    %205 = vector.shape_cast %204 : vector<1x3x1280xf32> to vector<3x1280xf32>
    %c204 = arith.constant 204 : index
    %c0_218 = arith.constant 0 : index
    %206 = vector.load %arg5[%c204, %c0_218] : memref<243x1280xf32, #tpu.memory_space<vmem>>, vector<3x1280xf32>
    tpu.vector_store %arg5[%c204, %c0_218], %205 {strides = array<i32>} : memref<243x1280xf32, #tpu.memory_space<vmem>>, vector<3x1280xf32>,
    %c0_219 = arith.constant 0 : index
    %c0_220 = arith.constant 0 : index
    %c440 = arith.constant 440 : index
    %207 = vector.load %arg1[%c0_219, %c0_220, %c440] : memref<1x3x1784xf32, #tpu.memory_space<vmem>>, vector<1x3x1280xf32>
    %208 = vector.shape_cast %207 : vector<1x3x1280xf32> to vector<3x1280xf32>
    %c207 = arith.constant 207 : index
    %c0_221 = arith.constant 0 : index
    %209 = vector.load %arg5[%c207, %c0_221] : memref<243x1280xf32, #tpu.memory_space<vmem>>, vector<3x1280xf32>
    tpu.vector_store %arg5[%c207, %c0_221], %208 {strides = array<i32>} : memref<243x1280xf32, #tpu.memory_space<vmem>>, vector<3x1280xf32>,
    %c0_222 = arith.constant 0 : index
    %c0_223 = arith.constant 0 : index
    %c441 = arith.constant 441 : index
    %210 = vector.load %arg1[%c0_222, %c0_223, %c441] : memref<1x3x1784xf32, #tpu.memory_space<vmem>>, vector<1x3x1280xf32>
    %211 = vector.shape_cast %210 : vector<1x3x1280xf32> to vector<3x1280xf32>
    %c210 = arith.constant 210 : index
    %c0_224 = arith.constant 0 : index
    %212 = vector.load %arg5[%c210, %c0_224] : memref<243x1280xf32, #tpu.memory_space<vmem>>, vector<3x1280xf32>
    tpu.vector_store %arg5[%c210, %c0_224], %211 {strides = array<i32>} : memref<243x1280xf32, #tpu.memory_space<vmem>>, vector<3x1280xf32>,
    %c0_225 = arith.constant 0 : index
    %c0_226 = arith.constant 0 : index
    %c442 = arith.constant 442 : index
    %213 = vector.load %arg1[%c0_225, %c0_226, %c442] : memref<1x3x1784xf32, #tpu.memory_space<vmem>>, vector<1x3x1280xf32>
    %214 = vector.shape_cast %213 : vector<1x3x1280xf32> to vector<3x1280xf32>
    %c213 = arith.constant 213 : index
    %c0_227 = arith.constant 0 : index
    %215 = vector.load %arg5[%c213, %c0_227] : memref<243x1280xf32, #tpu.memory_space<vmem>>, vector<3x1280xf32>
    tpu.vector_store %arg5[%c213, %c0_227], %214 {strides = array<i32>} : memref<243x1280xf32, #tpu.memory_space<vmem>>, vector<3x1280xf32>,
    %c0_228 = arith.constant 0 : index
    %c0_229 = arith.constant 0 : index
    %c496 = arith.constant 496 : index
    %216 = vector.load %arg1[%c0_228, %c0_229, %c496] : memref<1x3x1784xf32, #tpu.memory_space<vmem>>, vector<1x3x1280xf32>
    %217 = vector.shape_cast %216 : vector<1x3x1280xf32> to vector<3x1280xf32>
    %c216 = arith.constant 216 : index
    %c0_230 = arith.constant 0 : index
    %218 = vector.load %arg5[%c216, %c0_230] : memref<243x1280xf32, #tpu.memory_space<vmem>>, vector<3x1280xf32>
    tpu.vector_store %arg5[%c216, %c0_230], %217 {strides = array<i32>} : memref<243x1280xf32, #tpu.memory_space<vmem>>, vector<3x1280xf32>,
    %c0_231 = arith.constant 0 : index
    %c0_232 = arith.constant 0 : index
    %c497 = arith.constant 497 : index
    %219 = vector.load %arg1[%c0_231, %c0_232, %c497] : memref<1x3x1784xf32, #tpu.memory_space<vmem>>, vector<1x3x1280xf32>
    %220 = vector.shape_cast %219 : vector<1x3x1280xf32> to vector<3x1280xf32>
    %c219 = arith.constant 219 : index
    %c0_233 = arith.constant 0 : index
    %221 = vector.load %arg5[%c219, %c0_233] : memref<243x1280xf32, #tpu.memory_space<vmem>>, vector<3x1280xf32>
    tpu.vector_store %arg5[%c219, %c0_233], %220 {strides = array<i32>} : memref<243x1280xf32, #tpu.memory_space<vmem>>, vector<3x1280xf32>,
    %c0_234 = arith.constant 0 : index
    %c0_235 = arith.constant 0 : index
    %c498 = arith.constant 498 : index
    %222 = vector.load %arg1[%c0_234, %c0_235, %c498] : memref<1x3x1784xf32, #tpu.memory_space<vmem>>, vector<1x3x1280xf32>
    %223 = vector.shape_cast %222 : vector<1x3x1280xf32> to vector<3x1280xf32>
    %c222 = arith.constant 222 : index
    %c0_236 = arith.constant 0 : index
    %224 = vector.load %arg5[%c222, %c0_236] : memref<243x1280xf32, #tpu.memory_space<vmem>>, vector<3x1280xf32>
    tpu.vector_store %arg5[%c222, %c0_236], %223 {strides = array<i32>} : memref<243x1280xf32, #tpu.memory_space<vmem>>, vector<3x1280xf32>,
    %c0_237 = arith.constant 0 : index
    %c0_238 = arith.constant 0 : index
    %c499 = arith.constant 499 : index
    %225 = vector.load %arg1[%c0_237, %c0_238, %c499] : memref<1x3x1784xf32, #tpu.memory_space<vmem>>, vector<1x3x1280xf32>
    %226 = vector.shape_cast %225 : vector<1x3x1280xf32> to vector<3x1280xf32>
    %c225 = arith.constant 225 : index
    %c0_239 = arith.constant 0 : index
    %227 = vector.load %arg5[%c225, %c0_239] : memref<243x1280xf32, #tpu.memory_space<vmem>>, vector<3x1280xf32>
    tpu.vector_store %arg5[%c225, %c0_239], %226 {strides = array<i32>} : memref<243x1280xf32, #tpu.memory_space<vmem>>, vector<3x1280xf32>,
    %c0_240 = arith.constant 0 : index
    %c0_241 = arith.constant 0 : index
    %c500 = arith.constant 500 : index
    %228 = vector.load %arg1[%c0_240, %c0_241, %c500] : memref<1x3x1784xf32, #tpu.memory_space<vmem>>, vector<1x3x1280xf32>
    %229 = vector.shape_cast %228 : vector<1x3x1280xf32> to vector<3x1280xf32>
    %c228 = arith.constant 228 : index
    %c0_242 = arith.constant 0 : index
    %230 = vector.load %arg5[%c228, %c0_242] : memref<243x1280xf32, #tpu.memory_space<vmem>>, vector<3x1280xf32>
    tpu.vector_store %arg5[%c228, %c0_242], %229 {strides = array<i32>} : memref<243x1280xf32, #tpu.memory_space<vmem>>, vector<3x1280xf32>,
    %c0_243 = arith.constant 0 : index
    %c0_244 = arith.constant 0 : index
    %c501 = arith.constant 501 : index
    %231 = vector.load %arg1[%c0_243, %c0_244, %c501] : memref<1x3x1784xf32, #tpu.memory_space<vmem>>, vector<1x3x1280xf32>
    %232 = vector.shape_cast %231 : vector<1x3x1280xf32> to vector<3x1280xf32>
    %c231 = arith.constant 231 : index
    %c0_245 = arith.constant 0 : index
    %233 = vector.load %arg5[%c231, %c0_245] : memref<243x1280xf32, #tpu.memory_space<vmem>>, vector<3x1280xf32>
    tpu.vector_store %arg5[%c231, %c0_245], %232 {strides = array<i32>} : memref<243x1280xf32, #tpu.memory_space<vmem>>, vector<3x1280xf32>,
    %c0_246 = arith.constant 0 : index
    %c0_247 = arith.constant 0 : index
    %c502 = arith.constant 502 : index
    %234 = vector.load %arg1[%c0_246, %c0_247, %c502] : memref<1x3x1784xf32, #tpu.memory_space<vmem>>, vector<1x3x1280xf32>
    %235 = vector.shape_cast %234 : vector<1x3x1280xf32> to vector<3x1280xf32>
    %c234 = arith.constant 234 : index
    %c0_248 = arith.constant 0 : index
    %236 = vector.load %arg5[%c234, %c0_248] : memref<243x1280xf32, #tpu.memory_space<vmem>>, vector<3x1280xf32>
    tpu.vector_store %arg5[%c234, %c0_248], %235 {strides = array<i32>} : memref<243x1280xf32, #tpu.memory_space<vmem>>, vector<3x1280xf32>,
    %c0_249 = arith.constant 0 : index
    %c0_250 = arith.constant 0 : index
    %c503 = arith.constant 503 : index
    %237 = vector.load %arg1[%c0_249, %c0_250, %c503] : memref<1x3x1784xf32, #tpu.memory_space<vmem>>, vector<1x3x1280xf32>
    %238 = vector.shape_cast %237 : vector<1x3x1280xf32> to vector<3x1280xf32>
    %c237 = arith.constant 237 : index
    %c0_251 = arith.constant 0 : index
    %239 = vector.load %arg5[%c237, %c0_251] : memref<243x1280xf32, #tpu.memory_space<vmem>>, vector<3x1280xf32>
    tpu.vector_store %arg5[%c237, %c0_251], %238 {strides = array<i32>} : memref<243x1280xf32, #tpu.memory_space<vmem>>, vector<3x1280xf32>,
    %c0_252 = arith.constant 0 : index
    %c0_253 = arith.constant 0 : index
    %c504 = arith.constant 504 : index
    %240 = vector.load %arg1[%c0_252, %c0_253, %c504] : memref<1x3x1784xf32, #tpu.memory_space<vmem>>, vector<1x3x1280xf32>
    %241 = vector.shape_cast %240 : vector<1x3x1280xf32> to vector<3x1280xf32>
    %c240 = arith.constant 240 : index
    %c0_254 = arith.constant 0 : index
    %242 = vector.load %arg5[%c240, %c0_254] : memref<243x1280xf32, #tpu.memory_space<vmem>>, vector<3x1280xf32>
    tpu.vector_store %arg5[%c240, %c0_254], %241 {strides = array<i32>} : memref<243x1280xf32, #tpu.memory_space<vmem>>, vector<3x1280xf32>,
    %c0_255 = arith.constant 0 : index
    %c0_256 = arith.constant 0 : index
    %243 = vector.load %arg2[%c0_255, %c0_256] : memref<16x243xf32, #tpu.memory_space<vmem>>, vector<16x243xf32>
    %c0_257 = arith.constant 0 : index
    %c0_258 = arith.constant 0 : index
    %244 = vector.load %arg5[%c0_257, %c0_258] : memref<243x1280xf32, #tpu.memory_space<vmem>>, vector<243x1280xf32>
    %cst = arith.constant dense<0.000000e+00> : vector<16x1280xf32>
    %245 = tpu.matmul %243, %244, %cst {dimension_numbers = #tpu.dot_dimension_numbers<[1], [0], [0], [1], [0, 0, 1, 1], [], []>} : vector<16x243xf32>, vector<243x1280xf32>, vector<16x1280xf32> -> vector<16x1280xf32>
    %c0_259 = arith.constant 0 : index
    %c0_260 = arith.constant 0 : index
    %246 = vector.load %arg3[%c0_259, %c0_260] : memref<16x1xf32, #tpu.memory_space<vmem>>, vector<16x1xf32>
    %247 = vector.broadcast %246 : vector<16x1xf32> to vector<16x1280xf32>
    %248 = arith.addf %245, %247 : vector<16x1280xf32>
    %cst_261 = arith.constant 5.000000e-01 : f32
    %249 = vector.broadcast %cst_261 : f32 to vector<16x1280xf32>
    %250 = arith.mulf %249, %248 : vector<16x1280xf32>
    %251 = math.tanh %250 : vector<16x1280xf32>
    %cst_262 = arith.constant 5.000000e-01 : f32
    %252 = vector.broadcast %cst_262 : f32 to vector<16x1280xf32>
    %253 = arith.mulf %252, %251 : vector<16x1280xf32>
    %cst_263 = arith.constant 5.000000e-01 : f32
    %254 = vector.broadcast %cst_263 : f32 to vector<16x1280xf32>
    %255 = arith.addf %253, %254 : vector<16x1280xf32>
    %c0_264 = arith.constant 0 : index
    %c0_265 = arith.constant 0 : index
    %256 = vector.load %arg4[%c0_264, %c0_265] : memref<16x1280xf32, #tpu.memory_space<vmem>>, vector<16x1280xf32>
    tpu.vector_store %arg4[%c0_264, %c0_265], %255 {strides = array<i32>} : memref<16x1280xf32, #tpu.memory_space<vmem>>, vector<16x1280xf32>,
    return
  }
  func.func @transform_0(%arg0: i32) -> (i32, i32, i32) {
    %c0_i32 = arith.constant 0 : i32
    %c0_i32_0 = arith.constant 0 : i32
    %c0_i32_1 = arith.constant 0 : i32
    return %arg0, %c0_i32, %c0_i32_0 : i32, i32, i32
  }
  func.func @transform_1(%arg0: i32) -> (i32, i32) {
    %c0_i32 = arith.constant 0 : i32
    %c0_i32_0 = arith.constant 0 : i32
    %c0_i32_1 = arith.constant 0 : i32
    return %c0_i32, %c0_i32_0 : i32, i32
  }
  func.func @transform_2(%arg0: i32) -> (i32, i32) {
    %c0_i32 = arith.constant 0 : i32
    %c0_i32_0 = arith.constant 0 : i32
    %c0_i32_1 = arith.constant 0 : i32
    return %c0_i32, %c0_i32_0 : i32, i32
  }
  func.func @transform_3(%arg0: i32) -> (i32, i32) {
    %c0_i32 = arith.constant 0 : i32
    %c0_i32_0 = arith.constant 0 : i32
    return %c0_i32, %arg0 : i32, i32
  }
}

</mosaic_0001>

<bundles_post_ra>
// kernel: conv_transpose2d_sigmoid.1
= control target key start
LH: loop header
LB: loop body
LE: loop exit
PB: predicated region body
PF: predicated region fallthrough
CT: control target
= control target key end

     0   :  { %s8263_s12 = smov 0   ;;  %s8265_s13 = smov 0   ;;  %s10937_s0 = inlined_call_operand.vmem [shape: f32[2,3,1784], index: 0, kind: input, shape index: {}]   ;;  %s10938_s1 = inlined_call_operand.vmem [shape: f32[16,243], index: 1, kind: input, shape index: {}]   ;;  %s10939_s2 = inlined_call_operand.vmem [shape: f32[16,1], index: 2, kind: input, shape index: {}]   ;;  %s10940_s3 = inlined_call_operand.vmem [shape: f32[16,2560], index: 3, kind: output, shape index: {}]  }
   0x1   :  { %s8267_s14 = smov 0  }
   0x2 LB: > { %s8276_s15 = sadd.s32 4294967295, %s8195_s14   ;;  %s8278_s16 = sadd.s32 1, %s8195_s14   ;;  %s8195_s14 = sphi %s8267_s14, %s11007_s14   ;;  %s8191_s13 = sphi %s8265_s13, %s11006_s13   ;;  %s8187_s12 = sphi %s8263_s12, %s11005_s12  }
   0x3   : > { %s85_s17 = ssub.s32 %s8195_s14, %s8278_s16  ;;  %s88_s18 = sadd.s32 1, %s8191_s13 }
   0x4   : > { %p86_p0 = scmp.eq.s32.totalorder %s85_s17, 0  ;;  %p98_p1 = scmp.ne.s32.totalorder %s8191_s13, %s8187_s12 }
   0x5   : > { %p99_p2 = scmp.eq.s32.totalorder %s8276_s15, 1  ;;  %p7524_p3 = scmp.ge.s32.totalorder %s8195_s14, 1 }
   0x6   : > { %s8286_s19 = scalar_select %p86_p0, %s8191_s13, %s88_s18  }
   0x7   : > { %p8288_p4 = por %p99_p2, %p98_p1  ;;  %p137_p5 = scmp.lt.s32.totalorder %s8195_s14, 3 }
   0x9   : > { %p138_p6 = pnand %p7524_p3, %p137_p5 }
   0xa   : > { %p160_p7 = scmp.lt.s32.totalorder (!%p138_p6), %s8276_s15, 1  ;;  %s8197_s26 = smov (!%p138_p6), 127  }
   0xb   : > { %141 = sbr.rel (%p138_p6) target bundleno = 2124 (0x84c), region = 32  ;;  %s8198_s27 = smov (!%p138_p6), 126  }
   0xc   : > { %s8199_s28 = smov (!%p138_p6), 125   ;;  %s8200_s29 = smov (!%p138_p6), 124  }
   0xd   : > { %s8201_s30 = smov (!%p138_p6), 123   ;;  %s8202_s4 = smov (!%p138_p6), 122  }
   0xe   : > { %s8203_s5 = smov (!%p138_p6), 121   ;;  %s8204_s6 = smov (!%p138_p6), 120  }
   0xf   : > { %s8205_s7 = smov (!%p138_p6), 66   ;;  %s8206_s8 = smov (!%p138_p6), 65  }
  0x10   : > { %s161_s21 = scalar_select %p160_p7, %s8276_s15, 1  ;;  %vm246_vm0 = vcmask 1039360   ;;  %vm327_vm1 = vcmask 1031168   ;;  %vm418_vm2 = vcmask 1022976   ;;  %vm489_vm3 = vcmask 1014784  }
  0x11   : > { %vm570_vm4 = vcmask 1006592   ;;  %s8207_s9 = smov 64   ;;  %vm661_vm5 = vcmask 998400   ;;  %s8208_s10 = smov 63   ;;  %vm742_vm6 = vcmask 990208   ;;  %vm812_vm7 = vcmask 982016  }
  0x12   : > { %s7613_s22 = smul.u32 56, %s161_s21  ;;  %s8209_s11 = smov 62   ;;  %vm893_vm8 = vcmask 539648   ;;  %vm974_vm9 = vcmask 531456   ;;  %vm1065_vm10 = vcmask 523264   ;;  %vm1136_vm11 = vcmask 515072  }
  0x13   : > { %s8210_s14 = smov 61   ;;  %s8211_s17 = smov 60   ;;  %vm1217_vm12 = vcmask 506880   ;;  %vm1308_vm13 = vcmask 498688   ;;  %vm1389_vm14 = vcmask 490496   ;;  %vm1459_vm15 = vcmask 482304  }
  0x14   : > { %s8297_s25 = scalar_lea.vmem %s10937_s0, %s7613_s22  ;;  %s8212_s18 = smov 59  }
  0x15   : > { %v197_v0 = vld [vmem:[%s8297_s25 + $0x8] sm:$0x77]  ;;  %v196_v1 = vld [vmem:[%s8297_s25] sm:$0x77]  ;;  %v198_v2 = vld [vmem:[%s8297_s25 + $0x10] sm:$0x77] }
  0x16   : > { %v215_v3 = vrot.slane %v197_v0, 5  ;;  %v209_v4 = vcombine.high %v197_v0, %v197_v0  ;;  %v213_v5 = vrot.slane %v196_v1, 5  ;;  %v217_v7 = vrot.slane %v198_v2, 5  ;;  %v199_v9 = vld [vmem:[%s8297_s25 + $0x18] sm:$0x77]  ;;  %s8213_s21 = smov 58  }
  0x17   : > { %v210_v8 = vcombine.high %v198_v2, %v198_v2  ;;  %v208_v10 = vcombine.high %v196_v1, %v196_v1  ;;  %v219_v12 = vrot.slane %v199_v9, 5  ;;  %v211_v13 = vcombine.high %v199_v9, %v199_v9  ;;  %v200_v14 = vld [vmem:[%s8297_s25 + $0x20] sm:$0x77]  ;;  %v201_v21 = vld [vmem:[%s8297_s25 + $0x28] sm:$0x7]  ;;  %s10944_s22 = smov 4  }
  0x18   : > { %228 = vrot.lane.b32.xlu1 %v215_v3, %s8197_s26  ;;  %224 = vrot.lane.b32.xlu0 %v213_v5, %s8197_s26  ;;  %v216_v6 = vrot.slane %v209_v4, 5  ;;  %v212_v17 = vcombine.high %v200_v14, %v200_v14  ;;  %v221_v19 = vrot.slane %v200_v14, 5  ;;  %v277_v20 = vld [vmem:[%s8297_s25] sm:$0x77]  ;;  %v223_v23 = vrot.slane %v201_v21, 5  ;;  %s8215_s23 = smov 3  }
  0x19   : > { %v218_v11 = vrot.slane %v210_v8, 5  ;;  %v220_v15 = vrot.slane %v211_v13, 5  ;;  %v214_v16 = vrot.slane %v208_v10, 5  ;;  %v294_v22 = vrot.slane %v277_v20, 2  ;;  %v278_v25 = vld [vmem:[%s8297_s25 + $0x8] sm:$0x77] }
  0x1a   : > { %v222_v18 = vrot.slane %v212_v17, 5  ;;  %v289_v24 = vcombine.high %v277_v20, %v277_v20  ;;  %v296_v26 = vrot.slane %v278_v25, 2  ;;  %v290_v28 = vcombine.high %v278_v25, %v278_v25  ;;  %v279_v29 = vld [vmem:[%s8297_s25 + $0x10] sm:$0x77]  ;;  %v280_v33 = vld [vmem:[%s8297_s25 + $0x18] sm:$0x77] }
  0x1b   : > { %v298_v30 = vrot.slane %v279_v29, 2  ;;  %v291_v32 = vcombine.high %v279_v29, %v279_v29  ;;  %v166_v34 = vld [vmem:[%s8297_s25] sm:$0x77]  ;;  %v167_v35 = vld [vmem:[%s8297_s25 + $0x8] sm:$0x77]  ;;  %v300_v38 = vrot.slane %v280_v33, 2  ;;  %v292_v40 = vcombine.high %v280_v33, %v280_v33 }
  0x1c   : > { %230 = vrot.lane.b32.xlu1 %v216_v6, %s8197_s26  ;;  %232 = vrot.lane.b32.xlu0 %v217_v7, %s8197_s26  ;;  %v295_v27 = vrot.slane %v289_v24, 2  ;;  %v297_v31 = vrot.slane %v290_v28, 2  ;;  %v176_v36 = vcombine.high %v166_v34, %v166_v34  ;;  %186 = vst [vmem:[#allocation2 + $0x4c8] sm:$0x7] %v166_v34  ;;  %v177_v37 = vcombine.high %v167_v35, %v167_v35  ;;  %v281_v41 = vld [vmem:[%s8297_s25 + $0x20] sm:$0x77] }
  0x1d   : > { %188 = vst [vmem:[#allocation2 + $0x7f8] sm:$0x7] %v167_v35  ;;  %v299_v39 = vrot.slane %v291_v32, 2  ;;  %v302_v42 = vrot.slane %v281_v41, 2  ;;  %v301_v43 = vrot.slane %v292_v40, 2  ;;  %v293_v44 = vcombine.high %v281_v41, %v281_v41  ;;  %s8216_s24 = smov 2  }
  0x1e   : > { %187 = vst [vmem:[#allocation2 + $0x808] sm:$0x7] %v176_v36  ;;  %189 = vst [vmem:[#allocation2 + $0x758] sm:$0x7] %v177_v37  ;;  %v282_v45 = vld [vmem:[%s8297_s25 + $0x28] sm:$0x7] }
  0x1f   : > { %v368_v46 = vld [vmem:[%s8297_s25] sm:$0x77]  ;;  %v304_v47 = vrot.slane %v282_v45, 2  ;;  %v303_v48 = vrot.slane %v293_v44, 2  ;;  %v369_v50 = vld [vmem:[%s8297_s25 + $0x8] sm:$0x77] }
  0x20   : > { %234 = vrot.lane.b32.xlu1 %v218_v11, %s8197_s26  ;;  %236 = vrot.lane.b32.xlu0 %v219_v12, %s8197_s26  ;;  %v380_v49 = vcombine.high %v368_v46, %v368_v46  ;;  %v168_v51 = vld [vmem:[%s8297_s25 + $0x10] sm:$0x77]  ;;  %v385_v54 = vrot.slane %v368_v46, 7  ;;  %v381_v55 = vcombine.high %v369_v50, %v369_v50  ;;  %v169_v57 = vld [vmem:[%s8297_s25 + $0x18] sm:$0x77]  ;;  %v387_v60 = vrot.slane %v369_v50, 7 }
  0x21   : > { %v178_v52 = vcombine.high %v168_v51, %v168_v51  ;;  %190 = vst [vmem:[#allocation2 + $0x320] sm:$0x7] %v168_v51  ;;  %v370_v56 = vld [vmem:[%s8297_s25 + $0x10] sm:$0x77]  ;;  %v179_v58 = vcombine.high %v169_v57, %v169_v57  ;;  %192 = vst [vmem:[#allocation2 + $0x8f8] sm:$0x7] %v169_v57 }
  0x22   : > { %v386_v53 = vrot.slane %v380_v49, 7  ;;  %v388_v59 = vrot.slane %v381_v55, 7  ;;  %v382_v61 = vcombine.high %v370_v56, %v370_v56  ;;  %v371_v62 = vld [vmem:[%s8297_s25 + $0x18] sm:$0x77]  ;;  %v170_v63 = vld [vmem:[%s8297_s25 + $0x20] sm:$0x77] }
  0x23   : > { %191 = vst [vmem:[#allocation2 + $0x438] sm:$0x7] %v178_v52  ;;  %193 = vst [vmem:[#allocation2 + $0x4d0] sm:$0x7] %v179_v58  ;;  %v180_v0 = vcombine.high %v170_v63, %v170_v63  ;;  %v389_v2 = vrot.slane %v370_v56, 7  ;;  %v383_v3 = vcombine.high %v371_v62, %v371_v62  ;;  %v391_v6 = vrot.slane %v371_v62, 7 }
  0x24   : > { %238 = vrot.lane.b32.xlu1 %v220_v15, %s8197_s26  ;;  %226 = vrot.lane.b32.xlu0 %v214_v16, %s8197_s26  ;;  %194 = vst [vmem:[#allocation2 + $0x6e8] sm:$0x7] %v170_v63  ;;  %v390_v1 = vrot.slane %v382_v61, 7  ;;  %v372_v4 = vld [vmem:[%s8297_s25 + $0x20] sm:$0x77] }
  0x25   : > { %195 = vst [vmem:[#allocation2 + $0x6a8] sm:$0x7] %v180_v0  ;;  %v392_v5 = vrot.slane %v383_v3, 7  ;;  %v384_v7 = vcombine.high %v372_v4, %v372_v4  ;;  %v393_v9 = vrot.slane %v372_v4, 7  ;;  %v449_v10 = vld [vmem:[%s8297_s25] sm:$0x77] }
  0x26   : > { %v373_v11 = vld [vmem:[%s8297_s25 + $0x28] sm:$0x7]  ;;  %v461_v12 = vcombine.low %v449_v10, %v449_v10  ;;  %v451_v16 = vld [vmem:[%s8297_s25 + $0x10] sm:$0x77]  ;;  %v453_v20 = vld [vmem:[%s8297_s25 + $0x20] sm:$0x77] }
  0x27   : > { %v394_v8 = vrot.slane %v384_v7, 7  ;;  %v395_v13 = vrot.slane %v373_v11, 7  ;;  %v450_v14 = vld [vmem:[%s8297_s25 + $0x8] sm:$0x77]  ;;  %v463_v17 = vcombine.low %v451_v16, %v451_v16  ;;  %v465_v21 = vcombine.low %v453_v20, %v453_v20  ;;  %v522_v29 = vld [vmem:[%s8297_s25 + $0x10] sm:$0x77] }
  0x28   : > { %242 = vrot.lane.b32.xlu1 %v222_v18, %s8197_s26  ;;  %240 = vrot.lane.b32.xlu0 %v221_v19, %s8197_s26  ;;  %v462_v15 = vcombine.low %v450_v14, %v450_v14  ;;  %v452_v18 = vld [vmem:[%s8297_s25 + $0x18] sm:$0x77]  ;;  %v521_v25 = vld [vmem:[%s8297_s25 + $0x8] sm:$0x77]  ;;  %v534_v32 = vcombine.high %v522_v29, %v522_v29  ;;  %v541_v35 = vrot.slane %v522_v29, 1 }
  0x29   : > { %v464_v19 = vcombine.low %v452_v18, %v452_v18  ;;  %v533_v28 = vcombine.high %v521_v25, %v521_v25  ;;  %v523_v33 = vld [vmem:[%s8297_s25 + $0x18] sm:$0x77]  ;;  %v524_v37 = vld [vmem:[%s8297_s25 + $0x20] sm:$0x77]  ;;  %v525_v44 = vld [vmem:[%s8297_s25 + $0x28] sm:$0x7] }
  0x2a   : > { %v542_v34 = vrot.slane %v534_v32, 1  ;;  %v535_v36 = vcombine.high %v523_v33, %v523_v33  ;;  %v536_v40 = vcombine.high %v524_v37, %v524_v37  ;;  %v547_v46 = vrot.slane %v525_v44, 1  ;;  %v613_v52 = vld [vmem:[%s8297_s25 + $0x10] sm:$0x77]  ;;  %v614_v56 = vld [vmem:[%s8297_s25 + $0x18] sm:$0x77] }
  0x2b   : > { %v625_v55 = vcombine.high %v613_v52, %v613_v52  ;;  %v626_v61 = vcombine.high %v614_v56, %v614_v56  ;;  %v615_v62 = vld [vmem:[%s8297_s25 + $0x20] sm:$0x77]  ;;  %v695_v32 = vld [vmem:[%s8297_s25 + $0x18] sm:$0x77] }
  0x2c   : > { %305 = vrot.lane.b32.xlu1 %v294_v22, %s8198_s27  ;;  %244 = vrot.lane.b32.xlu0 %v223_v23, %s8197_s26  ;;  %v520_v22 = vld [vmem:[%s8297_s25] sm:$0x77]  ;;  %v7706_v23 = vld [vmem:[%s8297_s25 + $0x28] ss:$0 sps:$4 sm:$0x77]   ;;  %v546_v41 = vrot.slane %v536_v40, 1 }
  0x2d   : > { %v532_v24 = vcombine.high %v520_v22, %v520_v22  ;;  %v636_v3 = vrot.slane %v615_v62, 6  ;;  %v635_v4 = vrot.slane %v626_v61, 6  ;;  %v692_v7 = vld [vmem:[%s8297_s25] sm:$0x77] }
  0x30   : > { %309 = vrot.lane.b32.xlu1 %v296_v26, %s8198_s27  ;;  %307 = vrot.lane.b32.xlu0 %v295_v27, %s8198_s27  ;;  %v538_v26 = vrot.slane %v532_v24, 1  ;;  %v537_v27 = vrot.slane %v520_v22, 1  ;;  %v709_v22 = vrot.slane %v692_v7, 3  ;;  %v694_v24 = vld [vmem:[%s8297_s25 + $0x10] sm:$0x77] }
  0x34   : > { %313 = vrot.lane.b32.xlu1 %v298_v30, %s8198_s27  ;;  %311 = vrot.lane.b32.xlu0 %v297_v31, %s8198_s27  ;;  %v540_v30 = vrot.slane %v533_v28, 1  ;;  %v539_v31 = vrot.slane %v521_v25, 1 }
  0x38   : > { %317 = vrot.lane.b32.xlu1 %v300_v38, %s8198_s27  ;;  %315 = vrot.lane.b32.xlu0 %v299_v39, %s8198_s27  ;;  %v544_v38 = vrot.slane %v535_v36, 1  ;;  %v543_v39 = vrot.slane %v523_v33, 1 }
  0x3c   : > { %321 = vrot.lane.b32.xlu1 %v302_v42, %s8198_s27  ;;  %319 = vrot.lane.b32.xlu0 %v301_v43, %s8198_s27  ;;  %v545_v42 = vrot.slane %v524_v37, 1  ;;  %v611_v43 = vld [vmem:[%s8297_s25] sm:$0x77]  ;;  %v713_v37 = vrot.slane %v694_v24, 3 }
  0x3d   : > { %v628_v45 = vrot.slane %v611_v43, 6 }
  0x40   : > { %325 = vrot.lane.b32.xlu1 %v304_v47, %s8198_s27  ;;  %323 = vrot.lane.b32.xlu0 %v303_v48, %s8198_s27  ;;  %v623_v47 = vcombine.high %v611_v43, %v611_v43  ;;  %v612_v48 = vld [vmem:[%s8297_s25 + $0x8] sm:$0x77] }
  0x41   : > { %v630_v49 = vrot.slane %v612_v48, 6  ;;  %v624_v51 = vcombine.high %v612_v48, %v612_v48 }
  0x42   : > { %v629_v50 = vrot.slane %v623_v47, 6 }
  0x44   : > { %398 = vrot.lane.b32.xlu1 %v386_v53, %s8199_s28  ;;  %396 = vrot.lane.b32.xlu0 %v385_v54, %s8199_s28  ;;  %v632_v53 = vrot.slane %v613_v52, 6  ;;  %v631_v54 = vrot.slane %v624_v51, 6 }
  0x48   : > { %402 = vrot.lane.b32.xlu1 %v388_v59, %s8199_s28  ;;  %400 = vrot.lane.b32.xlu0 %v387_v60, %s8199_s28  ;;  %v634_v59 = vrot.slane %v614_v56, 6  ;;  %v633_v60 = vrot.slane %v625_v55, 6 }
  0x4c   : > { %406 = vrot.lane.b32.xlu1 %v390_v1, %s8199_s28  ;;  %404 = vrot.lane.b32.xlu0 %v389_v2, %s8199_s28 }
  0x50   : > { %410 = vrot.lane.b32.xlu1 %v392_v5, %s8199_s28  ;;  %408 = vrot.lane.b32.xlu0 %v391_v6, %s8199_s28  ;;  %v627_v5 = vcombine.high %v615_v62, %v615_v62  ;;  %v616_v6 = vld [vmem:[%s8297_s25 + $0x28] sm:$0x7] }
  0x54   : > { %414 = vrot.lane.b32.xlu1 %v394_v8, %s8199_s28  ;;  %412 = vrot.lane.b32.xlu0 %v393_v9, %s8199_s28 }
  0x58   : > { %467 = vrot.lane.b32.xlu1 %v461_v12, %s8200_s29  ;;  %416 = vrot.lane.b32.xlu0 %v395_v13, %s8199_s28  ;;  %v638_v12 = vrot.slane %v616_v6, 6  ;;  %v637_v13 = vrot.slane %v627_v5, 6 }
  0x5c   : > { %471 = vrot.lane.b32.xlu1 %v462_v15, %s8200_s29  ;;  %469 = vrot.lane.b32.xlu0 %v449_v10, %s8200_s29  ;;  %v693_v15 = vld [vmem:[%s8297_s25 + $0x8] sm:$0x77] }
  0x60   : > { %475 = vrot.lane.b32.xlu1 %v463_v17, %s8200_s29  ;;  %473 = vrot.lane.b32.xlu0 %v450_v14, %s8200_s29  ;;  %v704_v14 = vcombine.high %v692_v7, %v692_v7  ;;  %v775_v7 = vld [vmem:[%s8297_s25 + $0x10] sm:$0x77] }
  0x64   : > { %479 = vrot.lane.b32.xlu1 %v464_v19, %s8200_s29  ;;  %477 = vrot.lane.b32.xlu0 %v451_v16, %s8200_s29 }
  0x68   : > { %483 = vrot.lane.b32.xlu1 %v465_v21, %s8200_s29  ;;  %481 = vrot.lane.b32.xlu0 %v452_v18, %s8200_s29  ;;  %v710_v21 = vrot.slane %v704_v14, 3 }
  0x6c   : > { %487 = vrot.lane.b32.xlu1 %v7706_v23, %s8200_s29  ;;  %485 = vrot.lane.b32.xlu0 %v453_v20, %s8200_s29  ;;  %v705_v23 = vcombine.high %v693_v15, %v693_v15 }
  0x6e   : > { %v712_v29 = vrot.slane %v705_v23, 3 }
  0x70   : > { %550 = vrot.lane.b32.xlu1 %v538_v26, %s8201_s30  ;;  %548 = vrot.lane.b32.xlu0 %v537_v27, %s8201_s30 }
  0x74   : > { %554 = vrot.lane.b32.xlu1 %v540_v30, %s8201_s30  ;;  %552 = vrot.lane.b32.xlu0 %v539_v31, %s8201_s30  ;;  %v711_v30 = vrot.slane %v693_v15, 3  ;;  %v706_v31 = vcombine.high %v694_v24, %v694_v24 }
  0x76   : > { %v714_v36 = vrot.slane %v706_v31, 3 }
  0x78   : > { %558 = vrot.lane.b32.xlu1 %v542_v34, %s8201_s30  ;;  %556 = vrot.lane.b32.xlu0 %v541_v35, %s8201_s30 }
  0x7c   : > { %562 = vrot.lane.b32.xlu1 %v544_v38, %s8201_s30  ;;  %560 = vrot.lane.b32.xlu0 %v543_v39, %s8201_s30  ;;  %v707_v38 = vcombine.high %v695_v32, %v695_v32  ;;  %v696_v39 = vld [vmem:[%s8297_s25 + $0x20] sm:$0x77] }
  0x7d   : > { %v717_v52 = vrot.slane %v696_v39, 3 }
  0x7e   : > { %v716_v44 = vrot.slane %v707_v38, 3 }
  0x80   : > { %566 = vrot.lane.b32.xlu1 %v546_v41, %s8201_s30  ;;  %564 = vrot.lane.b32.xlu0 %v545_v42, %s8201_s30 }
  0x84   : > { %639 = vrot.lane.b32.xlu1 %v628_v45, %s8202_s4  ;;  %568 = vrot.lane.b32.xlu0 %v547_v46, %s8201_s30  ;;  %v715_v45 = vrot.slane %v695_v32, 3  ;;  %v708_v46 = vcombine.high %v696_v39, %v696_v39  ;;  %s8217_s30 = smov 1  }
  0x86   : > { %v718_v51 = vrot.slane %v708_v46, 3 }
  0x88   : > { %643 = vrot.lane.b32.xlu1 %v630_v49, %s8202_s4  ;;  %641 = vrot.lane.b32.xlu0 %v629_v50, %s8202_s4 }
  0x8a   : > { %v229_v57 = vpop.permute.xlu1 %228  ;;  %v225_v58 = vpop.permute.xlu0 %224 }
  0x8c   : > { %647 = vrot.lane.b32.xlu1 %v632_v53, %s8202_s4  ;;  %645 = vrot.lane.b32.xlu0 %v631_v54, %s8202_s4  ;;  %v697_v53 = vld [vmem:[%s8297_s25 + $0x28] sm:$0x7] }
  0x8e   : > { %v231_v63 = vpop.permute.xlu1 %230  ;;  %v233_v0 = vpop.permute.xlu0 %232 }
  0x8f   : > { %v249_v1 = vsel %vm246_vm0, %v229_v57, %v231_v63  ;;  %v250_v2 = vsel %vm246_vm0, %v231_v63, %v233_v0 }
  0x90   : > { %269 = vst [vmem:[#allocation2 + $0x7f8] sm:$0x38] %v249_v1  ;;  %270 = vst [vmem:[#allocation2 + $0x758] sm:$0x38] %v250_v2  ;;  %651 = vrot.lane.b32.xlu1 %v634_v59, %s8202_s4  ;;  %649 = vrot.lane.b32.xlu0 %v633_v60, %s8202_s4  ;;  %v773_v59 = vld [vmem:[%s8297_s25] sm:$0x77] }
  0x91   : > { %v774_v1 = vld [vmem:[%s8297_s25 + $0x8] sm:$0x77] }
  0x92   : > { %v235_v8 = vpop.permute.xlu1 %234  ;;  %v237_v9 = vpop.permute.xlu0 %236  ;;  %v786_v6 = vcombine.high %v774_v1, %v774_v1 }
  0x93   : > { %v251_v10 = vsel %vm246_vm0, %v233_v0, %v235_v8  ;;  %v252_v11 = vsel %vm246_vm0, %v235_v8, %v237_v9  ;;  %v785_v0 = vcombine.high %v773_v59, %v773_v59 }
  0x94   : > { %271 = vst [vmem:[#allocation2 + $0x320] sm:$0x38] %v251_v10  ;;  %272 = vst [vmem:[#allocation2 + $0x438] sm:$0x38] %v252_v11  ;;  %655 = vrot.lane.b32.xlu1 %v636_v3, %s8202_s4  ;;  %653 = vrot.lane.b32.xlu0 %v635_v4, %s8202_s4  ;;  %v787_v11 = vcombine.high %v775_v7, %v775_v7 }
  0x96   : > { %v239_v16 = vpop.permute.xlu1 %238  ;;  %v227_v17 = vpop.permute.xlu0 %226 }
  0x97   : > { %v253_v18 = vsel %vm246_vm0, %v237_v9, %v239_v16  ;;  %v247_v19 = vsel %vm246_vm0, %v225_v58, %v227_v17  ;;  %v248_v20 = vsel %vm246_vm0, %v227_v17, %v229_v57  ;;  %v719_v58 = vrot.slane %v697_v53, 3 }
  0x98   : > { %273 = vst [vmem:[#allocation2 + $0x8f8] sm:$0x38] %v253_v18  ;;  %267 = vst [vmem:[#allocation2 + $0x4c8] sm:$0x38] %v247_v19  ;;  %659 = vrot.lane.b32.xlu1 %v638_v12, %s8202_s4  ;;  %657 = vrot.lane.b32.xlu0 %v637_v13, %s8202_s4  ;;  %v776_v12 = vld [vmem:[%s8297_s25 + $0x18] sm:$0x77] }
  0x99   : > { %268 = vst [vmem:[#allocation2 + $0x808] sm:$0x38] %v248_v20  ;;  %v788_v17 = vcombine.high %v776_v12, %v776_v12  ;;  %v777_v18 = vld [vmem:[%s8297_s25 + $0x20] sm:$0x77]  ;;  %s8222_s4 = smov 8  }
  0x9a   : > { %v243_v25 = vpop.permute.xlu1 %242  ;;  %v241_v26 = vpop.permute.xlu0 %240  ;;  %v843_v19 = vld [vmem:[%s8297_s25] sm:$0x77]  ;;  %v789_v24 = vcombine.high %v777_v18, %v777_v18 }
  0x9b   : > { %v254_v27 = vsel %vm246_vm0, %v239_v16, %v241_v26  ;;  %v255_v28 = vsel %vm246_vm0, %v241_v26, %v243_v25  ;;  %v778_v26 = vld [vmem:[%s8297_s25 + $0x28] sm:$0x7] }
  0x9c   : > { %274 = vst [vmem:[#allocation2 + $0x4d0] sm:$0x38] %v254_v27  ;;  %275 = vst [vmem:[#allocation2 + $0x6e8] sm:$0x38] %v255_v28  ;;  %722 = vrot.lane.b32.xlu1 %v710_v21, %s8203_s5  ;;  %720 = vrot.lane.b32.xlu0 %v709_v22, %s8203_s5  ;;  %v844_v27 = vld [vmem:[%s8297_s25 + $0x8] sm:$0x77] }
  0x9e   : > { %v306_v33 = vpop.permute.xlu1 %305  ;;  %v245_v34 = vpop.permute.xlu0 %244 }
  0x9f   : > { %v256_v35 = vsel %vm246_vm0, %v243_v25, %v245_v34  ;;  %v855_v25 = vcombine.high %v843_v19, %v843_v19  ;;  %v856_v34 = vcombine.high %v844_v27, %v844_v27 }
  0xa0   : > { %276 = vst [vmem:[#allocation2 + $0x6a8] sm:$0x38] %v256_v35  ;;  %726 = vrot.lane.b32.xlu1 %v712_v29, %s8203_s5  ;;  %724 = vrot.lane.b32.xlu0 %v711_v30, %s8203_s5  ;;  %v845_v35 = vld [vmem:[%s8297_s25 + $0x10] sm:$0x77] }
  0xa1   : > { %v861_v32 = vrot.slane %v855_v25, 5  ;;  %v927_v25 = vld [vmem:[%s8297_s25 + $0x18] sm:$0x77] }
  0xa2   : > { %v310_v40 = vpop.permute.xlu1 %309  ;;  %v308_v41 = vpop.permute.xlu0 %307 }
  0xa3   : > { %v328_v42 = vsel %vm327_vm1, %v306_v33, %v308_v41  ;;  %v329_v43 = vsel %vm327_vm1, %v308_v41, %v310_v40  ;;  %v860_v33 = vrot.slane %v843_v19, 5  ;;  %v862_v41 = vrot.slane %v844_v27, 5 }
  0xa4   : > { %348 = vst [vmem:[#allocation2 + $0x750] ss:$-644 sps:$4 sm:$0xc1] %v328_v42   ;;  %349 = vst [vmem:[#allocation2 + $0x300] ss:$1292 sps:$4 sm:$0xc1] %v329_v43   ;;  %730 = vrot.lane.b32.xlu1 %v714_v36, %s8203_s5  ;;  %728 = vrot.lane.b32.xlu0 %v713_v37, %s8203_s5  ;;  %v857_v42 = vcombine.high %v845_v35, %v845_v35 }
  0xa5   : > { %v846_v43 = vld [vmem:[%s8297_s25 + $0x18] sm:$0x77] }
  0xa6   : > { %v314_v47 = vpop.permute.xlu1 %313  ;;  %v312_v48 = vpop.permute.xlu0 %311 }
  0xa7   : > { %v330_v49 = vsel %vm327_vm1, %v310_v40, %v312_v48  ;;  %v331_v50 = vsel %vm327_vm1, %v312_v48, %v314_v47  ;;  %v863_v40 = vrot.slane %v856_v34, 5  ;;  %v864_v48 = vrot.slane %v845_v35, 5 }
  0xa8   : > { %350 = vst [vmem:[#allocation2 + $0x708] ss:$244 sps:$4 sm:$0xc1] %v330_v49   ;;  %351 = vst [vmem:[#allocation2 + $0x7f0] ss:$-148 sps:$4 sm:$0xc1] %v331_v50   ;;  %734 = vrot.lane.b32.xlu1 %v716_v44, %s8203_s5  ;;  %732 = vrot.lane.b32.xlu0 %v715_v45, %s8203_s5  ;;  %v858_v49 = vcombine.high %v846_v43, %v846_v43 }
  0xa9   : > { %v847_v50 = vld [vmem:[%s8297_s25 + $0x20] sm:$0x77] }
  0xaa   : > { %v318_v54 = vpop.permute.xlu1 %317  ;;  %v316_v55 = vpop.permute.xlu0 %315 }
  0xab   : > { %v332_v56 = vsel %vm327_vm1, %v314_v47, %v316_v55  ;;  %v333_v57 = vsel %vm327_vm1, %v316_v55, %v318_v54  ;;  %v865_v47 = vrot.slane %v857_v42, 5  ;;  %v867_v55 = vrot.slane %v858_v49, 5  ;;  %v1016_v49 = vld [vmem:[%s8297_s25 + $0x8] sm:$0x77] }
  0xac   : > { %352 = vst [vmem:[#allocation2 + $0x570] ss:$-588 sps:$4 sm:$0xc1] %v332_v56   ;;  %353 = vst [vmem:[#allocation2 + $0x580] ss:$-324 sps:$4 sm:$0xc1] %v333_v57   ;;  %738 = vrot.lane.b32.xlu1 %v718_v51, %s8203_s5  ;;  %736 = vrot.lane.b32.xlu0 %v717_v52, %s8203_s5  ;;  %v859_v57 = vcombine.high %v847_v50, %v847_v50 }
  0xad   : > { %v866_v56 = vrot.slane %v846_v43, 5 }
  0xae   : > { %v322_v60 = vpop.permute.xlu1 %321  ;;  %v320_v61 = vpop.permute.xlu0 %319 }
  0xaf   : > { %v334_v62 = vsel %vm327_vm1, %v318_v54, %v320_v61  ;;  %v335_v63 = vsel %vm327_vm1, %v320_v61, %v322_v60 }
  0xb0   : > { %354 = vst [vmem:[#allocation2 + $0x3a8] ss:$1364 sps:$4 sm:$0xc1] %v334_v62   ;;  %355 = vst [vmem:[#allocation2 + $0x8e0] ss:$-1036 sps:$4 sm:$0xc1] %v335_v63   ;;  %790 = vrot.lane.b32.xlu1 %v773_v59, %s8204_s6  ;;  %740 = vrot.lane.b32.xlu0 %v719_v58, %s8203_s5 }
  0xb1   : > { %v869_v62 = vrot.slane %v859_v57, 5  ;;  %v868_v63 = vrot.slane %v847_v50, 5  ;;  %v1017_v57 = vld [vmem:[%s8297_s25 + $0x10] sm:$0x77]  ;;  %s8223_s5 = smov 7  }
  0xb2   : > { %v326_v2 = vpop.permute.xlu1 %325  ;;  %v324_v3 = vpop.permute.xlu0 %323 }
  0xb3   : > { %v336_v4 = vsel %vm327_vm1, %v322_v60, %v324_v3  ;;  %v337_v5 = vsel %vm327_vm1, %v324_v3, %v326_v2 }
  0xb4   : > { %356 = vst [vmem:[#allocation2 + $0x960] ss:$-628 sps:$4 sm:$0xc1] %v336_v4   ;;  %357 = vst [vmem:[#allocation2 + $0x898] ss:$-492 sps:$4 sm:$0xc1] %v337_v5   ;;  %794 = vrot.lane.b32.xlu1 %v774_v1, %s8204_s6  ;;  %792 = vrot.lane.b32.xlu0 %v785_v0, %s8204_s6 }
  0xb5   : > { %v924_v0 = vld [vmem:[%s8297_s25] sm:$0x77]  ;;  %v848_v1 = vld [vmem:[%s8297_s25 + $0x28] sm:$0x7] }
  0xb6   : > { %v399_v8 = vpop.permute.xlu1 %398  ;;  %v397_v9 = vpop.permute.xlu0 %396 }
  0xb7   : > { %v419_v10 = vsel %vm418_vm2, %v397_v9, %v399_v8  ;;  %v925_v9 = vld [vmem:[%s8297_s25 + $0x8] sm:$0x77] }
  0xb8   : > { %439 = vst [vmem:[#allocation2 + $0x750] sm:$0xe] %v419_v10  ;;  %798 = vrot.lane.b32.xlu1 %v775_v7, %s8204_s6  ;;  %796 = vrot.lane.b32.xlu0 %v786_v6, %s8204_s6  ;;  %v941_v6 = vrot.slane %v924_v0, 2  ;;  %v870_v7 = vrot.slane %v848_v1, 5  ;;  %v1018_v1 = vld [vmem:[%s8297_s25 + $0x18] sm:$0x77] }
  0xba   : > { %v403_v13 = vpop.permute.xlu1 %402  ;;  %v401_v14 = vpop.permute.xlu0 %400 }
  0xbb   : > { %v420_v15 = vsel %vm418_vm2, %v399_v8, %v401_v14  ;;  %v421_v16 = vsel %vm418_vm2, %v401_v14, %v403_v13  ;;  %v936_v8 = vcombine.high %v924_v0, %v924_v0  ;;  %v943_v14 = vrot.slane %v925_v9, 2 }
  0xbc   : > { %440 = vst [vmem:[#allocation2 + $0x300] sm:$0xe] %v420_v15  ;;  %441 = vst [vmem:[#allocation2 + $0x708] sm:$0xe] %v421_v16  ;;  %802 = vrot.lane.b32.xlu1 %v776_v12, %s8204_s6  ;;  %800 = vrot.lane.b32.xlu0 %v787_v11, %s8204_s6  ;;  %v937_v16 = vcombine.high %v925_v9, %v925_v9  ;;  %v1029_v0 = vcombine.high %v1017_v57, %v1017_v57 }
  0xbd   : > { %v942_v15 = vrot.slane %v936_v8, 2  ;;  %v1019_v8 = vld [vmem:[%s8297_s25 + $0x20] sm:$0x77] }
  0xbe   : > { %v407_v20 = vpop.permute.xlu1 %406  ;;  %v405_v21 = vpop.permute.xlu0 %404 }
  0xbf   : > { %v422_v22 = vsel %vm418_vm2, %v403_v13, %v405_v21  ;;  %v423_v23 = vsel %vm418_vm2, %v405_v21, %v407_v20 }
  0xc0   : > { %442 = vst [vmem:[#allocation2 + $0x7f0] sm:$0xe] %v422_v22  ;;  %443 = vst [vmem:[#allocation2 + $0x570] sm:$0xe] %v423_v23  ;;  %806 = vrot.lane.b32.xlu1 %v777_v18, %s8204_s6  ;;  %804 = vrot.lane.b32.xlu0 %v788_v17, %s8204_s6  ;;  %v926_v17 = vld [vmem:[%s8297_s25 + $0x10] sm:$0x77] }
  0xc1   : > { %v945_v22 = vrot.slane %v926_v17, 2  ;;  %v944_v23 = vrot.slane %v937_v16, 2 }
  0xc2   : > { %v411_v28 = vpop.permute.xlu1 %410  ;;  %v409_v29 = vpop.permute.xlu0 %408 }
  0xc3   : > { %v424_v30 = vsel %vm418_vm2, %v407_v20, %v409_v29  ;;  %v425_v31 = vsel %vm418_vm2, %v409_v29, %v411_v28  ;;  %v947_v29 = vrot.slane %v927_v25, 2 }
  0xc4   : > { %444 = vst [vmem:[#allocation2 + $0x580] sm:$0xe] %v424_v30  ;;  %445 = vst [vmem:[#allocation2 + $0x3a8] sm:$0xe] %v425_v31  ;;  %810 = vrot.lane.b32.xlu1 %v778_v26, %s8204_s6  ;;  %808 = vrot.lane.b32.xlu0 %v789_v24, %s8204_s6  ;;  %v938_v24 = vcombine.high %v926_v17, %v926_v17  ;;  %v939_v31 = vcombine.high %v927_v25, %v927_v25  ;;  %s8224_s6 = smov 6  }
  0xc6   : > { %v415_v36 = vpop.permute.xlu1 %414  ;;  %v413_v37 = vpop.permute.xlu0 %412  ;;  %v946_v30 = vrot.slane %v938_v24, 2 }
  0xc7   : > { %v426_v38 = vsel %vm418_vm2, %v411_v28, %v413_v37  ;;  %v427_v39 = vsel %vm418_vm2, %v413_v37, %v415_v36 }
  0xc8   : > { %446 = vst [vmem:[#allocation2 + $0x8e0] sm:$0xe] %v426_v38  ;;  %447 = vst [vmem:[#allocation2 + $0x960] sm:$0xe] %v427_v39  ;;  %873 = vrot.lane.b32.xlu1 %v861_v32, %s8205_s7  ;;  %871 = vrot.lane.b32.xlu0 %v860_v33, %s8205_s7  ;;  %v928_v32 = vld [vmem:[%s8297_s25 + $0x20] sm:$0x77] }
  0xc9   : > { %v949_v37 = vrot.slane %v928_v32, 2  ;;  %v948_v38 = vrot.slane %v939_v31, 2  ;;  %v940_v39 = vcombine.high %v928_v32, %v928_v32 }
  0xca   : > { %v468_v44 = vpop.permute.xlu1 %467  ;;  %v417_v45 = vpop.permute.xlu0 %416 }
  0xcb   : > { %v428_v46 = vsel %vm418_vm2, %v415_v36, %v417_v45 }
  0xcc   : > { %448 = vst [vmem:[#allocation2 + $0x898] sm:$0xe] %v428_v46  ;;  %877 = vrot.lane.b32.xlu1 %v863_v40, %s8205_s7  ;;  %875 = vrot.lane.b32.xlu0 %v862_v41, %s8205_s7  ;;  %v929_v40 = vld [vmem:[%s8297_s25 + $0x28] sm:$0x7]  ;;  %v1015_v41 = vld [vmem:[%s8297_s25] sm:$0x77] }
  0xcd   : > { %v951_v46 = vrot.slane %v929_v40, 2 }
  0xce   : > { %v472_v51 = vpop.permute.xlu1 %471  ;;  %v470_v52 = vpop.permute.xlu0 %469 }
  0xcf   : > { %v490_v53 = vsel %vm489_vm3, %v468_v44, %v470_v52  ;;  %v491_v54 = vsel %vm489_vm3, %v470_v52, %v472_v51 }
  0xd0   : > { %510 = vst [vmem:[#allocation2 + $0x750] sm:$0x70] %v490_v53  ;;  %511 = vst [vmem:[#allocation2 + $0x300] sm:$0x70] %v491_v54  ;;  %881 = vrot.lane.b32.xlu1 %v865_v47, %s8205_s7  ;;  %879 = vrot.lane.b32.xlu0 %v864_v48, %s8205_s7  ;;  %v950_v47 = vrot.slane %v940_v39, 2  ;;  %v1027_v48 = vcombine.high %v1015_v41, %v1015_v41 }
  0xd2   : > { %v476_v58 = vpop.permute.xlu1 %475  ;;  %v474_v59 = vpop.permute.xlu0 %473  ;;  %v1033_v54 = vrot.slane %v1027_v48, 7 }
  0xd3   : > { %v492_v60 = vsel %vm489_vm3, %v472_v51, %v474_v59  ;;  %v493_v61 = vsel %vm489_vm3, %v474_v59, %v476_v58 }
  0xd4   : > { %512 = vst [vmem:[#allocation2 + $0x708] sm:$0x70] %v492_v60  ;;  %513 = vst [vmem:[#allocation2 + $0x7f0] sm:$0x70] %v493_v61  ;;  %885 = vrot.lane.b32.xlu1 %v867_v55, %s8205_s7  ;;  %883 = vrot.lane.b32.xlu0 %v866_v56, %s8205_s7  ;;  %v1032_v55 = vrot.slane %v1015_v41, 7  ;;  %v1028_v56 = vcombine.high %v1016_v49, %v1016_v49 }
  0xd6   : > { %v480_v2 = vpop.permute.xlu1 %479  ;;  %v478_v3 = vpop.permute.xlu0 %477 }
  0xd7   : > { %v494_v4 = vsel %vm489_vm3, %v476_v58, %v478_v3  ;;  %v495_v5 = vsel %vm489_vm3, %v478_v3, %v480_v2 }
  0xd8   : > { %514 = vst [vmem:[#allocation2 + $0x570] sm:$0x70] %v494_v4  ;;  %515 = vst [vmem:[#allocation2 + $0x580] sm:$0x70] %v495_v5  ;;  %889 = vrot.lane.b32.xlu1 %v869_v62, %s8205_s7  ;;  %887 = vrot.lane.b32.xlu0 %v868_v63, %s8205_s7  ;;  %v1035_v62 = vrot.slane %v1028_v56, 7  ;;  %v1034_v63 = vrot.slane %v1016_v49, 7 }
  0xd9   : > { %v1037_v5 = vrot.slane %v1029_v0, 7 }
  0xda   : > { %v484_v10 = vpop.permute.xlu1 %483  ;;  %v482_v11 = vpop.permute.xlu0 %481 }
  0xdb   : > { %v496_v12 = vsel %vm489_vm3, %v480_v2, %v482_v11  ;;  %v497_v13 = vsel %vm489_vm3, %v482_v11, %v484_v10 }
  0xdc   : > { %516 = vst [vmem:[#allocation2 + $0x3a8] sm:$0x70] %v496_v12  ;;  %517 = vst [vmem:[#allocation2 + $0x8e0] sm:$0x70] %v497_v13  ;;  %952 = vrot.lane.b32.xlu1 %v941_v6, %s8206_s8  ;;  %891 = vrot.lane.b32.xlu0 %v870_v7, %s8205_s7  ;;  %v1036_v6 = vrot.slane %v1017_v57, 7  ;;  %v1030_v7 = vcombine.high %v1018_v1, %v1018_v1 }
  0xde   : > { %v488_v18 = vpop.permute.xlu1 %487  ;;  %v486_v19 = vpop.permute.xlu0 %485  ;;  %v1039_v13 = vrot.slane %v1030_v7, 7 }
  0xdf   : > { %v498_v20 = vsel %vm489_vm3, %v484_v10, %v486_v19  ;;  %v499_v21 = vsel %vm489_vm3, %v486_v19, %v488_v18 }
  0xe0   : > { %518 = vst [vmem:[#allocation2 + $0x960] sm:$0x70] %v498_v20  ;;  %519 = vst [vmem:[#allocation2 + $0x898] sm:$0x70] %v499_v21  ;;  %956 = vrot.lane.b32.xlu1 %v943_v14, %s8206_s8  ;;  %954 = vrot.lane.b32.xlu0 %v942_v15, %s8206_s8  ;;  %v1038_v14 = vrot.slane %v1018_v1, 7  ;;  %v1031_v15 = vcombine.high %v1019_v8, %v1019_v8  ;;  %v1040_v21 = vrot.slane %v1019_v8, 7 }
  0xe2   : > { %v551_v26 = vpop.permute.xlu1 %550  ;;  %v549_v27 = vpop.permute.xlu0 %548  ;;  %v1041_v20 = vrot.slane %v1031_v15, 7 }
  0xe3   : > { %v571_v28 = vsel %vm570_vm4, %v549_v27, %v551_v26 }
  0xe4   : > { %591 = vst [vmem:[#allocation2 + $0x7d8] ss:$-132 sps:$4 sm:$0x83] %v571_v28   ;;  %960 = vrot.lane.b32.xlu1 %v945_v22, %s8206_s8  ;;  %958 = vrot.lane.b32.xlu0 %v944_v23, %s8206_s8  ;;  %v1096_v22 = vld [vmem:[%s8297_s25] sm:$0x77] }
  0xe5   : > { %v1020_v23 = vld [vmem:[%s8297_s25 + $0x28] sm:$0x7]  ;;  %v1108_v28 = vcombine.low %v1096_v22, %v1096_v22 }
  0xe6   : > { %v555_v33 = vpop.permute.xlu1 %554  ;;  %v553_v34 = vpop.permute.xlu0 %552 }
  0xe7   : > { %v572_v35 = vsel %vm570_vm4, %v551_v26, %v553_v34  ;;  %v573_v36 = vsel %vm570_vm4, %v553_v34, %v555_v33 }
  0xe8   : > { %592 = vst [vmem:[#allocation2 + $0x778] ss:$-1140 sps:$4 sm:$0x83] %v572_v35   ;;  %593 = vst [vmem:[#allocation2 + $0x488] ss:$644 sps:$4 sm:$0x83] %v573_v36   ;;  %964 = vrot.lane.b32.xlu1 %v947_v29, %s8206_s8  ;;  %962 = vrot.lane.b32.xlu0 %v946_v30, %s8206_s8 }
  0xe9   : > { %v1042_v29 = vrot.slane %v1020_v23, 7  ;;  %v1097_v30 = vld [vmem:[%s8297_s25 + $0x8] sm:$0x77]  ;;  %v1098_v36 = vld [vmem:[%s8297_s25 + $0x10] sm:$0x77] }
  0xea   : > { %v559_v42 = vpop.permute.xlu1 %558  ;;  %v557_v43 = vpop.permute.xlu0 %556  ;;  %v1109_v35 = vcombine.low %v1097_v30, %v1097_v30  ;;  %v1110_v41 = vcombine.low %v1098_v36, %v1098_v36 }
  0xeb   : > { %v574_v44 = vsel %vm570_vm4, %v555_v33, %v557_v43  ;;  %v575_v45 = vsel %vm570_vm4, %v557_v43, %v559_v42 }
  0xec   : > { %594 = vst [vmem:[#allocation2 + $0x378] ss:$1148 sps:$4 sm:$0x83] %v574_v44   ;;  %595 = vst [vmem:[#allocation2 + $0x98] ss:$1244 sps:$4 sm:$0x83] %v575_v45   ;;  %968 = vrot.lane.b32.xlu1 %v949_v37, %s8206_s8  ;;  %966 = vrot.lane.b32.xlu0 %v948_v38, %s8206_s8 }
  0xee   : > { %v563_v50 = vpop.permute.xlu1 %562  ;;  %v561_v51 = vpop.permute.xlu0 %560 }
  0xef   : > { %v576_v52 = vsel %vm570_vm4, %v559_v42, %v561_v51  ;;  %v577_v53 = vsel %vm570_vm4, %v561_v51, %v563_v50  ;;  %v1099_v42 = vld [vmem:[%s8297_s25 + $0x18] sm:$0x77] }
  0xf0   : > { %596 = vst [vmem:[#allocation2 + $0x370] ss:$532 sps:$4 sm:$0x83] %v576_v52   ;;  %597 = vst [vmem:[#allocation2 + $0x838] ss:$-1164 sps:$4 sm:$0x83] %v577_v53   ;;  %972 = vrot.lane.b32.xlu1 %v951_v46, %s8206_s8  ;;  %970 = vrot.lane.b32.xlu0 %v950_v47, %s8206_s8  ;;  %v1111_v46 = vcombine.low %v1099_v42, %v1099_v42 }
  0xf1   : > { %v1100_v47 = vld [vmem:[%s8297_s25 + $0x20] sm:$0x77] }
  0xf2   : > { %v567_v58 = vpop.permute.xlu1 %566  ;;  %v565_v59 = vpop.permute.xlu0 %564  ;;  %v1112_v52 = vcombine.low %v1100_v47, %v1100_v47  ;;  %v1167_v53 = vld [vmem:[%s8297_s25] sm:$0x77] }
  0xf3   : > { %v578_v60 = vsel %vm570_vm4, %v563_v50, %v565_v59  ;;  %v579_v61 = vsel %vm570_vm4, %v565_v59, %v567_v58  ;;  %v1179_v59 = vcombine.high %v1167_v53, %v1167_v53 }
  0xf4   : > { %598 = vst [vmem:[#allocation2 + $0x800] ss:$228 sps:$4 sm:$0x83] %v578_v60   ;;  %599 = vst [vmem:[#allocation2 + $0x270] ss:$1780 sps:$4 sm:$0x83] %v579_v61   ;;  %1045 = vrot.lane.b32.xlu1 %v1033_v54, %s8207_s9  ;;  %1043 = vrot.lane.b32.xlu0 %v1032_v55, %s8207_s9 }
  0xf5   : > { %v1168_v60 = vld [vmem:[%s8297_s25 + $0x8] sm:$0x77]  ;;  %v1185_v1 = vrot.slane %v1179_v59, 1 }
  0xf6   : > { %v640_v2 = vpop.permute.xlu1 %639  ;;  %v569_v3 = vpop.permute.xlu0 %568 }
  0xf7   : > { %v580_v4 = vsel %vm570_vm4, %v567_v58, %v569_v3  ;;  %v7747_v58 = vld [vmem:[%s8297_s25 + $0x28] ss:$0 sps:$4 sm:$0x77]   ;;  %v1180_v3 = vcombine.high %v1168_v60, %v1168_v60  ;;  %vm1540_vm4 = vcmask 474112  }
  0xf8   : > { %600 = vst [vmem:[#allocation2 + $0x650] ss:$588 sps:$4 sm:$0x83] %v580_v4   ;;  %1049 = vrot.lane.b32.xlu1 %v1035_v62, %s8207_s9  ;;  %1047 = vrot.lane.b32.xlu0 %v1034_v63, %s8207_s9  ;;  %v1169_v4 = vld [vmem:[%s8297_s25 + $0x10] sm:$0x77] }
  0xfa   : > { %v644_v9 = vpop.permute.xlu1 %643  ;;  %v642_v10 = vpop.permute.xlu0 %641 }
  0xfb   : > { %v662_v11 = vsel %vm661_vm5, %v640_v2, %v642_v10  ;;  %v663_v12 = vsel %vm661_vm5, %v642_v10, %v644_v9  ;;  %v1184_v2 = vrot.slane %v1167_v53, 1  ;;  %v1186_v10 = vrot.slane %v1168_v60, 1 }
  0xfc   : > { %682 = vst [vmem:[#allocation2 + $0x7d8] sm:$0x1c] %v662_v11  ;;  %683 = vst [vmem:[#allocation2 + $0x778] sm:$0x1c] %v663_v12  ;;  %1053 = vrot.lane.b32.xlu1 %v1037_v5, %s8207_s9  ;;  %1051 = vrot.lane.b32.xlu0 %v1036_v6, %s8207_s9  ;;  %v1181_v11 = vcombine.high %v1169_v4, %v1169_v4  ;;  %v1170_v12 = vld [vmem:[%s8297_s25 + $0x18] sm:$0x77] }
  0xfe   : > { %v648_v16 = vpop.permute.xlu1 %647  ;;  %v646_v17 = vpop.permute.xlu0 %645 }
  0xff   : > { %v664_v18 = vsel %vm661_vm5, %v644_v9, %v646_v17  ;;  %v665_v19 = vsel %vm661_vm5, %v646_v17, %v648_v16  ;;  %v1187_v9 = vrot.slane %v1180_v3, 1  ;;  %v1188_v17 = vrot.slane %v1169_v4, 1 }
 0x100   : > { %684 = vst [vmem:[#allocation2 + $0x488] sm:$0x1c] %v664_v18  ;;  %685 = vst [vmem:[#allocation2 + $0x378] sm:$0x1c] %v665_v19  ;;  %1057 = vrot.lane.b32.xlu1 %v1039_v13, %s8207_s9  ;;  %1055 = vrot.lane.b32.xlu0 %v1038_v14, %s8207_s9  ;;  %v1182_v18 = vcombine.high %v1170_v12, %v1170_v12  ;;  %v1171_v19 = vld [vmem:[%s8297_s25 + $0x20] sm:$0x77] }
 0x102   : > { %v652_v24 = vpop.permute.xlu1 %651  ;;  %v650_v25 = vpop.permute.xlu0 %649 }
 0x103   : > { %v666_v26 = vsel %vm661_vm5, %v648_v16, %v650_v25  ;;  %v667_v27 = vsel %vm661_vm5, %v650_v25, %v652_v24  ;;  %v1189_v16 = vrot.slane %v1181_v11, 1  ;;  %v1190_v25 = vrot.slane %v1170_v12, 1 }
 0x104   : > { %686 = vst [vmem:[#allocation2 + $0x98] sm:$0x1c] %v666_v26  ;;  %687 = vst [vmem:[#allocation2 + $0x370] sm:$0x1c] %v667_v27  ;;  %1061 = vrot.lane.b32.xlu1 %v1041_v20, %s8207_s9  ;;  %1059 = vrot.lane.b32.xlu0 %v1040_v21, %s8207_s9  ;;  %v1183_v26 = vcombine.high %v1171_v19, %v1171_v19 }
 0x106   : > { %v656_v31 = vpop.permute.xlu1 %655  ;;  %v654_v32 = vpop.permute.xlu0 %653 }
 0x107   : > { %v668_v33 = vsel %vm661_vm5, %v652_v24, %v654_v32  ;;  %v669_v34 = vsel %vm661_vm5, %v654_v32, %v656_v31  ;;  %v1191_v24 = vrot.slane %v1182_v18, 1  ;;  %v1192_v32 = vrot.slane %v1171_v19, 1  ;;  %v1340_v18 = vld [vmem:[%s8297_s25 + $0x8] sm:$0x77] }
 0x108   : > { %688 = vst [vmem:[#allocation2 + $0x838] sm:$0x1c] %v668_v33  ;;  %689 = vst [vmem:[#allocation2 + $0x800] sm:$0x1c] %v669_v34  ;;  %1114 = vrot.lane.b32.xlu1 %v1108_v28, %s8208_s10  ;;  %1063 = vrot.lane.b32.xlu0 %v1042_v29, %s8207_s9  ;;  %v1258_v33 = vld [vmem:[%s8297_s25] sm:$0x77] }
 0x109   : > { %v1172_v34 = vld [vmem:[%s8297_s25 + $0x28] sm:$0x7] }
 0x10a   : > { %v660_v37 = vpop.permute.xlu1 %659  ;;  %v658_v38 = vpop.permute.xlu0 %657 }
 0x10b   : > { %v670_v39 = vsel %vm661_vm5, %v656_v31, %v658_v38  ;;  %v671_v40 = vsel %vm661_vm5, %v658_v38, %v660_v37  ;;  %v1193_v31 = vrot.slane %v1183_v26, 1  ;;  %v1341_v26 = vld [vmem:[%s8297_s25 + $0x10] sm:$0x77]  ;;  %vm1621_vm5 = vcmask 31744  }
 0x10c   : > { %690 = vst [vmem:[#allocation2 + $0x270] sm:$0x1c] %v670_v39  ;;  %691 = vst [vmem:[#allocation2 + $0x650] sm:$0x1c] %v671_v40  ;;  %1118 = vrot.lane.b32.xlu1 %v1109_v35, %s8208_s10  ;;  %1116 = vrot.lane.b32.xlu0 %v1096_v22, %s8208_s10  ;;  %v1275_v39 = vrot.slane %v1258_v33, 6  ;;  %v1194_v40 = vrot.slane %v1172_v34, 1 }
 0x10d   : > { %v1342_v34 = vld [vmem:[%s8297_s25 + $0x18] sm:$0x77] }
 0x10e   : > { %v723_v43 = vpop.permute.xlu1 %722  ;;  %v721_v44 = vpop.permute.xlu0 %720 }
 0x10f   : > { %v743_v45 = vsel %vm742_vm6, %v721_v44, %v723_v43 }
 0x110   : > { %763 = vst [vmem:[#allocation2 + $0x7d8] sm:$0xe0] %v743_v45  ;;  %1122 = vrot.lane.b32.xlu1 %v1110_v41, %s8208_s10  ;;  %1120 = vrot.lane.b32.xlu0 %v1097_v30, %s8208_s10  ;;  %v1270_v41 = vcombine.high %v1258_v33, %v1258_v33  ;;  %v1353_v33 = vcombine.high %v1341_v26, %v1341_v26 }
 0x112   : > { %v727_v48 = vpop.permute.xlu1 %726  ;;  %v725_v49 = vpop.permute.xlu0 %724 }
 0x113   : > { %v744_v50 = vsel %vm742_vm6, %v723_v43, %v725_v49  ;;  %v745_v51 = vsel %vm742_vm6, %v725_v49, %v727_v48 }
 0x114   : > { %764 = vst [vmem:[#allocation2 + $0x778] sm:$0xe0] %v744_v50  ;;  %765 = vst [vmem:[#allocation2 + $0x488] sm:$0xe0] %v745_v51  ;;  %1126 = vrot.lane.b32.xlu1 %v1111_v46, %s8208_s10  ;;  %1124 = vrot.lane.b32.xlu0 %v1098_v36, %s8208_s10  ;;  %v1260_v50 = vld [vmem:[%s8297_s25 + $0x10] sm:$0x77] }
 0x116   : > { %v731_v54 = vpop.permute.xlu1 %730  ;;  %v729_v55 = vpop.permute.xlu0 %728 }
 0x117   : > { %v746_v56 = vsel %vm742_vm6, %v727_v48, %v729_v55  ;;  %v747_v57 = vsel %vm742_vm6, %v729_v55, %v731_v54  ;;  %v1276_v48 = vrot.slane %v1270_v41, 6  ;;  %v1279_v55 = vrot.slane %v1260_v50, 6  ;;  %v1343_v41 = vld [vmem:[%s8297_s25 + $0x20] sm:$0x77] }
 0x118   : > { %766 = vst [vmem:[#allocation2 + $0x378] sm:$0xe0] %v746_v56  ;;  %767 = vst [vmem:[#allocation2 + $0x98] sm:$0xe0] %v747_v57  ;;  %1130 = vrot.lane.b32.xlu1 %v1112_v52, %s8208_s10  ;;  %1128 = vrot.lane.b32.xlu0 %v1099_v42, %s8208_s10  ;;  %v1259_v42 = vld [vmem:[%s8297_s25 + $0x8] sm:$0x77]  ;;  %v1272_v57 = vcombine.high %v1260_v50, %v1260_v50 }
 0x119   : > { %v1271_v49 = vcombine.high %v1259_v42, %v1259_v42 }
 0x11a   : > { %v735_v61 = vpop.permute.xlu1 %734  ;;  %v733_v62 = vpop.permute.xlu0 %732 }
 0x11b   : > { %v748_v63 = vsel %vm742_vm6, %v731_v54, %v733_v62  ;;  %v749_v0 = vsel %vm742_vm6, %v733_v62, %v735_v61  ;;  %v1278_v56 = vrot.slane %v1271_v49, 6 }
 0x11c   : > { %768 = vst [vmem:[#allocation2 + $0x370] sm:$0xe0] %v748_v63  ;;  %769 = vst [vmem:[#allocation2 + $0x838] sm:$0xe0] %v749_v0  ;;  %1134 = vrot.lane.b32.xlu1 %v7747_v58, %s8208_s10  ;;  %1132 = vrot.lane.b32.xlu0 %v1100_v47, %s8208_s10  ;;  %v1277_v47 = vrot.slane %v1259_v42, 6  ;;  %v1280_v63 = vrot.slane %v1272_v57, 6 }
 0x11d   : > { %v1261_v58 = vld [vmem:[%s8297_s25 + $0x18] sm:$0x77] }
 0x11e   : > { %v739_v5 = vpop.permute.xlu1 %738  ;;  %v737_v6 = vpop.permute.xlu0 %736  ;;  %v1281_v62 = vrot.slane %v1261_v58, 6  ;;  %v1273_v0 = vcombine.high %v1261_v58, %v1261_v58 }
 0x11f   : > { %v750_v7 = vsel %vm742_vm6, %v735_v61, %v737_v6  ;;  %v751_v8 = vsel %vm742_vm6, %v737_v6, %v739_v5 }
 0x120   : > { %770 = vst [vmem:[#allocation2 + $0x800] sm:$0xe0] %v750_v7  ;;  %771 = vst [vmem:[#allocation2 + $0x270] sm:$0xe0] %v751_v8  ;;  %1197 = vrot.lane.b32.xlu1 %v1185_v1, %s8209_s11  ;;  %1195 = vrot.lane.b32.xlu0 %v1184_v2, %s8209_s11  ;;  %v1262_v1 = vld [vmem:[%s8297_s25 + $0x20] sm:$0x77] }
 0x121   : > { %v1283_v6 = vrot.slane %v1262_v1, 6  ;;  %v1282_v7 = vrot.slane %v1273_v0, 6  ;;  %v1274_v8 = vcombine.high %v1262_v1, %v1262_v1 }
 0x122   : > { %v791_v13 = vpop.permute.xlu1 %790  ;;  %v741_v14 = vpop.permute.xlu0 %740 }
 0x123   : > { %v752_v15 = vsel %vm742_vm6, %v739_v5, %v741_v14  ;;  %vm1712_vm6 = vcmask 23552  }
 0x124   : > { %772 = vst [vmem:[#allocation2 + $0x650] sm:$0xe0] %v752_v15  ;;  %1201 = vrot.lane.b32.xlu1 %v1187_v9, %s8209_s11  ;;  %1199 = vrot.lane.b32.xlu0 %v1186_v10, %s8209_s11  ;;  %v1263_v9 = vld [vmem:[%s8297_s25 + $0x28] sm:$0x7]  ;;  %v1339_v10 = vld [vmem:[%s8297_s25] sm:$0x77] }
 0x125   : > { %v1285_v15 = vrot.slane %v1263_v9, 6  ;;  %v1422_v9 = vld [vmem:[%s8297_s25 + $0x10] sm:$0x77] }
 0x126   : > { %v795_v20 = vpop.permute.xlu1 %794  ;;  %v793_v21 = vpop.permute.xlu0 %792 }
 0x127   : > { %v813_v22 = vsel %vm812_vm7, %v791_v13, %v793_v21  ;;  %v814_v23 = vsel %vm812_vm7, %v793_v21, %v795_v20 }
 0x128   : > { %833 = vst [vmem:[#allocation2 + $0x548] sm:$0x7] %v813_v22  ;;  %834 = vst [vmem:[#allocation2 + $0x70] sm:$0x7] %v814_v23  ;;  %1205 = vrot.lane.b32.xlu1 %v1189_v16, %s8209_s11  ;;  %1203 = vrot.lane.b32.xlu0 %v1188_v17, %s8209_s11  ;;  %v1284_v16 = vrot.slane %v1274_v8, 6  ;;  %v1351_v17 = vcombine.high %v1339_v10, %v1339_v10 }
 0x12a   : > { %v799_v27 = vpop.permute.xlu1 %798  ;;  %v797_v28 = vpop.permute.xlu0 %796  ;;  %v1357_v23 = vrot.slane %v1351_v17, 3 }
 0x12b   : > { %v815_v29 = vsel %vm812_vm7, %v795_v20, %v797_v28  ;;  %v816_v30 = vsel %vm812_vm7, %v797_v28, %v799_v27 }
 0x12c   : > { %835 = vst [vmem:[#allocation2 + $0x78] sm:$0x7] %v815_v29  ;;  %836 = vst [vmem:[#allocation2 + $0x6f8] sm:$0x7] %v816_v30  ;;  %1209 = vrot.lane.b32.xlu1 %v1191_v24, %s8209_s11  ;;  %1207 = vrot.lane.b32.xlu0 %v1190_v25, %s8209_s11  ;;  %v1356_v24 = vrot.slane %v1339_v10, 3  ;;  %v1352_v25 = vcombine.high %v1340_v18, %v1340_v18 }
 0x12e   : > { %v803_v35 = vpop.permute.xlu1 %802  ;;  %v801_v36 = vpop.permute.xlu0 %800 }
 0x12f   : > { %v817_v37 = vsel %vm812_vm7, %v799_v27, %v801_v36  ;;  %v818_v38 = vsel %vm812_vm7, %v801_v36, %v803_v35 }
 0x130   : > { %837 = vst [vmem:[#allocation2 + $0x5c0] sm:$0x7] %v817_v37  ;;  %838 = vst [vmem:[#allocation2 + $0x8] sm:$0x7] %v818_v38  ;;  %1213 = vrot.lane.b32.xlu1 %v1193_v31, %s8209_s11  ;;  %1211 = vrot.lane.b32.xlu0 %v1192_v32, %s8209_s11  ;;  %v1359_v31 = vrot.slane %v1352_v25, 3  ;;  %v1358_v32 = vrot.slane %v1340_v18, 3 }
 0x131   : > { %v1361_v38 = vrot.slane %v1353_v33, 3 }
 0x132   : > { %v807_v43 = vpop.permute.xlu1 %806  ;;  %v805_v44 = vpop.permute.xlu0 %804 }
 0x133   : > { %v819_v45 = vsel %vm812_vm7, %v803_v35, %v805_v44  ;;  %v820_v46 = vsel %vm812_vm7, %v805_v44, %v807_v43 }
 0x134   : > { %839 = vst [vmem:[#allocation2 + $0x908] sm:$0x7] %v819_v45  ;;  %840 = vst [vmem:[#allocation2 + $0x730] sm:$0x7] %v820_v46  ;;  %1286 = vrot.lane.b32.xlu1 %v1275_v39, %s8210_s14  ;;  %1215 = vrot.lane.b32.xlu0 %v1194_v40, %s8209_s11  ;;  %v1360_v39 = vrot.slane %v1341_v26, 3  ;;  %v1354_v40 = vcombine.high %v1342_v34, %v1342_v34 }
 0x136   : > { %v811_v51 = vpop.permute.xlu1 %810  ;;  %v809_v52 = vpop.permute.xlu0 %808  ;;  %v1363_v46 = vrot.slane %v1354_v40, 3 }
 0x137   : > { %v821_v53 = vsel %vm812_vm7, %v807_v43, %v809_v52  ;;  %v822_v54 = vsel %vm812_vm7, %v809_v52, %v811_v51  ;;  %vm1783_vm7 = vcmask 15360  }
 0x138   : > { %841 = vst [vmem:[#allocation2 + $0x618] sm:$0x7] %v821_v53  ;;  %842 = vst [vmem:[#allocation2 + $0xe0] sm:$0x7] %v822_v54  ;;  %1290 = vrot.lane.b32.xlu1 %v1277_v47, %s8210_s14  ;;  %1288 = vrot.lane.b32.xlu0 %v1276_v48, %s8210_s14  ;;  %v1362_v47 = vrot.slane %v1342_v34, 3  ;;  %v1355_v48 = vcombine.high %v1343_v41, %v1343_v41  ;;  %v1364_v54 = vrot.slane %v1343_v41, 3 }
 0x13a   : > { %v874_v59 = vpop.permute.xlu1 %873  ;;  %v872_v60 = vpop.permute.xlu0 %871  ;;  %v1365_v53 = vrot.slane %v1355_v48, 3 }
 0x13b   : > { %v894_v61 = vsel %vm893_vm8, %v872_v60, %v874_v59 }
 0x13c   : > { %914 = vst [vmem:[#allocation2 + $0x548] sm:$0x38] %v894_v61  ;;  %1294 = vrot.lane.b32.xlu1 %v1279_v55, %s8210_s14  ;;  %1292 = vrot.lane.b32.xlu0 %v1278_v56, %s8210_s14  ;;  %v1344_v55 = vld [vmem:[%s8297_s25 + $0x28] sm:$0x7]  ;;  %v1420_v61 = vld [vmem:[%s8297_s25] sm:$0x77] }
 0x13d   : > { %v1366_v60 = vrot.slane %v1344_v55, 3 }
 0x13e   : > { %v878_v2 = vpop.permute.xlu1 %877  ;;  %v876_v3 = vpop.permute.xlu0 %875 }
 0x13f   : > { %v895_v4 = vsel %vm893_vm8, %v874_v59, %v876_v3  ;;  %v896_v5 = vsel %vm893_vm8, %v876_v3, %v878_v2  ;;  %v1421_v3 = vld [vmem:[%s8297_s25 + $0x8] sm:$0x77] }
 0x140   : > { %915 = vst [vmem:[#allocation2 + $0x70] sm:$0x38] %v895_v4  ;;  %916 = vst [vmem:[#allocation2 + $0x78] sm:$0x38] %v896_v5  ;;  %1298 = vrot.lane.b32.xlu1 %v1281_v62, %s8210_s14  ;;  %1296 = vrot.lane.b32.xlu0 %v1280_v63, %s8210_s14  ;;  %v1433_v8 = vcombine.high %v1421_v3, %v1421_v3 }
 0x142   : > { %v882_v11 = vpop.permute.xlu1 %881  ;;  %v880_v12 = vpop.permute.xlu0 %879 }
 0x143   : > { %v897_v13 = vsel %vm893_vm8, %v878_v2, %v880_v12  ;;  %v898_v14 = vsel %vm893_vm8, %v880_v12, %v882_v11  ;;  %v1432_v2 = vcombine.high %v1420_v61, %v1420_v61 }
 0x144   : > { %917 = vst [vmem:[#allocation2 + $0x6f8] sm:$0x38] %v897_v13  ;;  %918 = vst [vmem:[#allocation2 + $0x5c0] sm:$0x38] %v898_v14  ;;  %1302 = vrot.lane.b32.xlu1 %v1283_v6, %s8210_s14  ;;  %1300 = vrot.lane.b32.xlu0 %v1282_v7, %s8210_s14  ;;  %v1434_v13 = vcombine.high %v1422_v9, %v1422_v9  ;;  %v1423_v14 = vld [vmem:[%s8297_s25 + $0x18] sm:$0x77] }
 0x146   : > { %v886_v19 = vpop.permute.xlu1 %885  ;;  %v884_v20 = vpop.permute.xlu0 %883 }
 0x147   : > { %v899_v21 = vsel %vm893_vm8, %v882_v11, %v884_v20  ;;  %v900_v22 = vsel %vm893_vm8, %v884_v20, %v886_v19  ;;  %v1424_v20 = vld [vmem:[%s8297_s25 + $0x20] sm:$0x77] }
 0x148   : > { %919 = vst [vmem:[#allocation2 + $0x8] sm:$0x38] %v899_v21  ;;  %920 = vst [vmem:[#allocation2 + $0x908] sm:$0x38] %v900_v22  ;;  %1306 = vrot.lane.b32.xlu1 %v1285_v15, %s8210_s14  ;;  %1304 = vrot.lane.b32.xlu0 %v1284_v16, %s8210_s14  ;;  %v1490_v21 = vld [vmem:[%s8297_s25] sm:$0x77]  ;;  %v1436_v26 = vcombine.high %v1424_v20, %v1424_v20 }
 0x149   : > { %s8229_s14 = smov 71  }
 0x14a   : > { %v890_v27 = vpop.permute.xlu1 %889  ;;  %v888_v28 = vpop.permute.xlu0 %887 }
 0x14b   : > { %v901_v29 = vsel %vm893_vm8, %v886_v19, %v888_v28  ;;  %v902_v30 = vsel %vm893_vm8, %v888_v28, %v890_v27  ;;  %v1435_v19 = vcombine.high %v1423_v14, %v1423_v14  ;;  %v1425_v28 = vld [vmem:[%s8297_s25 + $0x28] sm:$0x7] }
 0x14c   : > { %921 = vst [vmem:[#allocation2 + $0x730] sm:$0x38] %v901_v29  ;;  %922 = vst [vmem:[#allocation2 + $0x618] sm:$0x38] %v902_v30  ;;  %1369 = vrot.lane.b32.xlu1 %v1357_v23, %s8211_s17  ;;  %1367 = vrot.lane.b32.xlu0 %v1356_v24, %s8211_s17  ;;  %v1491_v29 = vld [vmem:[%s8297_s25 + $0x8] sm:$0x77] }
 0x14e   : > { %v953_v35 = vpop.permute.xlu1 %952  ;;  %v892_v36 = vpop.permute.xlu0 %891 }
 0x14f   : > { %v903_v37 = vsel %vm893_vm8, %v890_v27, %v892_v36  ;;  %v1502_v27 = vcombine.high %v1490_v21, %v1490_v21  ;;  %v1503_v36 = vcombine.high %v1491_v29, %v1491_v29 }
 0x150   : > { %923 = vst [vmem:[#allocation2 + $0xe0] sm:$0x38] %v903_v37  ;;  %1373 = vrot.lane.b32.xlu1 %v1359_v31, %s8211_s17  ;;  %1371 = vrot.lane.b32.xlu0 %v1358_v32, %s8211_s17  ;;  %v1492_v37 = vld [vmem:[%s8297_s25 + $0x10] sm:$0x77] }
 0x151   : > { %v1508_v34 = vrot.slane %v1502_v27, 5  ;;  %v1574_v27 = vld [vmem:[%s8297_s25 + $0x18] sm:$0x77] }
 0x152   : > { %v957_v42 = vpop.permute.xlu1 %956  ;;  %v955_v43 = vpop.permute.xlu0 %954 }
 0x153   : > { %v975_v44 = vsel %vm974_vm9, %v953_v35, %v955_v43  ;;  %v976_v45 = vsel %vm974_vm9, %v955_v43, %v957_v42  ;;  %v1507_v35 = vrot.slane %v1490_v21, 5  ;;  %v1509_v43 = vrot.slane %v1491_v29, 5 }
 0x154   : > { %995 = vst [vmem:[#allocation2 + $0x80] ss:$1228 sps:$4 sm:$0xc1] %v975_v44   ;;  %996 = vst [vmem:[#allocation2 + $0x3a0] ss:$-812 sps:$4 sm:$0xc1] %v976_v45   ;;  %1377 = vrot.lane.b32.xlu1 %v1361_v38, %s8211_s17  ;;  %1375 = vrot.lane.b32.xlu0 %v1360_v39, %s8211_s17  ;;  %v1504_v44 = vcombine.high %v1492_v37, %v1492_v37 }
 0x155   : > { %v1493_v45 = vld [vmem:[%s8297_s25 + $0x18] sm:$0x77] }
 0x156   : > { %v961_v49 = vpop.permute.xlu1 %960  ;;  %v959_v50 = vpop.permute.xlu0 %958 }
 0x157   : > { %v977_v51 = vsel %vm974_vm9, %v957_v42, %v959_v50  ;;  %v978_v52 = vsel %vm974_vm9, %v959_v50, %v961_v49  ;;  %v1510_v42 = vrot.slane %v1503_v36, 5  ;;  %v1511_v50 = vrot.slane %v1492_v37, 5 }
 0x158   : > { %997 = vst [vmem:[#allocation2 + $0xb0] ss:$-52 sps:$4 sm:$0xc1] %v977_v51   ;;  %998 = vst [vmem:[#allocation2 + $0x5f8] ss:$260 sps:$4 sm:$0xc1] %v978_v52   ;;  %1381 = vrot.lane.b32.xlu1 %v1363_v46, %s8211_s17  ;;  %1379 = vrot.lane.b32.xlu0 %v1362_v47, %s8211_s17  ;;  %v1505_v51 = vcombine.high %v1493_v45, %v1493_v45 }
 0x159   : > { %v1494_v52 = vld [vmem:[%s8297_s25 + $0x20] sm:$0x77] }
 0x15a   : > { %v965_v56 = vpop.permute.xlu1 %964  ;;  %v963_v57 = vpop.permute.xlu0 %962 }
 0x15b   : > { %v979_v58 = vsel %vm974_vm9, %v961_v49, %v963_v57  ;;  %v980_v59 = vsel %vm974_vm9, %v963_v57, %v965_v56  ;;  %v1512_v49 = vrot.slane %v1504_v44, 5  ;;  %v1514_v57 = vrot.slane %v1505_v51, 5  ;;  %v1663_v51 = vld [vmem:[%s8297_s25 + $0x8] sm:$0x77] }
 0x15c   : > { %999 = vst [vmem:[#allocation2 + $0x550] ss:$116 sps:$4 sm:$0xc1] %v979_v58   ;;  %1000 = vst [vmem:[#allocation2 + $0x5c8] ss:$-1468 sps:$4 sm:$0xc1] %v980_v59   ;;  %1385 = vrot.lane.b32.xlu1 %v1365_v53, %s8211_s17  ;;  %1383 = vrot.lane.b32.xlu0 %v1364_v54, %s8211_s17  ;;  %v1506_v59 = vcombine.high %v1494_v52, %v1494_v52 }
 0x15d   : > { %v1513_v58 = vrot.slane %v1493_v45, 5 }
 0x15e   : > { %v969_v62 = vpop.permute.xlu1 %968  ;;  %v967_v63 = vpop.permute.xlu0 %966 }
 0x15f   : > { %v981_v0 = vsel %vm974_vm9, %v965_v56, %v967_v63  ;;  %v982_v1 = vsel %vm974_vm9, %v967_v63, %v969_v62 }
 0x160   : > { %1001 = vst [vmem:[#allocation2 + $0x220] ss:$1772 sps:$4 sm:$0xc1] %v981_v0   ;;  %1002 = vst [vmem:[#allocation2 + $0x928] ss:$-500 sps:$4 sm:$0xc1] %v982_v1   ;;  %1437 = vrot.lane.b32.xlu1 %v1420_v61, %s8212_s18  ;;  %1387 = vrot.lane.b32.xlu0 %v1366_v60, %s8211_s17 }
 0x161   : > { %v1516_v0 = vrot.slane %v1506_v59, 5  ;;  %v1515_v1 = vrot.slane %v1494_v52, 5  ;;  %v1664_v59 = vld [vmem:[%s8297_s25 + $0x10] sm:$0x77]  ;;  %s8230_s17 = smov 12  }
 0x162   : > { %v973_v4 = vpop.permute.xlu1 %972  ;;  %v971_v5 = vpop.permute.xlu0 %970 }
 0x163   : > { %v983_v6 = vsel %vm974_vm9, %v969_v62, %v971_v5  ;;  %v984_v7 = vsel %vm974_vm9, %v971_v5, %v973_v4 }
 0x164   : > { %1003 = vst [vmem:[#allocation2 + $0x688] ss:$-108 sps:$4 sm:$0xc1] %v983_v6   ;;  %1004 = vst [vmem:[#allocation2 + $0x790] ss:$-1708 sps:$4 sm:$0xc1] %v984_v7   ;;  %1441 = vrot.lane.b32.xlu1 %v1421_v3, %s8212_s18  ;;  %1439 = vrot.lane.b32.xlu0 %v1432_v2, %s8212_s18 }
 0x165   : > { %v1571_v2 = vld [vmem:[%s8297_s25] sm:$0x77]  ;;  %v1495_v3 = vld [vmem:[%s8297_s25 + $0x28] sm:$0x7] }
 0x166   : > { %v1046_v10 = vpop.permute.xlu1 %1045  ;;  %v1044_v11 = vpop.permute.xlu0 %1043 }
 0x167   : > { %v1066_v12 = vsel %vm1065_vm10, %v1044_v11, %v1046_v10  ;;  %v1572_v11 = vld [vmem:[%s8297_s25 + $0x8] sm:$0x77] }
 0x168   : > { %1086 = vst [vmem:[#allocation2 + $0x80] sm:$0xe] %v1066_v12  ;;  %1445 = vrot.lane.b32.xlu1 %v1422_v9, %s8212_s18  ;;  %1443 = vrot.lane.b32.xlu0 %v1433_v8, %s8212_s18  ;;  %v1588_v8 = vrot.slane %v1571_v2, 2  ;;  %v1517_v9 = vrot.slane %v1495_v3, 5  ;;  %v1665_v3 = vld [vmem:[%s8297_s25 + $0x18] sm:$0x77] }
 0x16a   : > { %v1050_v15 = vpop.permute.xlu1 %1049  ;;  %v1048_v16 = vpop.permute.xlu0 %1047 }
 0x16b   : > { %v1067_v17 = vsel %vm1065_vm10, %v1046_v10, %v1048_v16  ;;  %v1068_v18 = vsel %vm1065_vm10, %v1048_v16, %v1050_v15  ;;  %v1583_v10 = vcombine.high %v1571_v2, %v1571_v2  ;;  %v1590_v16 = vrot.slane %v1572_v11, 2 }
 0x16c   : > { %1087 = vst [vmem:[#allocation2 + $0x3a0] sm:$0xe] %v1067_v17  ;;  %1088 = vst [vmem:[#allocation2 + $0xb0] sm:$0xe] %v1068_v18  ;;  %1449 = vrot.lane.b32.xlu1 %v1423_v14, %s8212_s18  ;;  %1447 = vrot.lane.b32.xlu0 %v1434_v13, %s8212_s18  ;;  %v1584_v18 = vcombine.high %v1572_v11, %v1572_v11  ;;  %v1676_v2 = vcombine.high %v1664_v59, %v1664_v59 }
 0x16d   : > { %v1589_v17 = vrot.slane %v1583_v10, 2  ;;  %v1666_v10 = vld [vmem:[%s8297_s25 + $0x20] sm:$0x77] }
 0x16e   : > { %v1054_v22 = vpop.permute.xlu1 %1053  ;;  %v1052_v23 = vpop.permute.xlu0 %1051 }
 0x16f   : > { %v1069_v24 = vsel %vm1065_vm10, %v1050_v15, %v1052_v23  ;;  %v1070_v25 = vsel %vm1065_vm10, %v1052_v23, %v1054_v22 }
 0x170   : > { %1089 = vst [vmem:[#allocation2 + $0x5f8] sm:$0xe] %v1069_v24  ;;  %1090 = vst [vmem:[#allocation2 + $0x550] sm:$0xe] %v1070_v25  ;;  %1453 = vrot.lane.b32.xlu1 %v1424_v20, %s8212_s18  ;;  %1451 = vrot.lane.b32.xlu0 %v1435_v19, %s8212_s18  ;;  %v1573_v19 = vld [vmem:[%s8297_s25 + $0x10] sm:$0x77] }
 0x171   : > { %v1592_v24 = vrot.slane %v1573_v19, 2  ;;  %v1591_v25 = vrot.slane %v1584_v18, 2 }
 0x172   : > { %v1058_v30 = vpop.permute.xlu1 %1057  ;;  %v1056_v31 = vpop.permute.xlu0 %1055 }
 0x173   : > { %v1071_v32 = vsel %vm1065_vm10, %v1054_v22, %v1056_v31  ;;  %v1072_v33 = vsel %vm1065_vm10, %v1056_v31, %v1058_v30  ;;  %v1594_v31 = vrot.slane %v1574_v27, 2 }
 0x174   : > { %1091 = vst [vmem:[#allocation2 + $0x5c8] sm:$0xe] %v1071_v32  ;;  %1092 = vst [vmem:[#allocation2 + $0x220] sm:$0xe] %v1072_v33  ;;  %1457 = vrot.lane.b32.xlu1 %v1425_v28, %s8212_s18  ;;  %1455 = vrot.lane.b32.xlu0 %v1436_v26, %s8212_s18  ;;  %v1585_v26 = vcombine.high %v1573_v19, %v1573_v19  ;;  %v1586_v33 = vcombine.high %v1574_v27, %v1574_v27  ;;  %s8232_s18 = smov 10  }
 0x176   : > { %v1062_v38 = vpop.permute.xlu1 %1061  ;;  %v1060_v39 = vpop.permute.xlu0 %1059  ;;  %v1593_v32 = vrot.slane %v1585_v26, 2 }
 0x177   : > { %v1073_v40 = vsel %vm1065_vm10, %v1058_v30, %v1060_v39  ;;  %v1074_v41 = vsel %vm1065_vm10, %v1060_v39, %v1062_v38 }
 0x178   : > { %1093 = vst [vmem:[#allocation2 + $0x928] sm:$0xe] %v1073_v40  ;;  %1094 = vst [vmem:[#allocation2 + $0x688] sm:$0xe] %v1074_v41  ;;  %1520 = vrot.lane.b32.xlu1 %v1508_v34, %s8213_s21  ;;  %1518 = vrot.lane.b32.xlu0 %v1507_v35, %s8213_s21  ;;  %v1575_v34 = vld [vmem:[%s8297_s25 + $0x20] sm:$0x77] }
 0x179   : > { %v1596_v39 = vrot.slane %v1575_v34, 2  ;;  %v1595_v40 = vrot.slane %v1586_v33, 2  ;;  %v1587_v41 = vcombine.high %v1575_v34, %v1575_v34 }
 0x17a   : > { %v1115_v46 = vpop.permute.xlu1 %1114  ;;  %v1064_v47 = vpop.permute.xlu0 %1063 }
 0x17b   : > { %v1075_v48 = vsel %vm1065_vm10, %v1062_v38, %v1064_v47 }
 0x17c   : > { %1095 = vst [vmem:[#allocation2 + $0x790] sm:$0xe] %v1075_v48  ;;  %1524 = vrot.lane.b32.xlu1 %v1510_v42, %s8213_s21  ;;  %1522 = vrot.lane.b32.xlu0 %v1509_v43, %s8213_s21  ;;  %v1576_v42 = vld [vmem:[%s8297_s25 + $0x28] sm:$0x7]  ;;  %v1662_v43 = vld [vmem:[%s8297_s25] sm:$0x77] }
 0x17d   : > { %v1598_v48 = vrot.slane %v1576_v42, 2 }
 0x17e   : > { %v1119_v53 = vpop.permute.xlu1 %1118  ;;  %v1117_v54 = vpop.permute.xlu0 %1116 }
 0x17f   : > { %v1137_v55 = vsel %vm1136_vm11, %v1115_v46, %v1117_v54  ;;  %v1138_v56 = vsel %vm1136_vm11, %v1117_v54, %v1119_v53 }
 0x180   : > { %1157 = vst [vmem:[#allocation2 + $0x80] sm:$0x70] %v1137_v55  ;;  %1158 = vst [vmem:[#allocation2 + $0x3a0] sm:$0x70] %v1138_v56  ;;  %1528 = vrot.lane.b32.xlu1 %v1512_v49, %s8213_s21  ;;  %1526 = vrot.lane.b32.xlu0 %v1511_v50, %s8213_s21  ;;  %v1597_v49 = vrot.slane %v1587_v41, 2  ;;  %v1674_v50 = vcombine.high %v1662_v43, %v1662_v43 }
 0x182   : > { %v1123_v60 = vpop.permute.xlu1 %1122  ;;  %v1121_v61 = vpop.permute.xlu0 %1120  ;;  %v1680_v56 = vrot.slane %v1674_v50, 7 }
 0x183   : > { %v1139_v62 = vsel %vm1136_vm11, %v1119_v53, %v1121_v61  ;;  %v1140_v63 = vsel %vm1136_vm11, %v1121_v61, %v1123_v60 }
 0x184   : > { %1159 = vst [vmem:[#allocation2 + $0xb0] sm:$0x70] %v1139_v62  ;;  %1160 = vst [vmem:[#allocation2 + $0x5f8] sm:$0x70] %v1140_v63  ;;  %1532 = vrot.lane.b32.xlu1 %v1514_v57, %s8213_s21  ;;  %1530 = vrot.lane.b32.xlu0 %v1513_v58, %s8213_s21  ;;  %v1679_v57 = vrot.slane %v1662_v43, 7  ;;  %v1675_v58 = vcombine.high %v1663_v51, %v1663_v51 }
 0x186   : > { %v1127_v4 = vpop.permute.xlu1 %1126  ;;  %v1125_v5 = vpop.permute.xlu0 %1124 }
 0x187   : > { %v1141_v6 = vsel %vm1136_vm11, %v1123_v60, %v1125_v5  ;;  %v1142_v7 = vsel %vm1136_vm11, %v1125_v5, %v1127_v4 }
 0x188   : > { %1161 = vst [vmem:[#allocation2 + $0x550] sm:$0x70] %v1141_v6  ;;  %1162 = vst [vmem:[#allocation2 + $0x5c8] sm:$0x70] %v1142_v7  ;;  %1536 = vrot.lane.b32.xlu1 %v1516_v0, %s8213_s21  ;;  %1534 = vrot.lane.b32.xlu0 %v1515_v1, %s8213_s21  ;;  %v1682_v0 = vrot.slane %v1675_v58, 7  ;;  %v1681_v1 = vrot.slane %v1663_v51, 7 }
 0x189   : > { %v1684_v7 = vrot.slane %v1676_v2, 7 }
 0x18a   : > { %v1131_v12 = vpop.permute.xlu1 %1130  ;;  %v1129_v13 = vpop.permute.xlu0 %1128 }
 0x18b   : > { %v1143_v14 = vsel %vm1136_vm11, %v1127_v4, %v1129_v13  ;;  %v1144_v15 = vsel %vm1136_vm11, %v1129_v13, %v1131_v12 }
 0x18c   : > { %1163 = vst [vmem:[#allocation2 + $0x220] sm:$0x70] %v1143_v14  ;;  %1164 = vst [vmem:[#allocation2 + $0x928] sm:$0x70] %v1144_v15  ;;  %1599 = vrot.lane.b32.xlu1 %v1588_v8, %s10944_s22  ;;  %1538 = vrot.lane.b32.xlu0 %v1517_v9, %s8213_s21  ;;  %v1683_v8 = vrot.slane %v1664_v59, 7  ;;  %v1677_v9 = vcombine.high %v1665_v3, %v1665_v3  ;;  %s8233_s21 = smov 9  }
 0x18e   : > { %v1135_v20 = vpop.permute.xlu1 %1134  ;;  %v1133_v21 = vpop.permute.xlu0 %1132  ;;  %v1686_v15 = vrot.slane %v1677_v9, 7 }
 0x18f   : > { %v1145_v22 = vsel %vm1136_vm11, %v1131_v12, %v1133_v21  ;;  %v1146_v23 = vsel %vm1136_vm11, %v1133_v21, %v1135_v20 }
 0x190   : > { %1165 = vst [vmem:[#allocation2 + $0x688] sm:$0x70] %v1145_v22  ;;  %1166 = vst [vmem:[#allocation2 + $0x790] sm:$0x70] %v1146_v23  ;;  %1603 = vrot.lane.b32.xlu1 %v1590_v16, %s10944_s22  ;;  %1601 = vrot.lane.b32.xlu0 %v1589_v17, %s10944_s22  ;;  %v1685_v16 = vrot.slane %v1665_v3, 7  ;;  %v1678_v17 = vcombine.high %v1666_v10, %v1666_v10  ;;  %v1687_v23 = vrot.slane %v1666_v10, 7 }
 0x192   : > { %v1198_v28 = vpop.permute.xlu1 %1197  ;;  %v1196_v29 = vpop.permute.xlu0 %1195  ;;  %v1688_v22 = vrot.slane %v1678_v17, 7 }
 0x193   : > { %v1218_v30 = vsel %vm1217_vm12, %v1196_v29, %v1198_v28 }
 0x194   : > { %1238 = vst [vmem:[#allocation2 + $0x530] ss:$-1196 sps:$4 sm:$0x83] %v1218_v30   ;;  %1607 = vrot.lane.b32.xlu1 %v1592_v24, %s10944_s22  ;;  %1605 = vrot.lane.b32.xlu0 %v1591_v25, %s10944_s22  ;;  %v1743_v24 = vld [vmem:[%s8297_s25] sm:$0x77] }
 0x195   : > { %v1667_v25 = vld [vmem:[%s8297_s25 + $0x28] sm:$0x7]  ;;  %v1755_v30 = vcombine.low %v1743_v24, %v1743_v24 }
 0x196   : > { %v1202_v35 = vpop.permute.xlu1 %1201  ;;  %v1200_v36 = vpop.permute.xlu0 %1199 }
 0x197   : > { %v1219_v37 = vsel %vm1217_vm12, %v1198_v28, %v1200_v36  ;;  %v1220_v38 = vsel %vm1217_vm12, %v1200_v36, %v1202_v35 }
 0x198   : > { %1239 = vst [vmem:[#allocation2 + $0x670] ss:$-716 sps:$4 sm:$0x83] %v1219_v37   ;;  %1240 = vst [vmem:[#allocation2 + $0x888] ss:$-2004 sps:$4 sm:$0x83] %v1220_v38   ;;  %1611 = vrot.lane.b32.xlu1 %v1594_v31, %s10944_s22  ;;  %1609 = vrot.lane.b32.xlu0 %v1593_v32, %s10944_s22 }
 0x199   : > { %v1689_v31 = vrot.slane %v1667_v25, 7  ;;  %v1744_v32 = vld [vmem:[%s8297_s25 + $0x8] sm:$0x77]  ;;  %v1745_v38 = vld [vmem:[%s8297_s25 + $0x10] sm:$0x77] }
 0x19a   : > { %v1206_v44 = vpop.permute.xlu1 %1205  ;;  %v1204_v45 = vpop.permute.xlu0 %1203  ;;  %v1756_v37 = vcombine.low %v1744_v32, %v1744_v32  ;;  %v1757_v43 = vcombine.low %v1745_v38, %v1745_v38 }
 0x19b   : > { %v1221_v46 = vsel %vm1217_vm12, %v1202_v35, %v1204_v45  ;;  %v1222_v47 = vsel %vm1217_vm12, %v1204_v45, %v1206_v44 }
 0x19c   : > { %1241 = vst [vmem:[#allocation2 + $0x7c0] ss:$-452 sps:$4 sm:$0x83] %v1221_v46   ;;  %1242 = vst [vmem:[#allocation2 + $0x718] ss:$-452 sps:$4 sm:$0x83] %v1222_v47   ;;  %1615 = vrot.lane.b32.xlu1 %v1596_v39, %s10944_s22  ;;  %1613 = vrot.lane.b32.xlu0 %v1595_v40, %s10944_s22 }
 0x19e   : > { %v1210_v52 = vpop.permute.xlu1 %1209  ;;  %v1208_v53 = vpop.permute.xlu0 %1207 }
 0x19f   : > { %v1223_v54 = vsel %vm1217_vm12, %v1206_v44, %v1208_v53  ;;  %v1224_v55 = vsel %vm1217_vm12, %v1208_v53, %v1210_v52  ;;  %v1746_v44 = vld [vmem:[%s8297_s25 + $0x18] sm:$0x77] }
 0x1a0   : > { %1243 = vst [vmem:[#allocation2 + $0x130] ss:$1180 sps:$4 sm:$0x83] %v1223_v54   ;;  %1244 = vst [vmem:[#allocation2 + $0x1a8] ss:$124 sps:$4 sm:$0x83] %v1224_v55   ;;  %1619 = vrot.lane.b32.xlu1 %v1598_v48, %s10944_s22  ;;  %1617 = vrot.lane.b32.xlu0 %v1597_v49, %s10944_s22  ;;  %v1758_v48 = vcombine.low %v1746_v44, %v1746_v44 }
 0x1a1   : > { %v1747_v49 = vld [vmem:[%s8297_s25 + $0x20] sm:$0x77] }
 0x1a2   : > { %v1214_v60 = vpop.permute.xlu1 %1213  ;;  %v1212_v61 = vpop.permute.xlu0 %1211  ;;  %v1759_v54 = vcombine.low %v1747_v49, %v1747_v49  ;;  %v1814_v55 = vld [vmem:[%s8297_s25] sm:$0x77] }
 0x1a3   : > { %v1225_v62 = vsel %vm1217_vm12, %v1210_v52, %v1212_v61  ;;  %v1226_v63 = vsel %vm1217_vm12, %v1212_v61, %v1214_v60  ;;  %v1826_v61 = vcombine.high %v1814_v55, %v1814_v55 }
 0x1a4   : > { %1245 = vst [vmem:[#allocation2 + $0x2e0] ss:$1612 sps:$4 sm:$0x83] %v1225_v62   ;;  %1246 = vst [vmem:[#allocation2 + $0x368] ss:$804 sps:$4 sm:$0x83] %v1226_v63   ;;  %1692 = vrot.lane.b32.xlu1 %v1680_v56, %s8215_s23  ;;  %1690 = vrot.lane.b32.xlu0 %v1679_v57, %s8215_s23 }
 0x1a5   : > { %v1815_v62 = vld [vmem:[%s8297_s25 + $0x8] sm:$0x77]  ;;  %v1832_v3 = vrot.slane %v1826_v61, 1 }
 0x1a6   : > { %v1287_v4 = vpop.permute.xlu1 %1286  ;;  %v1216_v5 = vpop.permute.xlu0 %1215 }
 0x1a7   : > { %v1227_v6 = vsel %vm1217_vm12, %v1214_v60, %v1216_v5  ;;  %v7788_v60 = vld [vmem:[%s8297_s25 + $0x28] ss:$0 sps:$4 sm:$0x77]   ;;  %v1827_v5 = vcombine.high %v1815_v62, %v1815_v62 }
 0x1a8   : > { %1247 = vst [vmem:[#allocation2 + $0x748] ss:$76 sps:$4 sm:$0x83] %v1227_v6   ;;  %1696 = vrot.lane.b32.xlu1 %v1682_v0, %s8215_s23  ;;  %1694 = vrot.lane.b32.xlu0 %v1681_v1, %s8215_s23  ;;  %v1816_v6 = vld [vmem:[%s8297_s25 + $0x10] sm:$0x77] }
 0x1aa   : > { %v1291_v11 = vpop.permute.xlu1 %1290  ;;  %v1289_v12 = vpop.permute.xlu0 %1288 }
 0x1ab   : > { %v1309_v13 = vsel %vm1308_vm13, %v1287_v4, %v1289_v12  ;;  %v1310_v14 = vsel %vm1308_vm13, %v1289_v12, %v1291_v11  ;;  %v1831_v4 = vrot.slane %v1814_v55, 1  ;;  %v1833_v12 = vrot.slane %v1815_v62, 1 }
 0x1ac   : > { %1329 = vst [vmem:[#allocation2 + $0x530] sm:$0x1c] %v1309_v13  ;;  %1330 = vst [vmem:[#allocation2 + $0x670] sm:$0x1c] %v1310_v14  ;;  %1700 = vrot.lane.b32.xlu1 %v1684_v7, %s8215_s23  ;;  %1698 = vrot.lane.b32.xlu0 %v1683_v8, %s8215_s23  ;;  %v1828_v13 = vcombine.high %v1816_v6, %v1816_v6  ;;  %v1817_v14 = vld [vmem:[%s8297_s25 + $0x18] sm:$0x77] }
 0x1ae   : > { %v1295_v18 = vpop.permute.xlu1 %1294  ;;  %v1293_v19 = vpop.permute.xlu0 %1292 }
 0x1af   : > { %v1311_v20 = vsel %vm1308_vm13, %v1291_v11, %v1293_v19  ;;  %v1312_v21 = vsel %vm1308_vm13, %v1293_v19, %v1295_v18  ;;  %v1834_v11 = vrot.slane %v1827_v5, 1  ;;  %v1835_v19 = vrot.slane %v1816_v6, 1 }
 0x1b0   : > { %1331 = vst [vmem:[#allocation2 + $0x888] sm:$0x1c] %v1311_v20  ;;  %1332 = vst [vmem:[#allocation2 + $0x7c0] sm:$0x1c] %v1312_v21  ;;  %1704 = vrot.lane.b32.xlu1 %v1686_v15, %s8215_s23  ;;  %1702 = vrot.lane.b32.xlu0 %v1685_v16, %s8215_s23  ;;  %v1829_v20 = vcombine.high %v1817_v14, %v1817_v14  ;;  %v1818_v21 = vld [vmem:[%s8297_s25 + $0x20] sm:$0x77] }
 0x1b2   : > { %v1299_v26 = vpop.permute.xlu1 %1298  ;;  %v1297_v27 = vpop.permute.xlu0 %1296 }
 0x1b3   : > { %v1313_v28 = vsel %vm1308_vm13, %v1295_v18, %v1297_v27  ;;  %v1314_v29 = vsel %vm1308_vm13, %v1297_v27, %v1299_v26  ;;  %v1836_v18 = vrot.slane %v1828_v13, 1  ;;  %v1837_v27 = vrot.slane %v1817_v14, 1 }
 0x1b4   : > { %1333 = vst [vmem:[#allocation2 + $0x718] sm:$0x1c] %v1313_v28  ;;  %1334 = vst [vmem:[#allocation2 + $0x130] sm:$0x1c] %v1314_v29  ;;  %1708 = vrot.lane.b32.xlu1 %v1688_v22, %s8215_s23  ;;  %1706 = vrot.lane.b32.xlu0 %v1687_v23, %s8215_s23  ;;  %v1830_v28 = vcombine.high %v1818_v21, %v1818_v21 }
 0x1b6   : > { %v1303_v33 = vpop.permute.xlu1 %1302  ;;  %v1301_v34 = vpop.permute.xlu0 %1300 }
 0x1b7   : > { %v1315_v35 = vsel %vm1308_vm13, %v1299_v26, %v1301_v34  ;;  %v1316_v36 = vsel %vm1308_vm13, %v1301_v34, %v1303_v33  ;;  %v1838_v26 = vrot.slane %v1829_v20, 1  ;;  %v1840_v34 = vrot.slane %v1830_v28, 1  ;;  %v1955_v20 = vld [vmem:[%s8297_s25 + $0x2c] sm:$0x7] }
 0x1b8   : > { %1335 = vst [vmem:[#allocation2 + $0x1a8] sm:$0x1c] %v1315_v35  ;;  %1336 = vst [vmem:[#allocation2 + $0x2e0] sm:$0x1c] %v1316_v36  ;;  %1761 = vrot.lane.b32.xlu1 %v1755_v30, %s8216_s24  ;;  %1710 = vrot.lane.b32.xlu0 %v1689_v31, %s8215_s23  ;;  %v1839_v35 = vrot.slane %v1818_v21, 1 }
 0x1ba   : > { %v1307_v39 = vpop.permute.xlu1 %1306  ;;  %v1305_v40 = vpop.permute.xlu0 %1304 }
 0x1bb   : > { %v1317_v41 = vsel %vm1308_vm13, %v1303_v33, %v1305_v40  ;;  %v1318_v42 = vsel %vm1308_vm13, %v1305_v40, %v1307_v39  ;;  %v1905_v33 = vld [vmem:[%s8297_s25 + $0x4] sm:$0x77]  ;;  %vm1864_vm13 = vcmask 7168  }
 0x1bc   : > { %1337 = vst [vmem:[#allocation2 + $0x368] sm:$0x1c] %v1317_v41  ;;  %1338 = vst [vmem:[#allocation2 + $0x748] sm:$0x1c] %v1318_v42  ;;  %1765 = vrot.lane.b32.xlu1 %v1756_v37, %s8216_s24  ;;  %1763 = vrot.lane.b32.xlu0 %v1743_v24, %s8216_s24  ;;  %v1915_v36 = vcombine.high %v1905_v33, %v1905_v33  ;;  %v1950_v37 = vld [vmem:[%s8297_s25 + $0x4] sm:$0x77] }
 0x1bd   : > { %v1920_v42 = vrot.slane %v1905_v33, 6 }
 0x1be   : > { %v1370_v45 = vpop.permute.xlu1 %1369  ;;  %v1368_v46 = vpop.permute.xlu0 %1367  ;;  %v1921_v41 = vrot.slane %v1915_v36, 6 }
 0x1bf   : > { %v1390_v47 = vsel %vm1389_vm14, %v1368_v46, %v1370_v45  ;;  %1940 = vst [vmem:[#allocation2 + $0x230] sm:$0x1c] %v1920_v42 }
 0x1c0   : > { %1410 = vst [vmem:[#allocation2 + $0x530] sm:$0xe0] %v1390_v47  ;;  %1769 = vrot.lane.b32.xlu1 %v1757_v43, %s8216_s24  ;;  %1767 = vrot.lane.b32.xlu0 %v1744_v32, %s8216_s24  ;;  %v1962_v47 = vcombine.high %v1950_v37, %v1950_v37  ;;  %1941 = vst [vmem:[#allocation2 + $0x420] sm:$0x1c] %v1921_v41 }
 0x1c2   : > { %v1374_v50 = vpop.permute.xlu1 %1373  ;;  %v1372_v51 = vpop.permute.xlu0 %1371 }
 0x1c3   : > { %v1391_v52 = vsel %vm1389_vm14, %v1370_v45, %v1372_v51  ;;  %v1392_v53 = vsel %vm1389_vm14, %v1372_v51, %v1374_v50  ;;  %v1967_v45 = vrot.slane %v1950_v37, 3 }
 0x1c4   : > { %1411 = vst [vmem:[#allocation2 + $0x670] sm:$0xe0] %v1391_v52  ;;  %1412 = vst [vmem:[#allocation2 + $0x888] sm:$0xe0] %v1392_v53  ;;  %1773 = vrot.lane.b32.xlu1 %v1758_v48, %s8216_s24  ;;  %1771 = vrot.lane.b32.xlu0 %v1745_v38, %s8216_s24  ;;  %v1819_v38 = vld [vmem:[%s8297_s25 + $0x28] sm:$0x7] }
 0x1c5   : > { %v1841_v46 = vrot.slane %v1819_v38, 1  ;;  %v1906_v48 = vld [vmem:[%s8297_s25 + $0xc] sm:$0x77] }
 0x1c6   : > { %v1378_v56 = vpop.permute.xlu1 %1377  ;;  %v1376_v57 = vpop.permute.xlu0 %1375 }
 0x1c7   : > { %v1393_v58 = vsel %vm1389_vm14, %v1374_v50, %v1376_v57  ;;  %v1394_v59 = vsel %vm1389_vm14, %v1376_v57, %v1378_v56  ;;  %v1916_v50 = vcombine.high %v1906_v48, %v1906_v48 }
 0x1c8   : > { %1413 = vst [vmem:[#allocation2 + $0x7c0] sm:$0xe0] %v1393_v58  ;;  %1414 = vst [vmem:[#allocation2 + $0x718] sm:$0xe0] %v1394_v59  ;;  %1777 = vrot.lane.b32.xlu1 %v1759_v54, %s8216_s24  ;;  %1775 = vrot.lane.b32.xlu0 %v1746_v44, %s8216_s24  ;;  %v1968_v58 = vrot.slane %v1962_v47, 3 }
 0x1c9   : > { %v1923_v55 = vrot.slane %v1916_v50, 6  ;;  %v2032_v47 = vld [vmem:[%s8297_s25 + $0x14] sm:$0x77] }
 0x1ca   : > { %v1382_v63 = vpop.permute.xlu1 %1381  ;;  %v1380_v0 = vpop.permute.xlu0 %1379 }
 0x1cb   : > { %v1395_v1 = vsel %vm1389_vm14, %v1378_v56, %v1380_v0  ;;  %v1396_v2 = vsel %vm1389_vm14, %v1380_v0, %v1382_v63  ;;  %v1922_v56 = vrot.slane %v1906_v48, 6  ;;  %1943 = vst [vmem:[#allocation2 + $0x348] sm:$0x1c] %v1923_v55  ;;  %v2033_v55 = vld [vmem:[%s8297_s25 + $0x1c] sm:$0x77] }
 0x1cc   : > { %1415 = vst [vmem:[#allocation2 + $0x130] sm:$0xe0] %v1395_v1  ;;  %1416 = vst [vmem:[#allocation2 + $0x1a8] sm:$0xe0] %v1396_v2  ;;  %1781 = vrot.lane.b32.xlu1 %v7788_v60, %s8216_s24  ;;  %1779 = vrot.lane.b32.xlu0 %v1747_v49, %s8216_s24  ;;  %v1951_v49 = vld [vmem:[%s8297_s25 + $0xc] sm:$0x77] }
 0x1cd   : > { %v1969_v57 = vrot.slane %v1951_v49, 3  ;;  %v1963_v59 = vcombine.high %v1951_v49, %v1951_v49  ;;  %v1952_v60 = vld [vmem:[%s8297_s25 + $0x14] sm:$0x77]  ;;  %1942 = vst [vmem:[#allocation2 + $0x5d0] sm:$0x1c] %v1922_v56 }
 0x1ce   : > { %v1386_v7 = vpop.permute.xlu1 %1385  ;;  %v1384_v8 = vpop.permute.xlu0 %1383  ;;  %v1971_v1 = vrot.slane %v1952_v60, 3 }
 0x1cf   : > { %v1397_v9 = vsel %vm1389_vm14, %v1382_v63, %v1384_v8  ;;  %v1398_v10 = vsel %vm1389_vm14, %v1384_v8, %v1386_v7  ;;  %v1970_v2 = vrot.slane %v1963_v59, 3 }
 0x1d0   : > { %1417 = vst [vmem:[#allocation2 + $0x2e0] sm:$0xe0] %v1397_v9  ;;  %1418 = vst [vmem:[#allocation2 + $0x368] sm:$0xe0] %v1398_v10  ;;  %1844 = vrot.lane.b32.xlu1 %v1832_v3, %s8217_s30  ;;  %1842 = vrot.lane.b32.xlu0 %v1831_v4, %s8217_s30  ;;  %v1964_v3 = vcombine.high %v1952_v60, %v1952_v60  ;;  %v1953_v4 = vld [vmem:[%s8297_s25 + $0x1c] sm:$0x77]  ;;  %v2045_v60 = vcombine.high %v2033_v55, %v2033_v55 }
 0x1d1   : > { %v1973_v8 = vrot.slane %v1953_v4, 3  ;;  %v1965_v10 = vcombine.high %v1953_v4, %v1953_v4 }
 0x1d2   : > { %v1438_v15 = vpop.permute.xlu1 %1437  ;;  %v1388_v16 = vpop.permute.xlu0 %1387  ;;  %v1972_v9 = vrot.slane %v1964_v3, 3  ;;  %v2099_v3 = vld [vmem:[%s8297_s25 + $0x4] sm:$0x77] }
 0x1d3   : > { %v1399_v17 = vsel %vm1389_vm14, %v1386_v7, %v1388_v16  ;;  %vm3715_vm14 = vcmask 605184  }
 0x1d4   : > { %1419 = vst [vmem:[#allocation2 + $0x748] sm:$0xe0] %v1399_v17  ;;  %1848 = vrot.lane.b32.xlu1 %v1834_v11, %s8217_s30  ;;  %1846 = vrot.lane.b32.xlu0 %v1833_v12, %s8217_s30  ;;  %v1954_v11 = vld [vmem:[%s8297_s25 + $0x24] sm:$0x77]  ;;  %v1974_v17 = vrot.slane %v1965_v10, 3 }
 0x1d5   : > { %v1975_v16 = vrot.slane %v1954_v11, 3  ;;  %v2035_v10 = vld [vmem:[%s8297_s25 + $0x2c] sm:$0x7] }
 0x1d6   : > { %v1442_v22 = vpop.permute.xlu1 %1441  ;;  %v1440_v23 = vpop.permute.xlu0 %1439 }
 0x1d7   : > { %v1460_v24 = vsel %vm1459_vm15, %v1438_v15, %v1440_v23  ;;  %v1461_v25 = vsel %vm1459_vm15, %v1440_v23, %v1442_v22 }
 0x1d8   : > { %1480 = vst [vmem:[#allocation2 + $0x950] sm:$0x7] %v1460_v24  ;;  %1481 = vst [vmem:[#allocation2 + $0x7d0] sm:$0x7] %v1461_v25  ;;  %1852 = vrot.lane.b32.xlu1 %v1836_v18, %s8217_s30  ;;  %1850 = vrot.lane.b32.xlu0 %v1835_v19, %s8217_s30  ;;  %v1966_v18 = vcombine.high %v1954_v11, %v1954_v11  ;;  %v1907_v19 = vld [vmem:[%s8297_s25 + $0x14] sm:$0x77] }
 0x1d9   : > { %v1917_v21 = vcombine.high %v1907_v19, %v1907_v19  ;;  %v1924_v28 = vrot.slane %v1907_v19, 6  ;;  %v2100_v11 = vld [vmem:[%s8297_s25 + $0xc] sm:$0x77]  ;;  %v2101_v19 = vld [vmem:[%s8297_s25 + $0x14] sm:$0x77] }
 0x1da   : > { %v1446_v29 = vpop.permute.xlu1 %1445  ;;  %v1444_v30 = vpop.permute.xlu0 %1443 }
 0x1db   : > { %v1462_v31 = vsel %vm1459_vm15, %v1442_v22, %v1444_v30  ;;  %v1463_v32 = vsel %vm1459_vm15, %v1444_v30, %v1446_v29  ;;  %v1976_v30 = vrot.slane %v1966_v18, 3  ;;  %1944 = vst [vmem:[#allocation2 + $0x768] sm:$0x1c] %v1924_v28  ;;  %v2112_v18 = vcombine.high %v2100_v11, %v2100_v11 }
 0x1dc   : > { %1482 = vst [vmem:[#allocation2 + $0x158] sm:$0x7] %v1462_v31  ;;  %1483 = vst [vmem:[#allocation2 + $0x318] sm:$0x7] %v1463_v32  ;;  %1856 = vrot.lane.b32.xlu1 %v1838_v26, %s8217_s30  ;;  %1854 = vrot.lane.b32.xlu0 %v1837_v27, %s8217_s30  ;;  %v1908_v26 = vld [vmem:[%s8297_s25 + $0x1c] sm:$0x77] }
 0x1dd   : > { %v1925_v27 = vrot.slane %v1917_v21, 6  ;;  %v1918_v31 = vcombine.high %v1908_v26, %v1908_v26  ;;  %v2030_v32 = vld [vmem:[%s8297_s25 + $0x4] sm:$0x77]  ;;  %v1926_v36 = vrot.slane %v1908_v26, 6  ;;  %v2113_v26 = vcombine.high %v2101_v19, %v2101_v19 }
 0x1de   : > { %v1450_v39 = vpop.permute.xlu1 %1449  ;;  %v1448_v40 = vpop.permute.xlu0 %1447 }
 0x1df   : > { %v1464_v43 = vsel %vm1459_vm15, %v1446_v29, %v1448_v40  ;;  %v1465_v44 = vsel %vm1459_vm15, %v1448_v40, %v1450_v39  ;;  %v1977_v29 = vrot.slane %v1955_v20, 3  ;;  %1945 = vst [vmem:[#allocation2 + $0x3c0] sm:$0x1c] %v1925_v27  ;;  %1946 = vst [vmem:[#allocation2 + $0x938] sm:$0x1c] %v1926_v36 }
 0x1e0   : > { %1484 = vst [vmem:[#allocation2 + $0x538] sm:$0x7] %v1464_v43  ;;  %1485 = vst [vmem:[#allocation2 + $0xf8] sm:$0x7] %v1465_v44  ;;  %1860 = vrot.lane.b32.xlu1 %v1840_v34, %s8217_s30  ;;  %1858 = vrot.lane.b32.xlu0 %v1839_v35, %s8217_s30  ;;  %v1927_v35 = vrot.slane %v1918_v31, 6 }
 0x1e1   : > { %v2031_v40 = vld [vmem:[%s8297_s25 + $0xc] sm:$0x77]  ;;  %v2102_v27 = vld [vmem:[%s8297_s25 + $0x1c] sm:$0x77] }
 0x1e2   : > { %v1454_v51 = vpop.permute.xlu1 %1453  ;;  %v1452_v52 = vpop.permute.xlu0 %1451  ;;  %1947 = vst [vmem:[#allocation2 + $0x930] sm:$0x1c] %v1927_v35  ;;  %v2122_v31 = vrot.slane %v2102_v27, 5 }
 0x1e3   : > { %v1466_v53 = vsel %vm1459_vm15, %v1450_v39, %v1452_v52  ;;  %v1467_v54 = vsel %vm1459_vm15, %v1452_v52, %v1454_v51  ;;  %v2042_v39 = vcombine.high %v2030_v32, %v2030_v32 }
 0x1e4   : > { %1486 = vst [vmem:[#allocation2 + $0x5e0] sm:$0x7] %v1466_v53  ;;  %1487 = vst [vmem:[#allocation2 + $0x138] sm:$0x7] %v1467_v54  ;;  %1978 = vrot.lane.b32.xlu1 %v1967_v45, %s8197_s26  ;;  %1862 = vrot.lane.b32.xlu0 %v1841_v46, %s8217_s30  ;;  %v2043_v45 = vcombine.high %v2031_v40, %v2031_v40  ;;  %v1909_v46 = vld [vmem:[%s8297_s25 + $0x24] sm:$0x77]  ;;  %v2044_v54 = vcombine.high %v2032_v47, %v2032_v47 }
 0x1e5   : > { %v1919_v48 = vcombine.high %v1909_v46, %v1909_v46  ;;  %v1928_v53 = vrot.slane %v1909_v46, 6 }
 0x1e6   : > { %v1458_v61 = vpop.permute.xlu1 %1457  ;;  %v1456_v62 = vpop.permute.xlu0 %1455 }
 0x1e7   : > { %v1468_v63 = vsel %vm1459_vm15, %v1454_v51, %v1456_v62  ;;  %v1469_v0 = vsel %vm1459_vm15, %v1456_v62, %v1458_v61  ;;  %v1929_v52 = vrot.slane %v1919_v48, 6  ;;  %1948 = vst [vmem:[#allocation2 + $0x7a8] sm:$0x1c] %v1928_v53  ;;  %v2034_v61 = vld [vmem:[%s8297_s25 + $0x24] sm:$0x77]  ;;  %vm10949_vm15 = vcmask 596992  }
 0x1e8   : > { %1488 = vst [vmem:[#allocation2 + $0x848] sm:$0x7] %v1468_v63  ;;  %1489 = vst [vmem:[#allocation2 + $0xc0] sm:$0x7] %v1469_v0  ;;  %1982 = vrot.lane.b32.xlu1 %v1969_v57, %s8197_s26  ;;  %1980 = vrot.lane.b32.xlu0 %v1968_v58, %s8197_s26 }
 0x1e9   : > { %1949 = vst [vmem:[#allocation2 + $0x468] sm:$0x1c] %v1929_v52 }
 0x1ea   : > { %v1521_v5 = vpop.permute.xlu1 %1520  ;;  %v1519_v6 = vpop.permute.xlu0 %1518 }
 0x1eb   : > { %v1541_v7 = vsel %vm1540_vm4, %v1519_v6, %v1521_v5 }
 0x1ec   : > { %1561 = vst [vmem:[#allocation2 + $0x950] sm:$0x38] %v1541_v7  ;;  %1986 = vrot.lane.b32.xlu1 %v1971_v1, %s8197_s26  ;;  %1984 = vrot.lane.b32.xlu0 %v1970_v2, %s8197_s26  ;;  %v2046_v2 = vcombine.high %v2034_v61, %v2034_v61 }
 0x1ee   : > { %v1525_v12 = vpop.permute.xlu1 %1524  ;;  %v1523_v13 = vpop.permute.xlu0 %1522 }
 0x1ef   : > { %v1542_v14 = vsel %vm1540_vm4, %v1521_v5, %v1523_v13  ;;  %v1543_v15 = vsel %vm1540_vm4, %v1523_v13, %v1525_v12 }
 0x1f0   : > { %1562 = vst [vmem:[#allocation2 + $0x7d0] sm:$0x38] %v1542_v14  ;;  %1563 = vst [vmem:[#allocation2 + $0x158] sm:$0x38] %v1543_v15  ;;  %1990 = vrot.lane.b32.xlu1 %v1973_v8, %s8197_s26  ;;  %1988 = vrot.lane.b32.xlu0 %v1972_v9, %s8197_s26  ;;  %v2116_v8 = vrot.slane %v2099_v3, 5  ;;  %v2111_v9 = vcombine.high %v2099_v3, %v2099_v3 }
 0x1f1   : > { %v2182_v3 = vld [vmem:[%s8297_s25 + $0x1c] sm:$0x77] }
 0x1f2   : > { %v1529_v22 = vpop.permute.xlu1 %1528  ;;  %v1527_v23 = vpop.permute.xlu0 %1526 }
 0x1f3   : > { %v1544_v24 = vsel %vm1540_vm4, %v1525_v12, %v1527_v23  ;;  %v1545_v25 = vsel %vm1540_vm4, %v1527_v23, %v1529_v22 }
 0x1f4   : > { %1564 = vst [vmem:[#allocation2 + $0x318] sm:$0x38] %v1544_v24  ;;  %1565 = vst [vmem:[#allocation2 + $0x538] sm:$0x38] %v1545_v25  ;;  %1994 = vrot.lane.b32.xlu1 %v1975_v16, %s8197_s26  ;;  %1992 = vrot.lane.b32.xlu0 %v1974_v17, %s8197_s26  ;;  %v2118_v16 = vrot.slane %v2100_v11, 5  ;;  %v2117_v17 = vrot.slane %v2111_v9, 5  ;;  %v2194_v9 = vcombine.high %v2182_v3, %v2182_v3 }
 0x1f5   : > { %v2120_v24 = vrot.slane %v2101_v19, 5  ;;  %v2119_v25 = vrot.slane %v2112_v18, 5 }
 0x1f6   : > { %v1533_v33 = vpop.permute.xlu1 %1532  ;;  %v1531_v34 = vpop.permute.xlu0 %1530 }
 0x1f7   : > { %v1546_v37 = vsel %vm1540_vm4, %v1529_v22, %v1531_v34  ;;  %v1547_v38 = vsel %vm1540_vm4, %v1531_v34, %v1533_v33  ;;  %v2103_v34 = vld [vmem:[%s8297_s25 + $0x24] sm:$0x77] }
 0x1f8   : > { %1566 = vst [vmem:[#allocation2 + $0xf8] sm:$0x38] %v1546_v37  ;;  %1567 = vst [vmem:[#allocation2 + $0x5e0] sm:$0x38] %v1547_v38  ;;  %1998 = vrot.lane.b32.xlu1 %v1977_v29, %s8197_s26  ;;  %1996 = vrot.lane.b32.xlu0 %v1976_v30, %s8197_s26  ;;  %s8218_s26 = smov 70  }
 0x1fa   : > { %v1537_v41 = vpop.permute.xlu1 %1536  ;;  %v1535_v42 = vpop.permute.xlu0 %1534 }
 0x1fb   : > { %v1548_v43 = vsel %vm1540_vm4, %v1533_v33, %v1535_v42  ;;  %v1549_v44 = vsel %vm1540_vm4, %v1535_v42, %v1537_v41  ;;  %v2114_v33 = vcombine.high %v2102_v27, %v2102_v27  ;;  %v2104_v42 = vld [vmem:[%s8297_s25 + $0x2c] sm:$0x7] }
 0x1fc   : > { %1568 = vst [vmem:[#allocation2 + $0x138] sm:$0x38] %v1548_v43  ;;  %1569 = vst [vmem:[#allocation2 + $0x848] sm:$0x38] %v1549_v44  ;;  %2049 = vrot.lane.b32.xlu1 %v2042_v39, %s8198_s27  ;;  %2047 = vrot.lane.b32.xlu0 %v2030_v32, %s8198_s27  ;;  %v2121_v32 = vrot.slane %v2113_v26, 5  ;;  %v2124_v39 = vrot.slane %v2103_v34, 5 }
 0x1fd   : > { %v2179_v43 = vld [vmem:[%s8297_s25 + $0x4] sm:$0x77]  ;;  %v2126_v48 = vrot.slane %v2104_v42, 5 }
 0x1fe   : > { %v1600_v49 = vpop.permute.xlu1 %1599  ;;  %v1539_v50 = vpop.permute.xlu0 %1538 }
 0x1ff   : > { %v1550_v51 = vsel %vm1540_vm4, %v1537_v41, %v1539_v50  ;;  %v2115_v41 = vcombine.high %v2103_v34, %v2103_v34  ;;  %v2191_v50 = vcombine.high %v2179_v43, %v2179_v43  ;;  %vm3887_vm4 = vcmask 588800  }
 0x200   : > { %1570 = vst [vmem:[#allocation2 + $0xc0] sm:$0x38] %v1550_v51  ;;  %2053 = vrot.lane.b32.xlu1 %v2043_v45, %s8198_s27  ;;  %2051 = vrot.lane.b32.xlu0 %v2031_v40, %s8198_s27  ;;  %v2123_v40 = vrot.slane %v2114_v33, 5  ;;  %v2180_v51 = vld [vmem:[%s8297_s25 + $0xc] sm:$0x77] }
 0x201   : > { %v2270_v33 = vld [vmem:[%s8297_s25 + $0xc] sm:$0x77] }
 0x202   : > { %v1604_v56 = vpop.permute.xlu1 %1603  ;;  %v1602_v57 = vpop.permute.xlu0 %1601 }
 0x203   : > { %v1622_v58 = vsel %vm1621_vm5, %v1600_v49, %v1602_v57  ;;  %v1623_v59 = vsel %vm1621_vm5, %v1602_v57, %v1604_v56  ;;  %v2125_v49 = vrot.slane %v2115_v41, 5  ;;  %v2196_v57 = vrot.slane %v2179_v43, 2  ;;  %v2271_v41 = vld [vmem:[%s8297_s25 + $0x14] sm:$0x77] }
 0x204   : > { %1642 = vst [vmem:[#allocation2 + $0x958] ss:$-4 sps:$4 sm:$0xc1] %v1622_v58   ;;  %1643 = vst [vmem:[#allocation2 + $0x988] ss:$-436 sps:$4 sm:$0xc1] %v1623_v59   ;;  %2057 = vrot.lane.b32.xlu1 %v2044_v54, %s8198_s27  ;;  %2055 = vrot.lane.b32.xlu0 %v2032_v47, %s8198_s27  ;;  %v2192_v58 = vcombine.high %v2180_v51, %v2180_v51 }
 0x205   : > { %v2181_v59 = vld [vmem:[%s8297_s25 + $0x14] sm:$0x77] }
 0x206   : > { %v1608_v62 = vpop.permute.xlu1 %1607  ;;  %v1606_v63 = vpop.permute.xlu0 %1605 }
 0x207   : > { %v1624_v0 = vsel %vm1621_vm5, %v1604_v56, %v1606_v63  ;;  %v1625_v1 = vsel %vm1621_vm5, %v1606_v63, %v1608_v62  ;;  %v2197_v56 = vrot.slane %v2191_v50, 2 }
 0x208   : > { %1644 = vst [vmem:[#allocation2 + $0x5a8] ss:$-1100 sps:$4 sm:$0xc1] %v1624_v0   ;;  %1645 = vst [vmem:[#allocation2 + $0x8c0] ss:$-1444 sps:$4 sm:$0xc1] %v1625_v1   ;;  %2061 = vrot.lane.b32.xlu1 %v2045_v60, %s8198_s27  ;;  %2059 = vrot.lane.b32.xlu0 %v2033_v55, %s8198_s27 }
 0x209   : > { %v2199_v0 = vrot.slane %v2192_v58, 2  ;;  %v2198_v1 = vrot.slane %v2180_v51, 2 }
 0x20a   : > { %v1612_v4 = vpop.permute.xlu1 %1611  ;;  %v1610_v5 = vpop.permute.xlu0 %1609 }
 0x20b   : > { %v1626_v6 = vsel %vm1621_vm5, %v1608_v62, %v1610_v5  ;;  %v1627_v7 = vsel %vm1621_vm5, %v1610_v5, %v1612_v4 }
 0x20c   : > { %1646 = vst [vmem:[#allocation2 + $0x1f8] ss:$836 sps:$4 sm:$0xc1] %v1626_v6   ;;  %1647 = vst [vmem:[#allocation2 + $0x310] ss:$-532 sps:$4 sm:$0xc1] %v1627_v7   ;;  %2065 = vrot.lane.b32.xlu1 %v2046_v2, %s8198_s27  ;;  %2063 = vrot.lane.b32.xlu0 %v2034_v61, %s8198_s27  ;;  %v2193_v2 = vcombine.high %v2181_v59, %v2181_v59 }
 0x20e   : > { %v1616_v12 = vpop.permute.xlu1 %1615  ;;  %v1614_v13 = vpop.permute.xlu0 %1613  ;;  %v2201_v7 = vrot.slane %v2193_v2, 2 }
 0x20f   : > { %v1628_v14 = vsel %vm1621_vm5, %v1612_v4, %v1614_v13  ;;  %v1629_v15 = vsel %vm1621_vm5, %v1614_v13, %v1616_v12 }
 0x210   : > { %1648 = vst [vmem:[#allocation2 + $0x660] ss:$-124 sps:$4 sm:$0xc1] %v1628_v14   ;;  %1649 = vst [vmem:[#allocation2 + $0x7b8] ss:$-1660 sps:$4 sm:$0xc1] %v1629_v15   ;;  %2127 = vrot.lane.b32.xlu1 %v2116_v8, %s8199_s28  ;;  %2067 = vrot.lane.b32.xlu0 %v2035_v10, %s8198_s27 }
 0x211   : > { %v2200_v8 = vrot.slane %v2181_v59, 2  ;;  %v2183_v10 = vld [vmem:[%s8297_s25 + $0x24] sm:$0x77]  ;;  %v2203_v15 = vrot.slane %v2194_v9, 2  ;;  %s8219_s27 = smov 69  }
 0x212   : > { %v1620_v20 = vpop.permute.xlu1 %1619  ;;  %v1618_v21 = vpop.permute.xlu0 %1617 }
 0x213   : > { %v1630_v22 = vsel %vm1621_vm5, %v1616_v12, %v1618_v21  ;;  %v1631_v23 = vsel %vm1621_vm5, %v1618_v21, %v1620_v20 }
 0x214   : > { %1650 = vst [vmem:[#allocation2 + $0x8e8] ss:$-156 sps:$4 sm:$0xc1] %v1630_v22   ;;  %1651 = vst [vmem:[#allocation2 + $0x8d8] ss:$-2068 sps:$4 sm:$0xc1] %v1631_v23   ;;  %2131 = vrot.lane.b32.xlu1 %v2118_v16, %s8199_s28  ;;  %2129 = vrot.lane.b32.xlu0 %v2117_v17, %s8199_s28  ;;  %v2195_v17 = vcombine.high %v2183_v10, %v2183_v10 }
 0x215   : > { %v2202_v16 = vrot.slane %v2182_v3, 2  ;;  %v2204_v23 = vrot.slane %v2183_v10, 2 }
 0x216   : > { %v1693_v28 = vpop.permute.xlu1 %1692  ;;  %v1691_v29 = vpop.permute.xlu0 %1690  ;;  %v2205_v22 = vrot.slane %v2195_v17, 2 }
 0x217   : > { %v1713_v30 = vsel %vm1712_vm6, %v1691_v29, %v1693_v28 }
 0x218   : > { %1733 = vst [vmem:[#allocation2 + $0x958] sm:$0xe] %v1713_v30  ;;  %2135 = vrot.lane.b32.xlu1 %v2120_v24, %s8199_s28  ;;  %2133 = vrot.lane.b32.xlu0 %v2119_v25, %s8199_s28  ;;  %v2269_v24 = vld [vmem:[%s8297_s25 + $0x4] sm:$0x77]  ;;  %v2184_v25 = vld [vmem:[%s8297_s25 + $0x2c] sm:$0x7] }
 0x219   : > { %v2286_v30 = vrot.slane %v2269_v24, 7 }
 0x21a   : > { %v1697_v35 = vpop.permute.xlu1 %1696  ;;  %v1695_v36 = vpop.permute.xlu0 %1694 }
 0x21b   : > { %v1714_v37 = vsel %vm1712_vm6, %v1693_v28, %v1695_v36  ;;  %v1715_v38 = vsel %vm1712_vm6, %v1695_v36, %v1697_v35 }
 0x21c   : > { %1734 = vst [vmem:[#allocation2 + $0x988] sm:$0xe] %v1714_v37  ;;  %1735 = vst [vmem:[#allocation2 + $0x5a8] sm:$0xe] %v1715_v38  ;;  %2139 = vrot.lane.b32.xlu1 %v2122_v31, %s8199_s28  ;;  %2137 = vrot.lane.b32.xlu0 %v2121_v32, %s8199_s28  ;;  %v2206_v31 = vrot.slane %v2184_v25, 2  ;;  %v2281_v32 = vcombine.high %v2269_v24, %v2269_v24  ;;  %v2288_v38 = vrot.slane %v2270_v33, 7 }
 0x21d   : > { %v2353_v24 = vld [vmem:[%s8297_s25 + $0x1c] sm:$0x77] }
 0x21e   : > { %v1701_v44 = vpop.permute.xlu1 %1700  ;;  %v1699_v45 = vpop.permute.xlu0 %1698 }
 0x21f   : > { %v1716_v46 = vsel %vm1712_vm6, %v1697_v35, %v1699_v45  ;;  %v1717_v47 = vsel %vm1712_vm6, %v1699_v45, %v1701_v44 }
 0x220   : > { %1736 = vst [vmem:[#allocation2 + $0x8c0] sm:$0xe] %v1716_v46  ;;  %1737 = vst [vmem:[#allocation2 + $0x1f8] sm:$0xe] %v1717_v47  ;;  %2143 = vrot.lane.b32.xlu1 %v2124_v39, %s8199_s28  ;;  %2141 = vrot.lane.b32.xlu0 %v2123_v40, %s8199_s28  ;;  %v2287_v39 = vrot.slane %v2281_v32, 7  ;;  %v2282_v40 = vcombine.high %v2270_v33, %v2270_v33  ;;  %v2290_v46 = vrot.slane %v2271_v41, 7 }
 0x222   : > { %v1705_v52 = vpop.permute.xlu1 %1704  ;;  %v1703_v53 = vpop.permute.xlu0 %1702  ;;  %v2289_v47 = vrot.slane %v2282_v40, 7 }
 0x223   : > { %v1718_v54 = vsel %vm1712_vm6, %v1701_v44, %v1703_v53  ;;  %v1719_v55 = vsel %vm1712_vm6, %v1703_v53, %v1705_v52 }
 0x224   : > { %1738 = vst [vmem:[#allocation2 + $0x310] sm:$0xe] %v1718_v54  ;;  %1739 = vst [vmem:[#allocation2 + $0x660] sm:$0xe] %v1719_v55  ;;  %2147 = vrot.lane.b32.xlu1 %v2126_v48, %s8199_s28  ;;  %2145 = vrot.lane.b32.xlu0 %v2125_v49, %s8199_s28  ;;  %v2283_v48 = vcombine.high %v2271_v41, %v2271_v41  ;;  %v2272_v49 = vld [vmem:[%s8297_s25 + $0x1c] sm:$0x77] }
 0x225   : > { %v2292_v53 = vrot.slane %v2272_v49, 7  ;;  %v2284_v55 = vcombine.high %v2272_v49, %v2272_v49  ;;  %s8220_s28 = smov 68  }
 0x226   : > { %v1709_v60 = vpop.permute.xlu1 %1708  ;;  %v1707_v61 = vpop.permute.xlu0 %1706  ;;  %v2291_v54 = vrot.slane %v2283_v48, 7 }
 0x227   : > { %v1720_v62 = vsel %vm1712_vm6, %v1705_v52, %v1707_v61  ;;  %v1721_v63 = vsel %vm1712_vm6, %v1707_v61, %v1709_v60 }
 0x228   : > { %1740 = vst [vmem:[#allocation2 + $0x7b8] sm:$0xe] %v1720_v62  ;;  %1741 = vst [vmem:[#allocation2 + $0x8e8] sm:$0xe] %v1721_v63  ;;  %2209 = vrot.lane.b32.xlu1 %v2197_v56, %s8200_s29  ;;  %2207 = vrot.lane.b32.xlu0 %v2196_v57, %s8200_s29  ;;  %v2273_v56 = vld [vmem:[%s8297_s25 + $0x24] sm:$0x77] }
 0x229   : > { %v2294_v61 = vrot.slane %v2273_v56, 7  ;;  %v2293_v62 = vrot.slane %v2284_v55, 7  ;;  %v2285_v63 = vcombine.high %v2273_v56, %v2273_v56 }
 0x22a   : > { %v1762_v4 = vpop.permute.xlu1 %1761  ;;  %v1711_v5 = vpop.permute.xlu0 %1710 }
 0x22b   : > { %v1722_v6 = vsel %vm1712_vm6, %v1709_v60, %v1711_v5 }
 0x22c   : > { %1742 = vst [vmem:[#allocation2 + $0x8d8] sm:$0xe] %v1722_v6  ;;  %2213 = vrot.lane.b32.xlu1 %v2199_v0, %s8200_s29  ;;  %2211 = vrot.lane.b32.xlu0 %v2198_v1, %s8200_s29  ;;  %v2274_v0 = vld [vmem:[%s8297_s25 + $0x2c] sm:$0x7]  ;;  %v2295_v6 = vrot.slane %v2285_v63, 7 }
 0x22d   : > { %v2296_v5 = vrot.slane %v2274_v0, 7 }
 0x22e   : > { %v1766_v11 = vpop.permute.xlu1 %1765  ;;  %v1764_v12 = vpop.permute.xlu0 %1763 }
 0x22f   : > { %v1784_v13 = vsel %vm1783_vm7, %v1762_v4, %v1764_v12  ;;  %v1785_v14 = vsel %vm1783_vm7, %v1764_v12, %v1766_v11 }
 0x230   : > { %1804 = vst [vmem:[#allocation2 + $0x958] sm:$0x70] %v1784_v13  ;;  %1805 = vst [vmem:[#allocation2 + $0x988] sm:$0x70] %v1785_v14  ;;  %2217 = vrot.lane.b32.xlu1 %v2201_v7, %s8200_s29  ;;  %2215 = vrot.lane.b32.xlu0 %v2200_v8, %s8200_s29  ;;  %v2350_v7 = vld [vmem:[%s8297_s25 + $0x4] sm:$0x77] }
 0x231   : > { %v2362_v12 = vcombine.low %v2350_v7, %v2350_v7  ;;  %v2351_v13 = vld [vmem:[%s8297_s25 + $0xc] sm:$0x77] }
 0x232   : > { %v1770_v18 = vpop.permute.xlu1 %1769  ;;  %v1768_v19 = vpop.permute.xlu0 %1767 }
 0x233   : > { %v1786_v20 = vsel %vm1783_vm7, %v1766_v11, %v1768_v19  ;;  %v1787_v21 = vsel %vm1783_vm7, %v1768_v19, %v1770_v18  ;;  %v2352_v19 = vld [vmem:[%s8297_s25 + $0x14] sm:$0x77] }
 0x234   : > { %1806 = vst [vmem:[#allocation2 + $0x5a8] sm:$0x70] %v1786_v20  ;;  %1807 = vst [vmem:[#allocation2 + $0x8c0] sm:$0x70] %v1787_v21  ;;  %2221 = vrot.lane.b32.xlu1 %v2203_v15, %s8200_s29  ;;  %2219 = vrot.lane.b32.xlu0 %v2202_v16, %s8200_s29 }
 0x236   : > { %v1774_v26 = vpop.permute.xlu1 %1773  ;;  %v1772_v27 = vpop.permute.xlu0 %1771 }
 0x237   : > { %v1788_v28 = vsel %vm1783_vm7, %v1770_v18, %v1772_v27  ;;  %v1789_v29 = vsel %vm1783_vm7, %v1772_v27, %v1774_v26  ;;  %v2363_v18 = vcombine.low %v2351_v13, %v2351_v13 }
 0x238   : > { %1808 = vst [vmem:[#allocation2 + $0x1f8] sm:$0x70] %v1788_v28  ;;  %1809 = vst [vmem:[#allocation2 + $0x310] sm:$0x70] %v1789_v29  ;;  %2225 = vrot.lane.b32.xlu1 %v2205_v22, %s8200_s29  ;;  %2223 = vrot.lane.b32.xlu0 %v2204_v23, %s8200_s29  ;;  %v2364_v23 = vcombine.low %v2352_v19, %v2352_v19  ;;  %v2365_v29 = vcombine.low %v2353_v24, %v2353_v24 }
 0x23a   : > { %v1778_v34 = vpop.permute.xlu1 %1777  ;;  %v1776_v35 = vpop.permute.xlu0 %1775 }
 0x23b   : > { %v1790_v36 = vsel %vm1783_vm7, %v1774_v26, %v1776_v35  ;;  %v1791_v37 = vsel %vm1783_vm7, %v1776_v35, %v1778_v34 }
 0x23c   : > { %1810 = vst [vmem:[#allocation2 + $0x660] sm:$0x70] %v1790_v36  ;;  %1811 = vst [vmem:[#allocation2 + $0x7b8] sm:$0x70] %v1791_v37  ;;  %2297 = vrot.lane.b32.xlu1 %v2286_v30, %s8218_s26  ;;  %2227 = vrot.lane.b32.xlu0 %v2206_v31, %s8200_s29  ;;  %v2354_v30 = vld [vmem:[%s8297_s25 + $0x24] sm:$0x77] }
 0x23d   : > { %v2366_v35 = vcombine.low %v2354_v30, %v2354_v30  ;;  %v2421_v36 = vld [vmem:[%s8297_s25 + $0x4] sm:$0x77]  ;;  %s8221_s29 = smov 67  }
 0x23e   : > { %v1782_v42 = vpop.permute.xlu1 %1781  ;;  %v1780_v43 = vpop.permute.xlu0 %1779  ;;  %v2438_v41 = vrot.slane %v2421_v36, 1 }
 0x23f   : > { %v1792_v44 = vsel %vm1783_vm7, %v1778_v34, %v1780_v43  ;;  %v1793_v45 = vsel %vm1783_vm7, %v1780_v43, %v1782_v42  ;;  %v7824_v42 = vld [vmem:[%s8297_s25 + $0x2c] ss:$0 sps:$4 sm:$0x77]   ;;  %v2433_v43 = vcombine.high %v2421_v36, %v2421_v36  ;;  %v2515_v36 = vld [vmem:[%s8297_s25 + $0x1c] sm:$0x77] }
 0x240   : > { %1812 = vst [vmem:[#allocation2 + $0x8e8] sm:$0x70] %v1792_v44  ;;  %1813 = vst [vmem:[#allocation2 + $0x8d8] sm:$0x70] %v1793_v45  ;;  %2301 = vrot.lane.b32.xlu1 %v2288_v38, %s8218_s26  ;;  %2299 = vrot.lane.b32.xlu0 %v2287_v39, %s8218_s26  ;;  %v2422_v44 = vld [vmem:[%s8297_s25 + $0xc] sm:$0x77] }
 0x241   : > { %v2440_v49 = vrot.slane %v2422_v44, 1 }
 0x242   : > { %v1845_v50 = vpop.permute.xlu1 %1844  ;;  %v1843_v51 = vpop.permute.xlu0 %1842 }
 0x243   : > { %v1865_v52 = vsel %vm1864_vm13, %v1843_v51, %v1845_v50  ;;  %v2434_v51 = vcombine.high %v2422_v44, %v2422_v44 }
 0x244   : > { %1885 = vst [vmem:[#allocation2 + $0x230] ss:$1836 sps:$4 sm:$0x83] %v1865_v52   ;;  %2305 = vrot.lane.b32.xlu1 %v2290_v46, %s8218_s26  ;;  %2303 = vrot.lane.b32.xlu0 %v2289_v47, %s8218_s26  ;;  %v2423_v52 = vld [vmem:[%s8297_s25 + $0x14] sm:$0x77] }
 0x246   : > { %v1849_v57 = vpop.permute.xlu1 %1848  ;;  %v1847_v58 = vpop.permute.xlu0 %1846 }
 0x247   : > { %v1866_v59 = vsel %vm1864_vm13, %v1845_v50, %v1847_v58  ;;  %v1867_v60 = vsel %vm1864_vm13, %v1847_v58, %v1849_v57  ;;  %v2439_v50 = vrot.slane %v2433_v43, 1  ;;  %v2441_v58 = vrot.slane %v2434_v51, 1  ;;  %v2516_v43 = vld [vmem:[%s8297_s25 + $0x24] sm:$0x77] }
 0x248   : > { %1886 = vst [vmem:[#allocation2 + $0x420] ss:$1388 sps:$4 sm:$0x83] %v1866_v59   ;;  %1887 = vst [vmem:[#allocation2 + $0x5d0] ss:$-36 sps:$4 sm:$0x83] %v1867_v60   ;;  %2309 = vrot.lane.b32.xlu1 %v2292_v53, %s8218_s26  ;;  %2307 = vrot.lane.b32.xlu0 %v2291_v54, %s8218_s26  ;;  %v2435_v59 = vcombine.high %v2423_v52, %v2423_v52 }
 0x249   : > { %v2424_v60 = vld [vmem:[%s8297_s25 + $0x1c] sm:$0x77] }
 0x24a   : > { %v1853_v1 = vpop.permute.xlu1 %1852  ;;  %v1851_v2 = vpop.permute.xlu0 %1850  ;;  %v2444_v0 = vrot.slane %v2424_v60, 1 }
 0x24b   : > { %v1868_v3 = vsel %vm1864_vm13, %v1849_v57, %v1851_v2  ;;  %v1869_v4 = vsel %vm1864_vm13, %v1851_v2, %v1853_v1  ;;  %v2442_v57 = vrot.slane %v2423_v52, 1  ;;  %v2436_v2 = vcombine.high %v2424_v60, %v2424_v60 }
 0x24c   : > { %1888 = vst [vmem:[#allocation2 + $0x348] ss:$1404 sps:$4 sm:$0x83] %v1868_v3   ;;  %1889 = vst [vmem:[#allocation2 + $0x768] ss:$-1388 sps:$4 sm:$0x83] %v1869_v4   ;;  %2313 = vrot.lane.b32.xlu1 %v2294_v61, %s8218_s26  ;;  %2311 = vrot.lane.b32.xlu0 %v2293_v62, %s8218_s26 }
 0x24d   : > { %v2425_v3 = vld [vmem:[%s8297_s25 + $0x24] sm:$0x77] }
 0x24e   : > { %v1857_v8 = vpop.permute.xlu1 %1856  ;;  %v1855_v9 = vpop.permute.xlu0 %1854 }
 0x24f   : > { %v1870_v10 = vsel %vm1864_vm13, %v1853_v1, %v1855_v9  ;;  %v1871_v11 = vsel %vm1864_vm13, %v1855_v9, %v1857_v8  ;;  %v2443_v1 = vrot.slane %v2435_v59, 1  ;;  %v2445_v9 = vrot.slane %v2436_v2, 1  ;;  %v2594_v2 = vld [vmem:[%s8297_s25 + $0xc] sm:$0x77] }
 0x250   : > { %1890 = vst [vmem:[#allocation2 + $0x3c0] ss:$-172 sps:$4 sm:$0x83] %v1870_v10   ;;  %1891 = vst [vmem:[#allocation2 + $0x938] ss:$-724 sps:$4 sm:$0x83] %v1871_v11   ;;  %2317 = vrot.lane.b32.xlu1 %v2296_v5, %s8218_s26  ;;  %2315 = vrot.lane.b32.xlu0 %v2295_v6, %s8218_s26  ;;  %v2437_v10 = vcombine.high %v2425_v3, %v2425_v3 }
 0x251   : > { %v2426_v11 = vld [vmem:[%s8297_s25 + $0x2c] sm:$0x7] }
 0x252   : > { %v1861_v14 = vpop.permute.xlu1 %1860  ;;  %v1859_v15 = vpop.permute.xlu0 %1858 }
 0x253   : > { %v1872_v16 = vsel %vm1864_vm13, %v1857_v8, %v1859_v15  ;;  %v1873_v17 = vsel %vm1864_vm13, %v1859_v15, %v1861_v14  ;;  %v2446_v8 = vrot.slane %v2425_v3, 1 }
 0x254   : > { %1892 = vst [vmem:[#allocation2 + $0x930] ss:$-372 sps:$4 sm:$0x83] %v1872_v16   ;;  %1893 = vst [vmem:[#allocation2 + $0x7a8] ss:$324 sps:$4 sm:$0x83] %v1873_v17   ;;  %2370 = vrot.lane.b32.xlu1 %v2350_v7, %s8219_s27  ;;  %2368 = vrot.lane.b32.xlu0 %v2362_v12, %s8219_s27 }
 0x255   : > { %v2512_v12 = vld [vmem:[%s8297_s25 + $0x4] sm:$0x77]  ;;  %v2448_v17 = vrot.slane %v2426_v11, 1 }
 0x256   : > { %v1979_v20 = vpop.permute.xlu1 %1978  ;;  %v1863_v21 = vpop.permute.xlu0 %1862 }
 0x257   : > { %v1874_v22 = vsel %vm1864_vm13, %v1861_v14, %v1863_v21 }
 0x258   : > { %1894 = vst [vmem:[#allocation2 + $0x468] ss:$1140 sps:$4 sm:$0x83] %v1874_v22   ;;  %2374 = vrot.lane.b32.xlu1 %v2351_v13, %s8219_s27  ;;  %2372 = vrot.lane.b32.xlu0 %v2363_v18, %s8219_s27  ;;  %v2447_v18 = vrot.slane %v2437_v10, 1  ;;  %v2595_v10 = vld [vmem:[%s8297_s25 + $0x14] sm:$0x77] }
 0x25a   : > { %v1983_v25 = vpop.permute.xlu1 %1982  ;;  %v1981_v26 = vpop.permute.xlu0 %1980 }
 0x25b   : > { %v2000_v27 = vsel %vm246_vm0, %v1979_v20, %v1981_v26  ;;  %v2001_v28 = vsel %vm246_vm0, %v1981_v26, %v1983_v25  ;;  %v2513_v20 = vld [vmem:[%s8297_s25 + $0xc] sm:$0x77]  ;;  %v2529_v26 = vrot.slane %v2512_v12, 6 }
 0x25c   : > { %2020 = vst [vmem:[#allocation2 + $0x230] sm:$0xe0] %v2000_v27  ;;  %2021 = vst [vmem:[#allocation2 + $0x420] sm:$0xe0] %v2001_v28  ;;  %2378 = vrot.lane.b32.xlu1 %v2352_v19, %s8219_s27  ;;  %2376 = vrot.lane.b32.xlu0 %v2364_v23, %s8219_s27  ;;  %v2524_v19 = vcombine.high %v2512_v12, %v2512_v12  ;;  %v2525_v27 = vcombine.high %v2513_v20, %v2513_v20  ;;  %v2514_v28 = vld [vmem:[%s8297_s25 + $0x14] sm:$0x77] }
 0x25e   : > { %v1987_v31 = vpop.permute.xlu1 %1986  ;;  %v1985_v32 = vpop.permute.xlu0 %1984 }
 0x25f   : > { %v2002_v33 = vsel %vm246_vm0, %v1983_v25, %v1985_v32  ;;  %v2003_v34 = vsel %vm246_vm0, %v1985_v32, %v1987_v31  ;;  %v2530_v25 = vrot.slane %v2524_v19, 6 }
 0x260   : > { %2022 = vst [vmem:[#allocation2 + $0x5d0] sm:$0xe0] %v2002_v33  ;;  %2023 = vst [vmem:[#allocation2 + $0x348] sm:$0xe0] %v2003_v34  ;;  %2382 = vrot.lane.b32.xlu1 %v2353_v24, %s8219_s27  ;;  %2380 = vrot.lane.b32.xlu0 %v2365_v29, %s8219_s27  ;;  %v2532_v33 = vrot.slane %v2525_v27, 6  ;;  %v2531_v34 = vrot.slane %v2513_v20, 6 }
 0x262   : > { %v1991_v37 = vpop.permute.xlu1 %1990  ;;  %v1989_v38 = vpop.permute.xlu0 %1988 }
 0x263   : > { %v2004_v39 = vsel %vm246_vm0, %v1987_v31, %v1989_v38  ;;  %v2005_v40 = vsel %vm246_vm0, %v1989_v38, %v1991_v37 }
 0x264   : > { %2024 = vst [vmem:[#allocation2 + $0x768] sm:$0xe0] %v2004_v39  ;;  %2025 = vst [vmem:[#allocation2 + $0x3c0] sm:$0xe0] %v2005_v40  ;;  %2386 = vrot.lane.b32.xlu1 %v2354_v30, %s8219_s27  ;;  %2384 = vrot.lane.b32.xlu0 %v2366_v35, %s8219_s27  ;;  %v2526_v35 = vcombine.high %v2514_v28, %v2514_v28 }
 0x266   : > { %v1995_v45 = vpop.permute.xlu1 %1994  ;;  %v1993_v46 = vpop.permute.xlu0 %1992  ;;  %v2534_v40 = vrot.slane %v2526_v35, 6 }
 0x267   : > { %v2006_v47 = vsel %vm246_vm0, %v1991_v37, %v1993_v46  ;;  %v2007_v48 = vsel %vm246_vm0, %v1993_v46, %v1995_v45 }
 0x268   : > { %2026 = vst [vmem:[#allocation2 + $0x938] sm:$0xe0] %v2006_v47  ;;  %2027 = vst [vmem:[#allocation2 + $0x930] sm:$0xe0] %v2007_v48  ;;  %2449 = vrot.lane.b32.xlu1 %v2438_v41, %s8220_s28  ;;  %2388 = vrot.lane.b32.xlu0 %v7824_v42, %s8219_s27  ;;  %v2533_v41 = vrot.slane %v2514_v28, 6  ;;  %v2527_v42 = vcombine.high %v2515_v36, %v2515_v36 }
 0x26a   : > { %v1999_v53 = vpop.permute.xlu1 %1998  ;;  %v1997_v54 = vpop.permute.xlu0 %1996  ;;  %v2536_v48 = vrot.slane %v2527_v42, 6 }
 0x26b   : > { %v2008_v55 = vsel %vm246_vm0, %v1995_v45, %v1997_v54  ;;  %v2009_v56 = vsel %vm246_vm0, %v1997_v54, %v1999_v53  ;;  %vm2319_vm0 = vcmask 572416  }
 0x26c   : > { %2028 = vst [vmem:[#allocation2 + $0x7a8] sm:$0xe0] %v2008_v55  ;;  %2029 = vst [vmem:[#allocation2 + $0x468] sm:$0xe0] %v2009_v56  ;;  %2453 = vrot.lane.b32.xlu1 %v2440_v49, %s8220_s28  ;;  %2451 = vrot.lane.b32.xlu0 %v2439_v50, %s8220_s28  ;;  %v2535_v49 = vrot.slane %v2515_v36, 6  ;;  %v2528_v50 = vcombine.high %v2516_v43, %v2516_v43  ;;  %v2537_v56 = vrot.slane %v2516_v43, 6 }
 0x26e   : > { %v2050_v61 = vpop.permute.xlu1 %2049  ;;  %v2048_v62 = vpop.permute.xlu0 %2047  ;;  %v2538_v55 = vrot.slane %v2528_v50, 6 }
 0x26f   : > { %v2069_v63 = vsel %vm327_vm1, %v2048_v62, %v2050_v61 }
 0x270   : > { %2089 = vst [vmem:[#allocation2 + $0x2d0] sm:$0x7] %v2069_v63  ;;  %2457 = vrot.lane.b32.xlu1 %v2442_v57, %s8220_s28  ;;  %2455 = vrot.lane.b32.xlu0 %v2441_v58, %s8220_s28  ;;  %v2593_v57 = vld [vmem:[%s8297_s25 + $0x4] sm:$0x77]  ;;  %v2517_v58 = vld [vmem:[%s8297_s25 + $0x2c] sm:$0x7] }
 0x271   : > { %v2610_v63 = vrot.slane %v2593_v57, 3 }
 0x272   : > { %v2054_v4 = vpop.permute.xlu1 %2053  ;;  %v2052_v5 = vpop.permute.xlu0 %2051 }
 0x273   : > { %v2070_v6 = vsel %vm327_vm1, %v2050_v61, %v2052_v5  ;;  %v2071_v7 = vsel %vm327_vm1, %v2052_v5, %v2054_v4 }
 0x274   : > { %2090 = vst [vmem:[#allocation2 + $0x2f0] sm:$0x7] %v2070_v6  ;;  %2091 = vst [vmem:[#allocation2 + $0x4f8] sm:$0x7] %v2071_v7  ;;  %2461 = vrot.lane.b32.xlu1 %v2444_v0, %s8220_s28  ;;  %2459 = vrot.lane.b32.xlu0 %v2443_v1, %s8220_s28  ;;  %v2539_v0 = vrot.slane %v2517_v58, 6  ;;  %v2605_v1 = vcombine.high %v2593_v57, %v2593_v57  ;;  %v2612_v7 = vrot.slane %v2594_v2, 3 }
 0x275   : > { %v2676_v57 = vld [vmem:[%s8297_s25 + $0x1c] sm:$0x77] }
 0x276   : > { %v2058_v13 = vpop.permute.xlu1 %2057  ;;  %v2056_v14 = vpop.permute.xlu0 %2055 }
 0x277   : > { %v2072_v15 = vsel %vm327_vm1, %v2054_v4, %v2056_v14  ;;  %v2073_v16 = vsel %vm327_vm1, %v2056_v14, %v2058_v13 }
 0x278   : > { %2092 = vst [vmem:[#allocation2 + $0x228] sm:$0x7] %v2072_v15  ;;  %2093 = vst [vmem:[#allocation2 + $0x8a8] sm:$0x7] %v2073_v16  ;;  %2465 = vrot.lane.b32.xlu1 %v2446_v8, %s8220_s28  ;;  %2463 = vrot.lane.b32.xlu0 %v2445_v9, %s8220_s28  ;;  %v2611_v8 = vrot.slane %v2605_v1, 3  ;;  %v2606_v9 = vcombine.high %v2594_v2, %v2594_v2  ;;  %v2614_v15 = vrot.slane %v2595_v10, 3 }
 0x27a   : > { %v2062_v21 = vpop.permute.xlu1 %2061  ;;  %v2060_v22 = vpop.permute.xlu0 %2059  ;;  %v2613_v16 = vrot.slane %v2606_v9, 3 }
 0x27b   : > { %v2074_v23 = vsel %vm327_vm1, %v2058_v13, %v2060_v22  ;;  %v2075_v24 = vsel %vm327_vm1, %v2060_v22, %v2062_v21 }
 0x27c   : > { %2094 = vst [vmem:[#allocation2 + $0x870] sm:$0x7] %v2074_v23  ;;  %2095 = vst [vmem:[#allocation2 + $0x558] sm:$0x7] %v2075_v24  ;;  %2469 = vrot.lane.b32.xlu1 %v2448_v17, %s8220_s28  ;;  %2467 = vrot.lane.b32.xlu0 %v2447_v18, %s8220_s28  ;;  %v2607_v17 = vcombine.high %v2595_v10, %v2595_v10  ;;  %v2596_v18 = vld [vmem:[%s8297_s25 + $0x1c] sm:$0x77] }
 0x27d   : > { %v2616_v22 = vrot.slane %v2596_v18, 3  ;;  %v2608_v24 = vcombine.high %v2596_v18, %v2596_v18 }
 0x27e   : > { %v2066_v29 = vpop.permute.xlu1 %2065  ;;  %v2064_v30 = vpop.permute.xlu0 %2063  ;;  %v2615_v23 = vrot.slane %v2607_v17, 3 }
 0x27f   : > { %v2076_v31 = vsel %vm327_vm1, %v2062_v21, %v2064_v30  ;;  %v2077_v32 = vsel %vm327_vm1, %v2064_v30, %v2066_v29 }
 0x280   : > { %2096 = vst [vmem:[#allocation2 + $0x1b8] sm:$0x7] %v2076_v31  ;;  %2097 = vst [vmem:[#allocation2 + $0x2c8] sm:$0x7] %v2077_v32  ;;  %2542 = vrot.lane.b32.xlu1 %v2530_v25, %s8221_s29  ;;  %2540 = vrot.lane.b32.xlu0 %v2529_v26, %s8221_s29  ;;  %v2597_v25 = vld [vmem:[%s8297_s25 + $0x24] sm:$0x77] }
 0x281   : > { %v2618_v30 = vrot.slane %v2597_v25, 3  ;;  %v2617_v31 = vrot.slane %v2608_v24, 3  ;;  %v2609_v32 = vcombine.high %v2597_v25, %v2597_v25 }
 0x282   : > { %v2128_v37 = vpop.permute.xlu1 %2127  ;;  %v2068_v38 = vpop.permute.xlu0 %2067 }
 0x283   : > { %v2078_v39 = vsel %vm327_vm1, %v2066_v29, %v2068_v38  ;;  %vm2390_vm1 = vcmask 564224  }
 0x284   : > { %2098 = vst [vmem:[#allocation2 + $0x2d8] sm:$0x7] %v2078_v39  ;;  %2546 = vrot.lane.b32.xlu1 %v2532_v33, %s8221_s29  ;;  %2544 = vrot.lane.b32.xlu0 %v2531_v34, %s8221_s29  ;;  %v2598_v33 = vld [vmem:[%s8297_s25 + $0x2c] sm:$0x7]  ;;  %v2619_v39 = vrot.slane %v2609_v32, 3 }
 0x285   : > { %v2620_v38 = vrot.slane %v2598_v33, 3 }
 0x286   : > { %v2132_v44 = vpop.permute.xlu1 %2131  ;;  %v2130_v45 = vpop.permute.xlu0 %2129 }
 0x287   : > { %v2149_v46 = vsel %vm418_vm2, %v2128_v37, %v2130_v45  ;;  %v2150_v47 = vsel %vm418_vm2, %v2130_v45, %v2132_v44 }
 0x288   : > { %2169 = vst [vmem:[#allocation2 + $0x2d0] sm:$0x38] %v2149_v46  ;;  %2170 = vst [vmem:[#allocation2 + $0x2f0] sm:$0x38] %v2150_v47  ;;  %2550 = vrot.lane.b32.xlu1 %v2534_v40, %s8221_s29  ;;  %2548 = vrot.lane.b32.xlu0 %v2533_v41, %s8221_s29  ;;  %v2673_v40 = vld [vmem:[%s8297_s25 + $0x4] sm:$0x77] }
 0x289   : > { %v2685_v45 = vcombine.high %v2673_v40, %v2673_v40  ;;  %v2674_v46 = vld [vmem:[%s8297_s25 + $0xc] sm:$0x77] }
 0x28a   : > { %v2136_v51 = vpop.permute.xlu1 %2135  ;;  %v2134_v52 = vpop.permute.xlu0 %2133 }
 0x28b   : > { %v2151_v53 = vsel %vm418_vm2, %v2132_v44, %v2134_v52  ;;  %v2152_v54 = vsel %vm418_vm2, %v2134_v52, %v2136_v51  ;;  %v2675_v52 = vld [vmem:[%s8297_s25 + $0x14] sm:$0x77] }
 0x28c   : > { %2171 = vst [vmem:[#allocation2 + $0x4f8] sm:$0x38] %v2151_v53  ;;  %2172 = vst [vmem:[#allocation2 + $0x228] sm:$0x38] %v2152_v54  ;;  %2554 = vrot.lane.b32.xlu1 %v2536_v48, %s8221_s29  ;;  %2552 = vrot.lane.b32.xlu0 %v2535_v49, %s8221_s29 }
 0x28e   : > { %v2140_v59 = vpop.permute.xlu1 %2139  ;;  %v2138_v60 = vpop.permute.xlu0 %2137 }
 0x28f   : > { %v2153_v61 = vsel %vm418_vm2, %v2136_v51, %v2138_v60  ;;  %v2154_v62 = vsel %vm418_vm2, %v2138_v60, %v2140_v59  ;;  %v2686_v51 = vcombine.high %v2674_v46, %v2674_v46 }
 0x290   : > { %2173 = vst [vmem:[#allocation2 + $0x8a8] sm:$0x38] %v2153_v61  ;;  %2174 = vst [vmem:[#allocation2 + $0x870] sm:$0x38] %v2154_v62  ;;  %2558 = vrot.lane.b32.xlu1 %v2538_v55, %s8221_s29  ;;  %2556 = vrot.lane.b32.xlu0 %v2537_v56, %s8221_s29  ;;  %v2687_v56 = vcombine.high %v2675_v52, %v2675_v52  ;;  %v2688_v62 = vcombine.high %v2676_v57, %v2676_v57 }
 0x292   : > { %v2144_v3 = vpop.permute.xlu1 %2143  ;;  %v2142_v4 = vpop.permute.xlu0 %2141 }
 0x293   : > { %v2155_v5 = vsel %vm418_vm2, %v2140_v59, %v2142_v4  ;;  %v2156_v6 = vsel %vm418_vm2, %v2142_v4, %v2144_v3 }
 0x294   : > { %2175 = vst [vmem:[#allocation2 + $0x558] sm:$0x38] %v2155_v5  ;;  %2176 = vst [vmem:[#allocation2 + $0x1b8] sm:$0x38] %v2156_v6  ;;  %2621 = vrot.lane.b32.xlu1 %v2610_v63, %s8205_s7  ;;  %2560 = vrot.lane.b32.xlu0 %v2539_v0, %s8221_s29  ;;  %v2677_v63 = vld [vmem:[%s8297_s25 + $0x24] sm:$0x77] }
 0x295   : > { %v2689_v4 = vcombine.high %v2677_v63, %v2677_v63  ;;  %v2742_v5 = vld [vmem:[%s8297_s25 + $0x4] sm:$0x77] }
 0x296   : > { %v2148_v11 = vpop.permute.xlu1 %2147  ;;  %v2146_v12 = vpop.permute.xlu0 %2145  ;;  %v2759_v10 = vrot.slane %v2742_v5, 5 }
 0x297   : > { %v2157_v13 = vsel %vm418_vm2, %v2144_v3, %v2146_v12  ;;  %v2158_v14 = vsel %vm418_vm2, %v2146_v12, %v2148_v11  ;;  %v2754_v11 = vcombine.high %v2742_v5, %v2742_v5  ;;  %v2678_v12 = vld [vmem:[%s8297_s25 + $0x2c] sm:$0x7]  ;;  %v2825_v5 = vld [vmem:[%s8297_s25 + $0x1c] sm:$0x77]  ;;  %vm2471_vm2 = vcmask 556032  }
 0x298   : > { %2177 = vst [vmem:[#allocation2 + $0x2c8] sm:$0x38] %v2157_v13  ;;  %2178 = vst [vmem:[#allocation2 + $0x2d8] sm:$0x38] %v2158_v14  ;;  %2625 = vrot.lane.b32.xlu1 %v2612_v7, %s8205_s7  ;;  %2623 = vrot.lane.b32.xlu0 %v2611_v8, %s8205_s7  ;;  %v2743_v13 = vld [vmem:[%s8297_s25 + $0xc] sm:$0x77] }
 0x299   : > { %v2761_v18 = vrot.slane %v2743_v13, 5 }
 0x29a   : > { %v2210_v19 = vpop.permute.xlu1 %2209  ;;  %v2208_v20 = vpop.permute.xlu0 %2207 }
 0x29b   : > { %v2229_v21 = vsel %vm489_vm3, %v2208_v20, %v2210_v19  ;;  %v2755_v20 = vcombine.high %v2743_v13, %v2743_v13 }
 0x29c   : > { %2249 = vst [vmem:[#allocation2 + $0x810] ss:$-1340 sps:$4 sm:$0xc1] %v2229_v21   ;;  %2629 = vrot.lane.b32.xlu1 %v2614_v15, %s8205_s7  ;;  %2627 = vrot.lane.b32.xlu0 %v2613_v16, %s8205_s7  ;;  %v2744_v21 = vld [vmem:[%s8297_s25 + $0x14] sm:$0x77] }
 0x29e   : > { %v2214_v26 = vpop.permute.xlu1 %2213  ;;  %v2212_v27 = vpop.permute.xlu0 %2211 }
 0x29f   : > { %v2230_v28 = vsel %vm489_vm3, %v2210_v19, %v2212_v27  ;;  %v2231_v29 = vsel %vm489_vm3, %v2212_v27, %v2214_v26  ;;  %v2760_v19 = vrot.slane %v2754_v11, 5  ;;  %v2762_v27 = vrot.slane %v2755_v20, 5 }
 0x2a0   : > { %2250 = vst [vmem:[#allocation2 + $0x738] ss:$-1092 sps:$4 sm:$0xc1] %v2230_v28   ;;  %2251 = vst [vmem:[#allocation2 + $0x7e0] ss:$-740 sps:$4 sm:$0xc1] %v2231_v29   ;;  %2633 = vrot.lane.b32.xlu1 %v2616_v22, %s8205_s7  ;;  %2631 = vrot.lane.b32.xlu0 %v2615_v23, %s8205_s7  ;;  %v2756_v28 = vcombine.high %v2744_v21, %v2744_v21  ;;  %v2837_v11 = vcombine.high %v2825_v5, %v2825_v5 }
 0x2a1   : > { %v2745_v29 = vld [vmem:[%s8297_s25 + $0x1c] sm:$0x77] }
 0x2a2   : > { %v2218_v34 = vpop.permute.xlu1 %2217  ;;  %v2216_v35 = vpop.permute.xlu0 %2215  ;;  %v2765_v33 = vrot.slane %v2745_v29, 5 }
 0x2a3   : > { %v2232_v36 = vsel %vm489_vm3, %v2214_v26, %v2216_v35  ;;  %v2233_v37 = vsel %vm489_vm3, %v2216_v35, %v2218_v34  ;;  %v2763_v26 = vrot.slane %v2744_v21, 5  ;;  %v2757_v35 = vcombine.high %v2745_v29, %v2745_v29 }
 0x2a4   : > { %2252 = vst [vmem:[#allocation2 + $0x200] ss:$44 sps:$4 sm:$0xc1] %v2232_v36   ;;  %2253 = vst [vmem:[#allocation2 + $0x5e8] ss:$708 sps:$4 sm:$0xc1] %v2233_v37   ;;  %2637 = vrot.lane.b32.xlu1 %v2618_v30, %s8205_s7  ;;  %2635 = vrot.lane.b32.xlu0 %v2617_v31, %s8205_s7 }
 0x2a5   : > { %v2746_v36 = vld [vmem:[%s8297_s25 + $0x24] sm:$0x77] }
 0x2a6   : > { %v2222_v41 = vpop.permute.xlu1 %2221  ;;  %v2220_v42 = vpop.permute.xlu0 %2219 }
 0x2a7   : > { %v2234_v43 = vsel %vm489_vm3, %v2218_v34, %v2220_v42  ;;  %v2235_v44 = vsel %vm489_vm3, %v2220_v42, %v2222_v41  ;;  %v2764_v34 = vrot.slane %v2756_v28, 5  ;;  %v2766_v42 = vrot.slane %v2757_v35, 5  ;;  %v2913_v35 = vld [vmem:[%s8297_s25 + $0xc] sm:$0x77] }
 0x2a8   : > { %2254 = vst [vmem:[#allocation2 + $0x390] ss:$1252 sps:$4 sm:$0xc1] %v2234_v43   ;;  %2255 = vst [vmem:[#allocation2 + $0x860] ss:$-772 sps:$4 sm:$0xc1] %v2235_v44   ;;  %2641 = vrot.lane.b32.xlu1 %v2620_v38, %s8205_s7  ;;  %2639 = vrot.lane.b32.xlu0 %v2619_v39, %s8205_s7  ;;  %v2758_v43 = vcombine.high %v2746_v36, %v2746_v36 }
 0x2a9   : > { %v2747_v44 = vld [vmem:[%s8297_s25 + $0x2c] sm:$0x7] }
 0x2aa   : > { %v2226_v47 = vpop.permute.xlu1 %2225  ;;  %v2224_v48 = vpop.permute.xlu0 %2223 }
 0x2ab   : > { %v2236_v49 = vsel %vm489_vm3, %v2222_v41, %v2224_v48  ;;  %v2237_v50 = vsel %vm489_vm3, %v2224_v48, %v2226_v47  ;;  %v2767_v41 = vrot.slane %v2746_v36, 5 }
 0x2ac   : > { %2256 = vst [vmem:[#allocation2 + $0x240] ss:$-132 sps:$4 sm:$0xc1] %v2236_v49   ;;  %2257 = vst [vmem:[#allocation2 + $0x10] ss:$700 sps:$4 sm:$0xc1] %v2237_v50   ;;  %2692 = vrot.lane.b32.xlu1 %v2685_v45, %s8206_s8  ;;  %2690 = vrot.lane.b32.xlu0 %v2673_v40, %s8206_s8 }
 0x2ad   : > { %v2822_v45 = vld [vmem:[%s8297_s25 + $0x4] sm:$0x77]  ;;  %v2769_v50 = vrot.slane %v2747_v44, 5 }
 0x2ae   : > { %v2298_v53 = vpop.permute.xlu1 %2297  ;;  %v2228_v54 = vpop.permute.xlu0 %2227 }
 0x2af   : > { %v2238_v55 = vsel %vm489_vm3, %v2226_v47, %v2228_v54  ;;  %vm2562_vm3 = vcmask 547840  }
 0x2b0   : > { %2258 = vst [vmem:[#allocation2 + $0x628] ss:$-844 sps:$4 sm:$0xc1] %v2238_v55   ;;  %2696 = vrot.lane.b32.xlu1 %v2686_v51, %s8206_s8  ;;  %2694 = vrot.lane.b32.xlu0 %v2674_v46, %s8206_s8  ;;  %v2768_v51 = vrot.slane %v2758_v43, 5  ;;  %v2914_v43 = vld [vmem:[%s8297_s25 + $0x14] sm:$0x77] }
 0x2b2   : > { %v2302_v58 = vpop.permute.xlu1 %2301  ;;  %v2300_v59 = vpop.permute.xlu0 %2299 }
 0x2b3   : > { %v2320_v60 = vsel %vm2319_vm0, %v2298_v53, %v2300_v59  ;;  %v2321_v61 = vsel %vm2319_vm0, %v2300_v59, %v2302_v58  ;;  %v2823_v53 = vld [vmem:[%s8297_s25 + $0xc] sm:$0x77]  ;;  %v2839_v59 = vrot.slane %v2822_v45, 2 }
 0x2b4   : > { %2340 = vst [vmem:[#allocation2 + $0x810] sm:$0xe] %v2320_v60  ;;  %2341 = vst [vmem:[#allocation2 + $0x738] sm:$0xe] %v2321_v61  ;;  %2700 = vrot.lane.b32.xlu1 %v2687_v56, %s8206_s8  ;;  %2698 = vrot.lane.b32.xlu0 %v2675_v52, %s8206_s8  ;;  %v2834_v52 = vcombine.high %v2822_v45, %v2822_v45  ;;  %v2835_v60 = vcombine.high %v2823_v53, %v2823_v53  ;;  %v2824_v61 = vld [vmem:[%s8297_s25 + $0x14] sm:$0x77] }
 0x2b6   : > { %v2306_v0 = vpop.permute.xlu1 %2305  ;;  %v2304_v1 = vpop.permute.xlu0 %2303 }
 0x2b7   : > { %v2322_v2 = vsel %vm2319_vm0, %v2302_v58, %v2304_v1  ;;  %v2323_v3 = vsel %vm2319_vm0, %v2304_v1, %v2306_v0  ;;  %v2840_v58 = vrot.slane %v2834_v52, 2 }
 0x2b8   : > { %2342 = vst [vmem:[#allocation2 + $0x7e0] sm:$0xe] %v2322_v2  ;;  %2343 = vst [vmem:[#allocation2 + $0x200] sm:$0xe] %v2323_v3  ;;  %2704 = vrot.lane.b32.xlu1 %v2688_v62, %s8206_s8  ;;  %2702 = vrot.lane.b32.xlu0 %v2676_v57, %s8206_s8  ;;  %v2842_v2 = vrot.slane %v2835_v60, 2  ;;  %v2841_v3 = vrot.slane %v2823_v53, 2 }
 0x2ba   : > { %v2310_v6 = vpop.permute.xlu1 %2309  ;;  %v2308_v7 = vpop.permute.xlu0 %2307 }
 0x2bb   : > { %v2324_v8 = vsel %vm2319_vm0, %v2306_v0, %v2308_v7  ;;  %v2325_v9 = vsel %vm2319_vm0, %v2308_v7, %v2310_v6 }
 0x2bc   : > { %2344 = vst [vmem:[#allocation2 + $0x5e8] sm:$0xe] %v2324_v8  ;;  %2345 = vst [vmem:[#allocation2 + $0x390] sm:$0xe] %v2325_v9  ;;  %2708 = vrot.lane.b32.xlu1 %v2689_v4, %s8206_s8  ;;  %2706 = vrot.lane.b32.xlu0 %v2677_v63, %s8206_s8  ;;  %v2836_v4 = vcombine.high %v2824_v61, %v2824_v61 }
 0x2be   : > { %v2314_v14 = vpop.permute.xlu1 %2313  ;;  %v2312_v15 = vpop.permute.xlu0 %2311  ;;  %v2844_v9 = vrot.slane %v2836_v4, 2 }
 0x2bf   : > { %v2326_v16 = vsel %vm2319_vm0, %v2310_v6, %v2312_v15  ;;  %v2327_v17 = vsel %vm2319_vm0, %v2312_v15, %v2314_v14 }
 0x2c0   : > { %2346 = vst [vmem:[#allocation2 + $0x860] sm:$0xe] %v2326_v16  ;;  %2347 = vst [vmem:[#allocation2 + $0x240] sm:$0xe] %v2327_v17  ;;  %2770 = vrot.lane.b32.xlu1 %v2759_v10, %s8207_s9  ;;  %2710 = vrot.lane.b32.xlu0 %v2678_v12, %s8206_s8  ;;  %v2843_v10 = vrot.slane %v2824_v61, 2  ;;  %v2846_v17 = vrot.slane %v2837_v11, 2 }
 0x2c1   : > { %v2826_v12 = vld [vmem:[%s8297_s25 + $0x24] sm:$0x77]  ;;  %s10954_s8 = smov 5  }
 0x2c2   : > { %v2318_v22 = vpop.permute.xlu1 %2317  ;;  %v2316_v23 = vpop.permute.xlu0 %2315 }
 0x2c3   : > { %v2328_v24 = vsel %vm2319_vm0, %v2314_v14, %v2316_v23  ;;  %v2329_v25 = vsel %vm2319_vm0, %v2316_v23, %v2318_v22 }
 0x2c4   : > { %2348 = vst [vmem:[#allocation2 + $0x10] sm:$0xe] %v2328_v24  ;;  %2349 = vst [vmem:[#allocation2 + $0x628] sm:$0xe] %v2329_v25  ;;  %2774 = vrot.lane.b32.xlu1 %v2761_v18, %s8207_s9  ;;  %2772 = vrot.lane.b32.xlu0 %v2760_v19, %s8207_s9  ;;  %v2845_v18 = vrot.slane %v2825_v5, 2  ;;  %v2838_v19 = vcombine.high %v2826_v12, %v2826_v12  ;;  %v2847_v25 = vrot.slane %v2826_v12, 2 }
 0x2c6   : > { %v2371_v30 = vpop.permute.xlu1 %2370  ;;  %v2369_v31 = vpop.permute.xlu0 %2368  ;;  %v2848_v24 = vrot.slane %v2838_v19, 2 }
 0x2c7   : > { %v2391_v32 = vsel %vm2390_vm1, %v2369_v31, %v2371_v30 }
 0x2c8   : > { %2411 = vst [vmem:[#allocation2 + $0x810] sm:$0x70] %v2391_v32  ;;  %2778 = vrot.lane.b32.xlu1 %v2763_v26, %s8207_s9  ;;  %2776 = vrot.lane.b32.xlu0 %v2762_v27, %s8207_s9  ;;  %v2912_v26 = vld [vmem:[%s8297_s25 + $0x4] sm:$0x77]  ;;  %v2827_v27 = vld [vmem:[%s8297_s25 + $0x2c] sm:$0x7] }
 0x2c9   : > { %v2929_v32 = vrot.slane %v2912_v26, 7 }
 0x2ca   : > { %v2375_v37 = vpop.permute.xlu1 %2374  ;;  %v2373_v38 = vpop.permute.xlu0 %2372 }
 0x2cb   : > { %v2392_v39 = vsel %vm2390_vm1, %v2371_v30, %v2373_v38  ;;  %v2393_v40 = vsel %vm2390_vm1, %v2373_v38, %v2375_v37 }
 0x2cc   : > { %2412 = vst [vmem:[#allocation2 + $0x738] sm:$0x70] %v2392_v39  ;;  %2413 = vst [vmem:[#allocation2 + $0x7e0] sm:$0x70] %v2393_v40  ;;  %2782 = vrot.lane.b32.xlu1 %v2765_v33, %s8207_s9  ;;  %2780 = vrot.lane.b32.xlu0 %v2764_v34, %s8207_s9  ;;  %v2849_v33 = vrot.slane %v2827_v27, 2  ;;  %v2924_v34 = vcombine.high %v2912_v26, %v2912_v26  ;;  %v2931_v40 = vrot.slane %v2913_v35, 7 }
 0x2cd   : > { %v2995_v26 = vld [vmem:[%s8297_s25 + $0x1c] sm:$0x77] }
 0x2ce   : > { %v2379_v46 = vpop.permute.xlu1 %2378  ;;  %v2377_v47 = vpop.permute.xlu0 %2376 }
 0x2cf   : > { %v2394_v48 = vsel %vm2390_vm1, %v2375_v37, %v2377_v47  ;;  %v2395_v49 = vsel %vm2390_vm1, %v2377_v47, %v2379_v46 }
 0x2d0   : > { %2414 = vst [vmem:[#allocation2 + $0x200] sm:$0x70] %v2394_v48  ;;  %2415 = vst [vmem:[#allocation2 + $0x5e8] sm:$0x70] %v2395_v49  ;;  %2786 = vrot.lane.b32.xlu1 %v2767_v41, %s8207_s9  ;;  %2784 = vrot.lane.b32.xlu0 %v2766_v42, %s8207_s9  ;;  %v2930_v41 = vrot.slane %v2924_v34, 7  ;;  %v2925_v42 = vcombine.high %v2913_v35, %v2913_v35  ;;  %v2933_v48 = vrot.slane %v2914_v43, 7 }
 0x2d2   : > { %v2383_v54 = vpop.permute.xlu1 %2382  ;;  %v2381_v55 = vpop.permute.xlu0 %2380  ;;  %v2932_v49 = vrot.slane %v2925_v42, 7 }
 0x2d3   : > { %v2396_v56 = vsel %vm2390_vm1, %v2379_v46, %v2381_v55  ;;  %v2397_v57 = vsel %vm2390_vm1, %v2381_v55, %v2383_v54 }
 0x2d4   : > { %2416 = vst [vmem:[#allocation2 + $0x390] sm:$0x70] %v2396_v56  ;;  %2417 = vst [vmem:[#allocation2 + $0x860] sm:$0x70] %v2397_v57  ;;  %2790 = vrot.lane.b32.xlu1 %v2769_v50, %s8207_s9  ;;  %2788 = vrot.lane.b32.xlu0 %v2768_v51, %s8207_s9  ;;  %v2926_v50 = vcombine.high %v2914_v43, %v2914_v43  ;;  %v2915_v51 = vld [vmem:[%s8297_s25 + $0x1c] sm:$0x77] }
 0x2d5   : > { %v2935_v55 = vrot.slane %v2915_v51, 7  ;;  %v2927_v57 = vcombine.high %v2915_v51, %v2915_v51  ;;  %s8226_s9 = smov 74  }
 0x2d6   : > { %v2387_v62 = vpop.permute.xlu1 %2386  ;;  %v2385_v63 = vpop.permute.xlu0 %2384  ;;  %v2934_v56 = vrot.slane %v2926_v50, 7 }
 0x2d7   : > { %v2398_v0 = vsel %vm2390_vm1, %v2383_v54, %v2385_v63  ;;  %v2399_v1 = vsel %vm2390_vm1, %v2385_v63, %v2387_v62 }
 0x2d8   : > { %2418 = vst [vmem:[#allocation2 + $0x240] sm:$0x70] %v2398_v0  ;;  %2419 = vst [vmem:[#allocation2 + $0x10] sm:$0x70] %v2399_v1  ;;  %2852 = vrot.lane.b32.xlu1 %v2840_v58, %s8208_s10  ;;  %2850 = vrot.lane.b32.xlu0 %v2839_v59, %s8208_s10  ;;  %v2916_v58 = vld [vmem:[%s8297_s25 + $0x24] sm:$0x77] }
 0x2d9   : > { %v2937_v63 = vrot.slane %v2916_v58, 7  ;;  %v2936_v0 = vrot.slane %v2927_v57, 7  ;;  %v2928_v1 = vcombine.high %v2916_v58, %v2916_v58 }
 0x2da   : > { %v2450_v6 = vpop.permute.xlu1 %2449  ;;  %v2389_v7 = vpop.permute.xlu0 %2388 }
 0x2db   : > { %v2400_v8 = vsel %vm2390_vm1, %v2387_v62, %v2389_v7 }
 0x2dc   : > { %2420 = vst [vmem:[#allocation2 + $0x628] sm:$0x70] %v2400_v8  ;;  %2856 = vrot.lane.b32.xlu1 %v2842_v2, %s8208_s10  ;;  %2854 = vrot.lane.b32.xlu0 %v2841_v3, %s8208_s10  ;;  %v2917_v2 = vld [vmem:[%s8297_s25 + $0x2c] sm:$0x7]  ;;  %v2938_v8 = vrot.slane %v2928_v1, 7 }
 0x2dd   : > { %v2939_v7 = vrot.slane %v2917_v2, 7 }
 0x2de   : > { %v2454_v13 = vpop.permute.xlu1 %2453  ;;  %v2452_v14 = vpop.permute.xlu0 %2451 }
 0x2df   : > { %v2472_v15 = vsel %vm2471_vm2, %v2450_v6, %v2452_v14  ;;  %v2473_v16 = vsel %vm2471_vm2, %v2452_v14, %v2454_v13 }
 0x2e0   : > { %2492 = vst [vmem:[#allocation2 + $0x620] ss:$500 sps:$4 sm:$0x83] %v2472_v15   ;;  %2493 = vst [vmem:[#allocation2 + $0x1d0] ss:$1388 sps:$4 sm:$0x83] %v2473_v16   ;;  %2860 = vrot.lane.b32.xlu1 %v2844_v9, %s8208_s10  ;;  %2858 = vrot.lane.b32.xlu0 %v2843_v10, %s8208_s10 }
 0x2e1   : > { %v2992_v9 = vld [vmem:[%s8297_s25 + $0x4] sm:$0x77]  ;;  %v2993_v15 = vld [vmem:[%s8297_s25 + $0xc] sm:$0x77] }
 0x2e2   : > { %v2458_v20 = vpop.permute.xlu1 %2457  ;;  %v2456_v21 = vpop.permute.xlu0 %2455  ;;  %v3004_v14 = vcombine.low %v2992_v9, %v2992_v9 }
 0x2e3   : > { %v2474_v22 = vsel %vm2471_vm2, %v2454_v13, %v2456_v21  ;;  %v2475_v23 = vsel %vm2471_vm2, %v2456_v21, %v2458_v20  ;;  %v2994_v21 = vld [vmem:[%s8297_s25 + $0x14] sm:$0x77] }
 0x2e4   : > { %2494 = vst [vmem:[#allocation2 + $0x2b8] ss:$1324 sps:$4 sm:$0x83] %v2474_v22   ;;  %2495 = vst [vmem:[#allocation2 + $0xd0] ss:$308 sps:$4 sm:$0x83] %v2475_v23   ;;  %2864 = vrot.lane.b32.xlu1 %v2846_v17, %s8208_s10  ;;  %2862 = vrot.lane.b32.xlu0 %v2845_v18, %s8208_s10 }
 0x2e6   : > { %v2462_v28 = vpop.permute.xlu1 %2461  ;;  %v2460_v29 = vpop.permute.xlu0 %2459 }
 0x2e7   : > { %v2476_v30 = vsel %vm2471_vm2, %v2458_v20, %v2460_v29  ;;  %v2477_v31 = vsel %vm2471_vm2, %v2460_v29, %v2462_v28  ;;  %v3005_v20 = vcombine.low %v2993_v15, %v2993_v15 }
 0x2e8   : > { %2496 = vst [vmem:[#allocation2 + $0x450] ss:$412 sps:$4 sm:$0x83] %v2476_v30   ;;  %2497 = vst [vmem:[#allocation2 + $0x820] ss:$-1164 sps:$4 sm:$0x83] %v2477_v31   ;;  %2868 = vrot.lane.b32.xlu1 %v2848_v24, %s8208_s10  ;;  %2866 = vrot.lane.b32.xlu0 %v2847_v25, %s8208_s10  ;;  %v3006_v25 = vcombine.low %v2994_v21, %v2994_v21  ;;  %v3007_v31 = vcombine.low %v2995_v26, %v2995_v26 }
 0x2ea   : > { %v2466_v36 = vpop.permute.xlu1 %2465  ;;  %v2464_v37 = vpop.permute.xlu0 %2463 }
 0x2eb   : > { %v2478_v38 = vsel %vm2471_vm2, %v2462_v28, %v2464_v37  ;;  %v2479_v39 = vsel %vm2471_vm2, %v2464_v37, %v2466_v36 }
 0x2ec   : > { %2498 = vst [vmem:[#allocation2 + $0x1c0] ss:$1700 sps:$4 sm:$0x83] %v2478_v38   ;;  %2499 = vst [vmem:[#allocation2 + $0x8b8] ss:$-1652 sps:$4 sm:$0x83] %v2479_v39   ;;  %2940 = vrot.lane.b32.xlu1 %v2929_v32, %s8209_s11  ;;  %2870 = vrot.lane.b32.xlu0 %v2849_v33, %s8208_s10 }
 0x2ed   : > { %v2996_v32 = vld [vmem:[%s8297_s25 + $0x24] sm:$0x77]  ;;  %s8227_s10 = smov 73  }
 0x2ee   : > { %v2470_v44 = vpop.permute.xlu1 %2469  ;;  %v2468_v45 = vpop.permute.xlu0 %2467  ;;  %v3008_v37 = vcombine.low %v2996_v32, %v2996_v32  ;;  %v3063_v38 = vld [vmem:[%s8297_s25 + $0x4] sm:$0x77] }
 0x2ef   : > { %v2480_v46 = vsel %vm2471_vm2, %v2466_v36, %v2468_v45  ;;  %v2481_v47 = vsel %vm2471_vm2, %v2468_v45, %v2470_v44  ;;  %v3080_v43 = vrot.slane %v3063_v38, 1  ;;  %v7865_v44 = vld [vmem:[%s8297_s25 + $0x2c] ss:$0 sps:$4 sm:$0x77]   ;;  %v3075_v45 = vcombine.high %v3063_v38, %v3063_v38  ;;  %v3157_v38 = vld [vmem:[%s8297_s25 + $0x1c] sm:$0x77] }
 0x2f0   : > { %2500 = vst [vmem:[#allocation2 + $0x6d8] ss:$-1732 sps:$4 sm:$0x83] %v2480_v46   ;;  %2501 = vst [vmem:[#allocation2 + $0x290] ss:$924 sps:$4 sm:$0x83] %v2481_v47   ;;  %2944 = vrot.lane.b32.xlu1 %v2931_v40, %s8209_s11  ;;  %2942 = vrot.lane.b32.xlu0 %v2930_v41, %s8209_s11 }
 0x2f1   : > { %v3064_v46 = vld [vmem:[%s8297_s25 + $0xc] sm:$0x77] }
 0x2f2   : > { %v2543_v52 = vpop.permute.xlu1 %2542  ;;  %v2541_v53 = vpop.permute.xlu0 %2540  ;;  %v3082_v51 = vrot.slane %v3064_v46, 1 }
 0x2f3   : > { %v2563_v54 = vsel %vm2562_vm3, %v2541_v53, %v2543_v52  ;;  %v3076_v53 = vcombine.high %v3064_v46, %v3064_v46 }
 0x2f4   : > { %2583 = vst [vmem:[#allocation2 + $0x620] sm:$0x1c] %v2563_v54  ;;  %2948 = vrot.lane.b32.xlu1 %v2933_v48, %s8209_s11  ;;  %2946 = vrot.lane.b32.xlu0 %v2932_v49, %s8209_s11  ;;  %v3065_v54 = vld [vmem:[%s8297_s25 + $0x14] sm:$0x77] }
 0x2f6   : > { %v2547_v59 = vpop.permute.xlu1 %2546  ;;  %v2545_v60 = vpop.permute.xlu0 %2544 }
 0x2f7   : > { %v2564_v61 = vsel %vm2562_vm3, %v2543_v52, %v2545_v60  ;;  %v2565_v62 = vsel %vm2562_vm3, %v2545_v60, %v2547_v59  ;;  %v3081_v52 = vrot.slane %v3075_v45, 1  ;;  %v3083_v60 = vrot.slane %v3076_v53, 1  ;;  %v3158_v45 = vld [vmem:[%s8297_s25 + $0x24] sm:$0x77] }
 0x2f8   : > { %2584 = vst [vmem:[#allocation2 + $0x1d0] sm:$0x1c] %v2564_v61  ;;  %2585 = vst [vmem:[#allocation2 + $0x2b8] sm:$0x1c] %v2565_v62  ;;  %2952 = vrot.lane.b32.xlu1 %v2935_v55, %s8209_s11  ;;  %2950 = vrot.lane.b32.xlu0 %v2934_v56, %s8209_s11  ;;  %v3077_v61 = vcombine.high %v3065_v54, %v3065_v54  ;;  %v3066_v62 = vld [vmem:[%s8297_s25 + $0x1c] sm:$0x77] }
 0x2f9   : > { %v3086_v2 = vrot.slane %v3066_v62, 1 }
 0x2fa   : > { %v2551_v3 = vpop.permute.xlu1 %2550  ;;  %v2549_v4 = vpop.permute.xlu0 %2548 }
 0x2fb   : > { %v2566_v5 = vsel %vm2562_vm3, %v2547_v59, %v2549_v4  ;;  %v2567_v6 = vsel %vm2562_vm3, %v2549_v4, %v2551_v3  ;;  %v3084_v59 = vrot.slane %v3065_v54, 1  ;;  %v3078_v4 = vcombine.high %v3066_v62, %v3066_v62 }
 0x2fc   : > { %2586 = vst [vmem:[#allocation2 + $0xd0] sm:$0x1c] %v2566_v5  ;;  %2587 = vst [vmem:[#allocation2 + $0x450] sm:$0x1c] %v2567_v6  ;;  %2956 = vrot.lane.b32.xlu1 %v2937_v63, %s8209_s11  ;;  %2954 = vrot.lane.b32.xlu0 %v2936_v0, %s8209_s11  ;;  %v3067_v5 = vld [vmem:[%s8297_s25 + $0x24] sm:$0x77] }
 0x2fe   : > { %v2555_v10 = vpop.permute.xlu1 %2554  ;;  %v2553_v11 = vpop.permute.xlu0 %2552 }
 0x2ff   : > { %v2568_v12 = vsel %vm2562_vm3, %v2551_v3, %v2553_v11  ;;  %v2569_v13 = vsel %vm2562_vm3, %v2553_v11, %v2555_v10  ;;  %v3085_v3 = vrot.slane %v3077_v61, 1  ;;  %v3087_v11 = vrot.slane %v3078_v4, 1  ;;  %v3236_v4 = vld [vmem:[%s8297_s25 + $0xc] sm:$0x77] }
 0x300   : > { %2588 = vst [vmem:[#allocation2 + $0x820] sm:$0x1c] %v2568_v12  ;;  %2589 = vst [vmem:[#allocation2 + $0x1c0] sm:$0x1c] %v2569_v13  ;;  %2960 = vrot.lane.b32.xlu1 %v2939_v7, %s8209_s11  ;;  %2958 = vrot.lane.b32.xlu0 %v2938_v8, %s8209_s11  ;;  %v3079_v12 = vcombine.high %v3067_v5, %v3067_v5  ;;  %v3068_v13 = vld [vmem:[%s8297_s25 + $0x2c] sm:$0x7] }
 0x301   : > { %s8228_s11 = smov 72  }
 0x302   : > { %v2559_v16 = vpop.permute.xlu1 %2558  ;;  %v2557_v17 = vpop.permute.xlu0 %2556 }
 0x303   : > { %v2570_v18 = vsel %vm2562_vm3, %v2555_v10, %v2557_v17  ;;  %v2571_v19 = vsel %vm2562_vm3, %v2557_v17, %v2559_v16  ;;  %v3088_v10 = vrot.slane %v3067_v5, 1 }
 0x304   : > { %2590 = vst [vmem:[#allocation2 + $0x8b8] sm:$0x1c] %v2570_v18  ;;  %2591 = vst [vmem:[#allocation2 + $0x6d8] sm:$0x1c] %v2571_v19  ;;  %3012 = vrot.lane.b32.xlu1 %v2992_v9, %s8222_s4  ;;  %3010 = vrot.lane.b32.xlu0 %v3004_v14, %s8222_s4  ;;  %v3154_v14 = vld [vmem:[%s8297_s25 + $0x4] sm:$0x77] }
 0x305   : > { %v3090_v19 = vrot.slane %v3068_v13, 1 }
 0x306   : > { %v2622_v22 = vpop.permute.xlu1 %2621  ;;  %v2561_v23 = vpop.permute.xlu0 %2560 }
 0x307   : > { %v2572_v24 = vsel %vm2562_vm3, %v2559_v16, %v2561_v23 }
 0x308   : > { %2592 = vst [vmem:[#allocation2 + $0x290] sm:$0x1c] %v2572_v24  ;;  %3016 = vrot.lane.b32.xlu1 %v2993_v15, %s8222_s4  ;;  %3014 = vrot.lane.b32.xlu0 %v3005_v20, %s8222_s4  ;;  %v3089_v20 = vrot.slane %v3079_v12, 1  ;;  %v3237_v12 = vld [vmem:[%s8297_s25 + $0x14] sm:$0x77] }
 0x30a   : > { %v2626_v27 = vpop.permute.xlu1 %2625  ;;  %v2624_v28 = vpop.permute.xlu0 %2623 }
 0x30b   : > { %v2643_v29 = vsel %vm893_vm8, %v2622_v22, %v2624_v28  ;;  %v2644_v30 = vsel %vm893_vm8, %v2624_v28, %v2626_v27  ;;  %v3155_v22 = vld [vmem:[%s8297_s25 + $0xc] sm:$0x77]  ;;  %v3171_v28 = vrot.slane %v3154_v14, 6 }
 0x30c   : > { %2663 = vst [vmem:[#allocation2 + $0x620] sm:$0xe0] %v2643_v29  ;;  %2664 = vst [vmem:[#allocation2 + $0x1d0] sm:$0xe0] %v2644_v30  ;;  %3020 = vrot.lane.b32.xlu1 %v2994_v21, %s8222_s4  ;;  %3018 = vrot.lane.b32.xlu0 %v3006_v25, %s8222_s4  ;;  %v3166_v21 = vcombine.high %v3154_v14, %v3154_v14  ;;  %v3167_v29 = vcombine.high %v3155_v22, %v3155_v22  ;;  %v3156_v30 = vld [vmem:[%s8297_s25 + $0x14] sm:$0x77] }
 0x30e   : > { %v2630_v33 = vpop.permute.xlu1 %2629  ;;  %v2628_v34 = vpop.permute.xlu0 %2627 }
 0x30f   : > { %v2645_v35 = vsel %vm893_vm8, %v2626_v27, %v2628_v34  ;;  %v2646_v36 = vsel %vm893_vm8, %v2628_v34, %v2630_v33  ;;  %v3172_v27 = vrot.slane %v3166_v21, 6 }
 0x310   : > { %2665 = vst [vmem:[#allocation2 + $0x2b8] sm:$0xe0] %v2645_v35  ;;  %2666 = vst [vmem:[#allocation2 + $0xd0] sm:$0xe0] %v2646_v36  ;;  %3024 = vrot.lane.b32.xlu1 %v2995_v26, %s8222_s4  ;;  %3022 = vrot.lane.b32.xlu0 %v3007_v31, %s8222_s4  ;;  %v3174_v35 = vrot.slane %v3167_v29, 6  ;;  %v3173_v36 = vrot.slane %v3155_v22, 6 }
 0x312   : > { %v2634_v39 = vpop.permute.xlu1 %2633  ;;  %v2632_v40 = vpop.permute.xlu0 %2631 }
 0x313   : > { %v2647_v41 = vsel %vm893_vm8, %v2630_v33, %v2632_v40  ;;  %v2648_v42 = vsel %vm893_vm8, %v2632_v40, %v2634_v39 }
 0x314   : > { %2667 = vst [vmem:[#allocation2 + $0x450] sm:$0xe0] %v2647_v41  ;;  %2668 = vst [vmem:[#allocation2 + $0x820] sm:$0xe0] %v2648_v42  ;;  %3028 = vrot.lane.b32.xlu1 %v2996_v32, %s8222_s4  ;;  %3026 = vrot.lane.b32.xlu0 %v3008_v37, %s8222_s4  ;;  %v3168_v37 = vcombine.high %v3156_v30, %v3156_v30 }
 0x316   : > { %v2638_v47 = vpop.permute.xlu1 %2637  ;;  %v2636_v48 = vpop.permute.xlu0 %2635  ;;  %v3176_v42 = vrot.slane %v3168_v37, 6 }
 0x317   : > { %v2649_v49 = vsel %vm893_vm8, %v2634_v39, %v2636_v48  ;;  %v2650_v50 = vsel %vm893_vm8, %v2636_v48, %v2638_v47 }
 0x318   : > { %2669 = vst [vmem:[#allocation2 + $0x1c0] sm:$0xe0] %v2649_v49  ;;  %2670 = vst [vmem:[#allocation2 + $0x8b8] sm:$0xe0] %v2650_v50  ;;  %3091 = vrot.lane.b32.xlu1 %v3080_v43, %s8223_s5  ;;  %3030 = vrot.lane.b32.xlu0 %v7865_v44, %s8222_s4  ;;  %v3175_v43 = vrot.slane %v3156_v30, 6  ;;  %v3169_v44 = vcombine.high %v3157_v38, %v3157_v38 }
 0x31a   : > { %v2642_v55 = vpop.permute.xlu1 %2641  ;;  %v2640_v56 = vpop.permute.xlu0 %2639  ;;  %v3178_v50 = vrot.slane %v3169_v44, 6 }
 0x31b   : > { %v2651_v57 = vsel %vm893_vm8, %v2638_v47, %v2640_v56  ;;  %v2652_v58 = vsel %vm893_vm8, %v2640_v56, %v2642_v55 }
 0x31c   : > { %2671 = vst [vmem:[#allocation2 + $0x6d8] sm:$0xe0] %v2651_v57  ;;  %2672 = vst [vmem:[#allocation2 + $0x290] sm:$0xe0] %v2652_v58  ;;  %3095 = vrot.lane.b32.xlu1 %v3082_v51, %s8223_s5  ;;  %3093 = vrot.lane.b32.xlu0 %v3081_v52, %s8223_s5  ;;  %v3177_v51 = vrot.slane %v3157_v38, 6  ;;  %v3170_v52 = vcombine.high %v3158_v45, %v3158_v45  ;;  %v3179_v58 = vrot.slane %v3158_v45, 6 }
 0x31e   : > { %v2693_v63 = vpop.permute.xlu1 %2692  ;;  %v2691_v0 = vpop.permute.xlu0 %2690  ;;  %v3180_v57 = vrot.slane %v3170_v52, 6 }
 0x31f   : > { %v2712_v1 = vsel %vm974_vm9, %v2691_v0, %v2693_v63 }
 0x320   : > { %2732 = vst [vmem:[#allocation2 + $0x8a0] sm:$0x7] %v2712_v1  ;;  %3099 = vrot.lane.b32.xlu1 %v3084_v59, %s8223_s5  ;;  %3097 = vrot.lane.b32.xlu0 %v3083_v60, %s8223_s5  ;;  %v3235_v59 = vld [vmem:[%s8297_s25 + $0x4] sm:$0x77]  ;;  %v3159_v60 = vld [vmem:[%s8297_s25 + $0x2c] sm:$0x7] }
 0x321   : > { %v3252_v1 = vrot.slane %v3235_v59, 3 }
 0x322   : > { %v2697_v6 = vpop.permute.xlu1 %2696  ;;  %v2695_v7 = vpop.permute.xlu0 %2694 }
 0x323   : > { %v2713_v8 = vsel %vm974_vm9, %v2693_v63, %v2695_v7  ;;  %v2714_v9 = vsel %vm974_vm9, %v2695_v7, %v2697_v6 }
 0x324   : > { %2733 = vst [vmem:[#allocation2 + $0x3b0] sm:$0x7] %v2713_v8  ;;  %2734 = vst [vmem:[#allocation2 + $0x288] sm:$0x7] %v2714_v9  ;;  %3103 = vrot.lane.b32.xlu1 %v3086_v2, %s8223_s5  ;;  %3101 = vrot.lane.b32.xlu0 %v3085_v3, %s8223_s5  ;;  %v3181_v2 = vrot.slane %v3159_v60, 6  ;;  %v3247_v3 = vcombine.high %v3235_v59, %v3235_v59  ;;  %v3254_v9 = vrot.slane %v3236_v4, 3 }
 0x325   : > { %v3319_v59 = vld [vmem:[%s8297_s25 + $0x1c] sm:$0x77] }
 0x326   : > { %v2701_v15 = vpop.permute.xlu1 %2700  ;;  %v2699_v16 = vpop.permute.xlu0 %2698 }
 0x327   : > { %v2715_v17 = vsel %vm974_vm9, %v2697_v6, %v2699_v16  ;;  %v2716_v18 = vsel %vm974_vm9, %v2699_v16, %v2701_v15 }
 0x328   : > { %2735 = vst [vmem:[#allocation2 + $0x3b8] sm:$0x7] %v2715_v17  ;;  %2736 = vst [vmem:[#allocation2 + $0x840] sm:$0x7] %v2716_v18  ;;  %3107 = vrot.lane.b32.xlu1 %v3088_v10, %s8223_s5  ;;  %3105 = vrot.lane.b32.xlu0 %v3087_v11, %s8223_s5  ;;  %v3253_v10 = vrot.slane %v3247_v3, 3  ;;  %v3248_v11 = vcombine.high %v3236_v4, %v3236_v4  ;;  %v3256_v17 = vrot.slane %v3237_v12, 3 }
 0x32a   : > { %v2705_v23 = vpop.permute.xlu1 %2704  ;;  %v2703_v24 = vpop.permute.xlu0 %2702  ;;  %v3255_v18 = vrot.slane %v3248_v11, 3 }
 0x32b   : > { %v2717_v25 = vsel %vm974_vm9, %v2701_v15, %v2703_v24  ;;  %v2718_v26 = vsel %vm974_vm9, %v2703_v24, %v2705_v23 }
 0x32c   : > { %2737 = vst [vmem:[#allocation2 + $0x5b0] sm:$0x7] %v2717_v25  ;;  %2738 = vst [vmem:[#allocation2 + $0x4e8] sm:$0x7] %v2718_v26  ;;  %3111 = vrot.lane.b32.xlu1 %v3090_v19, %s8223_s5  ;;  %3109 = vrot.lane.b32.xlu0 %v3089_v20, %s8223_s5  ;;  %v3249_v19 = vcombine.high %v3237_v12, %v3237_v12  ;;  %v3238_v20 = vld [vmem:[%s8297_s25 + $0x1c] sm:$0x77] }
 0x32d   : > { %v3258_v24 = vrot.slane %v3238_v20, 3  ;;  %v3250_v26 = vcombine.high %v3238_v20, %v3238_v20 }
 0x32e   : > { %v2709_v31 = vpop.permute.xlu1 %2708  ;;  %v2707_v32 = vpop.permute.xlu0 %2706  ;;  %v3257_v25 = vrot.slane %v3249_v19, 3 }
 0x32f   : > { %v2719_v33 = vsel %vm974_vm9, %v2705_v23, %v2707_v32  ;;  %v2720_v34 = vsel %vm974_vm9, %v2707_v32, %v2709_v31 }
 0x330   : > { %2739 = vst [vmem:[#allocation2 + $0x780] sm:$0x7] %v2719_v33  ;;  %2740 = vst [vmem:[#allocation2 + $0x308] sm:$0x7] %v2720_v34  ;;  %3184 = vrot.lane.b32.xlu1 %v3172_v27, %s8224_s6  ;;  %3182 = vrot.lane.b32.xlu0 %v3171_v28, %s8224_s6  ;;  %v3239_v27 = vld [vmem:[%s8297_s25 + $0x24] sm:$0x77] }
 0x331   : > { %v3260_v32 = vrot.slane %v3239_v27, 3  ;;  %v3259_v33 = vrot.slane %v3250_v26, 3  ;;  %v3251_v34 = vcombine.high %v3239_v27, %v3239_v27 }
 0x332   : > { %v2771_v39 = vpop.permute.xlu1 %2770  ;;  %v2711_v40 = vpop.permute.xlu0 %2710 }
 0x333   : > { %v2721_v41 = vsel %vm974_vm9, %v2709_v31, %v2711_v40  ;;  %vm3032_vm9 = vcmask 64512  }
 0x334   : > { %2741 = vst [vmem:[#allocation2 + $0x698] sm:$0x7] %v2721_v41  ;;  %3188 = vrot.lane.b32.xlu1 %v3174_v35, %s8224_s6  ;;  %3186 = vrot.lane.b32.xlu0 %v3173_v36, %s8224_s6  ;;  %v3240_v35 = vld [vmem:[%s8297_s25 + $0x2c] sm:$0x7]  ;;  %v3261_v41 = vrot.slane %v3251_v34, 3 }
 0x335   : > { %v3262_v40 = vrot.slane %v3240_v35, 3 }
 0x336   : > { %v2775_v46 = vpop.permute.xlu1 %2774  ;;  %v2773_v47 = vpop.permute.xlu0 %2772 }
 0x337   : > { %v2792_v48 = vsel %vm1065_vm10, %v2771_v39, %v2773_v47  ;;  %v2793_v49 = vsel %vm1065_vm10, %v2773_v47, %v2775_v46 }
 0x338   : > { %2812 = vst [vmem:[#allocation2 + $0x8a0] sm:$0x38] %v2792_v48  ;;  %2813 = vst [vmem:[#allocation2 + $0x3b0] sm:$0x38] %v2793_v49  ;;  %3192 = vrot.lane.b32.xlu1 %v3176_v42, %s8224_s6  ;;  %3190 = vrot.lane.b32.xlu0 %v3175_v43, %s8224_s6  ;;  %v3316_v42 = vld [vmem:[%s8297_s25 + $0x4] sm:$0x77] }
 0x339   : > { %v3328_v47 = vcombine.high %v3316_v42, %v3316_v42  ;;  %v3317_v48 = vld [vmem:[%s8297_s25 + $0xc] sm:$0x77] }
 0x33a   : > { %v2779_v53 = vpop.permute.xlu1 %2778  ;;  %v2777_v54 = vpop.permute.xlu0 %2776 }
 0x33b   : > { %v2794_v55 = vsel %vm1065_vm10, %v2775_v46, %v2777_v54  ;;  %v2795_v56 = vsel %vm1065_vm10, %v2777_v54, %v2779_v53  ;;  %v3318_v54 = vld [vmem:[%s8297_s25 + $0x14] sm:$0x77] }
 0x33c   : > { %2814 = vst [vmem:[#allocation2 + $0x288] sm:$0x38] %v2794_v55  ;;  %2815 = vst [vmem:[#allocation2 + $0x3b8] sm:$0x38] %v2795_v56  ;;  %3196 = vrot.lane.b32.xlu1 %v3178_v50, %s8224_s6  ;;  %3194 = vrot.lane.b32.xlu0 %v3177_v51, %s8224_s6 }
 0x33e   : > { %v2783_v61 = vpop.permute.xlu1 %2782  ;;  %v2781_v62 = vpop.permute.xlu0 %2780 }
 0x33f   : > { %v2796_v63 = vsel %vm1065_vm10, %v2779_v53, %v2781_v62  ;;  %v2797_v0 = vsel %vm1065_vm10, %v2781_v62, %v2783_v61  ;;  %v3329_v53 = vcombine.high %v3317_v48, %v3317_v48 }
 0x340   : > { %2816 = vst [vmem:[#allocation2 + $0x840] sm:$0x38] %v2796_v63  ;;  %2817 = vst [vmem:[#allocation2 + $0x5b0] sm:$0x38] %v2797_v0  ;;  %3200 = vrot.lane.b32.xlu1 %v3180_v57, %s8224_s6  ;;  %3198 = vrot.lane.b32.xlu0 %v3179_v58, %s8224_s6  ;;  %v3330_v58 = vcombine.high %v3318_v54, %v3318_v54  ;;  %v3331_v0 = vcombine.high %v3319_v59, %v3319_v59 }
 0x342   : > { %v2787_v5 = vpop.permute.xlu1 %2786  ;;  %v2785_v6 = vpop.permute.xlu0 %2784 }
 0x343   : > { %v2798_v7 = vsel %vm1065_vm10, %v2783_v61, %v2785_v6  ;;  %v2799_v8 = vsel %vm1065_vm10, %v2785_v6, %v2787_v5 }
 0x344   : > { %2818 = vst [vmem:[#allocation2 + $0x4e8] sm:$0x38] %v2798_v7  ;;  %2819 = vst [vmem:[#allocation2 + $0x780] sm:$0x38] %v2799_v8  ;;  %3263 = vrot.lane.b32.xlu1 %v3252_v1, %s10954_s8  ;;  %3202 = vrot.lane.b32.xlu0 %v3181_v2, %s8224_s6  ;;  %v3320_v1 = vld [vmem:[%s8297_s25 + $0x24] sm:$0x77] }
 0x345   : > { %v3332_v6 = vcombine.high %v3320_v1, %v3320_v1  ;;  %v3385_v7 = vld [vmem:[%s8297_s25 + $0x4] sm:$0x77] }
 0x346   : > { %v2791_v13 = vpop.permute.xlu1 %2790  ;;  %v2789_v14 = vpop.permute.xlu0 %2788  ;;  %v3402_v12 = vrot.slane %v3385_v7, 5 }
 0x347   : > { %v2800_v15 = vsel %vm1065_vm10, %v2787_v5, %v2789_v14  ;;  %v2801_v16 = vsel %vm1065_vm10, %v2789_v14, %v2791_v13  ;;  %v3397_v13 = vcombine.high %v3385_v7, %v3385_v7  ;;  %v3321_v14 = vld [vmem:[%s8297_s25 + $0x2c] sm:$0x7]  ;;  %v3468_v7 = vld [vmem:[%s8297_s25 + $0x1c] sm:$0x77]  ;;  %vm3113_vm10 = vcmask 56320  }
 0x348   : > { %2820 = vst [vmem:[#allocation2 + $0x308] sm:$0x38] %v2800_v15  ;;  %2821 = vst [vmem:[#allocation2 + $0x698] sm:$0x38] %v2801_v16  ;;  %3267 = vrot.lane.b32.xlu1 %v3254_v9, %s10954_s8  ;;  %3265 = vrot.lane.b32.xlu0 %v3253_v10, %s10954_s8  ;;  %v3386_v15 = vld [vmem:[%s8297_s25 + $0xc] sm:$0x77] }
 0x349   : > { %v3404_v20 = vrot.slane %v3386_v15, 5 }
 0x34a   : > { %v2853_v21 = vpop.permute.xlu1 %2852  ;;  %v2851_v22 = vpop.permute.xlu0 %2850 }
 0x34b   : > { %v2872_v23 = vsel %vm1136_vm11, %v2851_v22, %v2853_v21  ;;  %v3398_v22 = vcombine.high %v3386_v15, %v3386_v15 }
 0x34c   : > { %2892 = vst [vmem:[#allocation2 + $0x1b0] ss:$1780 sps:$4 sm:$0xc1] %v2872_v23   ;;  %3271 = vrot.lane.b32.xlu1 %v3256_v17, %s10954_s8  ;;  %3269 = vrot.lane.b32.xlu0 %v3255_v18, %s10954_s8  ;;  %v3387_v23 = vld [vmem:[%s8297_s25 + $0x14] sm:$0x77] }
 0x34e   : > { %v2857_v28 = vpop.permute.xlu1 %2856  ;;  %v2855_v29 = vpop.permute.xlu0 %2854 }
 0x34f   : > { %v2873_v30 = vsel %vm1136_vm11, %v2853_v21, %v2855_v29  ;;  %v2874_v31 = vsel %vm1136_vm11, %v2855_v29, %v2857_v28  ;;  %v3403_v21 = vrot.slane %v3397_v13, 5  ;;  %v3405_v29 = vrot.slane %v3398_v22, 5 }
 0x350   : > { %2893 = vst [vmem:[#allocation2 + $0x408] ss:$-84 sps:$4 sm:$0xc1] %v2873_v30   ;;  %2894 = vst [vmem:[#allocation2 + $0x110] ss:$380 sps:$4 sm:$0xc1] %v2874_v31   ;;  %3275 = vrot.lane.b32.xlu1 %v3258_v24, %s10954_s8  ;;  %3273 = vrot.lane.b32.xlu0 %v3257_v25, %s10954_s8  ;;  %v3399_v30 = vcombine.high %v3387_v23, %v3387_v23  ;;  %v3480_v13 = vcombine.high %v3468_v7, %v3468_v7 }
 0x351   : > { %v3388_v31 = vld [vmem:[%s8297_s25 + $0x1c] sm:$0x77] }
 0x352   : > { %v2861_v36 = vpop.permute.xlu1 %2860  ;;  %v2859_v37 = vpop.permute.xlu0 %2858  ;;  %v3408_v35 = vrot.slane %v3388_v31, 5 }
 0x353   : > { %v2875_v38 = vsel %vm1136_vm11, %v2857_v28, %v2859_v37  ;;  %v2876_v39 = vsel %vm1136_vm11, %v2859_v37, %v2861_v36  ;;  %v3406_v28 = vrot.slane %v3387_v23, 5  ;;  %v3400_v37 = vcombine.high %v3388_v31, %v3388_v31 }
 0x354   : > { %2895 = vst [vmem:[#allocation2 + $0x38] ss:$900 sps:$4 sm:$0xc1] %v2875_v38   ;;  %2896 = vst [vmem:[#allocation2 + $0x458] ss:$1004 sps:$4 sm:$0xc1] %v2876_v39   ;;  %3279 = vrot.lane.b32.xlu1 %v3260_v32, %s10954_s8  ;;  %3277 = vrot.lane.b32.xlu0 %v3259_v33, %s10954_s8 }
 0x355   : > { %v3389_v38 = vld [vmem:[%s8297_s25 + $0x24] sm:$0x77] }
 0x356   : > { %v2865_v43 = vpop.permute.xlu1 %2864  ;;  %v2863_v44 = vpop.permute.xlu0 %2862 }
 0x357   : > { %v2877_v45 = vsel %vm1136_vm11, %v2861_v36, %v2863_v44  ;;  %v2878_v46 = vsel %vm1136_vm11, %v2863_v44, %v2865_v43  ;;  %v3407_v36 = vrot.slane %v3399_v30, 5  ;;  %v3409_v44 = vrot.slane %v3400_v37, 5  ;;  %v3556_v37 = vld [vmem:[%s8297_s25 + $0xc] sm:$0x77] }
 0x358   : > { %2897 = vst [vmem:[#allocation2 + $0x970] ss:$-956 sps:$4 sm:$0xc1] %v2877_v45   ;;  %2898 = vst [vmem:[#allocation2 + $0x1e8] ss:$772 sps:$4 sm:$0xc1] %v2878_v46   ;;  %3283 = vrot.lane.b32.xlu1 %v3262_v40, %s10954_s8  ;;  %3281 = vrot.lane.b32.xlu0 %v3261_v41, %s10954_s8  ;;  %v3401_v45 = vcombine.high %v3389_v38, %v3389_v38 }
 0x359   : > { %v3390_v46 = vld [vmem:[%s8297_s25 + $0x2c] sm:$0x7] }
 0x35a   : > { %v2869_v49 = vpop.permute.xlu1 %2868  ;;  %v2867_v50 = vpop.permute.xlu0 %2866 }
 0x35b   : > { %v2879_v51 = vsel %vm1136_vm11, %v2865_v43, %v2867_v50  ;;  %v2880_v52 = vsel %vm1136_vm11, %v2867_v50, %v2869_v49  ;;  %v3410_v43 = vrot.slane %v3389_v38, 5 }
 0x35c   : > { %2899 = vst [vmem:[#allocation2 + $0x6e0] ss:$164 sps:$4 sm:$0xc1] %v2879_v51   ;;  %2900 = vst [vmem:[#allocation2 + $0x4a8] ss:$-412 sps:$4 sm:$0xc1] %v2880_v52   ;;  %3335 = vrot.lane.b32.xlu1 %v3328_v47, %s10944_s22  ;;  %3333 = vrot.lane.b32.xlu0 %v3316_v42, %s10944_s22 }
 0x35d   : > { %v3465_v47 = vld [vmem:[%s8297_s25 + $0x4] sm:$0x77]  ;;  %v3412_v52 = vrot.slane %v3390_v46, 5 }
 0x35e   : > { %v2941_v55 = vpop.permute.xlu1 %2940  ;;  %v2871_v56 = vpop.permute.xlu0 %2870 }
 0x35f   : > { %v2881_v57 = vsel %vm1136_vm11, %v2869_v49, %v2871_v56  ;;  %vm3204_vm11 = vcmask 48128  }
 0x360   : > { %2901 = vst [vmem:[#allocation2 + $0x278] ss:$1060 sps:$4 sm:$0xc1] %v2881_v57   ;;  %3339 = vrot.lane.b32.xlu1 %v3329_v53, %s10944_s22  ;;  %3337 = vrot.lane.b32.xlu0 %v3317_v48, %s10944_s22  ;;  %v3411_v53 = vrot.slane %v3401_v45, 5  ;;  %v3557_v45 = vld [vmem:[%s8297_s25 + $0x14] sm:$0x77] }
 0x362   : > { %v2945_v60 = vpop.permute.xlu1 %2944  ;;  %v2943_v61 = vpop.permute.xlu0 %2942 }
 0x363   : > { %v2962_v62 = vsel %vm1217_vm12, %v2941_v55, %v2943_v61  ;;  %v2963_v63 = vsel %vm1217_vm12, %v2943_v61, %v2945_v60  ;;  %v3466_v55 = vld [vmem:[%s8297_s25 + $0xc] sm:$0x77]  ;;  %v3482_v61 = vrot.slane %v3465_v47, 2 }
 0x364   : > { %2982 = vst [vmem:[#allocation2 + $0x1b0] sm:$0xe] %v2962_v62  ;;  %2983 = vst [vmem:[#allocation2 + $0x408] sm:$0xe] %v2963_v63  ;;  %3343 = vrot.lane.b32.xlu1 %v3330_v58, %s10944_s22  ;;  %3341 = vrot.lane.b32.xlu0 %v3318_v54, %s10944_s22  ;;  %v3477_v54 = vcombine.high %v3465_v47, %v3465_v47  ;;  %v3478_v62 = vcombine.high %v3466_v55, %v3466_v55  ;;  %v3467_v63 = vld [vmem:[%s8297_s25 + $0x14] sm:$0x77] }
 0x366   : > { %v2949_v2 = vpop.permute.xlu1 %2948  ;;  %v2947_v3 = vpop.permute.xlu0 %2946 }
 0x367   : > { %v2964_v4 = vsel %vm1217_vm12, %v2945_v60, %v2947_v3  ;;  %v2965_v5 = vsel %vm1217_vm12, %v2947_v3, %v2949_v2  ;;  %v3483_v60 = vrot.slane %v3477_v54, 2 }
 0x368   : > { %2984 = vst [vmem:[#allocation2 + $0x110] sm:$0xe] %v2964_v4  ;;  %2985 = vst [vmem:[#allocation2 + $0x38] sm:$0xe] %v2965_v5  ;;  %3347 = vrot.lane.b32.xlu1 %v3331_v0, %s10944_s22  ;;  %3345 = vrot.lane.b32.xlu0 %v3319_v59, %s10944_s22  ;;  %v3485_v4 = vrot.slane %v3478_v62, 2  ;;  %v3484_v5 = vrot.slane %v3466_v55, 2 }
 0x36a   : > { %v2953_v8 = vpop.permute.xlu1 %2952  ;;  %v2951_v9 = vpop.permute.xlu0 %2950 }
 0x36b   : > { %v2966_v10 = vsel %vm1217_vm12, %v2949_v2, %v2951_v9  ;;  %v2967_v11 = vsel %vm1217_vm12, %v2951_v9, %v2953_v8 }
 0x36c   : > { %2986 = vst [vmem:[#allocation2 + $0x458] sm:$0xe] %v2966_v10  ;;  %2987 = vst [vmem:[#allocation2 + $0x970] sm:$0xe] %v2967_v11  ;;  %3351 = vrot.lane.b32.xlu1 %v3332_v6, %s10944_s22  ;;  %3349 = vrot.lane.b32.xlu0 %v3320_v1, %s10944_s22  ;;  %v3479_v6 = vcombine.high %v3467_v63, %v3467_v63 }
 0x36e   : > { %v2957_v16 = vpop.permute.xlu1 %2956  ;;  %v2955_v17 = vpop.permute.xlu0 %2954  ;;  %v3487_v11 = vrot.slane %v3479_v6, 2 }
 0x36f   : > { %v2968_v18 = vsel %vm1217_vm12, %v2953_v8, %v2955_v17  ;;  %v2969_v19 = vsel %vm1217_vm12, %v2955_v17, %v2957_v16 }
 0x370   : > { %2988 = vst [vmem:[#allocation2 + $0x1e8] sm:$0xe] %v2968_v18  ;;  %2989 = vst [vmem:[#allocation2 + $0x6e0] sm:$0xe] %v2969_v19  ;;  %3413 = vrot.lane.b32.xlu1 %v3402_v12, %s8215_s23  ;;  %3353 = vrot.lane.b32.xlu0 %v3321_v14, %s10944_s22  ;;  %v3486_v12 = vrot.slane %v3467_v63, 2  ;;  %v3489_v19 = vrot.slane %v3480_v13, 2 }
 0x371   : > { %v3469_v14 = vld [vmem:[%s8297_s25 + $0x24] sm:$0x77]  ;;  %v3666_v13 = vld [vmem:[%s8297_s25 + $0x10] sm:$0x77] }
 0x372   : > { %v2961_v24 = vpop.permute.xlu1 %2960  ;;  %v2959_v25 = vpop.permute.xlu0 %2958 }
 0x373   : > { %v2970_v26 = vsel %vm1217_vm12, %v2957_v16, %v2959_v25  ;;  %v2971_v27 = vsel %vm1217_vm12, %v2959_v25, %v2961_v24  ;;  %vm10941_vm12 = vcmask 39936  }
 0x374   : > { %2990 = vst [vmem:[#allocation2 + $0x4a8] sm:$0xe] %v2970_v26  ;;  %2991 = vst [vmem:[#allocation2 + $0x278] sm:$0xe] %v2971_v27  ;;  %3417 = vrot.lane.b32.xlu1 %v3404_v20, %s8215_s23  ;;  %3415 = vrot.lane.b32.xlu0 %v3403_v21, %s8215_s23  ;;  %v3488_v20 = vrot.slane %v3468_v7, 2  ;;  %v3481_v21 = vcombine.high %v3469_v14, %v3469_v14  ;;  %v3490_v27 = vrot.slane %v3469_v14, 2 }
 0x376   : > { %v3013_v32 = vpop.permute.xlu1 %3012  ;;  %v3011_v33 = vpop.permute.xlu0 %3010  ;;  %v3491_v26 = vrot.slane %v3481_v21, 2  ;;  %v3667_v21 = vld [vmem:[%s8297_s25 + $0x18] sm:$0x77] }
 0x377   : > { %v3033_v34 = vsel %vm3032_vm9, %v3011_v33, %v3013_v32 }
 0x378   : > { %3053 = vst [vmem:[#allocation2 + $0x1b0] sm:$0x70] %v3033_v34  ;;  %3421 = vrot.lane.b32.xlu1 %v3406_v28, %s8215_s23  ;;  %3419 = vrot.lane.b32.xlu0 %v3405_v29, %s8215_s23  ;;  %v3555_v28 = vld [vmem:[%s8297_s25 + $0x4] sm:$0x77]  ;;  %v3470_v29 = vld [vmem:[%s8297_s25 + $0x2c] sm:$0x7] }
 0x379   : > { %v3572_v34 = vrot.slane %v3555_v28, 7 }
 0x37a   : > { %v3017_v39 = vpop.permute.xlu1 %3016  ;;  %v3015_v40 = vpop.permute.xlu0 %3014 }
 0x37b   : > { %v3034_v41 = vsel %vm3032_vm9, %v3013_v32, %v3015_v40  ;;  %v3035_v42 = vsel %vm3032_vm9, %v3015_v40, %v3017_v39 }
 0x37c   : > { %3054 = vst [vmem:[#allocation2 + $0x408] sm:$0x70] %v3034_v41  ;;  %3055 = vst [vmem:[#allocation2 + $0x110] sm:$0x70] %v3035_v42  ;;  %3425 = vrot.lane.b32.xlu1 %v3408_v35, %s8215_s23  ;;  %3423 = vrot.lane.b32.xlu0 %v3407_v36, %s8215_s23  ;;  %v3492_v35 = vrot.slane %v3470_v29, 2  ;;  %v3567_v36 = vcombine.high %v3555_v28, %v3555_v28  ;;  %v3574_v42 = vrot.slane %v3556_v37, 7 }
 0x37d   : > { %v3684_v29 = vrot.slane %v3666_v13, 1 }
 0x37e   : > { %v3021_v48 = vpop.permute.xlu1 %3020  ;;  %v3019_v49 = vpop.permute.xlu0 %3018 }
 0x37f   : > { %v3036_v50 = vsel %vm3032_vm9, %v3017_v39, %v3019_v49  ;;  %v3037_v51 = vsel %vm3032_vm9, %v3019_v49, %v3021_v48 }
 0x380   : > { %3056 = vst [vmem:[#allocation2 + $0x38] sm:$0x70] %v3036_v50  ;;  %3057 = vst [vmem:[#allocation2 + $0x458] sm:$0x70] %v3037_v51  ;;  %3429 = vrot.lane.b32.xlu1 %v3410_v43, %s8215_s23  ;;  %3427 = vrot.lane.b32.xlu0 %v3409_v44, %s8215_s23  ;;  %v3573_v43 = vrot.slane %v3567_v36, 7  ;;  %v3568_v44 = vcombine.high %v3556_v37, %v3556_v37  ;;  %v3576_v50 = vrot.slane %v3557_v45, 7 }
 0x382   : > { %v3025_v56 = vpop.permute.xlu1 %3024  ;;  %v3023_v57 = vpop.permute.xlu0 %3022  ;;  %v3575_v51 = vrot.slane %v3568_v44, 7 }
 0x383   : > { %v3038_v58 = vsel %vm3032_vm9, %v3021_v48, %v3023_v57  ;;  %v3039_v59 = vsel %vm3032_vm9, %v3023_v57, %v3025_v56 }
 0x384   : > { %3058 = vst [vmem:[#allocation2 + $0x970] sm:$0x70] %v3038_v58  ;;  %3059 = vst [vmem:[#allocation2 + $0x1e8] sm:$0x70] %v3039_v59  ;;  %3433 = vrot.lane.b32.xlu1 %v3412_v52, %s8215_s23  ;;  %3431 = vrot.lane.b32.xlu0 %v3411_v53, %s8215_s23  ;;  %v3569_v52 = vcombine.high %v3557_v45, %v3557_v45  ;;  %v3558_v53 = vld [vmem:[%s8297_s25 + $0x1c] sm:$0x77] }
 0x385   : > { %v3578_v57 = vrot.slane %v3558_v53, 7  ;;  %v3570_v59 = vcombine.high %v3558_v53, %v3558_v53  ;;  %s8234_s23 = smov 14  }
 0x386   : > { %v3029_v0 = vpop.permute.xlu1 %3028  ;;  %v3027_v1 = vpop.permute.xlu0 %3026  ;;  %v3577_v58 = vrot.slane %v3569_v52, 7 }
 0x387   : > { %v3040_v2 = vsel %vm3032_vm9, %v3025_v56, %v3027_v1  ;;  %v3041_v3 = vsel %vm3032_vm9, %v3027_v1, %v3029_v0 }
 0x388   : > { %3060 = vst [vmem:[#allocation2 + $0x6e0] sm:$0x70] %v3040_v2  ;;  %3061 = vst [vmem:[#allocation2 + $0x4a8] sm:$0x70] %v3041_v3  ;;  %3495 = vrot.lane.b32.xlu1 %v3483_v60, %s8216_s24  ;;  %3493 = vrot.lane.b32.xlu0 %v3482_v61, %s8216_s24  ;;  %v3559_v60 = vld [vmem:[%s8297_s25 + $0x24] sm:$0x77] }
 0x389   : > { %v3580_v1 = vrot.slane %v3559_v60, 7  ;;  %v3579_v2 = vrot.slane %v3570_v59, 7  ;;  %v3571_v3 = vcombine.high %v3559_v60, %v3559_v60 }
 0x38a   : > { %v3092_v8 = vpop.permute.xlu1 %3091  ;;  %v3031_v9 = vpop.permute.xlu0 %3030 }
 0x38b   : > { %v3042_v10 = vsel %vm3032_vm9, %v3029_v0, %v3031_v9 }
 0x38c   : > { %3062 = vst [vmem:[#allocation2 + $0x278] sm:$0x70] %v3042_v10  ;;  %3499 = vrot.lane.b32.xlu1 %v3485_v4, %s8216_s24  ;;  %3497 = vrot.lane.b32.xlu0 %v3484_v5, %s8216_s24  ;;  %v3560_v4 = vld [vmem:[%s8297_s25 + $0x2c] sm:$0x7] }
 0x38d   : > { %v3665_v5 = vld [vmem:[%s8297_s25 + $0x8] sm:$0x77]  ;;  %v3582_v10 = vrot.slane %v3560_v4, 7  ;;  %v3638_v4 = vld [vmem:[%s8297_s25 + $0x20] sm:$0x77] }
 0x38e   : > { %v3096_v15 = vpop.permute.xlu1 %3095  ;;  %v3094_v16 = vpop.permute.xlu0 %3093  ;;  %3662 = vst [vmem:[#allocation2 + $0x1a0] sm:$0x70] %v3638_v4 }
 0x38f   : > { %v3114_v17 = vsel %vm3113_vm10, %v3092_v8, %v3094_v16  ;;  %v3115_v18 = vsel %vm3113_vm10, %v3094_v16, %v3096_v15 }
 0x390   : > { %3134 = vst [vmem:[#allocation2 + $0x4d8] ss:$-804 sps:$4 sm:$0x83] %v3114_v17   ;;  %3135 = vst [vmem:[#allocation2 + $0x40] ss:$972 sps:$4 sm:$0x83] %v3115_v18   ;;  %3503 = vrot.lane.b32.xlu1 %v3487_v11, %s8216_s24  ;;  %3501 = vrot.lane.b32.xlu0 %v3486_v12, %s8216_s24  ;;  %v3677_v12 = vcombine.high %v3665_v5, %v3665_v5 }
 0x391   : > { %v3581_v11 = vrot.slane %v3571_v3, 7 }
 0x392   : > { %v3100_v22 = vpop.permute.xlu1 %3099  ;;  %v3098_v23 = vpop.permute.xlu0 %3097  ;;  %v3683_v18 = vrot.slane %v3677_v12, 1 }
 0x393   : > { %v3116_v24 = vsel %vm3113_vm10, %v3096_v15, %v3098_v23  ;;  %v3117_v25 = vsel %vm3113_vm10, %v3098_v23, %v3100_v22 }
 0x394   : > { %3136 = vst [vmem:[#allocation2 + $0x740] ss:$-1580 sps:$4 sm:$0x83] %v3116_v24   ;;  %3137 = vst [vmem:[#allocation2 + $0x668] ss:$-1580 sps:$4 sm:$0x83] %v3117_v25   ;;  %3507 = vrot.lane.b32.xlu1 %v3489_v19, %s8216_s24  ;;  %3505 = vrot.lane.b32.xlu0 %v3488_v20, %s8216_s24  ;;  %v3678_v20 = vcombine.high %v3666_v13, %v3666_v13 }
 0x395   : > { %v3682_v19 = vrot.slane %v3665_v5, 1 }
 0x396   : > { %v3104_v30 = vpop.permute.xlu1 %3103  ;;  %v3102_v31 = vpop.permute.xlu0 %3101  ;;  %v3685_v28 = vrot.slane %v3678_v20, 1 }
 0x397   : > { %v3118_v32 = vsel %vm3113_vm10, %v3100_v22, %v3102_v31  ;;  %v3119_v33 = vsel %vm3113_vm10, %v3102_v31, %v3104_v30  ;;  %v3635_v22 = vld [vmem:[%s8297_s25 + $0x8] sm:$0x77]  ;;  %v3636_v31 = vld [vmem:[%s8297_s25 + $0x10] sm:$0x77] }
 0x398   : > { %3138 = vst [vmem:[#allocation2 + $0x218] ss:$580 sps:$4 sm:$0x83] %v3118_v32   ;;  %3139 = vst [vmem:[#allocation2 + $0x520] ss:$1108 sps:$4 sm:$0x83] %v3119_v33   ;;  %3511 = vrot.lane.b32.xlu1 %v3491_v26, %s8216_s24  ;;  %3509 = vrot.lane.b32.xlu0 %v3490_v27, %s8216_s24  ;;  %v3645_v27 = vcombine.low %v3635_v22, %v3635_v22  ;;  %v3646_v33 = vcombine.low %v3636_v31, %v3636_v31 }
 0x399   : > { %3656 = vst [vmem:[#allocation2 + $0xf0] sm:$0x70] %v3635_v22  ;;  %v3668_v32 = vld [vmem:[%s8297_s25 + $0x20] sm:$0x77]  ;;  %3658 = vst [vmem:[#allocation2 + $0x978] sm:$0x70] %v3636_v31 }
 0x39a   : > { %v3108_v38 = vpop.permute.xlu1 %3107  ;;  %v3106_v39 = vpop.permute.xlu0 %3105  ;;  %3655 = vst [vmem:[#allocation2 + $0x678] sm:$0x70] %v3645_v27  ;;  %3657 = vst [vmem:[#allocation2 + $0x330] sm:$0x70] %v3646_v33 }
 0x39b   : > { %v3120_v40 = vsel %vm3113_vm10, %v3104_v30, %v3106_v39  ;;  %v3121_v41 = vsel %vm3113_vm10, %v3106_v39, %v3108_v38  ;;  %v3679_v30 = vcombine.high %v3667_v21, %v3667_v21  ;;  %v3680_v39 = vcombine.high %v3668_v32, %v3668_v32 }
 0x39c   : > { %3140 = vst [vmem:[#allocation2 + $0x5f0] ss:$-1028 sps:$4 sm:$0x83] %v3120_v40   ;;  %3141 = vst [vmem:[#allocation2 + $0x8c8] ss:$-484 sps:$4 sm:$0x83] %v3121_v41   ;;  %3583 = vrot.lane.b32.xlu1 %v3572_v34, %s8217_s30  ;;  %3513 = vrot.lane.b32.xlu0 %v3492_v35, %s8216_s24 }
 0x39d   : > { %v3687_v37 = vrot.slane %v3679_v30, 1  ;;  %v3669_v40 = vld [vmem:[%s8297_s25 + $0x28] sm:$0x77]  ;;  %v3689_v45 = vrot.slane %v3680_v39, 1  ;;  %s8235_s24 = smov 13  }
 0x39e   : > { %v3112_v46 = vpop.permute.xlu1 %3111  ;;  %v3110_v47 = vpop.permute.xlu0 %3109  ;;  %v3690_v53 = vrot.slane %v3669_v40, 1 }
 0x39f   : > { %v3122_v48 = vsel %vm3113_vm10, %v3108_v38, %v3110_v47  ;;  %v3123_v49 = vsel %vm3113_vm10, %v3110_v47, %v3112_v46  ;;  %v3686_v38 = vrot.slane %v3667_v21, 1  ;;  %v3688_v46 = vrot.slane %v3668_v32, 1  ;;  %v3759_v21 = vld [vmem:[%s8297_s25 + $0x20] sm:$0x77] }
 0x3a0   : > { %3142 = vst [vmem:[#allocation2 + $0x4f0] ss:$-68 sps:$4 sm:$0x83] %v3122_v48   ;;  %3143 = vst [vmem:[#allocation2 + $0x168] ss:$276 sps:$4 sm:$0x83] %v3123_v49   ;;  %3587 = vrot.lane.b32.xlu1 %v3574_v42, %s8217_s30  ;;  %3585 = vrot.lane.b32.xlu0 %v3573_v43, %s8217_s30  ;;  %v3681_v47 = vcombine.high %v3669_v40, %v3669_v40  ;;  %v3771_v27 = vcombine.high %v3759_v21, %v3759_v21 }
 0x3a2   : > { %v3185_v54 = vpop.permute.xlu1 %3184  ;;  %v3183_v55 = vpop.permute.xlu0 %3182  ;;  %v3691_v52 = vrot.slane %v3681_v47, 1 }
 0x3a3   : > { %v3205_v56 = vsel %vm3204_vm11, %v3183_v55, %v3185_v54  ;;  %v3670_v55 = vld [vmem:[%s8297_s25 + $0x30] sm:$0x7] }
 0x3a4   : > { %3225 = vst [vmem:[#allocation2 + $0x4d8] sm:$0x1c] %v3205_v56  ;;  %3591 = vrot.lane.b32.xlu1 %v3576_v50, %s8217_s30  ;;  %3589 = vrot.lane.b32.xlu0 %v3575_v51, %s8217_s30 }
 0x3a6   : > { %v3189_v61 = vpop.permute.xlu1 %3188  ;;  %v3187_v62 = vpop.permute.xlu0 %3186 }
 0x3a7   : > { %v3206_v63 = vsel %vm3204_vm11, %v3185_v54, %v3187_v62  ;;  %v3207_v0 = vsel %vm3204_vm11, %v3187_v62, %v3189_v61  ;;  %v3756_v54 = vld [vmem:[%s8297_s25 + $0x8] sm:$0x77] }
 0x3a8   : > { %3226 = vst [vmem:[#allocation2 + $0x40] sm:$0x1c] %v3206_v63  ;;  %3227 = vst [vmem:[#allocation2 + $0x740] sm:$0x1c] %v3207_v0  ;;  %3595 = vrot.lane.b32.xlu1 %v3578_v57, %s8217_s30  ;;  %3593 = vrot.lane.b32.xlu0 %v3577_v58, %s8217_s30  ;;  %v3637_v58 = vld [vmem:[%s8297_s25 + $0x18] sm:$0x77]  ;;  %v3768_v0 = vcombine.high %v3756_v54, %v3756_v54 }
 0x3a9   : > { %3660 = vst [vmem:[#allocation2 + $0x640] sm:$0x70] %v3637_v58  ;;  %v3773_v62 = vrot.slane %v3756_v54, 6  ;;  %v3692_v63 = vrot.slane %v3670_v55, 1 }
 0x3aa   : > { %v3193_v6 = vpop.permute.xlu1 %3192  ;;  %v3191_v7 = vpop.permute.xlu0 %3190 }
 0x3ab   : > { %v3208_v8 = vsel %vm3204_vm11, %v3189_v61, %v3191_v7  ;;  %v3209_v9 = vsel %vm3204_vm11, %v3191_v7, %v3193_v6  ;;  %v3647_v61 = vcombine.low %v3637_v58, %v3637_v58  ;;  %v3648_v7 = vcombine.low %v3638_v4, %v3638_v4  ;;  %v3841_v4 = vld [vmem:[%s8297_s25 + $0x28] sm:$0x77] }
 0x3ac   : > { %3228 = vst [vmem:[#allocation2 + $0x668] sm:$0x1c] %v3208_v8  ;;  %3229 = vst [vmem:[#allocation2 + $0x218] sm:$0x1c] %v3209_v9  ;;  %3599 = vrot.lane.b32.xlu1 %v3580_v1, %s8217_s30  ;;  %3597 = vrot.lane.b32.xlu0 %v3579_v2, %s8217_s30  ;;  %v3757_v1 = vld [vmem:[%s8297_s25 + $0x10] sm:$0x77] }
 0x3ad   : > { %3659 = vst [vmem:[#allocation2] sm:$0x70] %v3647_v61  ;;  %v3775_v8 = vrot.slane %v3757_v1, 6  ;;  %v3774_v9 = vrot.slane %v3768_v0, 6  ;;  %3661 = vst [vmem:[#allocation2 + $0x128] sm:$0x70] %v3648_v7 }
 0x3ae   : > { %v3197_v14 = vpop.permute.xlu1 %3196  ;;  %v3195_v15 = vpop.permute.xlu0 %3194  ;;  %v3840_v61 = vld [vmem:[%s8297_s25 + $0x20] sm:$0x77] }
 0x3af   : > { %v3210_v16 = vsel %vm3204_vm11, %v3193_v6, %v3195_v15  ;;  %v3211_v17 = vsel %vm3204_vm11, %v3195_v15, %v3197_v14 }
 0x3b0   : > { %3230 = vst [vmem:[#allocation2 + $0x520] sm:$0x1c] %v3210_v16  ;;  %3231 = vst [vmem:[#allocation2 + $0x5f0] sm:$0x1c] %v3211_v17  ;;  %3603 = vrot.lane.b32.xlu1 %v3582_v10, %s8217_s30  ;;  %3601 = vrot.lane.b32.xlu0 %v3581_v11, %s8217_s30  ;;  %v3769_v10 = vcombine.high %v3757_v1, %v3757_v1  ;;  %v3758_v11 = vld [vmem:[%s8297_s25 + $0x18] sm:$0x77] }
 0x3b1   : > { %v3770_v20 = vcombine.high %v3758_v11, %v3758_v11  ;;  %s8236_s30 = smov 16  }
 0x3b2   : > { %v3201_v23 = vpop.permute.xlu1 %3200  ;;  %v3199_v24 = vpop.permute.xlu0 %3198 }
 0x3b3   : > { %v3212_v25 = vsel %vm3204_vm11, %v3197_v14, %v3199_v24  ;;  %v3213_v26 = vsel %vm3204_vm11, %v3199_v24, %v3201_v23  ;;  %v3639_v14 = vld [vmem:[%s8297_s25 + $0x28] sm:$0x77] }
 0x3b4   : > { %3232 = vst [vmem:[#allocation2 + $0x8c8] sm:$0x1c] %v3212_v25  ;;  %3233 = vst [vmem:[#allocation2 + $0x4f0] sm:$0x1c] %v3213_v26  ;;  %3695 = vrot.lane.b32.xlu1 %v3683_v18, %s8226_s9  ;;  %3693 = vrot.lane.b32.xlu0 %v3682_v19, %s8226_s9  ;;  %v3649_v17 = vcombine.low %v3639_v14, %v3639_v14  ;;  %v3777_v18 = vrot.slane %v3758_v11, 6  ;;  %v3776_v19 = vrot.slane %v3769_v10, 6 }
 0x3b5   : > { %3664 = vst [vmem:[#allocation2 + $0x100] sm:$0x70] %v3639_v14  ;;  %v3779_v25 = vrot.slane %v3759_v21, 6  ;;  %v3778_v26 = vrot.slane %v3770_v20, 6  ;;  %v3860_v10 = vrot.slane %v3840_v61, 3  ;;  %v3853_v11 = vcombine.high %v3841_v4, %v3841_v4 }
 0x3b6   : > { %v3264_v34 = vpop.permute.xlu1 %3263  ;;  %v3203_v35 = vpop.permute.xlu0 %3202  ;;  %3663 = vst [vmem:[#allocation2 + $0x3f0] sm:$0x70] %v3649_v17  ;;  %v3862_v17 = vrot.slane %v3841_v4, 3 }
 0x3b7   : > { %v3214_v36 = vsel %vm3204_vm11, %v3201_v23, %v3203_v35 }
 0x3b8   : > { %3234 = vst [vmem:[#allocation2 + $0x168] sm:$0x1c] %v3214_v36  ;;  %3699 = vrot.lane.b32.xlu1 %v3685_v28, %s8226_s9  ;;  %3697 = vrot.lane.b32.xlu0 %v3684_v29, %s8226_s9  ;;  %v3760_v28 = vld [vmem:[%s8297_s25 + $0x28] sm:$0x77]  ;;  %v3761_v36 = vld [vmem:[%s8297_s25 + $0x30] sm:$0x7] }
 0x3b9   : > { %v3781_v33 = vrot.slane %v3760_v28, 6  ;;  %v3772_v35 = vcombine.high %v3760_v28, %v3760_v28 }
 0x3ba   : > { %v3268_v41 = vpop.permute.xlu1 %3267  ;;  %v3266_v42 = vpop.permute.xlu0 %3265 }
 0x3bb   : > { %v3286_v43 = vsel %vm10941_vm12, %v3264_v34, %v3266_v42  ;;  %v3287_v44 = vsel %vm10941_vm12, %v3266_v42, %v3268_v41  ;;  %v3780_v34 = vrot.slane %v3771_v27, 6  ;;  %v3783_v42 = vrot.slane %v3761_v36, 6  ;;  %v3920_v36 = vld [vmem:[%s8297_s25 + $0x18] sm:$0x77] }
 0x3bc   : > { %3306 = vst [vmem:[#allocation2 + $0x4d8] sm:$0xe0] %v3286_v43  ;;  %3307 = vst [vmem:[#allocation2 + $0x40] sm:$0xe0] %v3287_v44  ;;  %3703 = vrot.lane.b32.xlu1 %v3687_v37, %s8226_s9  ;;  %3701 = vrot.lane.b32.xlu0 %v3686_v38, %s8226_s9  ;;  %v3837_v37 = vld [vmem:[%s8297_s25 + $0x8] sm:$0x77] }
 0x3bd   : > { %v3782_v43 = vrot.slane %v3772_v35, 6  ;;  %v3849_v44 = vcombine.high %v3837_v37, %v3837_v37 }
 0x3be   : > { %v3272_v48 = vpop.permute.xlu1 %3271  ;;  %v3270_v49 = vpop.permute.xlu0 %3269 }
 0x3bf   : > { %v3288_v50 = vsel %vm10941_vm12, %v3268_v41, %v3270_v49  ;;  %v3289_v51 = vsel %vm10941_vm12, %v3270_v49, %v3272_v48 }
 0x3c0   : > { %3308 = vst [vmem:[#allocation2 + $0x740] sm:$0xe0] %v3288_v50  ;;  %3309 = vst [vmem:[#allocation2 + $0x668] sm:$0xe0] %v3289_v51  ;;  %3707 = vrot.lane.b32.xlu1 %v3689_v45, %s8226_s9  ;;  %3705 = vrot.lane.b32.xlu0 %v3688_v46, %s8226_s9  ;;  %v3838_v45 = vld [vmem:[%s8297_s25 + $0x10] sm:$0x77] }
 0x3c1   : > { %v3855_v50 = vrot.slane %v3849_v44, 3  ;;  %v3854_v51 = vrot.slane %v3837_v37, 3 }
 0x3c2   : > { %v3276_v56 = vpop.permute.xlu1 %3275  ;;  %v3274_v57 = vpop.permute.xlu0 %3273 }
 0x3c3   : > { %v3290_v59 = vsel %vm10941_vm12, %v3272_v48, %v3274_v57  ;;  %v3291_v60 = vsel %vm10941_vm12, %v3274_v57, %v3276_v56 }
 0x3c4   : > { %3310 = vst [vmem:[#allocation2 + $0x218] sm:$0xe0] %v3290_v59  ;;  %3311 = vst [vmem:[#allocation2 + $0x520] sm:$0xe0] %v3291_v60  ;;  %3711 = vrot.lane.b32.xlu1 %v3691_v52, %s8226_s9  ;;  %3709 = vrot.lane.b32.xlu0 %v3690_v53, %s8226_s9  ;;  %v3850_v52 = vcombine.high %v3838_v45, %v3838_v45  ;;  %v3839_v53 = vld [vmem:[%s8297_s25 + $0x18] sm:$0x77] }
 0x3c5   : > { %v3856_v59 = vrot.slane %v3838_v45, 3  ;;  %v3851_v60 = vcombine.high %v3839_v53, %v3839_v53 }
 0x3c6   : > { %v3280_v2 = vpop.permute.xlu1 %3279  ;;  %v3278_v3 = vpop.permute.xlu0 %3277  ;;  %v3857_v58 = vrot.slane %v3850_v52, 3 }
 0x3c7   : > { %v3292_v5 = vsel %vm10941_vm12, %v3276_v56, %v3278_v3  ;;  %v3293_v6 = vsel %vm10941_vm12, %v3278_v3, %v3280_v2  ;;  %v3859_v1 = vrot.slane %v3851_v60, 3  ;;  %v3852_v3 = vcombine.high %v3840_v61, %v3840_v61 }
 0x3c8   : > { %3312 = vst [vmem:[#allocation2 + $0x5f0] sm:$0xe0] %v3292_v5  ;;  %3313 = vst [vmem:[#allocation2 + $0x8c8] sm:$0xe0] %v3293_v6  ;;  %3784 = vrot.lane.b32.xlu1 %v3773_v62, %s8227_s10  ;;  %3713 = vrot.lane.b32.xlu0 %v3692_v63, %s8226_s9 }
 0x3ca   : > { %v3284_v12 = vpop.permute.xlu1 %3283  ;;  %v3282_v13 = vpop.permute.xlu0 %3281 }
 0x3cb   : > { %v3294_v15 = vsel %vm10941_vm12, %v3280_v2, %v3282_v13  ;;  %v3295_v16 = vsel %vm10941_vm12, %v3282_v13, %v3284_v12  ;;  %v3858_v2 = vrot.slane %v3839_v53, 3 }
 0x3cc   : > { %3314 = vst [vmem:[#allocation2 + $0x4f0] sm:$0xe0] %v3294_v15  ;;  %3315 = vst [vmem:[#allocation2 + $0x168] sm:$0xe0] %v3295_v16  ;;  %3788 = vrot.lane.b32.xlu1 %v3775_v8, %s8227_s10  ;;  %3786 = vrot.lane.b32.xlu0 %v3774_v9, %s8227_s10  ;;  %v3861_v9 = vrot.slane %v3852_v3, 3  ;;  %v3863_v16 = vrot.slane %v3853_v11, 3 }
 0x3cd   : > { %v6701_v3 = vld [vmem:[#allocation2 + $0x40] sm:$0xff]  ;;  %v6690_v11 = vld [vmem:[#allocation2 + $0x1b0] sm:$0xff] }
 0x3ce   : > { %v3336_v22 = vpop.permute.xlu1 %3335  ;;  %v3334_v23 = vpop.permute.xlu0 %3333 }
 0x3cf   : > { %v3355_v24 = vsel %vm1621_vm5, %v3334_v23, %v3336_v22 }
 0x3d0   : > { %3375 = vst [vmem:[#allocation2 + $0x498] sm:$0x7] %v3355_v24  ;;  %3792 = vrot.lane.b32.xlu1 %v3777_v18, %s8227_s10  ;;  %3790 = vrot.lane.b32.xlu0 %v3776_v19, %s8227_s10  ;;  %v3842_v18 = vld [vmem:[%s8297_s25 + $0x30] sm:$0x7]  ;;  %v3918_v24 = vld [vmem:[%s8297_s25 + $0x8] sm:$0x77] }
 0x3d1   : > { %v3864_v23 = vrot.slane %v3842_v18, 3 }
 0x3d2   : > { %v3340_v29 = vpop.permute.xlu1 %3339  ;;  %v3338_v30 = vpop.permute.xlu0 %3337 }
 0x3d3   : > { %v3356_v31 = vsel %vm1621_vm5, %v3336_v22, %v3338_v30  ;;  %v3357_v32 = vsel %vm1621_vm5, %v3338_v30, %v3340_v29  ;;  %v3919_v30 = vld [vmem:[%s8297_s25 + $0x10] sm:$0x77] }
 0x3d4   : > { %3376 = vst [vmem:[#allocation2 + $0x188] sm:$0x7] %v3356_v31  ;;  %3377 = vst [vmem:[#allocation2 + $0x868] sm:$0x7] %v3357_v32  ;;  %3796 = vrot.lane.b32.xlu1 %v3779_v25, %s8227_s10  ;;  %3794 = vrot.lane.b32.xlu0 %v3778_v26, %s8227_s10  ;;  %v3931_v35 = vcombine.high %v3919_v30, %v3919_v30 }
 0x3d6   : > { %v3344_v38 = vpop.permute.xlu1 %3343  ;;  %v3342_v39 = vpop.permute.xlu0 %3341 }
 0x3d7   : > { %v3358_v40 = vsel %vm1621_vm5, %v3340_v29, %v3342_v39  ;;  %v3359_v41 = vsel %vm1621_vm5, %v3342_v39, %v3344_v38  ;;  %v3930_v29 = vcombine.high %v3918_v24, %v3918_v24 }
 0x3d8   : > { %3378 = vst [vmem:[#allocation2 + $0x150] sm:$0x7] %v3358_v40  ;;  %3379 = vst [vmem:[#allocation2 + $0x980] sm:$0x7] %v3359_v41  ;;  %3800 = vrot.lane.b32.xlu1 %v3781_v33, %s8227_s10  ;;  %3798 = vrot.lane.b32.xlu0 %v3780_v34, %s8227_s10  ;;  %v3932_v40 = vcombine.high %v3920_v36, %v3920_v36  ;;  %v3921_v41 = vld [vmem:[%s8297_s25 + $0x20] sm:$0x77] }
 0x3da   : > { %v3348_v46 = vpop.permute.xlu1 %3347  ;;  %v3346_v47 = vpop.permute.xlu0 %3345 }
 0x3db   : > { %v3360_v48 = vsel %vm1621_vm5, %v3344_v38, %v3346_v47  ;;  %v3361_v49 = vsel %vm1621_vm5, %v3346_v47, %v3348_v46  ;;  %v3922_v47 = vld [vmem:[%s8297_s25 + $0x28] sm:$0x77] }
 0x3dc   : > { %3380 = vst [vmem:[#allocation2 + $0x818] sm:$0x7] %v3360_v48  ;;  %3381 = vst [vmem:[#allocation2 + $0x490] sm:$0x7] %v3361_v49  ;;  %3804 = vrot.lane.b32.xlu1 %v3783_v42, %s8227_s10  ;;  %3802 = vrot.lane.b32.xlu0 %v3782_v43, %s8227_s10  ;;  %v3988_v48 = vld [vmem:[%s8297_s25 + $0x8] sm:$0x77]  ;;  %v3934_v53 = vcombine.high %v3922_v47, %v3922_v47 }
 0x3de   : > { %v3352_v54 = vpop.permute.xlu1 %3351  ;;  %v3350_v55 = vpop.permute.xlu0 %3349 }
 0x3df   : > { %v3362_v56 = vsel %vm1621_vm5, %v3348_v46, %v3350_v55  ;;  %v3363_v57 = vsel %vm1621_vm5, %v3350_v55, %v3352_v54  ;;  %v3933_v46 = vcombine.high %v3921_v41, %v3921_v41  ;;  %v3923_v55 = vld [vmem:[%s8297_s25 + $0x30] sm:$0x7] }
 0x3e0   : > { %3382 = vst [vmem:[#allocation2 + $0x4b0] sm:$0x7] %v3362_v56  ;;  %3383 = vst [vmem:[#allocation2 + $0x588] sm:$0x7] %v3363_v57  ;;  %3867 = vrot.lane.b32.xlu1 %v3855_v50, %s8228_s11  ;;  %3865 = vrot.lane.b32.xlu0 %v3854_v51, %s8228_s11 }
 0x3e2   : > { %v3414_v62 = vpop.permute.xlu1 %3413  ;;  %v3354_v63 = vpop.permute.xlu0 %3353 }
 0x3e3   : > { %v3364_v0 = vsel %vm1621_vm5, %v3352_v54, %v3354_v63  ;;  %v4000_v54 = vcombine.high %v3988_v48, %v3988_v48 }
 0x3e4   : > { %3384 = vst [vmem:[#allocation2 + $0x8f0] sm:$0x7] %v3364_v0  ;;  %3871 = vrot.lane.b32.xlu1 %v3857_v58, %s8228_s11  ;;  %3869 = vrot.lane.b32.xlu0 %v3856_v59, %s8228_s11  ;;  %v3989_v58 = vld [vmem:[%s8297_s25 + $0x10] sm:$0x77]  ;;  %v4005_v0 = vrot.slane %v3988_v48, 5  ;;  %v6672_v48 = vld [vmem:[#allocation2 + $0x2b8] sm:$0xff] }
 0x3e6   : > { %v3418_v5 = vpop.permute.xlu1 %3417  ;;  %v3416_v6 = vpop.permute.xlu0 %3415 }
 0x3e7   : > { %v3435_v7 = vsel %vm1712_vm6, %v3414_v62, %v3416_v6  ;;  %v3436_v8 = vsel %vm1712_vm6, %v3416_v6, %v3418_v5  ;;  %v4006_v62 = vrot.slane %v4000_v54, 5  ;;  %v6662_v54 = vld [vmem:[#allocation2 + $0x7e0] sm:$0xff] }
 0x3e8   : > { %3455 = vst [vmem:[#allocation2 + $0x498] sm:$0x38] %v3435_v7  ;;  %3456 = vst [vmem:[#allocation2 + $0x188] sm:$0x38] %v3436_v8  ;;  %3875 = vrot.lane.b32.xlu1 %v3859_v1, %s8228_s11  ;;  %3873 = vrot.lane.b32.xlu0 %v3858_v2, %s8228_s11  ;;  %v4001_v1 = vcombine.high %v3989_v58, %v3989_v58  ;;  %v6700_v7 = vld [vmem:[#allocation2 + $0x4d8] sm:$0xff] }
 0x3ea   : > { %v3422_v12 = vpop.permute.xlu1 %3421  ;;  %v3420_v13 = vpop.permute.xlu0 %3419 }
 0x3eb   : > { %v3437_v14 = vsel %vm1712_vm6, %v3418_v5, %v3420_v13  ;;  %v3438_v15 = vsel %vm1712_vm6, %v3420_v13, %v3422_v12 }
 0x3ec   : > { %3457 = vst [vmem:[#allocation2 + $0x868] sm:$0x38] %v3437_v14  ;;  %3458 = vst [vmem:[#allocation2 + $0x150] sm:$0x38] %v3438_v15  ;;  %3879 = vrot.lane.b32.xlu1 %v3861_v9, %s8228_s11  ;;  %3877 = vrot.lane.b32.xlu0 %v3860_v10, %s8228_s11  ;;  %v3990_v9 = vld [vmem:[%s8297_s25 + $0x18] sm:$0x77] }
 0x3ed   : > { %v6691_v10 = vld [vmem:[#allocation2 + $0x408] sm:$0xff]  ;;  %v6681_v15 = vld [vmem:[#allocation2 + $0x3b0] sm:$0xff]  ;;  %v4002_v18 = vcombine.high %v3990_v9, %v3990_v9 }
 0x3ee   : > { %v3426_v19 = vpop.permute.xlu1 %3425  ;;  %v3424_v20 = vpop.permute.xlu0 %3423 }
 0x3ef   : > { %v3439_v21 = vsel %vm1712_vm6, %v3422_v12, %v3424_v20  ;;  %v3440_v22 = vsel %vm1712_vm6, %v3424_v20, %v3426_v19  ;;  %v4008_v12 = vrot.slane %v4001_v1, 5 }
 0x3f0   : > { %3459 = vst [vmem:[#allocation2 + $0x980] sm:$0x38] %v3439_v21  ;;  %3460 = vst [vmem:[#allocation2 + $0x818] sm:$0x38] %v3440_v22  ;;  %3883 = vrot.lane.b32.xlu1 %v3863_v16, %s8228_s11  ;;  %3881 = vrot.lane.b32.xlu0 %v3862_v17, %s8228_s11  ;;  %v4007_v17 = vrot.slane %v3989_v58, 5  ;;  %v6680_v21 = vld [vmem:[#allocation2 + $0x8a0] sm:$0xff] }
 0x3f1   : > { %v6702_v22 = vld [vmem:[#allocation2 + $0x740] sm:$0xff] }
 0x3f2   : > { %v3430_v25 = vpop.permute.xlu1 %3429  ;;  %v3428_v26 = vpop.permute.xlu0 %3427 }
 0x3f3   : > { %v3441_v27 = vsel %vm1712_vm6, %v3426_v19, %v3428_v26  ;;  %v3442_v28 = vsel %vm1712_vm6, %v3428_v26, %v3430_v25  ;;  %v6703_v19 = vld [vmem:[#allocation2 + $0x668] sm:$0xff]  ;;  %v6670_v26 = vld [vmem:[#allocation2 + $0x620] sm:$0xff] }
 0x3f4   : > { %3461 = vst [vmem:[#allocation2 + $0x490] sm:$0x38] %v3441_v27  ;;  %3462 = vst [vmem:[#allocation2 + $0x4b0] sm:$0x38] %v3442_v28  ;;  %3935 = vrot.lane.b32.xlu1 %v3918_v24, %s8229_s14  ;;  %3885 = vrot.lane.b32.xlu0 %v3864_v23, %s8228_s11  ;;  %v9512_v23 = vld [vmem:[%s8297_s25 + $0x20] sm:$0x77] }
 0x3f5   : > { %v6671_v24 = vld [vmem:[#allocation2 + $0x1d0] sm:$0xff] }
 0x3f6   : > { %v3434_v31 = vpop.permute.xlu1 %3433  ;;  %v3432_v32 = vpop.permute.xlu0 %3431 }
 0x3f7   : > { %v3443_v33 = vsel %vm1712_vm6, %v3430_v25, %v3432_v32  ;;  %v3444_v34 = vsel %vm1712_vm6, %v3432_v32, %v3434_v31  ;;  %v6693_v25 = vld [vmem:[#allocation2 + $0x38] sm:$0xff]  ;;  %vm10947_vm6 = vcmask 580608  }
 0x3f8   : > { %3463 = vst [vmem:[#allocation2 + $0x588] sm:$0x38] %v3443_v33  ;;  %3464 = vst [vmem:[#allocation2 + $0x8f0] sm:$0x38] %v3444_v34  ;;  %3939 = vrot.lane.b32.xlu1 %v3919_v30, %s8229_s14  ;;  %3937 = vrot.lane.b32.xlu0 %v3930_v29, %s8229_s14  ;;  %v4010_v29 = vrot.slane %v4002_v18, 5  ;;  %v6692_v30 = vld [vmem:[#allocation2 + $0x110] sm:$0xff] }
 0x3f9   : > { %v6661_v31 = vld [vmem:[#allocation2 + $0x738] sm:$0xff]  ;;  %v4009_v34 = vrot.slane %v3990_v9, 5 }
 0x3fa   : > { %v3496_v37 = vpop.permute.xlu1 %3495  ;;  %v3494_v38 = vpop.permute.xlu0 %3493 }
 0x3fb   : > { %v3515_v39 = vsel %vm1783_vm7, %v3494_v38, %v3496_v37  ;;  %v6682_v38 = vld [vmem:[#allocation2 + $0x288] sm:$0xff] }
 0x3fc   : > { %3535 = vst [vmem:[#allocation2 + $0x678] ss:$-476 sps:$4 sm:$0xc1] %v3515_v39   ;;  %3943 = vrot.lane.b32.xlu1 %v3920_v36, %s8229_s14  ;;  %3941 = vrot.lane.b32.xlu0 %v3931_v35, %s8229_s14  ;;  %v4003_v35 = vcombine.high %v9512_v23, %v9512_v23  ;;  %v6683_v36 = vld [vmem:[#allocation2 + $0x3b8] sm:$0xff]  ;;  %v9521_v39 = vld [vmem:[%s8297_s25 + $0x28] sm:$0x77] }
 0x3fd   : > { %v4013_v1 = vrot.slane %v9521_v39, 5 }
 0x3fe   : > { %v3500_v42 = vpop.permute.xlu1 %3499  ;;  %v3498_v43 = vpop.permute.xlu0 %3497 }
 0x3ff   : > { %v3516_v44 = vsel %vm1783_vm7, %v3496_v37, %v3498_v43  ;;  %v3517_v45 = vsel %vm1783_vm7, %v3498_v43, %v3500_v42  ;;  %v6660_v37 = vld [vmem:[#allocation2 + $0x810] sm:$0xff] }
 0x400   : > { %3536 = vst [vmem:[#allocation2 + $0xf0] ss:$156 sps:$4 sm:$0xc1] %v3516_v44   ;;  %3537 = vst [vmem:[#allocation2 + $0x330] ss:$1340 sps:$4 sm:$0xc1] %v3517_v45   ;;  %3947 = vrot.lane.b32.xlu1 %v3921_v41, %s8229_s14  ;;  %3945 = vrot.lane.b32.xlu0 %v3932_v40, %s8229_s14 }
 0x401   : > { %v6651_v40 = vld [vmem:[#allocation2 + $0x2f0] sm:$0xff] }
 0x402   : > { %v3504_v49 = vpop.permute.xlu1 %3503  ;;  %v3502_v50 = vpop.permute.xlu0 %3501  ;;  %v6673_v43 = vld [vmem:[#allocation2 + $0xd0] sm:$0xff] }
 0x403   : > { %v3518_v51 = vsel %vm1783_vm7, %v3500_v42, %v3502_v50  ;;  %v3519_v52 = vsel %vm1783_vm7, %v3502_v50, %v3504_v49  ;;  %v6710_v63 = vld [vmem:[#allocation2 + $0x498] sm:$0xff]  ;;  %v6650_v44 = vld [vmem:[#allocation2 + $0x2d0] sm:$0xff]  ;;  %v4011_v50 = vrot.slane %v9512_v23, 5 }
 0x404   : > { %3538 = vst [vmem:[#allocation2 + $0x978] ss:$-2084 sps:$4 sm:$0xc1] %v3518_v51   ;;  %3539 = vst [vmem:[#allocation2] ss:$2436 sps:$4 sm:$0xc1] %v3519_v52   ;;  %3951 = vrot.lane.b32.xlu1 %v3922_v47, %s8229_s14  ;;  %3949 = vrot.lane.b32.xlu0 %v3933_v46, %s8229_s14  ;;  %v4004_v51 = vcombine.high %v9521_v39, %v9521_v39 }
 0x405   : > { %v4012_v47 = vrot.slane %v4003_v35, 5  ;;  %v6663_v52 = vld [vmem:[#allocation2 + $0x200] sm:$0xff]  ;;  %v4070_v39 = vld [vmem:[%s8297_s25 + $0x18] sm:$0x77] }
 0x406   : > { %v3508_v56 = vpop.permute.xlu1 %3507  ;;  %v3506_v57 = vpop.permute.xlu0 %3505 }
 0x407   : > { %v3520_v59 = vsel %vm1783_vm7, %v3504_v49, %v3506_v57  ;;  %v3521_v60 = vsel %vm1783_vm7, %v3506_v57, %v3508_v56  ;;  %v6711_v61 = vld [vmem:[#allocation2 + $0x188] sm:$0xff]  ;;  %v6641_v49 = vld [vmem:[#allocation2 + $0x420] sm:$0xff] }
 0x408   : > { %3540 = vst [vmem:[#allocation2 + $0x640] ss:$476 sps:$4 sm:$0xc1] %v3520_v59   ;;  %3541 = vst [vmem:[#allocation2 + $0x128] ss:$876 sps:$4 sm:$0xc1] %v3521_v60   ;;  %3955 = vrot.lane.b32.xlu1 %v3923_v55, %s8229_s14  ;;  %3953 = vrot.lane.b32.xlu0 %v3934_v53, %s8229_s14 }
 0x409   : > { %6920 = vmatprep.subr.mxu0 %v6711_v61  ;;  %v6712_v13 = vld [vmem:[#allocation2 + $0x868] sm:$0xff]  ;;  %v6640_v53 = vld [vmem:[#allocation2 + $0x230] sm:$0xff]  ;;  %v6630_v61 = vld [vmem:[#allocation2 + $0x958] sm:$0xff] }
 0x40a   : > { %6921 = vmatpush1.msra.mxu0 %v6710_v63  ;;  %v3512_v2 = vpop.permute.xlu1 %3511  ;;  %v3510_v4 = vpop.permute.xlu0 %3509  ;;  %v6631_v57 = vld [vmem:[#allocation2 + $0x988] sm:$0xff]  ;;  %v6652_v63 = vld [vmem:[#allocation2 + $0x4f8] sm:$0xff] }
 0x40b   : > { %6922 = vmatprep.subr.mxu0 %v6701_v3  ;;  %v3522_v5 = vsel %vm1783_vm7, %v3508_v56, %v3510_v4  ;;  %v3523_v6 = vsel %vm1783_vm7, %v3510_v4, %v3512_v2  ;;  %v6713_v8 = vld [vmem:[#allocation2 + $0x150] sm:$0xff]  ;;  %v6653_v60 = vld [vmem:[#allocation2 + $0x228] sm:$0xff] }
 0x40c   : > { %3542 = vst [vmem:[#allocation2 + $0x1a0] ss:$788 sps:$4 sm:$0xc1] %v3522_v5   ;;  %3543 = vst [vmem:[#allocation2 + $0x3f0] ss:$412 sps:$4 sm:$0xc1] %v3523_v6   ;;  %6923 = vmatpush1.msra.mxu0 %v6700_v7  ;;  %4018 = vrot.lane.b32.xlu1 %v4006_v62, %s8218_s26 }
 0x40d   : > { %4016 = vrot.lane.b32.xlu0 %v4005_v0, %s8218_s26  ;;  %6924 = vmatprep.subr.mxu0 %v6691_v10  ;;  %v4014_v62 = vrot.slane %v4004_v51, 5  ;;  %v6621_v0 = vld [vmem:[#allocation2 + $0x7d0] sm:$0xff]  ;;  %v4068_v6 = vld [vmem:[%s8297_s25 + $0x8] sm:$0x77] }
 0x40e   : > { %6997 = vmatprep.subr.mxu1 %v6713_v8  ;;  %6925 = vmatpush1.msra.mxu0 %v6690_v11  ;;  %v3584_v14 = vpop.permute.xlu1 %3583  ;;  %v3514_v16 = vpop.permute.xlu0 %3513  ;;  %v6620_v3 = vld [vmem:[#allocation2 + $0x950] sm:$0xff]  ;;  %v6561_v51 = vld [vmem:[#allocation2 + $0x808] sm:$0xff] }
 0x40f   : > { %6998 = vmatpush1.msra.mxu1 %v6712_v13  ;;  %6926 = vmatprep.subr.mxu0 %v6681_v15  ;;  %v3524_v20 = vsel %vm1783_vm7, %v3512_v2, %v3514_v16  ;;  %v6643_v2 = vld [vmem:[#allocation2 + $0x348] sm:$0xff]  ;;  %v6642_v7 = vld [vmem:[#allocation2 + $0x5d0] sm:$0xff]  ;;  %v6601_v16 = vld [vmem:[#allocation2 + $0x3a0] sm:$0xff]  ;;  %vm10951_vm7 = vcmask 97280  }
 0x410   : > { %6999 = vmatprep.subr.mxu1 %v6703_v19  ;;  %3544 = vst [vmem:[#allocation2 + $0x100] ss:$2036 sps:$4 sm:$0xc1] %v3524_v20   ;;  %6927 = vmatpush1.msra.mxu0 %v6680_v21  ;;  %v3993_v10 = vld [vmem:[%s8297_s25 + $0x30] sm:$0x7]  ;;  %v6632_v15 = vld [vmem:[#allocation2 + $0x5a8] sm:$0xff] }
 0x411   : > { %7000 = vmatpush1.msra.mxu1 %v6702_v22  ;;  %4022 = vrot.lane.b32.xlu1 %v4008_v12, %s8218_s26  ;;  %v6611_v11 = vld [vmem:[#allocation2 + $0x670] sm:$0xff]  ;;  %v6633_v12 = vld [vmem:[#allocation2 + $0x8c0] sm:$0xff]  ;;  %v6623_v20 = vld [vmem:[#allocation2 + $0x318] sm:$0xff] }
 0x412   : > { %4020 = vrot.lane.b32.xlu0 %v4007_v17, %s8218_s26  ;;  %6928 = vmatprep.subr.mxu0 %v6671_v24  ;;  %v3588_v27 = vpop.permute.xlu1 %3587  ;;  %v3586_v28 = vpop.permute.xlu0 %3585  ;;  %v6610_v13 = vld [vmem:[#allocation2 + $0x530] sm:$0xff]  ;;  %v4015_v17 = vrot.slane %v3993_v10, 5  ;;  %v6600_v21 = vld [vmem:[#allocation2 + $0x80] sm:$0xff] }
 0x413   : > { %7001 = vmatprep.subr.mxu1 %v6693_v25  ;;  %6929 = vmatpush1.msra.mxu0 %v6670_v26  ;;  %v3605_v32 = vsel %vm1864_vm13, %v3584_v14, %v3586_v28  ;;  %v3606_v33 = vsel %vm1864_vm13, %v3586_v28, %v3588_v27  ;;  %v4085_v14 = vrot.slane %v4068_v6, 2  ;;  %v4069_v24 = vld [vmem:[%s8297_s25 + $0x10] sm:$0x77]  ;;  %v4080_v25 = vcombine.high %v4068_v6, %v4068_v6  ;;  %v6622_v26 = vld [vmem:[#allocation2 + $0x158] sm:$0xff]  ;;  %v6613_v28 = vld [vmem:[#allocation2 + $0x7c0] sm:$0xff] }
 0x414   : > { %7002 = vmatpush1.msra.mxu1 %v6692_v30  ;;  %6930 = vmatprep.subr.mxu0 %v6661_v31  ;;  %3625 = vst [vmem:[#allocation2 + $0x678] sm:$0xe] %v3605_v32  ;;  %3626 = vst [vmem:[#allocation2 + $0xf0] sm:$0xe] %v3606_v33  ;;  %v4087_v30 = vrot.slane %v4069_v24, 2  ;;  %v6612_v33 = vld [vmem:[#allocation2 + $0x888] sm:$0xff] }
 0x415   : > { %7003 = vmatprep.subr.mxu1 %v6683_v36  ;;  %6931 = vmatpush1.msra.mxu0 %v6660_v37  ;;  %v4086_v35 = vrot.slane %v4080_v25, 2  ;;  %v6603_v37 = vld [vmem:[#allocation2 + $0x5f8] sm:$0xff] }
 0x416   : > { %7004 = vmatpush1.msra.mxu1 %v6682_v38  ;;  %4026 = vrot.lane.b32.xlu1 %v4010_v29, %s8218_s26  ;;  %v3592_v41 = vpop.permute.xlu1 %3591  ;;  %v3590_v42 = vpop.permute.xlu0 %3589  ;;  %v6590_v29 = vld [vmem:[#allocation2 + $0x548] sm:$0xff]  ;;  %v6580_v38 = vld [vmem:[#allocation2 + $0x7d8] sm:$0xff] }
 0x417   : > { %4024 = vrot.lane.b32.xlu0 %v4009_v34, %s8218_s26  ;;  %6932 = vmatprep.subr.mxu0 %v6651_v40  ;;  %v3607_v45 = vsel %vm1864_vm13, %v3588_v27, %v3590_v42  ;;  %v3608_v46 = vsel %vm1864_vm13, %v3590_v42, %v3592_v41  ;;  %v6591_v27 = vld [vmem:[#allocation2 + $0x70] sm:$0xff]  ;;  %v6581_v34 = vld [vmem:[#allocation2 + $0x778] sm:$0xff]  ;;  %v4081_v40 = vcombine.high %v4069_v24, %v4069_v24  ;;  %v6571_v42 = vld [vmem:[#allocation2 + $0x300] sm:$0xff] }
 0x418   : > { %7005 = vmatprep.subr.mxu1 %v6673_v43  ;;  %6933 = vmatpush1.msra.mxu0 %v6650_v44  ;;  %3627 = vst [vmem:[#allocation2 + $0x330] sm:$0xe] %v3607_v45  ;;  %3628 = vst [vmem:[#allocation2 + $0x978] sm:$0xe] %v3608_v46  ;;  %v6593_v45 = vld [vmem:[#allocation2 + $0x6f8] sm:$0xff]  ;;  %v6570_v46 = vld [vmem:[#allocation2 + $0x750] sm:$0xff] }
 0x419   : > { %7006 = vmatpush1.msra.mxu1 %v6672_v48  ;;  %6934 = vmatprep.subr.mxu0 %v6641_v49 }
 0x41a   : > { %7007 = vmatprep.subr.mxu1 %v6663_v52  ;;  %6935 = vmatpush1.msra.mxu0 %v6640_v53  ;;  %v3596_v55 = vpop.permute.xlu1 %3595  ;;  %v3594_v56 = vpop.permute.xlu0 %3593  ;;  %v4088_v52 = vrot.slane %v4081_v40, 2  ;;  %v4071_v53 = vld [vmem:[%s8297_s25 + $0x20] sm:$0x77] }
 0x41b   : > { %7008 = vmatpush1.msra.mxu1 %v6662_v54  ;;  %4030 = vrot.lane.b32.xlu1 %v4012_v47, %s8218_s26  ;;  %v3609_v58 = vsel %vm1864_vm13, %v3592_v41, %v3594_v56  ;;  %v3610_v59 = vsel %vm1864_vm13, %v3594_v56, %v3596_v55  ;;  %v6602_v41 = vld [vmem:[#allocation2 + $0xb0] sm:$0xff]  ;;  %v4089_v47 = vrot.slane %v4070_v39, 2  ;;  %v4082_v54 = vcombine.high %v4070_v39, %v4070_v39  ;;  %v6560_v56 = vld [vmem:[#allocation2 + $0x4c8] sm:$0xff] }
 0x41c   : > { %4028 = vrot.lane.b32.xlu0 %v4011_v50, %s8218_s26  ;;  %6936 = vmatprep.subr.mxu0 %v6631_v57  ;;  %3629 = vst [vmem:[#allocation2] sm:$0xe] %v3609_v58  ;;  %3630 = vst [vmem:[#allocation2 + $0x640] sm:$0xe] %v3610_v59  ;;  %v6592_v50 = vld [vmem:[#allocation2 + $0x78] sm:$0xff]  ;;  %v6582_v57 = vld [vmem:[#allocation2 + $0x488] sm:$0xff] }
 0x41d   : > { %7009 = vmatprep.subr.mxu1 %v6653_v60  ;;  %6937 = vmatpush1.msra.mxu0 %v6630_v61  ;;  %v6573_v60 = vld [vmem:[#allocation2 + $0x7f0] sm:$0xff]  ;;  %v4091_v61 = vrot.slane %v4071_v53, 2 }
 0x41e   : > { %7010 = vmatpush1.msra.mxu1 %v6652_v63  ;;  %6938 = vmatprep.subr.mxu0 %v6621_v0  ;;  %v3600_v4 = vpop.permute.xlu1 %3599  ;;  %v3598_v5 = vpop.permute.xlu0 %3597  ;;  %v6572_v0 = vld [vmem:[#allocation2 + $0x708] sm:$0xff] }
 0x41f   : > { %7011 = vmatprep.subr.mxu1 %v6643_v2  ;;  %6939 = vmatpush1.msra.mxu0 %v6620_v3  ;;  %v3611_v8 = vsel %vm1864_vm13, %v3596_v55, %v3598_v5  ;;  %v3612_v9 = vsel %vm1864_vm13, %v3598_v5, %v3600_v4  ;;  %v6583_v55 = vld [vmem:[#allocation2 + $0x378] sm:$0xff]  ;;  %v4072_v2 = vld [vmem:[%s8297_s25 + $0x28] sm:$0x77]  ;;  %v4083_v3 = vcombine.high %v4071_v53, %v4071_v53 }
 0x420   : > { %7012 = vmatpush1.msra.mxu1 %v6642_v7  ;;  %4034 = vrot.lane.b32.xlu1 %v4014_v62, %s8218_s26  ;;  %3631 = vst [vmem:[#allocation2 + $0x128] sm:$0xe] %v3611_v8  ;;  %3632 = vst [vmem:[#allocation2 + $0x1a0] sm:$0xe] %v3612_v9  ;;  %v6562_v5 = vld [vmem:[#allocation2 + $0x7f8] sm:$0xff]  ;;  %v4093_v8 = vrot.slane %v4072_v2, 2 }
 0x421   : > { %4032 = vrot.lane.b32.xlu0 %v4013_v1, %s8218_s26  ;;  %6940 = vmatprep.subr.mxu0 %v6611_v11  ;;  %v4090_v1 = vrot.slane %v4082_v54, 2  ;;  %v4092_v11 = vrot.slane %v4083_v3, 2  ;;  %v4239_v3 = vld [vmem:[%s8297_s25 + $0x10] sm:$0x77] }
 0x422   : > { %7013 = vmatprep.subr.mxu1 %v6633_v12  ;;  %6941 = vmatpush1.msra.mxu0 %v6610_v13  ;;  %v3604_v18 = vpop.permute.xlu1 %3603  ;;  %v3602_v19 = vpop.permute.xlu0 %3601  ;;  %v4073_v12 = vld [vmem:[%s8297_s25 + $0x30] sm:$0x7]  ;;  %v4084_v13 = vcombine.high %v4072_v2, %v4072_v2 }
 0x423   : > { %7014 = vmatpush1.msra.mxu1 %v6632_v15  ;;  %6942 = vmatprep.subr.mxu0 %v6601_v16  ;;  %v3613_v22 = vsel %vm1864_vm13, %v3600_v4, %v3602_v19  ;;  %v3614_v23 = vsel %vm1864_vm13, %v3602_v19, %v3604_v18  ;;  %v6563_v4 = vld [vmem:[#allocation2 + $0x758] sm:$0xff]  ;;  %vm4599_vm13 = vcmask 80896  }
 0x424   : > { %7015 = vmatprep.subr.mxu1 %v6623_v20  ;;  %6943 = vmatpush1.msra.mxu0 %v6600_v21  ;;  %3633 = vst [vmem:[#allocation2 + $0x3f0] sm:$0xe] %v3613_v22  ;;  %3634 = vst [vmem:[#allocation2 + $0x100] sm:$0xe] %v3614_v23  ;;  %v4094_v21 = vrot.slane %v4084_v13, 2 }
 0x425   : > { %7016 = vmatpush1.msra.mxu1 %v6622_v26  ;;  %4096 = vrot.lane.b32.xlu1 %v4085_v14, %s8219_s27  ;;  %v4158_v14 = vld [vmem:[%s8297_s25 + $0x8] sm:$0x77]  ;;  %v4159_v22 = vld [vmem:[%s8297_s25 + $0x10] sm:$0x77] }
 0x426   : > { %4036 = vrot.lane.b32.xlu0 %v4015_v17, %s8218_s26  ;;  %6944 = vmatprep.subr.mxu0 %v6591_v27  ;;  %v3696_v31 = vpop.permute.xlu1 %3695  ;;  %v3694_v32 = vpop.permute.xlu0 %3693  ;;  %v4095_v17 = vrot.slane %v4073_v12, 2  ;;  %v4170_v20 = vcombine.high %v4158_v14, %v4158_v14  ;;  %v4171_v27 = vcombine.high %v4159_v22, %v4159_v22 }
 0x427   : > { %7017 = vmatprep.subr.mxu1 %v6613_v28  ;;  %6945 = vmatpush1.msra.mxu0 %v6590_v29  ;;  %v3716_v36 = vsel %vm3715_vm14, %v3694_v32, %v3696_v31  ;;  %v4175_v28 = vrot.slane %v4158_v14, 7  ;;  %v4160_v29 = vld [vmem:[%s8297_s25 + $0x18] sm:$0x77]  ;;  %v4241_v14 = vld [vmem:[%s8297_s25 + $0x20] sm:$0x77] }
 0x428   : > { %7018 = vmatpush1.msra.mxu1 %v6612_v33  ;;  %6946 = vmatprep.subr.mxu0 %v6581_v34  ;;  %3736 = vst [vmem:[#allocation2 + $0x68] ss:$1556 sps:$4 sm:$0x83] %v3716_v36   ;;  %v4176_v25 = vrot.slane %v4170_v20, 7  ;;  %v4178_v32 = vrot.slane %v4171_v27, 7  ;;  %v4177_v36 = vrot.slane %v4159_v22, 7 }
 0x429   : > { %7019 = vmatprep.subr.mxu1 %v6603_v37  ;;  %6947 = vmatpush1.msra.mxu0 %v6580_v38  ;;  %v4161_v37 = vld [vmem:[%s8297_s25 + $0x20] sm:$0x77]  ;;  %v4242_v20 = vld [vmem:[%s8297_s25 + $0x28] sm:$0x77] }
 0x42a   : > { %7020 = vmatpush1.msra.mxu1 %v6602_v41  ;;  %4100 = vrot.lane.b32.xlu1 %v4087_v30, %s8219_s27  ;;  %v3700_v43 = vpop.permute.xlu1 %3699  ;;  %v3698_v44 = vpop.permute.xlu0 %3697 }
 0x42b   : > { %4098 = vrot.lane.b32.xlu0 %v4086_v35, %s8219_s27  ;;  %6948 = vmatprep.subr.mxu0 %v6571_v42  ;;  %v3717_v48 = vsel %vm3715_vm14, %v3696_v31, %v3698_v44  ;;  %v3718_v49 = vsel %vm3715_vm14, %v3698_v44, %v3700_v43  ;;  %v4172_v35 = vcombine.high %v4160_v29, %v4160_v29  ;;  %v4179_v44 = vrot.slane %v4160_v29, 7  ;;  %v7945_v29 = vld [vmem:[%s8297_s25 + $0x30] ss:$0 sps:$4 sm:$0x77]  }
 0x42c   : > { %7021 = vmatprep.subr.mxu1 %v6593_v45  ;;  %6949 = vmatpush1.msra.mxu0 %v6570_v46  ;;  %3737 = vst [vmem:[#allocation2 + $0x540] ss:$-1100 sps:$4 sm:$0x83] %v3717_v48   ;;  %3738 = vst [vmem:[#allocation2 + $0x3e8] ss:$-180 sps:$4 sm:$0x83] %v3718_v49  }
 0x42d   : > { %7022 = vmatpush1.msra.mxu1 %v6592_v50  ;;  %6950 = vmatprep.subr.mxu0 %v6561_v51  ;;  %v4180_v40 = vrot.slane %v4172_v35, 7  ;;  %v4162_v45 = vld [vmem:[%s8297_s25 + $0x28] sm:$0x77] }
 0x42e   : > { %7023 = vmatprep.subr.mxu1 %v6583_v55  ;;  %6951 = vmatpush1.msra.mxu0 %v6560_v56  ;;  %v3704_v58 = vpop.permute.xlu1 %3703  ;;  %v3702_v59 = vpop.permute.xlu0 %3701  ;;  %v4174_v51 = vcombine.high %v4162_v45, %v4162_v45 }
 0x42f   : > { %7024 = vmatpush1.msra.mxu1 %v6582_v57  ;;  %4104 = vrot.lane.b32.xlu1 %v4089_v47, %s8219_s27  ;;  %v3719_v62 = vsel %vm3715_vm14, %v3700_v43, %v3702_v59  ;;  %v3720_v63 = vsel %vm3715_vm14, %v3702_v59, %v3704_v58  ;;  %v4173_v43 = vcombine.high %v4161_v37, %v4161_v37  ;;  %v4238_v59 = vld [vmem:[%s8297_s25 + $0x8] sm:$0x77] }
 0x430   : > { %4102 = vrot.lane.b32.xlu0 %v4088_v52, %s8219_s27  ;;  %7025 = vmatprep.subr.mxu1 %v6573_v60  ;;  %3739 = vst [vmem:[#allocation2 + $0x940] ss:$60 sps:$4 sm:$0x83] %v3719_v62   ;;  %3740 = vst [vmem:[#allocation2 + $0x600] ss:$-1532 sps:$4 sm:$0x83] %v3720_v63   ;;  %v4250_v63 = vcombine.low %v4238_v59, %v4238_v59 }
 0x431   : > { %7026 = vmatpush1.msra.mxu1 %v6572_v0  ;;  %v4182_v48 = vrot.slane %v4173_v43, 7  ;;  %v4181_v52 = vrot.slane %v4161_v37, 7  ;;  %v4184_v55 = vrot.slane %v4174_v51, 7  ;;  %v4163_v60 = vld [vmem:[%s8297_s25 + $0x30] sm:$0x7] }
 0x432   : > { %7027 = vmatprep.subr.mxu1 %v6563_v4  ;;  %v3708_v6 = vpop.permute.xlu1 %3707  ;;  %v3706_v7 = vpop.permute.xlu0 %3705  ;;  %v4185_v2 = vrot.slane %v4163_v60, 7 }
 0x433   : > { %7028 = vmatpush1.msra.mxu1 %v6562_v5  ;;  %4108 = vrot.lane.b32.xlu1 %v4091_v61, %s8219_s27  ;;  %v3721_v9 = vsel %vm3715_vm14, %v3704_v58, %v3706_v7  ;;  %v3722_v10 = vsel %vm3715_vm14, %v3706_v7, %v3708_v6  ;;  %v4183_v58 = vrot.slane %v4162_v45, 7 }
 0x434   : > { %4106 = vrot.lane.b32.xlu0 %v4090_v1, %s8219_s27  ;;  %3741 = vst [vmem:[#allocation2 + $0x388] ss:$700 sps:$4 sm:$0x83] %v3721_v9   ;;  %3742 = vst [vmem:[#allocation2 + $0x20] ss:$268 sps:$4 sm:$0x83] %v3722_v10  }
 0x436   : > { %v3712_v15 = vpop.permute.xlu1 %3711  ;;  %v3710_v16 = vpop.permute.xlu0 %3709 }
 0x437   : > { %4112 = vrot.lane.b32.xlu1 %v4093_v8, %s8219_s27  ;;  %v3723_v18 = vsel %vm3715_vm14, %v3708_v6, %v3710_v16  ;;  %v3724_v19 = vsel %vm3715_vm14, %v3710_v16, %v3712_v15  ;;  %v4251_v6 = vcombine.low %v4239_v3, %v4239_v3  ;;  %v4240_v8 = vld [vmem:[%s8297_s25 + $0x18] sm:$0x77] }
 0x438   : > { %4110 = vrot.lane.b32.xlu0 %v4092_v11, %s8219_s27  ;;  %3743 = vst [vmem:[#allocation2 + $0x918] ss:$-1908 sps:$4 sm:$0x83] %v3723_v18   ;;  %3744 = vst [vmem:[#allocation2 + $0x4b8] ss:$-196 sps:$4 sm:$0x83] %v3724_v19   ;;  %v4252_v11 = vcombine.low %v4240_v8, %v4240_v8 }
 0x43a   : > { %v3785_v23 = vpop.permute.xlu1 %3784  ;;  %v3714_v24 = vpop.permute.xlu0 %3713 }
 0x43b   : > { %4116 = vrot.lane.b32.xlu1 %v4095_v17, %s8219_s27  ;;  %v3725_v26 = vsel %vm3715_vm14, %v3712_v15, %v3714_v24  ;;  %v4253_v17 = vcombine.low %v4241_v14, %v4241_v14 }
 0x43c   : > { %4114 = vrot.lane.b32.xlu0 %v4094_v21, %s8219_s27  ;;  %3745 = vst [vmem:[#allocation2 + $0x3e0] ss:$-732 sps:$4 sm:$0x83] %v3725_v26   ;;  %v4308_v26 = vld [vmem:[%s8297_s25 + $0x8] sm:$0x77]  ;;  %s8237_s27 = smov 15  }
 0x43e   : > { %v3789_v30 = vpop.permute.xlu1 %3788  ;;  %v3787_v31 = vpop.permute.xlu0 %3786 }
 0x43f   : > { %4188 = vrot.lane.b32.xlu1 %v4176_v25, %s8220_s28  ;;  %v3807_v33 = vsel %vm10949_vm15, %v3785_v23, %v3787_v31  ;;  %v3808_v34 = vsel %vm10949_vm15, %v3787_v31, %v3789_v30  ;;  %v4254_v23 = vcombine.low %v4242_v20, %v4242_v20 }
 0x440   : > { %4186 = vrot.lane.b32.xlu0 %v4175_v28, %s8220_s28  ;;  %3827 = vst [vmem:[#allocation2 + $0x68] sm:$0x1c] %v3807_v33  ;;  %3828 = vst [vmem:[#allocation2 + $0x540] sm:$0x1c] %v3808_v34  ;;  %v4309_v33 = vld [vmem:[%s8297_s25 + $0x10] sm:$0x77] }
 0x442   : > { %v3793_v38 = vpop.permute.xlu1 %3792  ;;  %v3791_v39 = vpop.permute.xlu0 %3790 }
 0x443   : > { %4192 = vrot.lane.b32.xlu1 %v4178_v32, %s8220_s28  ;;  %v3809_v41 = vsel %vm10949_vm15, %v3789_v30, %v3791_v39  ;;  %v3810_v42 = vsel %vm10949_vm15, %v3791_v39, %v3793_v38  ;;  %v4320_v32 = vcombine.high %v4308_v26, %v4308_v26  ;;  %v4325_v39 = vrot.slane %v4308_v26, 1 }
 0x444   : > { %4190 = vrot.lane.b32.xlu0 %v4177_v36, %s8220_s28  ;;  %3829 = vst [vmem:[#allocation2 + $0x3e8] sm:$0x1c] %v3809_v41  ;;  %3830 = vst [vmem:[#allocation2 + $0x940] sm:$0x1c] %v3810_v42 }
 0x445   : > { %v4326_v36 = vrot.slane %v4320_v32, 1 }
 0x446   : > { %v3797_v46 = vpop.permute.xlu1 %3796  ;;  %v3795_v47 = vpop.permute.xlu0 %3794 }
 0x447   : > { %4196 = vrot.lane.b32.xlu1 %v4180_v40, %s8220_s28  ;;  %v3811_v49 = vsel %vm10949_vm15, %v3793_v38, %v3795_v47  ;;  %v3812_v50 = vsel %vm10949_vm15, %v3795_v47, %v3797_v46  ;;  %v4321_v38 = vcombine.high %v4309_v33, %v4309_v33  ;;  %v4310_v40 = vld [vmem:[%s8297_s25 + $0x18] sm:$0x77]  ;;  %v4327_v47 = vrot.slane %v4309_v33, 1 }
 0x448   : > { %4194 = vrot.lane.b32.xlu0 %v4179_v44, %s8220_s28  ;;  %3831 = vst [vmem:[#allocation2 + $0x600] sm:$0x1c] %v3811_v49  ;;  %3832 = vst [vmem:[#allocation2 + $0x388] sm:$0x1c] %v3812_v50 }
 0x449   : > { %v4328_v43 = vrot.slane %v4321_v38, 1 }
 0x44a   : > { %v3801_v53 = vpop.permute.xlu1 %3800  ;;  %v3799_v54 = vpop.permute.xlu0 %3798 }
 0x44b   : > { %4200 = vrot.lane.b32.xlu1 %v4182_v48, %s8220_s28  ;;  %v3813_v56 = vsel %vm10949_vm15, %v3797_v46, %v3799_v54  ;;  %v3814_v57 = vsel %vm10949_vm15, %v3799_v54, %v3801_v53  ;;  %v4322_v46 = vcombine.high %v4310_v40, %v4310_v40  ;;  %v4311_v48 = vld [vmem:[%s8297_s25 + $0x20] sm:$0x77] }
 0x44c   : > { %4198 = vrot.lane.b32.xlu0 %v4181_v52, %s8220_s28  ;;  %3833 = vst [vmem:[#allocation2 + $0x20] sm:$0x1c] %v3813_v56  ;;  %3834 = vst [vmem:[#allocation2 + $0x918] sm:$0x1c] %v3814_v57  ;;  %v4323_v54 = vcombine.high %v4311_v48, %v4311_v48  ;;  %v4312_v56 = vld [vmem:[%s8297_s25 + $0x28] sm:$0x77] }
 0x44d   : > { %v4330_v51 = vrot.slane %v4322_v46, 1 }
 0x44e   : > { %v3805_v61 = vpop.permute.xlu1 %3804  ;;  %v3803_v62 = vpop.permute.xlu0 %3802 }
 0x44f   : > { %4204 = vrot.lane.b32.xlu1 %v4184_v55, %s8220_s28  ;;  %v3815_v0 = vsel %vm10949_vm15, %v3801_v53, %v3803_v62  ;;  %v3816_v1 = vsel %vm10949_vm15, %v3803_v62, %v3805_v61  ;;  %v4329_v55 = vrot.slane %v4310_v40, 1  ;;  %v4324_v62 = vcombine.high %v4312_v56, %v4312_v56 }
 0x450   : > { %4202 = vrot.lane.b32.xlu0 %v4183_v58, %s8220_s28  ;;  %3835 = vst [vmem:[#allocation2 + $0x4b8] sm:$0x1c] %v3815_v0  ;;  %3836 = vst [vmem:[#allocation2 + $0x3e0] sm:$0x1c] %v3816_v1 }
 0x452   : > { %v3868_v4 = vpop.permute.xlu1 %3867  ;;  %v3866_v5 = vpop.permute.xlu0 %3865 }
 0x453   : > { %4256 = vrot.lane.b32.xlu1 %v4250_v63, %s8221_s29  ;;  %v3888_v7 = vsel %vm3887_vm4, %v3866_v5, %v3868_v4  ;;  %v4331_v63 = vrot.slane %v4311_v48, 1  ;;  %v4333_v5 = vrot.slane %v4312_v56, 1 }
 0x454   : > { %4206 = vrot.lane.b32.xlu0 %v4185_v2, %s8220_s28  ;;  %3908 = vst [vmem:[#allocation2 + $0x68] sm:$0xe0] %v3888_v7  ;;  %v4334_v2 = vrot.slane %v4324_v62, 1  ;;  %v4313_v7 = vld [vmem:[%s8297_s25 + $0x30] sm:$0x7]  ;;  %s8238_s28 = smov 75  }
 0x456   : > { %v3872_v9 = vpop.permute.xlu1 %3871  ;;  %v3870_v10 = vpop.permute.xlu0 %3869 }
 0x457   : > { %4260 = vrot.lane.b32.xlu1 %v4251_v6, %s8221_s29  ;;  %v3889_v12 = vsel %vm3887_vm4, %v3868_v4, %v3870_v10  ;;  %v3890_v13 = vsel %vm3887_vm4, %v3870_v10, %v3872_v9  ;;  %v4398_v6 = vld [vmem:[%s8297_s25 + $0x8] sm:$0x77] }
 0x458   : > { %4258 = vrot.lane.b32.xlu0 %v4238_v59, %s8221_s29  ;;  %3909 = vst [vmem:[#allocation2 + $0x540] sm:$0xe0] %v3889_v12  ;;  %3910 = vst [vmem:[#allocation2 + $0x3e8] sm:$0xe0] %v3890_v13  ;;  %v4332_v59 = vrot.slane %v4323_v54, 1  ;;  %v4415_v10 = vrot.slane %v4398_v6, 6 }
 0x459   : > { %v4335_v13 = vrot.slane %v4313_v7, 1  ;;  %v4483_v7 = vld [vmem:[%s8297_s25 + $0x28] sm:$0x77] }
 0x45a   : > { %v3876_v15 = vpop.permute.xlu1 %3875  ;;  %v3874_v16 = vpop.permute.xlu0 %3873 }
 0x45b   : > { %4264 = vrot.lane.b32.xlu1 %v4252_v11, %s8221_s29  ;;  %v3891_v18 = vsel %vm3887_vm4, %v3872_v9, %v3874_v16  ;;  %v3892_v19 = vsel %vm3887_vm4, %v3874_v16, %v3876_v15 }
 0x45c   : > { %4262 = vrot.lane.b32.xlu0 %v4239_v3, %s8221_s29  ;;  %3911 = vst [vmem:[#allocation2 + $0x940] sm:$0xe0] %v3891_v18  ;;  %3912 = vst [vmem:[#allocation2 + $0x600] sm:$0xe0] %v3892_v19 }
 0x45e   : > { %v3880_v21 = vpop.permute.xlu1 %3879  ;;  %v3878_v22 = vpop.permute.xlu0 %3877 }
 0x45f   : > { %4268 = vrot.lane.b32.xlu1 %v4253_v17, %s8221_s29  ;;  %v3893_v24 = vsel %vm3887_vm4, %v3876_v15, %v3878_v22  ;;  %v3894_v25 = vsel %vm3887_vm4, %v3878_v22, %v3880_v21  ;;  %v4410_v15 = vcombine.high %v4398_v6, %v4398_v6 }
 0x460   : > { %4266 = vrot.lane.b32.xlu0 %v4240_v8, %s8221_s29  ;;  %3913 = vst [vmem:[#allocation2 + $0x388] sm:$0xe0] %v3893_v24  ;;  %3914 = vst [vmem:[#allocation2 + $0x20] sm:$0xe0] %v3894_v25 }
 0x461   : > { %v4416_v19 = vrot.slane %v4410_v15, 6 }
 0x462   : > { %v3884_v27 = vpop.permute.xlu1 %3883  ;;  %v3882_v28 = vpop.permute.xlu0 %3881 }
 0x463   : > { %4272 = vrot.lane.b32.xlu1 %v4254_v23, %s8221_s29  ;;  %v3895_v30 = vsel %vm3887_vm4, %v3880_v21, %v3882_v28  ;;  %v3896_v31 = vsel %vm3887_vm4, %v3882_v28, %v3884_v27  ;;  %v4400_v21 = vld [vmem:[%s8297_s25 + $0x18] sm:$0x77] }
 0x464   : > { %4270 = vrot.lane.b32.xlu0 %v4241_v14, %s8221_s29  ;;  %3915 = vst [vmem:[#allocation2 + $0x918] sm:$0xe0] %v3895_v30  ;;  %3916 = vst [vmem:[#allocation2 + $0x4b8] sm:$0xe0] %v3896_v31  ;;  %v4399_v14 = vld [vmem:[%s8297_s25 + $0x10] sm:$0x77]  ;;  %v4412_v28 = vcombine.high %v4400_v21, %v4400_v21 }
 0x465   : > { %v4417_v17 = vrot.slane %v4399_v14, 6  ;;  %v4411_v22 = vcombine.high %v4399_v14, %v4399_v14  ;;  %v4419_v23 = vrot.slane %v4400_v21, 6  ;;  %v4484_v21 = vld [vmem:[%s8297_s25 + $0x30] sm:$0x7] }
 0x466   : > { %v3936_v34 = vpop.permute.xlu1 %3935  ;;  %v3886_v35 = vpop.permute.xlu0 %3885  ;;  %v4420_v32 = vrot.slane %v4412_v28, 6 }
 0x467   : > { %4276 = vrot.lane.b32.xlu1 %v7945_v29, %s8221_s29  ;;  %v3897_v37 = vsel %vm3887_vm4, %v3884_v27, %v3886_v35  ;;  %v4418_v25 = vrot.slane %v4411_v22, 6  ;;  %v4401_v27 = vld [vmem:[%s8297_s25 + $0x20] sm:$0x77] }
 0x468   : > { %4274 = vrot.lane.b32.xlu0 %v4242_v20, %s8221_s29  ;;  %3917 = vst [vmem:[#allocation2 + $0x3e0] sm:$0xe0] %v3897_v37  ;;  %v4421_v31 = vrot.slane %v4401_v27, 6  ;;  %v4413_v35 = vcombine.high %v4401_v27, %v4401_v27  ;;  %s8239_s29 = smov 77  }
 0x46a   : > { %v3940_v41 = vpop.permute.xlu1 %3939  ;;  %v3938_v42 = vpop.permute.xlu0 %3937  ;;  %v4422_v40 = vrot.slane %v4413_v35, 6 }
 0x46b   : > { %4338 = vrot.lane.b32.xlu1 %v4326_v36, %s8205_s7  ;;  %v3958_v44 = vsel %vm10947_vm6, %v3936_v34, %v3938_v42  ;;  %v3959_v45 = vsel %vm10947_vm6, %v3938_v42, %v3940_v41  ;;  %v4402_v34 = vld [vmem:[%s8297_s25 + $0x28] sm:$0x77] }
 0x46c   : > { %4336 = vrot.lane.b32.xlu0 %v4325_v39, %s8205_s7  ;;  %3978 = vst [vmem:[#allocation2 + $0x850] sm:$0x7] %v3958_v44  ;;  %3979 = vst [vmem:[#allocation2 + $0x3f8] sm:$0x7] %v3959_v45  ;;  %v4423_v39 = vrot.slane %v4402_v34, 6  ;;  %v4414_v42 = vcombine.high %v4402_v34, %v4402_v34 }
 0x46e   : > { %v3944_v49 = vpop.permute.xlu1 %3943  ;;  %v3942_v50 = vpop.permute.xlu0 %3941 }
 0x46f   : > { %4342 = vrot.lane.b32.xlu1 %v4328_v43, %s8205_s7  ;;  %v3960_v52 = vsel %vm10947_vm6, %v3940_v41, %v3942_v50  ;;  %v3961_v53 = vsel %vm10947_vm6, %v3942_v50, %v3944_v49  ;;  %v4403_v41 = vld [vmem:[%s8297_s25 + $0x30] sm:$0x7]  ;;  %v4479_v43 = vld [vmem:[%s8297_s25 + $0x8] sm:$0x77]  ;;  %v4424_v50 = vrot.slane %v4414_v42, 6 }
 0x470   : > { %4340 = vrot.lane.b32.xlu0 %v4327_v47, %s8205_s7  ;;  %3980 = vst [vmem:[#allocation2 + $0x428] sm:$0x7] %v3960_v52  ;;  %3981 = vst [vmem:[#allocation2 + $0x948] sm:$0x7] %v3961_v53  ;;  %v4425_v48 = vrot.slane %v4403_v41, 6 }
 0x472   : > { %v3948_v57 = vpop.permute.xlu1 %3947  ;;  %v3946_v58 = vpop.permute.xlu0 %3945 }
 0x473   : > { %4346 = vrot.lane.b32.xlu1 %v4330_v51, %s8205_s7  ;;  %v3962_v60 = vsel %vm10947_vm6, %v3944_v49, %v3946_v58  ;;  %v3963_v61 = vsel %vm10947_vm6, %v3946_v58, %v3948_v57  ;;  %v4491_v49 = vcombine.high %v4479_v43, %v4479_v43  ;;  %v4480_v51 = vld [vmem:[%s8297_s25 + $0x10] sm:$0x77]  ;;  %v4496_v58 = vrot.slane %v4479_v43, 3  ;;  %v4563_v43 = vld [vmem:[%s8297_s25 + $0x20] sm:$0x77] }
 0x474   : > { %4344 = vrot.lane.b32.xlu0 %v4329_v55, %s8205_s7  ;;  %3982 = vst [vmem:[#allocation2 + $0xc8] sm:$0x7] %v3962_v60  ;;  %3983 = vst [vmem:[#allocation2 + $0x4c0] sm:$0x7] %v3963_v61  ;;  %v4492_v55 = vcombine.high %v4480_v51, %v4480_v51 }
 0x475   : > { %v4497_v54 = vrot.slane %v4491_v49, 3  ;;  %v4564_v49 = vld [vmem:[%s8297_s25 + $0x28] sm:$0x77] }
 0x476   : > { %v3952_v0 = vpop.permute.xlu1 %3951  ;;  %v3950_v1 = vpop.permute.xlu0 %3949  ;;  %v4499_v61 = vrot.slane %v4492_v55, 3 }
 0x477   : > { %4350 = vrot.lane.b32.xlu1 %v4332_v59, %s8205_s7  ;;  %v3964_v3 = vsel %vm10947_vm6, %v3948_v57, %v3950_v1  ;;  %v3965_v4 = vsel %vm10947_vm6, %v3950_v1, %v3952_v0  ;;  %v4481_v59 = vld [vmem:[%s8297_s25 + $0x18] sm:$0x77]  ;;  %v4482_v1 = vld [vmem:[%s8297_s25 + $0x20] sm:$0x77] }
 0x478   : > { %4348 = vrot.lane.b32.xlu0 %v4331_v63, %s8205_s7  ;;  %3984 = vst [vmem:[#allocation2 + $0x6c8] sm:$0x7] %v3964_v3  ;;  %3985 = vst [vmem:[#allocation2 + $0x998] sm:$0x7] %v3965_v4  ;;  %v4493_v62 = vcombine.high %v4481_v59, %v4481_v59  ;;  %v4494_v4 = vcombine.high %v4482_v1, %v4482_v1  ;;  %v4500_v6 = vrot.slane %v4481_v59, 3 }
 0x47a   : > { %v3956_v8 = vpop.permute.xlu1 %3955  ;;  %v3954_v9 = vpop.permute.xlu0 %3953  ;;  %v4501_v3 = vrot.slane %v4493_v62, 3 }
 0x47b   : > { %4354 = vrot.lane.b32.xlu1 %v4334_v2, %s8205_s7  ;;  %v3966_v11 = vsel %vm10947_vm6, %v3952_v0, %v3954_v9  ;;  %v3967_v12 = vsel %vm10947_vm6, %v3954_v9, %v3956_v8  ;;  %v4498_v0 = vrot.slane %v4480_v51, 3 }
 0x47c   : > { %4352 = vrot.lane.b32.xlu0 %v4333_v5, %s8205_s7  ;;  %3986 = vst [vmem:[#allocation2 + $0x470] sm:$0x7] %v3966_v11  ;;  %3987 = vst [vmem:[#allocation2 + $0x190] sm:$0x7] %v3967_v12  ;;  %v4503_v11 = vrot.slane %v4494_v4, 3  ;;  %v4495_v12 = vcombine.high %v4483_v7, %v4483_v7 }
 0x47e   : > { %v4019_v16 = vpop.permute.xlu1 %4018 }
 0x47f   : > { %4426 = vrot.lane.b32.xlu1 %v4415_v10, %s8230_s17  ;;  %v4017_v18 = vpop.permute.xlu0 %4016 }
 0x480   : > { %4356 = vrot.lane.b32.xlu0 %v4335_v13, %s8205_s7  ;;  %v4038_v20 = vsel %vm2319_vm0, %v4017_v18, %v4019_v16  ;;  %s8231_s7 = smov 11   ;;  %v4502_v13 = vrot.slane %v4482_v1, 3  ;;  %v4505_v18 = vrot.slane %v4495_v12, 3 }
 0x481   : > { %4058 = vst [vmem:[#allocation2 + $0x850] sm:$0x38] %v4038_v20 }
 0x483   : > { %4430 = vrot.lane.b32.xlu1 %v4417_v17, %s8230_s17  ;;  %v4023_v24 = vpop.permute.xlu1 %4022 }
 0x484   : > { %4428 = vrot.lane.b32.xlu0 %v4416_v19, %s8230_s17  ;;  %v4021_v26 = vpop.permute.xlu0 %4020  ;;  %v4504_v19 = vrot.slane %v4483_v7, 3 }
 0x485   : > { %v4039_v29 = vsel %vm2319_vm0, %v4019_v16, %v4021_v26  ;;  %v4040_v30 = vsel %vm2319_vm0, %v4021_v26, %v4023_v24  ;;  %v4506_v26 = vrot.slane %v4484_v21, 3 }
 0x486   : > { %4059 = vst [vmem:[#allocation2 + $0x3f8] sm:$0x38] %v4039_v29  ;;  %4060 = vst [vmem:[#allocation2 + $0x428] sm:$0x38] %v4040_v30 }
 0x487   : > { %4434 = vrot.lane.b32.xlu1 %v4419_v23, %s8230_s17 }
 0x488   : > { %4432 = vrot.lane.b32.xlu0 %v4418_v25, %s8230_s17  ;;  %v4027_v33 = vpop.permute.xlu1 %4026  ;;  %v4560_v25 = vld [vmem:[%s8297_s25 + $0x8] sm:$0x77] }
 0x489   : > { %v4025_v36 = vpop.permute.xlu0 %4024 }
 0x48a   : > { %v4041_v37 = vsel %vm2319_vm0, %v4023_v24, %v4025_v36  ;;  %v4042_v38 = vsel %vm2319_vm0, %v4025_v36, %v4027_v33 }
 0x48b   : > { %4438 = vrot.lane.b32.xlu1 %v4421_v31, %s8230_s17  ;;  %4061 = vst [vmem:[#allocation2 + $0x948] sm:$0x38] %v4041_v37  ;;  %4062 = vst [vmem:[#allocation2 + $0xc8] sm:$0x38] %v4042_v38  ;;  %v4572_v31 = vcombine.high %v4560_v25, %v4560_v25  ;;  %v4562_v38 = vld [vmem:[%s8297_s25 + $0x18] sm:$0x77] }
 0x48c   : > { %4436 = vrot.lane.b32.xlu0 %v4420_v32, %s8230_s17  ;;  %v4561_v32 = vld [vmem:[%s8297_s25 + $0x10] sm:$0x77]  ;;  %v4574_v42 = vcombine.high %v4562_v38, %v4562_v38 }
 0x48d   : > { %v4031_v44 = vpop.permute.xlu1 %4030  ;;  %v4573_v37 = vcombine.high %v4561_v32, %v4561_v32 }
 0x48e   : > { %v4029_v45 = vpop.permute.xlu0 %4028 }
 0x48f   : > { %4442 = vrot.lane.b32.xlu1 %v4423_v39, %s8230_s17  ;;  %v4043_v46 = vsel %vm2319_vm0, %v4027_v33, %v4029_v45  ;;  %v4044_v47 = vsel %vm2319_vm0, %v4029_v45, %v4031_v44 }
 0x490   : > { %4440 = vrot.lane.b32.xlu0 %v4422_v40, %s8230_s17  ;;  %4063 = vst [vmem:[#allocation2 + $0x4c0] sm:$0x38] %v4043_v46  ;;  %4064 = vst [vmem:[#allocation2 + $0x6c8] sm:$0x38] %v4044_v47 }
 0x492   : > { %v4035_v52 = vpop.permute.xlu1 %4034 }
 0x493   : > { %4446 = vrot.lane.b32.xlu1 %v4425_v48, %s8230_s17  ;;  %v4033_v53 = vpop.permute.xlu0 %4032  ;;  %v4575_v48 = vcombine.high %v4563_v43, %v4563_v43 }
 0x494   : > { %4444 = vrot.lane.b32.xlu0 %v4424_v50, %s8230_s17  ;;  %v4045_v56 = vsel %vm2319_vm0, %v4031_v44, %v4033_v53  ;;  %v4046_v57 = vsel %vm2319_vm0, %v4033_v53, %v4035_v52  ;;  %v4630_v50 = vld [vmem:[%s8297_s25 + $0x8] sm:$0x77] }
 0x495   : > { %4065 = vst [vmem:[#allocation2 + $0x998] sm:$0x38] %v4045_v56  ;;  %4066 = vst [vmem:[#allocation2 + $0x470] sm:$0x38] %v4046_v57  ;;  %v4642_v55 = vcombine.high %v4630_v50, %v4630_v50  ;;  %v4576_v56 = vcombine.high %v4564_v49, %v4564_v49  ;;  %v4565_v57 = vld [vmem:[%s8297_s25 + $0x30] sm:$0x7] }
 0x496   : > { %v4647_v1 = vrot.slane %v4630_v50, 5 }
 0x497   : > { %4509 = vrot.lane.b32.xlu1 %v4497_v54, %s8231_s7  ;;  %v4097_v60 = vpop.permute.xlu1 %4096 }
 0x498   : > { %4507 = vrot.lane.b32.xlu0 %v4496_v58, %s8231_s7  ;;  %v4037_v63 = vpop.permute.xlu0 %4036  ;;  %v4631_v58 = vld [vmem:[%s8297_s25 + $0x10] sm:$0x77] }
 0x499   : > { %v4047_v2 = vsel %vm2319_vm0, %v4035_v52, %v4037_v63  ;;  %v4648_v63 = vrot.slane %v4642_v55, 5  ;;  %v4714_v55 = vld [vmem:[%s8297_s25 + $0x20] sm:$0x77] }
 0x49a   : > { %4067 = vst [vmem:[#allocation2 + $0x190] sm:$0x38] %v4047_v2  ;;  %v4632_v2 = vld [vmem:[%s8297_s25 + $0x18] sm:$0x77] }
 0x49b   : > { %4513 = vrot.lane.b32.xlu1 %v4499_v61, %s8231_s7 }
 0x49c   : > { %4511 = vrot.lane.b32.xlu0 %v4498_v0, %s8231_s7  ;;  %v4101_v5 = vpop.permute.xlu1 %4100  ;;  %v4643_v0 = vcombine.high %v4631_v58, %v4631_v58 }
 0x49d   : > { %v4099_v8 = vpop.permute.xlu0 %4098 }
 0x49e   : > { %v4118_v9 = vsel %vm2390_vm1, %v4097_v60, %v4099_v8  ;;  %v4119_v10 = vsel %vm2390_vm1, %v4099_v8, %v4101_v5  ;;  %v4650_v7 = vrot.slane %v4643_v0, 5  ;;  %v4644_v8 = vcombine.high %v4632_v2, %v4632_v2 }
 0x49f   : > { %4138 = vst [vmem:[#allocation2 + $0x268] ss:$1516 sps:$4 sm:$0xc1] %v4118_v9   ;;  %4139 = vst [vmem:[#allocation2 + $0x830] ss:$-1076 sps:$4 sm:$0xc1] %v4119_v10   ;;  %4517 = vrot.lane.b32.xlu1 %v4501_v3, %s8231_s7 }
 0x4a0   : > { %4515 = vrot.lane.b32.xlu0 %v4500_v6, %s8231_s7  ;;  %v4649_v9 = vrot.slane %v4631_v58, 5  ;;  %v4633_v10 = vld [vmem:[%s8297_s25 + $0x20] sm:$0x77] }
 0x4a1   : > { %v4105_v14 = vpop.permute.xlu1 %4104 }
 0x4a2   : > { %v4103_v15 = vpop.permute.xlu0 %4102 }
 0x4a3   : > { %v4120_v16 = vsel %vm2390_vm1, %v4101_v5, %v4103_v15  ;;  %v4121_v17 = vsel %vm2390_vm1, %v4103_v15, %v4105_v14  ;;  %4521 = vrot.lane.b32.xlu1 %v4503_v11, %s8231_s7  ;;  %v4645_v15 = vcombine.high %v4633_v10, %v4633_v10 }
 0x4a4   : > { %4140 = vst [vmem:[#allocation2 + $0x760] ss:$-820 sps:$4 sm:$0xc1] %v4120_v16   ;;  %4141 = vst [vmem:[#allocation2 + $0x638] ss:$788 sps:$4 sm:$0xc1] %v4121_v17   ;;  %4519 = vrot.lane.b32.xlu0 %v4502_v13, %s8231_s7 }
 0x4a5   : > { %v4109_v20 = vpop.permute.xlu1 %4108  ;;  %v4651_v16 = vrot.slane %v4632_v2, 5  ;;  %v4634_v17 = vld [vmem:[%s8297_s25 + $0x28] sm:$0x77] }
 0x4a6   : > { %v4107_v22 = vpop.permute.xlu0 %4106 }
 0x4a7   : > { %v4122_v23 = vsel %vm2390_vm1, %v4105_v14, %v4107_v22  ;;  %v4123_v24 = vsel %vm2390_vm1, %v4107_v22, %v4109_v20  ;;  %4525 = vrot.lane.b32.xlu1 %v4505_v18, %s8231_s7  ;;  %v4652_v14 = vrot.slane %v4644_v8, 5  ;;  %v4654_v22 = vrot.slane %v4645_v15, 5  ;;  %v4801_v8 = vld [vmem:[%s8297_s25 + $0x8] sm:$0x77] }
 0x4a8   : > { %4142 = vst [vmem:[#allocation2 + $0x180] ss:$-180 sps:$4 sm:$0xc1] %v4122_v23   ;;  %4143 = vst [vmem:[#allocation2 + $0x1e0] ss:$740 sps:$4 sm:$0xc1] %v4123_v24   ;;  %4523 = vrot.lane.b32.xlu0 %v4504_v19, %s8231_s7  ;;  %v4646_v23 = vcombine.high %v4634_v17, %v4634_v17 }
 0x4a9   : > { %v4113_v27 = vpop.permute.xlu1 %4112  ;;  %v4653_v24 = vrot.slane %v4633_v10, 5 }
 0x4aa   : > { %v4111_v28 = vpop.permute.xlu0 %4110 }
 0x4ab   : > { %v4124_v29 = vsel %vm2390_vm1, %v4109_v20, %v4111_v28  ;;  %v4125_v30 = vsel %vm2390_vm1, %v4111_v28, %v4113_v27  ;;  %4577 = vrot.lane.b32.xlu1 %v4560_v25, %s8232_s18 }
 0x4ac   : > { %4144 = vst [vmem:[#allocation2 + $0x2e8] ss:$996 sps:$4 sm:$0xc1] %v4124_v29   ;;  %4145 = vst [vmem:[#allocation2 + $0x6b0] ss:$748 sps:$4 sm:$0xc1] %v4125_v30   ;;  %4527 = vrot.lane.b32.xlu0 %v4506_v26, %s8231_s7 }
 0x4ad   : > { %v4117_v33 = vpop.permute.xlu1 %4116  ;;  %v4656_v29 = vrot.slane %v4646_v23, 5  ;;  %v4655_v30 = vrot.slane %v4634_v17, 5  ;;  %v4818_v23 = vrot.slane %v4801_v8, 7 }
 0x4ae   : > { %v4115_v34 = vpop.permute.xlu0 %4114 }
 0x4af   : > { %v4126_v35 = vsel %vm2390_vm1, %v4113_v27, %v4115_v34  ;;  %v4127_v36 = vsel %vm2390_vm1, %v4115_v34, %v4117_v33  ;;  %4581 = vrot.lane.b32.xlu1 %v4561_v32, %s8232_s18  ;;  %v4635_v33 = vld [vmem:[%s8297_s25 + $0x30] sm:$0x7]  ;;  %vm4680_vm1 = vcmask 72704  }
 0x4b0   : > { %4146 = vst [vmem:[#allocation2 + $0x440] ss:$52 sps:$4 sm:$0xc1] %v4126_v35   ;;  %4147 = vst [vmem:[#allocation2 + $0x418] ss:$-644 sps:$4 sm:$0xc1] %v4127_v36   ;;  %4579 = vrot.lane.b32.xlu0 %v4572_v31, %s8232_s18 }
 0x4b1   : > { %v4189_v39 = vpop.permute.xlu1 %4188  ;;  %v4711_v31 = vld [vmem:[%s8297_s25 + $0x8] sm:$0x77] }
 0x4b2   : > { %v4187_v40 = vpop.permute.xlu0 %4186 }
 0x4b3   : > { %v4208_v41 = vsel %vm2471_vm2, %v4187_v40, %v4189_v39  ;;  %4585 = vrot.lane.b32.xlu1 %v4562_v38, %s8232_s18  ;;  %v4657_v38 = vrot.slane %v4635_v33, 5  ;;  %v4723_v40 = vcombine.high %v4711_v31, %v4711_v31 }
 0x4b4   : > { %4228 = vst [vmem:[#allocation2 + $0x268] sm:$0xe] %v4208_v41  ;;  %4583 = vrot.lane.b32.xlu0 %v4573_v37, %s8232_s18  ;;  %v4728_v37 = vrot.slane %v4711_v31, 2 }
 0x4b5   : > { %v4193_v44 = vpop.permute.xlu1 %4192 }
 0x4b6   : > { %v4191_v45 = vpop.permute.xlu0 %4190 }
 0x4b7   : > { %v4209_v46 = vsel %vm2471_vm2, %v4189_v39, %v4191_v45  ;;  %v4210_v47 = vsel %vm2471_vm2, %v4191_v45, %v4193_v44  ;;  %4589 = vrot.lane.b32.xlu1 %v4563_v43, %s8232_s18  ;;  %v4712_v39 = vld [vmem:[%s8297_s25 + $0x10] sm:$0x77] }
 0x4b8   : > { %4229 = vst [vmem:[#allocation2 + $0x830] sm:$0xe] %v4209_v46  ;;  %4230 = vst [vmem:[#allocation2 + $0x760] sm:$0xe] %v4210_v47  ;;  %4587 = vrot.lane.b32.xlu0 %v4574_v42, %s8232_s18  ;;  %v4730_v45 = vrot.slane %v4712_v39, 2  ;;  %v4729_v46 = vrot.slane %v4723_v40, 2 }
 0x4b9   : > { %v4197_v51 = vpop.permute.xlu1 %4196  ;;  %v4713_v47 = vld [vmem:[%s8297_s25 + $0x18] sm:$0x77] }
 0x4ba   : > { %v4195_v52 = vpop.permute.xlu0 %4194 }
 0x4bb   : > { %v4211_v53 = vsel %vm2471_vm2, %v4193_v44, %v4195_v52  ;;  %v4212_v54 = vsel %vm2471_vm2, %v4195_v52, %v4197_v51  ;;  %4593 = vrot.lane.b32.xlu1 %v4564_v49, %s8232_s18 }
 0x4bc   : > { %4231 = vst [vmem:[#allocation2 + $0x638] sm:$0xe] %v4211_v53  ;;  %4232 = vst [vmem:[#allocation2 + $0x180] sm:$0xe] %v4212_v54  ;;  %4591 = vrot.lane.b32.xlu0 %v4575_v48, %s8232_s18  ;;  %v4724_v48 = vcombine.high %v4712_v39, %v4712_v39  ;;  %v4732_v53 = vrot.slane %v4713_v47, 2 }
 0x4bd   : > { %v4201_v59 = vpop.permute.xlu1 %4200  ;;  %v4805_v39 = vld [vmem:[%s8297_s25 + $0x28] sm:$0x77] }
 0x4be   : > { %v4199_v60 = vpop.permute.xlu0 %4198  ;;  %v4731_v54 = vrot.slane %v4724_v48, 2 }
 0x4bf   : > { %v4213_v61 = vsel %vm2471_vm2, %v4197_v51, %v4199_v60  ;;  %v4214_v62 = vsel %vm2471_vm2, %v4199_v60, %v4201_v59  ;;  %4597 = vrot.lane.b32.xlu1 %v4565_v57, %s8232_s18  ;;  %v4734_v60 = vrot.slane %v4714_v55, 2 }
 0x4c0   : > { %4233 = vst [vmem:[#allocation2 + $0x1e0] sm:$0xe] %v4213_v61  ;;  %4234 = vst [vmem:[#allocation2 + $0x2e8] sm:$0xe] %v4214_v62  ;;  %4595 = vrot.lane.b32.xlu0 %v4576_v56, %s8232_s18  ;;  %v4725_v56 = vcombine.high %v4713_v47, %v4713_v47  ;;  %v4715_v62 = vld [vmem:[%s8297_s25 + $0x28] sm:$0x77] }
 0x4c1   : > { %v4205_v3 = vpop.permute.xlu1 %4204 }
 0x4c2   : > { %v4203_v4 = vpop.permute.xlu0 %4202  ;;  %v4733_v61 = vrot.slane %v4725_v56, 2 }
 0x4c3   : > { %v4215_v5 = vsel %vm2471_vm2, %v4201_v59, %v4203_v4  ;;  %v4216_v6 = vsel %vm2471_vm2, %v4203_v4, %v4205_v3  ;;  %4660 = vrot.lane.b32.xlu1 %v4648_v63, %s8233_s21  ;;  %v4726_v63 = vcombine.high %v4714_v55, %v4714_v55  ;;  %v4736_v4 = vrot.slane %v4715_v62, 2  ;;  %v4806_v55 = vld [vmem:[%s8297_s25 + $0x30] sm:$0x7] }
 0x4c4   : > { %4235 = vst [vmem:[#allocation2 + $0x6b0] sm:$0xe] %v4215_v5  ;;  %4236 = vst [vmem:[#allocation2 + $0x440] sm:$0xe] %v4216_v6  ;;  %4658 = vrot.lane.b32.xlu0 %v4647_v1, %s8233_s21  ;;  %v4716_v6 = vld [vmem:[%s8297_s25 + $0x30] sm:$0x7] }
 0x4c5   : > { %v4257_v11 = vpop.permute.xlu1 %4256  ;;  %v4735_v5 = vrot.slane %v4726_v63, 2 }
 0x4c6   : > { %v4207_v12 = vpop.permute.xlu0 %4206 }
 0x4c7   : > { %v4217_v13 = vsel %vm2471_vm2, %v4205_v3, %v4207_v12  ;;  %4664 = vrot.lane.b32.xlu1 %v4650_v7, %s8233_s21  ;;  %v4727_v7 = vcombine.high %v4715_v62, %v4715_v62  ;;  %vm10946_vm2 = vcmask 1042432  }
 0x4c8   : > { %4237 = vst [vmem:[#allocation2 + $0x418] sm:$0xe] %v4217_v13  ;;  %4662 = vrot.lane.b32.xlu0 %v4649_v9, %s8233_s21  ;;  %v4738_v13 = vrot.slane %v4716_v6, 2 }
 0x4c9   : > { %v4261_v18 = vpop.permute.xlu1 %4260  ;;  %v4737_v15 = vrot.slane %v4727_v7, 2 }
 0x4ca   : > { %v4259_v19 = vpop.permute.xlu0 %4258 }
 0x4cb   : > { %v4278_v20 = vsel %vm2562_vm3, %v4257_v11, %v4259_v19  ;;  %v4279_v21 = vsel %vm2562_vm3, %v4259_v19, %v4261_v18  ;;  %4668 = vrot.lane.b32.xlu1 %v4652_v14, %s8233_s21  ;;  %v4813_v14 = vcombine.high %v4801_v8, %v4801_v8 }
 0x4cc   : > { %4298 = vst [vmem:[#allocation2 + $0x268] sm:$0x70] %v4278_v20  ;;  %4299 = vst [vmem:[#allocation2 + $0x830] sm:$0x70] %v4279_v21  ;;  %4666 = vrot.lane.b32.xlu0 %v4651_v16, %s8233_s21  ;;  %v4802_v16 = vld [vmem:[%s8297_s25 + $0x10] sm:$0x77] }
 0x4cd   : > { %v4265_v25 = vpop.permute.xlu1 %4264  ;;  %v4819_v21 = vrot.slane %v4813_v14, 7  ;;  %v4820_v31 = vrot.slane %v4802_v16, 7  ;;  %v4885_v14 = vld [vmem:[%s8297_s25 + $0x28] sm:$0x77] }
 0x4ce   : > { %v4263_v26 = vpop.permute.xlu0 %4262 }
 0x4cf   : > { %v4280_v27 = vsel %vm2562_vm3, %v4261_v18, %v4263_v26  ;;  %v4281_v28 = vsel %vm2562_vm3, %v4263_v26, %v4265_v25  ;;  %4672 = vrot.lane.b32.xlu1 %v4654_v22, %s8233_s21  ;;  %v4814_v22 = vcombine.high %v4802_v16, %v4802_v16 }
 0x4d0   : > { %4300 = vst [vmem:[#allocation2 + $0x760] sm:$0x70] %v4280_v27  ;;  %4301 = vst [vmem:[#allocation2 + $0x638] sm:$0x70] %v4281_v28  ;;  %4670 = vrot.lane.b32.xlu0 %v4653_v24, %s8233_s21  ;;  %v4803_v24 = vld [vmem:[%s8297_s25 + $0x18] sm:$0x77] }
 0x4d1   : > { %v4269_v32 = vpop.permute.xlu1 %4268 }
 0x4d2   : > { %v4267_v34 = vpop.permute.xlu0 %4266 }
 0x4d3   : > { %v4282_v35 = vsel %vm2562_vm3, %v4265_v25, %v4267_v34  ;;  %v4283_v36 = vsel %vm2562_vm3, %v4267_v34, %v4269_v32  ;;  %4676 = vrot.lane.b32.xlu1 %v4656_v29, %s8233_s21  ;;  %v4821_v29 = vrot.slane %v4814_v22, 7 }
 0x4d4   : > { %4302 = vst [vmem:[#allocation2 + $0x180] sm:$0x70] %v4282_v35  ;;  %4303 = vst [vmem:[#allocation2 + $0x1e0] sm:$0x70] %v4283_v36  ;;  %4674 = vrot.lane.b32.xlu0 %v4655_v30, %s8233_s21  ;;  %v4815_v30 = vcombine.high %v4803_v24, %v4803_v24 }
 0x4d5   : > { %v4273_v41 = vpop.permute.xlu1 %4272 }
 0x4d6   : > { %v4271_v42 = vpop.permute.xlu0 %4270  ;;  %v4823_v36 = vrot.slane %v4815_v30, 7 }
 0x4d7   : > { %v4284_v43 = vsel %vm2562_vm3, %v4269_v32, %v4271_v42  ;;  %v4285_v44 = vsel %vm2562_vm3, %v4271_v42, %v4273_v41  ;;  %4739 = vrot.lane.b32.xlu1 %v4728_v37, %s8222_s4  ;;  %v4804_v32 = vld [vmem:[%s8297_s25 + $0x20] sm:$0x77] }
 0x4d8   : > { %4304 = vst [vmem:[#allocation2 + $0x2e8] sm:$0x70] %v4284_v43  ;;  %4305 = vst [vmem:[#allocation2 + $0x6b0] sm:$0x70] %v4285_v44  ;;  %4678 = vrot.lane.b32.xlu0 %v4657_v38, %s8233_s21  ;;  %v4816_v37 = vcombine.high %v4804_v32, %v4804_v32  ;;  %v4822_v38 = vrot.slane %v4803_v24, 7 }
 0x4d9   : > { %v4277_v49 = vpop.permute.xlu1 %4276 }
 0x4da   : > { %v4275_v50 = vpop.permute.xlu0 %4274  ;;  %v4825_v44 = vrot.slane %v4816_v37, 7 }
 0x4db   : > { %v4286_v51 = vsel %vm2562_vm3, %v4273_v41, %v4275_v50  ;;  %v4287_v52 = vsel %vm2562_vm3, %v4275_v50, %v4277_v49  ;;  %4743 = vrot.lane.b32.xlu1 %v4730_v45, %s8222_s4  ;;  %v4817_v45 = vcombine.high %v4805_v39, %v4805_v39  ;;  %vm6045_vm3 = vcmask 113664  }
 0x4dc   : > { %4306 = vst [vmem:[#allocation2 + $0x440] sm:$0x70] %v4286_v51  ;;  %4307 = vst [vmem:[#allocation2 + $0x418] sm:$0x70] %v4287_v52  ;;  %4741 = vrot.lane.b32.xlu0 %v4729_v46, %s8222_s4  ;;  %v4824_v46 = vrot.slane %v4804_v32, 7  ;;  %v4826_v52 = vrot.slane %v4805_v39, 7 }
 0x4dd   : > { %v4339_v57 = vpop.permute.xlu1 %4338  ;;  %v4827_v51 = vrot.slane %v4817_v45, 7 }
 0x4de   : > { %v4337_v58 = vpop.permute.xlu0 %4336 }
 0x4df   : > { %v4358_v59 = vsel %vm893_vm8, %v4337_v58, %v4339_v57  ;;  %4747 = vrot.lane.b32.xlu1 %v4732_v53, %s8222_s4  ;;  %v4881_v53 = vld [vmem:[%s8297_s25 + $0x8] sm:$0x77] }
 0x4e0   : > { %4378 = vst [vmem:[#allocation2 + $0x788] ss:$-1308 sps:$4 sm:$0x83] %v4358_v59   ;;  %4745 = vrot.lane.b32.xlu0 %v4731_v54, %s8222_s4  ;;  %v4893_v59 = vcombine.low %v4881_v53, %v4881_v53 }
 0x4e1   : > { %v4343_v0 = vpop.permute.xlu1 %4342 }
 0x4e2   : > { %v4341_v1 = vpop.permute.xlu0 %4340 }
 0x4e3   : > { %v4359_v2 = vsel %vm893_vm8, %v4339_v57, %v4341_v1  ;;  %v4360_v3 = vsel %vm893_vm8, %v4341_v1, %v4343_v0  ;;  %4751 = vrot.lane.b32.xlu1 %v4734_v60, %s8222_s4  ;;  %v4828_v60 = vrot.slane %v4806_v55, 7  ;;  %v9854_v55 = vld [vmem:[%s8297_s25 + $0xc] sm:$0x77] }
 0x4e4   : > { %4379 = vst [vmem:[#allocation2 + $0x710] ss:$292 sps:$4 sm:$0x83] %v4359_v2   ;;  %4380 = vst [vmem:[#allocation2 + $0x120] ss:$1604 sps:$4 sm:$0x83] %v4360_v3   ;;  %4749 = vrot.lane.b32.xlu0 %v4733_v61, %s8222_s4 }
 0x4e5   : > { %v4347_v9 = vpop.permute.xlu1 %4346  ;;  %v4882_v61 = vld [vmem:[%s8297_s25 + $0x10] sm:$0x77]  ;;  %v4883_v3 = vld [vmem:[%s8297_s25 + $0x18] sm:$0x77] }
 0x4e6   : > { %v4345_v10 = vpop.permute.xlu0 %4344  ;;  %v4894_v2 = vcombine.low %v4882_v61, %v4882_v61  ;;  %v4895_v8 = vcombine.low %v4883_v3, %v4883_v3 }
 0x4e7   : > { %v4361_v11 = vsel %vm893_vm8, %v4343_v0, %v4345_v10  ;;  %v4362_v12 = vsel %vm893_vm8, %v4345_v10, %v4347_v9  ;;  %4755 = vrot.lane.b32.xlu1 %v4736_v4, %s8222_s4 }
 0x4e8   : > { %4381 = vst [vmem:[#allocation2 + $0x58] ss:$1508 sps:$4 sm:$0x83] %v4361_v11   ;;  %4382 = vst [vmem:[#allocation2 + $0x4e0] ss:$-860 sps:$4 sm:$0x83] %v4362_v12   ;;  %4753 = vrot.lane.b32.xlu0 %v4735_v5, %s8222_s4 }
 0x4e9   : > { %v4351_v17 = vpop.permute.xlu1 %4350 }
 0x4ea   : > { %v4349_v18 = vpop.permute.xlu0 %4348 }
 0x4eb   : > { %v4363_v19 = vsel %vm893_vm8, %v4347_v9, %v4349_v18  ;;  %v4364_v20 = vsel %vm893_vm8, %v4349_v18, %v4351_v17  ;;  %4759 = vrot.lane.b32.xlu1 %v4738_v13, %s8222_s4  ;;  %v4884_v9 = vld [vmem:[%s8297_s25 + $0x20] sm:$0x77] }
 0x4ec   : > { %4383 = vst [vmem:[#allocation2 + $0x6d0] ss:$-1260 sps:$4 sm:$0x83] %v4363_v19   ;;  %4384 = vst [vmem:[#allocation2 + $0x160] ss:$396 sps:$4 sm:$0x83] %v4364_v20   ;;  %4757 = vrot.lane.b32.xlu0 %v4737_v15, %s8222_s4  ;;  %v4896_v13 = vcombine.low %v4884_v9, %v4884_v9  ;;  %v4897_v19 = vcombine.low %v4885_v14, %v4885_v14 }
 0x4ed   : > { %v4355_v25 = vpop.permute.xlu1 %4354  ;;  %v4951_v20 = vld [vmem:[%s8297_s25 + $0x8] sm:$0x77] }
 0x4ee   : > { %v4353_v26 = vpop.permute.xlu0 %4352 }
 0x4ef   : > { %v4365_v27 = vsel %vm893_vm8, %v4351_v17, %v4353_v26  ;;  %v4366_v28 = vsel %vm893_vm8, %v4353_v26, %v4355_v25  ;;  %4831 = vrot.lane.b32.xlu1 %v4819_v21, %s8223_s5  ;;  %v4963_v26 = vcombine.high %v4951_v20, %v4951_v20 }
 0x4f0   : > { %4385 = vst [vmem:[#allocation2 + $0x828] ss:$-372 sps:$4 sm:$0x83] %v4365_v27   ;;  %4386 = vst [vmem:[#allocation2 + $0x170] ss:$724 sps:$4 sm:$0x83] %v4366_v28   ;;  %4829 = vrot.lane.b32.xlu0 %v4818_v23, %s8223_s5 }
 0x4f1   : > { %v4427_v33 = vpop.permute.xlu1 %4426  ;;  %v4952_v27 = vld [vmem:[%s8297_s25 + $0x10] sm:$0x77]  ;;  %v4969_v32 = vrot.slane %v4963_v26, 1 }
 0x4f2   : > { %v4357_v34 = vpop.permute.xlu0 %4356 }
 0x4f3   : > { %v4367_v35 = vsel %vm893_vm8, %v4355_v25, %v4357_v34  ;;  %4835 = vrot.lane.b32.xlu1 %v4821_v29, %s8223_s5  ;;  %vm4529_vm8 = vcmask 89088   ;;  %v7986_v25 = vld [vmem:[%s8297_s25 + $0x30] ss:$0 sps:$4 sm:$0x77]   ;;  %v4968_v34 = vrot.slane %v4951_v20, 1 }
 0x4f4   : > { %4387 = vst [vmem:[#allocation2 + $0x798] ss:$-892 sps:$4 sm:$0x83] %v4367_v35   ;;  %4833 = vrot.lane.b32.xlu0 %v4820_v31, %s8223_s5 }
 0x4f5   : > { %v4431_v40 = vpop.permute.xlu1 %4430 }
 0x4f6   : > { %v4429_v41 = vpop.permute.xlu0 %4428 }
 0x4f7   : > { %v4449_v42 = vsel %vm10951_vm7, %v4427_v33, %v4429_v41  ;;  %v4450_v43 = vsel %vm10951_vm7, %v4429_v41, %v4431_v40  ;;  %4839 = vrot.lane.b32.xlu1 %v4823_v36, %s8223_s5  ;;  %v4964_v33 = vcombine.high %v4952_v27, %v4952_v27  ;;  %v6487_v41 = vld [vmem:[%s8297_s25 + $0xc] sm:$0x77] }
 0x4f8   : > { %4469 = vst [vmem:[#allocation2 + $0x788] sm:$0x1c] %v4449_v42  ;;  %4470 = vst [vmem:[#allocation2 + $0x710] sm:$0x1c] %v4450_v43  ;;  %4837 = vrot.lane.b32.xlu0 %v4822_v38, %s8223_s5  ;;  %v4953_v43 = vld [vmem:[%s8297_s25 + $0x18] sm:$0x77] }
 0x4f9   : > { %v4435_v47 = vpop.permute.xlu1 %4434  ;;  %v4971_v39 = vrot.slane %v4964_v33, 1 }
 0x4fa   : > { %v4433_v48 = vpop.permute.xlu0 %4432 }
 0x4fb   : > { %v4451_v49 = vsel %vm10951_vm7, %v4431_v40, %v4433_v48  ;;  %v4452_v50 = vsel %vm10951_vm7, %v4433_v48, %v4435_v47  ;;  %4843 = vrot.lane.b32.xlu1 %v4825_v44, %s8223_s5  ;;  %v4970_v40 = vrot.slane %v4952_v27, 1  ;;  %v6488_v48 = vld [vmem:[%s8297_s25 + $0x14] sm:$0x77] }
 0x4fc   : > { %4471 = vst [vmem:[#allocation2 + $0x120] sm:$0x1c] %v4451_v49  ;;  %4472 = vst [vmem:[#allocation2 + $0x58] sm:$0x1c] %v4452_v50  ;;  %4841 = vrot.lane.b32.xlu0 %v4824_v46, %s8223_s5  ;;  %v6499_v46 = vcombine.high %v6487_v41, %v6487_v41 }
 0x4fd   : > { %v4439_v54 = vpop.permute.xlu1 %4438 }
 0x4fe   : > { %v4437_v56 = vpop.permute.xlu0 %4436 }
 0x4ff   : > { %v4453_v57 = vsel %vm10951_vm7, %v4435_v47, %v4437_v56  ;;  %v4454_v58 = vsel %vm10951_vm7, %v4437_v56, %v4439_v54  ;;  %4847 = vrot.lane.b32.xlu1 %v4827_v51, %s8223_s5  ;;  %v4972_v47 = vrot.slane %v4953_v43, 1 }
 0x500   : > { %4473 = vst [vmem:[#allocation2 + $0x4e0] sm:$0x1c] %v4453_v57  ;;  %4474 = vst [vmem:[#allocation2 + $0x6d0] sm:$0x1c] %v4454_v58  ;;  %4845 = vrot.lane.b32.xlu0 %v4826_v52, %s8223_s5 }
 0x501   : > { %v4443_v62 = vpop.permute.xlu1 %4442 }
 0x502   : > { %v4441_v63 = vpop.permute.xlu0 %4440 }
 0x503   : > { %v4455_v0 = vsel %vm10951_vm7, %v4439_v54, %v4441_v63  ;;  %v4456_v1 = vsel %vm10951_vm7, %v4441_v63, %v4443_v62  ;;  %4899 = vrot.lane.b32.xlu1 %v4893_v59, %s8224_s6  ;;  %v6238_v59 = vld [vmem:[%s8297_s25 + $0x14] sm:$0x77] }
 0x504   : > { %4475 = vst [vmem:[#allocation2 + $0x160] sm:$0x1c] %v4455_v0  ;;  %4476 = vst [vmem:[#allocation2 + $0x828] sm:$0x1c] %v4456_v1  ;;  %4849 = vrot.lane.b32.xlu0 %v4828_v60, %s8223_s5  ;;  %v6249_v60 = vcombine.high %v9854_v55, %v9854_v55  ;;  %s8240_s5 = smov 76  }
 0x505   : > { %v4447_v4 = vpop.permute.xlu1 %4446 }
 0x506   : > { %v4445_v5 = vpop.permute.xlu0 %4444 }
 0x507   : > { %v4457_v6 = vsel %vm10951_vm7, %v4443_v62, %v4445_v5  ;;  %v4458_v7 = vsel %vm10951_vm7, %v4445_v5, %v4447_v4  ;;  %4903 = vrot.lane.b32.xlu1 %v4894_v2, %s8224_s6  ;;  %v6489_v62 = vld [vmem:[%s8297_s25 + $0x1c] sm:$0x77]  ;;  %v6256_v2 = vrot.slane %v6238_v59, 1  ;;  %v6250_v5 = vcombine.high %v6238_v59, %v6238_v59 }
 0x508   : > { %4477 = vst [vmem:[#allocation2 + $0x170] sm:$0x1c] %v4457_v6  ;;  %4478 = vst [vmem:[#allocation2 + $0x798] sm:$0x1c] %v4458_v7  ;;  %4901 = vrot.lane.b32.xlu0 %v4881_v53, %s8224_s6  ;;  %v6500_v53 = vcombine.high %v6488_v48, %v6488_v48  ;;  %v6239_v4 = vld [vmem:[%s8297_s25 + $0x1c] sm:$0x77] }
 0x509   : > { %v4510_v10 = vpop.permute.xlu1 %4509  ;;  %v9870_v7 = vld [vmem:[%s8297_s25 + $0xc] sm:$0x77] }
 0x50a   : > { %v4508_v11 = vpop.permute.xlu0 %4507 }
 0x50b   : > { %v4530_v12 = vsel %vm4529_vm8, %v4508_v11, %v4510_v10  ;;  %4907 = vrot.lane.b32.xlu1 %v4895_v8, %s8224_s6  ;;  %v6258_v11 = vrot.slane %v6239_v4, 1  ;;  %v6087_v4 = vld [vmem:[%s8297_s25 + $0x14] sm:$0x77] }
 0x50c   : > { %4550 = vst [vmem:[#allocation2 + $0x788] sm:$0xe0] %v4530_v12  ;;  %4905 = vrot.lane.b32.xlu0 %v4882_v61, %s8224_s6  ;;  %v6257_v12 = vrot.slane %v6250_v5, 1 }
 0x50d   : > { %v4514_v15 = vpop.permute.xlu1 %4513 }
 0x50e   : > { %v4512_v16 = vpop.permute.xlu0 %4511 }
 0x50f   : > { %v4531_v17 = vsel %vm4529_vm8, %v4510_v10, %v4512_v16  ;;  %v4532_v18 = vsel %vm4529_vm8, %v4512_v16, %v4514_v15  ;;  %4911 = vrot.lane.b32.xlu1 %v4896_v13, %s8224_s6  ;;  %v6328_v13 = vld [vmem:[%s8297_s25 + $0x14] sm:$0x77] }
 0x510   : > { %4551 = vst [vmem:[#allocation2 + $0x710] sm:$0xe0] %v4531_v17  ;;  %4552 = vst [vmem:[#allocation2 + $0x120] sm:$0xe0] %v4532_v18  ;;  %4909 = vrot.lane.b32.xlu0 %v4883_v3, %s8224_s6  ;;  %v6255_v3 = vrot.slane %v6249_v60, 1 }
 0x511   : > { %v4518_v21 = vpop.permute.xlu1 %4517 }
 0x512   : > { %v4516_v22 = vpop.permute.xlu0 %4515 }
 0x513   : > { %v4533_v23 = vsel %vm4529_vm8, %v4514_v15, %v4516_v22  ;;  %v4534_v24 = vsel %vm4529_vm8, %v4516_v22, %v4518_v21  ;;  %4915 = vrot.lane.b32.xlu1 %v4897_v19, %s8224_s6  ;;  %v6346_v19 = vrot.slane %v6328_v13, 6  ;;  %v6340_v22 = vcombine.high %v6328_v13, %v6328_v13 }
 0x514   : > { %4553 = vst [vmem:[#allocation2 + $0x58] sm:$0xe0] %v4533_v23  ;;  %4554 = vst [vmem:[#allocation2 + $0x4e0] sm:$0xe0] %v4534_v24  ;;  %4913 = vrot.lane.b32.xlu0 %v4884_v9, %s8224_s6  ;;  %v9885_v24 = vld [vmem:[%s8297_s25 + $0xc] sm:$0x77] }
 0x515   : > { %v4522_v28 = vpop.permute.xlu1 %4521 }
 0x516   : > { %v4520_v29 = vpop.permute.xlu0 %4519 }
 0x517   : > { %v4535_v30 = vsel %vm4529_vm8, %v4518_v21, %v4520_v29  ;;  %v4536_v31 = vsel %vm4529_vm8, %v4520_v29, %v4522_v28  ;;  %4919 = vrot.lane.b32.xlu1 %v7986_v25, %s8224_s6  ;;  %v6329_v21 = vld [vmem:[%s8297_s25 + $0x1c] sm:$0x77]  ;;  %v6408_v29 = vld [vmem:[%s8297_s25 + $0x14] sm:$0x77] }
 0x518   : > { %4555 = vst [vmem:[#allocation2 + $0x6d0] sm:$0xe0] %v4535_v30  ;;  %4556 = vst [vmem:[#allocation2 + $0x160] sm:$0xe0] %v4536_v31  ;;  %4917 = vrot.lane.b32.xlu0 %v4885_v14, %s8224_s6  ;;  %v6339_v14 = vcombine.high %v9870_v7, %v9870_v7  ;;  %v6348_v27 = vrot.slane %v6329_v21, 6  ;;  %v6419_v30 = vcombine.high %v9885_v24, %v9885_v24  ;;  %s10942_s6 = smov 78  }
 0x519   : > { %v4526_v35 = vpop.permute.xlu1 %4525 }
 0x51a   : > { %v4524_v36 = vpop.permute.xlu0 %4523  ;;  %v6345_v20 = vrot.slane %v6339_v14, 6 }
 0x51b   : > { %v4537_v37 = vsel %vm4529_vm8, %v4522_v28, %v4524_v36  ;;  %v4538_v38 = vsel %vm4529_vm8, %v4524_v36, %v4526_v35  ;;  %4981 = vrot.lane.b32.xlu1 %v4969_v32, %s10954_s8  ;;  %v6347_v28 = vrot.slane %v6340_v22, 6  ;;  %v6425_v36 = vrot.slane %v6419_v30, 3 }
 0x51c   : > { %4557 = vst [vmem:[#allocation2 + $0x828] sm:$0xe0] %v4537_v37  ;;  %4558 = vst [vmem:[#allocation2 + $0x170] sm:$0xe0] %v4538_v38  ;;  %4979 = vrot.lane.b32.xlu0 %v4968_v34, %s10954_s8  ;;  %v6409_v37 = vld [vmem:[%s8297_s25 + $0x1c] sm:$0x77]  ;;  %v6420_v38 = vcombine.high %v6408_v29, %v6408_v29 }
 0x51d   : > { %v4578_v42 = vpop.permute.xlu1 %4577  ;;  %v6428_v43 = vrot.slane %v6409_v37, 3 }
 0x51e   : > { %v4528_v44 = vpop.permute.xlu0 %4527 }
 0x51f   : > { %v4539_v45 = vsel %vm4529_vm8, %v4526_v35, %v4528_v44  ;;  %4985 = vrot.lane.b32.xlu1 %v4971_v39, %s10954_s8  ;;  %v6426_v35 = vrot.slane %v6408_v29, 3  ;;  %v6427_v44 = vrot.slane %v6420_v38, 3 }
 0x520   : > { %4559 = vst [vmem:[#allocation2 + $0x798] sm:$0xe0] %v4539_v45  ;;  %4983 = vrot.lane.b32.xlu0 %v4970_v40, %s10954_s8  ;;  %v9903_v45 = vld [vmem:[%s8297_s25 + $0xc] sm:$0x77] }
 0x521   : > { %v4582_v49 = vpop.permute.xlu1 %4581  ;;  %v6012_v37 = vrot.slane %v9903_v45, 2 }
 0x522   : > { %v4580_v50 = vpop.permute.xlu0 %4579 }
 0x523   : > { %v4600_v51 = vsel %vm4599_vm13, %v4578_v42, %v4580_v50  ;;  %v4601_v52 = vsel %vm4599_vm13, %v4580_v50, %v4582_v49  ;;  %6506 = vrot.lane.b32.xlu1 %v6499_v46, %s8222_s4  ;;  %v6344_v50 = vrot.slane %v9870_v7, 6 }
 0x524   : > { %4620 = vst [vmem:[#allocation2 + $0x30] sm:$0x7] %v4600_v51  ;;  %4621 = vst [vmem:[#allocation2 + $0x248] sm:$0x7] %v4601_v52  ;;  %4987 = vrot.lane.b32.xlu0 %v4972_v47, %s10954_s8  ;;  %v6007_v51 = vcombine.high %v9903_v45, %v9903_v45  ;;  %v6254_v52 = vrot.slane %v9854_v55, 1 }
 0x525   : > { %v4586_v54 = vpop.permute.xlu1 %4585  ;;  %v9920_v55 = vld [vmem:[%s8297_s25 + $0xc] sm:$0x77] }
 0x526   : > { %v4584_v56 = vpop.permute.xlu0 %4583  ;;  %v6013_v59 = vrot.slane %v6007_v51, 2  ;;  %v9959_v45 = vld [vmem:[%s8297_s25 + $0xc] sm:$0x77] }
 0x527   : > { %v4602_v57 = vsel %vm4599_vm13, %v4582_v49, %v4584_v56  ;;  %v4603_v58 = vsel %vm4599_vm13, %v4584_v56, %v4586_v54  ;;  %6510 = vrot.lane.b32.xlu1 %v6500_v53, %s8222_s4  ;;  %v5996_v53 = vld [vmem:[%s8297_s25 + $0x14] sm:$0x77] }
 0x528   : > { %4622 = vst [vmem:[#allocation2 + $0x198] sm:$0x7] %v4602_v57  ;;  %4623 = vst [vmem:[#allocation2 + $0xb8] sm:$0x7] %v4603_v58  ;;  %6508 = vrot.lane.b32.xlu0 %v6488_v48, %s8222_s4  ;;  %v6008_v60 = vcombine.high %v5996_v53, %v5996_v53 }
 0x529   : > { %v4590_v61 = vpop.permute.xlu1 %4589 }
 0x52a   : > { %v4588_v63 = vpop.permute.xlu0 %4587 }
 0x52b   : > { %v4604_v0 = vsel %vm4599_vm13, %v4586_v54, %v4588_v63  ;;  %v4605_v1 = vsel %vm4599_vm13, %v4588_v63, %v4590_v61  ;;  %6504 = vrot.lane.b32.xlu1 %v6487_v41, %s8222_s4 }
 0x52c   : > { %4624 = vst [vmem:[#allocation2 + $0x500] sm:$0x7] %v4604_v0  ;;  %4625 = vst [vmem:[#allocation2 + $0x528] sm:$0x7] %v4605_v1  ;;  %6512 = vrot.lane.b32.xlu0 %v6489_v62, %s8222_s4  ;;  %v6015_v1 = vrot.slane %v6008_v60, 2 }
 0x52d   : > { %v4594_v6 = vpop.permute.xlu1 %4593 }
 0x52e   : > { %v4592_v8 = vpop.permute.xlu0 %4591 }
 0x52f   : > { %v4606_v9 = vsel %vm4599_vm13, %v4590_v61, %v4592_v8  ;;  %v4607_v10 = vsel %vm4599_vm13, %v4592_v8, %v4594_v6  ;;  %6269 = vrot.lane.b32.xlu1 %v6256_v2, %s8231_s7  ;;  %v6424_v61 = vrot.slane %v9885_v24, 3  ;;  %v6098_v2 = vcombine.high %v9920_v55, %v9920_v55  ;;  %v6167_v24 = vld [vmem:[%s8297_s25 + $0xc] sm:$0x77] }
 0x530   : > { %4626 = vst [vmem:[#allocation2 + $0xa8] sm:$0x7] %v4606_v9  ;;  %4627 = vst [vmem:[#allocation2 + $0x6c0] sm:$0x7] %v4607_v10  ;;  %6267 = vrot.lane.b32.xlu0 %v6255_v3, %s8231_s7  ;;  %v6014_v3 = vrot.slane %v5996_v53, 2 }
 0x531   : > { %v4598_v15 = vpop.permute.xlu1 %4597  ;;  %v6104_v10 = vrot.slane %v6098_v2, 7  ;;  %v5916_v2 = vld [vmem:[%s8297_s25 + $0x1c] sm:$0x77] }
 0x532   : > { %v4596_v16 = vpop.permute.xlu0 %4595 }
 0x533   : > { %v4608_v17 = vsel %vm4599_vm13, %v4594_v6, %v4596_v16  ;;  %v4609_v18 = vsel %vm4599_vm13, %v4596_v16, %v4598_v15  ;;  %6273 = vrot.lane.b32.xlu1 %v6258_v11, %s8231_s7  ;;  %v5997_v6 = vld [vmem:[%s8297_s25 + $0x1c] sm:$0x77]  ;;  %v6099_v11 = vcombine.high %v6087_v4, %v6087_v4 }
 0x534   : > { %4628 = vst [vmem:[#allocation2 + $0x700] sm:$0x7] %v4608_v17  ;;  %4629 = vst [vmem:[#allocation2 + $0xd8] sm:$0x7] %v4609_v18  ;;  %6271 = vrot.lane.b32.xlu0 %v6257_v12, %s8231_s7  ;;  %v6016_v12 = vrot.slane %v5997_v6, 2  ;;  %v6105_v18 = vrot.slane %v6087_v4, 7 }
 0x535   : > { %v4661_v23 = vpop.permute.xlu1 %4660  ;;  %v6106_v17 = vrot.slane %v6099_v11, 7  ;;  %v9985_v11 = vld [vmem:[%s8297_s25 + $0xc] sm:$0x77] }
 0x536   : > { %v4659_v25 = vpop.permute.xlu0 %4658 }
 0x537   : > { %v4681_v26 = vsel %vm4680_vm1, %v4659_v25, %v4661_v23  ;;  %6359 = vrot.lane.b32.xlu1 %v6346_v19, %s8232_s18 }
 0x538   : > { %4701 = vst [vmem:[#allocation2 + $0x30] sm:$0x38] %v4681_v26  ;;  %6357 = vrot.lane.b32.xlu0 %v6345_v20, %s8232_s18  ;;  %v6088_v20 = vld [vmem:[%s8297_s25 + $0x1c] sm:$0x77] }
 0x539   : > { %v4665_v31 = vpop.permute.xlu1 %4664  ;;  %v6107_v25 = vrot.slane %v6088_v20, 7 }
 0x53a   : > { %v4663_v32 = vpop.permute.xlu0 %4662 }
 0x53b   : > { %v4682_v33 = vsel %vm4680_vm1, %v4661_v23, %v4663_v32  ;;  %v4683_v34 = vsel %vm4680_vm1, %v4663_v32, %v4665_v31  ;;  %6363 = vrot.lane.b32.xlu1 %v6348_v27, %s8232_s18  ;;  %v6168_v27 = vld [vmem:[%s8297_s25 + $0x14] sm:$0x77] }
 0x53c   : > { %4702 = vst [vmem:[#allocation2 + $0x248] sm:$0x38] %v4682_v33  ;;  %4703 = vst [vmem:[#allocation2 + $0x198] sm:$0x38] %v4683_v34  ;;  %6361 = vrot.lane.b32.xlu0 %v6347_v28, %s8232_s18  ;;  %v6169_v33 = vld [vmem:[%s8297_s25 + $0x1c] sm:$0x77] }
 0x53d   : > { %v4669_v39 = vpop.permute.xlu1 %4668  ;;  %v6181_v38 = vcombine.low %v6169_v33, %v6169_v33 }
 0x53e   : > { %v4667_v40 = vpop.permute.xlu0 %4666 }
 0x53f   : > { %v4684_v41 = vsel %vm4680_vm1, %v4665_v31, %v4667_v40  ;;  %v4685_v42 = vsel %vm4680_vm1, %v4667_v40, %v4669_v39  ;;  %6439 = vrot.lane.b32.xlu1 %v6426_v35, %s8233_s21  ;;  %v6180_v31 = vcombine.low %v6168_v27, %v6168_v27 }
 0x540   : > { %4704 = vst [vmem:[#allocation2 + $0xb8] sm:$0x38] %v4684_v41  ;;  %4705 = vst [vmem:[#allocation2 + $0x500] sm:$0x38] %v4685_v42  ;;  %6437 = vrot.lane.b32.xlu0 %v6425_v36, %s8233_s21  ;;  %v6179_v41 = vcombine.low %v6167_v24, %v6167_v24 }
 0x541   : > { %v4673_v46 = vpop.permute.xlu1 %4672 }
 0x542   : > { %v4671_v47 = vpop.permute.xlu0 %4670 }
 0x543   : > { %v4686_v48 = vsel %vm4680_vm1, %v4669_v39, %v4671_v47  ;;  %v4687_v49 = vsel %vm4680_vm1, %v4671_v47, %v4673_v46  ;;  %6443 = vrot.lane.b32.xlu1 %v6428_v43, %s8233_s21  ;;  %v6103_v43 = vrot.slane %v9920_v55, 7 }
 0x544   : > { %4706 = vst [vmem:[#allocation2 + $0x528] sm:$0x38] %v4686_v48  ;;  %4707 = vst [vmem:[#allocation2 + $0xa8] sm:$0x38] %v4687_v49  ;;  %6441 = vrot.lane.b32.xlu0 %v6427_v44, %s8233_s21  ;;  %v5845_v49 = vld [vmem:[%s8297_s25 + $0x14] sm:$0x77] }
 0x545   : > { %v4677_v54 = vpop.permute.xlu1 %4676 }
 0x546   : > { %v4675_v56 = vpop.permute.xlu0 %4674 }
 0x547   : > { %v4688_v57 = vsel %vm4680_vm1, %v4673_v46, %v4675_v56  ;;  %v4689_v58 = vsel %vm4680_vm1, %v4675_v56, %v4677_v54  ;;  %6355 = vrot.lane.b32.xlu1 %v6344_v50, %s8232_s18  ;;  %v5856_v50 = vcombine.high %v9959_v45, %v9959_v45 }
 0x548   : > { %4708 = vst [vmem:[#allocation2 + $0x6c0] sm:$0x38] %v4688_v57  ;;  %4709 = vst [vmem:[#allocation2 + $0x700] sm:$0x38] %v4689_v58  ;;  %6265 = vrot.lane.b32.xlu0 %v6254_v52, %s8231_s7  ;;  %v5914_v52 = vld [vmem:[%s8297_s25 + $0xc] sm:$0x77]  ;;  %v5857_v57 = vcombine.high %v5845_v49, %v5845_v49 }
 0x549   : > { %v4740_v62 = vpop.permute.xlu1 %4739  ;;  %v5846_v58 = vld [vmem:[%s8297_s25 + $0x1c] sm:$0x77]  ;;  %v5926_v60 = vcombine.high %v5914_v52, %v5914_v52 }
 0x54a   : > { %v4679_v63 = vpop.permute.xlu0 %4678 }
 0x54b   : > { %v4690_v0 = vsel %vm4680_vm1, %v4677_v54, %v4679_v63  ;;  %6025 = vrot.lane.b32.xlu1 %v6013_v59, %s8234_s23  ;;  %v5915_v59 = vld [vmem:[%s8297_s25 + $0x14] sm:$0x77] }
 0x54c   : > { %4710 = vst [vmem:[#allocation2 + $0xd8] sm:$0x38] %v4690_v0  ;;  %6435 = vrot.lane.b32.xlu0 %v6424_v61, %s8233_s21  ;;  %v5933_v0 = vrot.slane %v5915_v59, 5 }
 0x54d   : > { %v4744_v5 = vpop.permute.xlu1 %4743 }
 0x54e   : > { %v4742_v7 = vpop.permute.xlu0 %4741 }
 0x54f   : > { %v4761_v8 = vsel %vm3032_vm9, %v4740_v62, %v4742_v7  ;;  %v4762_v9 = vsel %vm3032_vm9, %v4742_v7, %v4744_v5  ;;  %6029 = vrot.lane.b32.xlu1 %v6015_v1, %s8234_s23  ;;  %v5932_v1 = vrot.slane %v5926_v60, 5 }
 0x550   : > { %4781 = vst [vmem:[#allocation2 + $0x28] ss:$12 sps:$4 sm:$0xc1] %v4761_v8   ;;  %4782 = vst [vmem:[#allocation2 + $0x60] ss:$492 sps:$4 sm:$0xc1] %v4762_v9   ;;  %6027 = vrot.lane.b32.xlu0 %v6014_v3, %s8234_s23  ;;  %v5927_v3 = vcombine.high %v5915_v59, %v5915_v59 }
 0x551   : > { %v4748_v13 = vpop.permute.xlu1 %4747  ;;  %v5935_v8 = vrot.slane %v5916_v2, 5 }
 0x552   : > { %v4746_v14 = vpop.permute.xlu0 %4745  ;;  %v5934_v9 = vrot.slane %v5927_v3, 5 }
 0x553   : > { %v4763_v15 = vsel %vm3032_vm9, %v4744_v5, %v4746_v14  ;;  %v4764_v16 = vsel %vm3032_vm9, %v4746_v14, %v4748_v13  ;;  %6116 = vrot.lane.b32.xlu1 %v6104_v10, %s8235_s24  ;;  %v5931_v14 = vrot.slane %v5914_v52, 5 }
 0x554   : > { %4783 = vst [vmem:[#allocation2 + $0x610] ss:$-1140 sps:$4 sm:$0xc1] %v4763_v15   ;;  %4784 = vst [vmem:[#allocation2 + $0x608] ss:$-1356 sps:$4 sm:$0xc1] %v4764_v16   ;;  %6031 = vrot.lane.b32.xlu0 %v6016_v12, %s8234_s23  ;;  %v5606_v16 = vcombine.high %v9985_v11, %v9985_v11 }
 0x555   : > { %v4752_v19 = vpop.permute.xlu1 %4751  ;;  %v5595_v15 = vld [vmem:[%s8297_s25 + $0x14] sm:$0x77] }
 0x556   : > { %v4750_v21 = vpop.permute.xlu0 %4749 }
 0x557   : > { %v4765_v22 = vsel %vm3032_vm9, %v4748_v13, %v4750_v21  ;;  %v4766_v23 = vsel %vm3032_vm9, %v4750_v21, %v4752_v19  ;;  %6120 = vrot.lane.b32.xlu1 %v6106_v17, %s8235_s24  ;;  %v5613_v21 = vrot.slane %v5595_v15, 1 }
 0x558   : > { %4785 = vst [vmem:[#allocation2 + $0x508] ss:$-4 sps:$4 sm:$0xc1] %v4765_v22   ;;  %4786 = vst [vmem:[#allocation2 + $0x280] ss:$684 sps:$4 sm:$0xc1] %v4766_v23   ;;  %6118 = vrot.lane.b32.xlu0 %v6105_v18, %s8235_s24 }
 0x559   : > { %v4756_v26 = vpop.permute.xlu1 %4755  ;;  %v5612_v22 = vrot.slane %v5606_v16, 1  ;;  %v9999_v23 = vld [vmem:[%s8297_s25 + $0x1c] sm:$0x77]  ;;  %v10061_v16 = vld [vmem:[%s8297_s25 + $0xc] sm:$0x77] }
 0x55a   : > { %v4754_v28 = vpop.permute.xlu0 %4753 }
 0x55b   : > { %v4767_v29 = vsel %vm3032_vm9, %v4752_v19, %v4754_v28  ;;  %v4768_v30 = vsel %vm3032_vm9, %v4754_v28, %v4756_v26  ;;  %6187 = vrot.lane.b32.xlu1 %v6167_v24, %s8230_s17  ;;  %v5607_v24 = vcombine.high %v5595_v15, %v5595_v15 }
 0x55c   : > { %4787 = vst [vmem:[#allocation2 + $0x3c8] ss:$-796 sps:$4 sm:$0xc1] %v4767_v29   ;;  %4788 = vst [vmem:[#allocation2 + $0x968] ss:$-676 sps:$4 sm:$0xc1] %v4768_v30   ;;  %6122 = vrot.lane.b32.xlu0 %v6107_v25, %s8235_s24 }
 0x55d   : > { %v4760_v32 = vpop.permute.xlu1 %4759  ;;  %v5615_v30 = vrot.slane %v9999_v23, 1 }
 0x55e   : > { %v4758_v34 = vpop.permute.xlu0 %4757 }
 0x55f   : > { %v4769_v35 = vsel %vm3032_vm9, %v4756_v26, %v4758_v34  ;;  %v4770_v36 = vsel %vm3032_vm9, %v4758_v34, %v4760_v32  ;;  %6191 = vrot.lane.b32.xlu1 %v6168_v27, %s8230_s17  ;;  %v10002_v26 = vld [vmem:[%s8297_s25 + $0xc] sm:$0x77]  ;;  %v5685_v32 = vld [vmem:[%s8297_s25 + $0x14] sm:$0x77] }
 0x560   : > { %4789 = vst [vmem:[#allocation2 + $0x680] ss:$132 sps:$4 sm:$0xc1] %v4769_v35   ;;  %4790 = vst [vmem:[#allocation2 + $0x400] ss:$-804 sps:$4 sm:$0xc1] %v4770_v36   ;;  %6189 = vrot.lane.b32.xlu0 %v6180_v31, %s8230_s17  ;;  %v5696_v33 = vcombine.high %v10002_v26, %v10002_v26 }
 0x561   : > { %v4832_v39 = vpop.permute.xlu1 %4831  ;;  %v5614_v31 = vrot.slane %v5607_v24, 1  ;;  %v5445_v24 = vld [vmem:[%s8297_s25 + $0x14] sm:$0x77] }
 0x562   : > { %v4830_v40 = vpop.permute.xlu0 %4829 }
 0x563   : > { %v4851_v42 = vsel %vm3113_vm10, %v4830_v40, %v4832_v39  ;;  %6023 = vrot.lane.b32.xlu1 %v6012_v37, %s8234_s23  ;;  %v10017_v40 = vld [vmem:[%s8297_s25 + $0x1c] sm:$0x77] }
 0x564   : > { %4871 = vst [vmem:[#allocation2 + $0x28] sm:$0xe] %v4851_v42  ;;  %6193 = vrot.lane.b32.xlu0 %v6181_v38, %s8230_s17  ;;  %v5703_v38 = vrot.slane %v5685_v32, 6 }
 0x565   : > { %v4836_v44 = vpop.permute.xlu1 %4835 }
 0x566   : > { %v4834_v46 = vpop.permute.xlu0 %4833 }
 0x567   : > { %v4852_v47 = vsel %vm3113_vm10, %v4832_v39, %v4834_v46  ;;  %v4853_v48 = vsel %vm3113_vm10, %v4834_v46, %v4836_v44  ;;  %6185 = vrot.lane.b32.xlu1 %v6179_v41, %s8230_s17  ;;  %v5702_v39 = vrot.slane %v5696_v33, 6  ;;  %v5697_v41 = vcombine.high %v5685_v32, %v5685_v32 }
 0x568   : > { %4872 = vst [vmem:[#allocation2 + $0x60] sm:$0xe] %v4852_v47  ;;  %4873 = vst [vmem:[#allocation2 + $0x610] sm:$0xe] %v4853_v48  ;;  %6114 = vrot.lane.b32.xlu0 %v6103_v43, %s8235_s24  ;;  %v10020_v43 = vld [vmem:[%s8297_s25 + $0xc] sm:$0x77] }
 0x569   : > { %v4840_v51 = vpop.permute.xlu1 %4839  ;;  %v5705_v47 = vrot.slane %v10017_v40, 6  ;;  %v5704_v48 = vrot.slane %v5697_v41, 6  ;;  %v5781_v15 = vrot.slane %v10020_v43, 3  ;;  %v10091_v41 = vld [vmem:[%s8297_s25 + $0x1c] sm:$0x77] }
 0x56a   : > { %v4838_v53 = vpop.permute.xlu0 %4837 }
 0x56b   : > { %v4854_v54 = vsel %vm3113_vm10, %v4836_v44, %v4838_v53  ;;  %v4855_v56 = vsel %vm3113_vm10, %v4838_v53, %v4840_v51  ;;  %5865 = vrot.lane.b32.xlu1 %v5845_v49, %s8236_s30  ;;  %v5765_v49 = vld [vmem:[%s8297_s25 + $0x14] sm:$0x77] }
 0x56c   : > { %4874 = vst [vmem:[#allocation2 + $0x608] sm:$0xe] %v4854_v54  ;;  %4875 = vst [vmem:[#allocation2 + $0x508] sm:$0xe] %v4855_v56  ;;  %5863 = vrot.lane.b32.xlu0 %v5856_v50, %s8236_s30  ;;  %v5776_v50 = vcombine.high %v10020_v43, %v10020_v43  ;;  %v5783_v56 = vrot.slane %v5765_v49, 3  ;;  %v5777_v59 = vcombine.high %v5765_v49, %v5765_v49  ;;  %v5465_v49 = vrot.slane %v10091_v41, 7 }
 0x56d   : > { %v4844_v61 = vpop.permute.xlu1 %4843 }
 0x56e   : > { %v4842_v55 = vpop.permute.xlu0 %4841 }
 0x56f   : > { %v4856_v62 = vsel %vm3113_vm10, %v4840_v51, %v4842_v55  ;;  %v4857_v63 = vsel %vm3113_vm10, %v4842_v55, %v4844_v61  ;;  %5869 = vrot.lane.b32.xlu1 %v5846_v58, %s8236_s30  ;;  %v10035_v58 = vld [vmem:[%s8297_s25 + $0x1c] sm:$0x77] }
 0x570   : > { %4876 = vst [vmem:[#allocation2 + $0x280] sm:$0xe] %v4856_v62  ;;  %4877 = vst [vmem:[#allocation2 + $0x3c8] sm:$0xe] %v4857_v63  ;;  %5867 = vrot.lane.b32.xlu0 %v5857_v57, %s8236_s30  ;;  %v5782_v57 = vrot.slane %v5776_v50, 3  ;;  %v5785_v62 = vrot.slane %v10035_v58, 3 }
 0x571   : > { %v4848_v4 = vpop.permute.xlu1 %4847  ;;  %v5784_v63 = vrot.slane %v5777_v59, 3 }
 0x572   : > { %v4846_v5 = vpop.permute.xlu0 %4845 }
 0x573   : > { %v4858_v6 = vsel %vm3113_vm10, %v4844_v61, %v4846_v5  ;;  %v4859_v7 = vsel %vm3113_vm10, %v4846_v5, %v4848_v4  ;;  %5946 = vrot.lane.b32.xlu1 %v5933_v0, %s8237_s27  ;;  %v10042_v0 = vld [vmem:[%s8297_s25 + $0xc] sm:$0x77]  ;;  %v5701_v5 = vrot.slane %v10002_v26, 6  ;;  %v10071_v26 = vld [vmem:[%s8297_s25 + $0x1c] sm:$0x77] }
 0x574   : > { %4878 = vst [vmem:[#allocation2 + $0x968] sm:$0xe] %v4858_v6  ;;  %4879 = vst [vmem:[#allocation2 + $0x680] sm:$0xe] %v4859_v7  ;;  %5944 = vrot.lane.b32.xlu0 %v5932_v1, %s8237_s27  ;;  %v5365_v6 = vcombine.high %v10042_v0, %v10042_v0  ;;  %v5611_v7 = vrot.slane %v9985_v11, 1  ;;  %v5374_v32 = vrot.slane %v10071_v26, 2 }
 0x575   : > { %v4900_v10 = vpop.permute.xlu1 %4899 }
 0x576   : > { %v4850_v12 = vpop.permute.xlu0 %4849 }
 0x577   : > { %v4860_v13 = vsel %vm3113_vm10, %v4848_v4, %v4850_v12  ;;  %5950 = vrot.lane.b32.xlu1 %v5935_v8, %s8237_s27  ;;  %v5354_v8 = vld [vmem:[%s8297_s25 + $0x14] sm:$0x77]  ;;  %vm10952_vm10 = vcmask 105472  }
 0x578   : > { %4880 = vst [vmem:[#allocation2 + $0x400] sm:$0xe] %v4860_v13  ;;  %5948 = vrot.lane.b32.xlu0 %v5934_v9, %s8237_s27  ;;  %v5371_v13 = vrot.slane %v5365_v6, 2 }
 0x579   : > { %v4904_v17 = vpop.permute.xlu1 %4903 }
 0x57a   : > { %v4902_v18 = vpop.permute.xlu0 %4901 }
 0x57b   : > { %v4921_v19 = vsel %vm3204_vm11, %v4900_v10, %v4902_v18  ;;  %v4922_v20 = vsel %vm3204_vm11, %v4902_v18, %v4904_v17  ;;  %5942 = vrot.lane.b32.xlu1 %v5931_v14, %s8237_s27  ;;  %v5366_v14 = vcombine.high %v5354_v8, %v5354_v8 }
 0x57c   : > { %4941 = vst [vmem:[#allocation2 + $0x28] sm:$0x70] %v4921_v19  ;;  %4942 = vst [vmem:[#allocation2 + $0x60] sm:$0x70] %v4922_v20  ;;  %5861 = vrot.lane.b32.xlu0 %v9959_v45, %s8236_s30 }
 0x57d   : > { %v4908_v25 = vpop.permute.xlu1 %4907  ;;  %v5373_v20 = vrot.slane %v5366_v14, 2  ;;  %v5272_v14 = vld [vmem:[%s8297_s25 + $0xc] sm:$0x77] }
 0x57e   : > { %v4906_v27 = vpop.permute.xlu0 %4905 }
 0x57f   : > { %v4923_v28 = vsel %vm3204_vm11, %v4904_v17, %v4906_v27  ;;  %v4924_v29 = vsel %vm3204_vm11, %v4906_v27, %v4908_v25  ;;  %5626 = vrot.lane.b32.xlu1 %v5613_v21, %s8228_s11  ;;  %v5456_v21 = vcombine.high %v10061_v16, %v10061_v16 }
 0x580   : > { %4943 = vst [vmem:[#allocation2 + $0x610] sm:$0x70] %v4923_v28  ;;  %4944 = vst [vmem:[#allocation2 + $0x608] sm:$0x70] %v4924_v29  ;;  %5624 = vrot.lane.b32.xlu0 %v5612_v22, %s8228_s11  ;;  %v5372_v22 = vrot.slane %v5354_v8, 2 }
 0x581   : > { %v4912_v34 = vpop.permute.xlu1 %4911 }
 0x582   : > { %v4910_v35 = vpop.permute.xlu0 %4909 }
 0x583   : > { %v4925_v36 = vsel %vm3204_vm11, %v4908_v25, %v4910_v35  ;;  %v4926_v37 = vsel %vm3204_vm11, %v4910_v35, %v4912_v34  ;;  %5630 = vrot.lane.b32.xlu1 %v5615_v30, %s8228_s11  ;;  %v5462_v30 = vrot.slane %v5456_v21, 7  ;;  %v5284_v21 = vcombine.high %v5272_v14, %v5272_v14 }
 0x584   : > { %4945 = vst [vmem:[#allocation2 + $0x508] sm:$0x70] %v4925_v36  ;;  %4946 = vst [vmem:[#allocation2 + $0x280] sm:$0x70] %v4926_v37  ;;  %5628 = vrot.lane.b32.xlu0 %v5614_v31, %s8228_s11  ;;  %v5457_v31 = vcombine.high %v5445_v24, %v5445_v24 }
 0x585   : > { %v4916_v42 = vpop.permute.xlu1 %4915 }
 0x586   : > { %v4914_v44 = vpop.permute.xlu0 %4913  ;;  %v5464_v37 = vrot.slane %v5457_v31, 7  ;;  %v5290_v31 = vrot.slane %v5284_v21, 5 }
 0x587   : > { %v4927_v45 = vsel %vm3204_vm11, %v4912_v34, %v4914_v44  ;;  %v4928_v46 = vsel %vm3204_vm11, %v4914_v44, %v4916_v42  ;;  %5716 = vrot.lane.b32.xlu1 %v5703_v38, %s8229_s14  ;;  %v5463_v38 = vrot.slane %v5445_v24, 7 }
 0x588   : > { %4947 = vst [vmem:[#allocation2 + $0x3c8] sm:$0x70] %v4927_v45  ;;  %4948 = vst [vmem:[#allocation2 + $0x968] sm:$0x70] %v4928_v46  ;;  %5714 = vrot.lane.b32.xlu0 %v5702_v39, %s8229_s14 }
 0x589   : > { %v4920_v51 = vpop.permute.xlu1 %4919 }
 0x58a   : > { %v4918_v52 = vpop.permute.xlu0 %4917 }
 0x58b   : > { %v4929_v53 = vsel %vm3204_vm11, %v4916_v42, %v4918_v52  ;;  %v4930_v54 = vsel %vm3204_vm11, %v4918_v52, %v4920_v51  ;;  %5720 = vrot.lane.b32.xlu1 %v5705_v47, %s8229_s14  ;;  %v5525_v51 = vld [vmem:[%s8297_s25 + $0x14] sm:$0x77]  ;;  %vm10953_vm11 = vcmask 130048  }
 0x58c   : > { %4949 = vst [vmem:[#allocation2 + $0x680] sm:$0x70] %v4929_v53  ;;  %4950 = vst [vmem:[#allocation2 + $0x400] sm:$0x70] %v4930_v54  ;;  %5718 = vrot.lane.b32.xlu0 %v5704_v48, %s8229_s14  ;;  %v5524_v48 = vld [vmem:[%s8297_s25 + $0xc] sm:$0x77]  ;;  %v5537_v54 = vcombine.low %v5525_v51, %v5525_v51 }
 0x58d   : > { %v4982_v60 = vpop.permute.xlu1 %4981 }
 0x58e   : > { %v4980_v61 = vpop.permute.xlu0 %4979 }
 0x58f   : > { %v5001_v55 = vsel %vm10941_vm12, %v4980_v61, %v4982_v60  ;;  %5796 = vrot.lane.b32.xlu1 %v5783_v56, %s8218_s26 }
 0x590   : > { %5021 = vst [vmem:[#allocation2 + $0x250] ss:$-548 sps:$4 sm:$0x83] %v5001_v55   ;;  %5794 = vrot.lane.b32.xlu0 %v5782_v57, %s8218_s26  ;;  %v10110_v57 = vld [vmem:[%s8297_s25 + $0x1c] sm:$0x77]  ;;  %v5370_v55 = vrot.slane %v10042_v0, 2 }
 0x591   : > { %v4986_v1 = vpop.permute.xlu1 %4985  ;;  %v5461_v0 = vrot.slane %v10061_v16, 7 }
 0x592   : > { %v4984_v2 = vpop.permute.xlu0 %4983 }
 0x593   : > { %v5002_v3 = vsel %vm10941_vm12, %v4982_v60, %v4984_v2  ;;  %v5003_v4 = vsel %vm10941_vm12, %v4984_v2, %v4986_v1  ;;  %5800 = vrot.lane.b32.xlu1 %v5785_v62, %s8218_s26  ;;  %v5538_v62 = vcombine.low %v10110_v57, %v10110_v57  ;;  %v5536_v2 = vcombine.low %v5524_v48, %v5524_v48 }
 0x594   : > { %5022 = vst [vmem:[#allocation2 + $0x1f0] ss:$-396 sps:$4 sm:$0x83] %v5002_v3   ;;  %5023 = vst [vmem:[#allocation2 + $0x658] ss:$-68 sps:$4 sm:$0x83] %v5003_v4   ;;  %5798 = vrot.lane.b32.xlu0 %v5784_v63, %s8218_s26 }
 0x595   : > { %v6507_v9 = vpop.permute.xlu1 %6506 }
 0x596   : > { %v10053_v10 = vpop.permute.xlu0 %4987 }
 0x597   : > { %v5004_v12 = vsel %vm10941_vm12, %v4986_v1, %v10053_v10  ;;  %5712 = vrot.lane.b32.xlu1 %v5701_v5, %s8229_s14  ;;  %v10127_v5 = vld [vmem:[%s8297_s25 + $0xc] sm:$0x77]  ;;  %vm5964_vm12 = vcmask 121856  }
 0x598   : > { %5024 = vst [vmem:[#allocation2 + $0x6b8] ss:$-172 sps:$4 sm:$0x83] %v5004_v12   ;;  %5622 = vrot.lane.b32.xlu0 %v5611_v7, %s8228_s11  ;;  %v5214_v12 = vcombine.high %v10127_v5, %v10127_v5 }
 0x599   : > { %v6511_v11 = vpop.permute.xlu1 %6510 }
 0x59a   : > { %v6509_v17 = vpop.permute.xlu0 %6508 }
 0x59b   : > { %v6527_v18 = vsel %vm3032_vm9, %v6507_v9, %v6509_v17  ;;  %v6528_v19 = vsel %vm3032_vm9, %v6509_v17, %v6511_v11  ;;  %5383 = vrot.lane.b32.xlu1 %v5371_v13, %s8238_s28 }
 0x59c   : > { %6547 = vst [vmem:[#allocation2 + $0x430] sm:$0x7] %v6527_v18  ;;  %6548 = vst [vmem:[#allocation2 + $0x648] sm:$0x7] %v6528_v19  ;;  %5792 = vrot.lane.b32.xlu0 %v5781_v15, %s8218_s26  ;;  %v10144_v19 = vld [vmem:[%s8297_s25 + $0x1c] sm:$0x77] }
 0x59d   : > { %v6505_v25 = vpop.permute.xlu1 %6504 }
 0x59e   : > { %v6526_v27 = vsel %vm3032_vm9, %v6505_v25, %v6507_v9  ;;  %v10074_v28 = vpop.permute.xlu0 %6512  ;;  %v5203_v9 = vld [vmem:[%s8297_s25 + $0x14] sm:$0x77] }
 0x59f   : > { %6546 = vst [vmem:[#allocation2 + $0x2b0] sm:$0x7] %v6526_v27  ;;  %v6529_v29 = vsel %vm3032_vm9, %v6511_v11, %v10074_v28  ;;  %5387 = vrot.lane.b32.xlu1 %v5373_v20, %s8238_s28  ;;  %v5215_v18 = vcombine.high %v5203_v9, %v5203_v9  ;;  %v5273_v20 = vld [vmem:[%s8297_s25 + $0x14] sm:$0x77] }
 0x5a0   : > { %6549 = vst [vmem:[#allocation2 + $0x7a0] sm:$0x7] %v6529_v29  ;;  %5385 = vrot.lane.b32.xlu0 %v5372_v22, %s8238_s28 }
 0x5a1   : > { %v6270_v33 = vpop.permute.xlu1 %6269 }
 0x5a2   : > { %v10081_v34 = vpop.permute.xlu0 %6267 }
 0x5a3   : > { %v6288_v35 = vsel %vm4529_vm8, %v10081_v34, %v6270_v33  ;;  %5474 = vrot.lane.b32.xlu1 %v5462_v30, %s8226_s9  ;;  %v6861_v36 = vld [vmem:[#allocation2 + $0x430] sm:$0x7]  ;;  %v6862_v47 = vld [vmem:[#allocation2 + $0x648] sm:$0x7]  ;;  %v5291_v30 = vrot.slane %v5273_v20, 5 }
 0x5a4   : > { %6308 = vst [vmem:[#allocation2 + $0x238] ss:$-420 sps:$4 sm:$0x83] %v6288_v35   ;;  %5389 = vrot.lane.b32.xlu0 %v5374_v32, %s8238_s28  ;;  %7526 = vmatprep.subr.msk.mxu0 %vm10946_vm2, %v6861_v36  ;;  %v10154_v32 = vld [vmem:[%s8297_s25 + $0x1c] sm:$0x77] }
 0x5a5   : > { %v10088_v39 = vpop.permute.xlu1 %6273 }
 0x5a6   : > { %v6272_v42 = vpop.permute.xlu0 %6271  ;;  %v6860_v43 = vld [vmem:[#allocation2 + $0x2b0] sm:$0x7] }
 0x5a7   : > { %v6289_v44 = vsel %vm4529_vm8, %v6270_v33, %v6272_v42  ;;  %v6290_v45 = vsel %vm4529_vm8, %v6272_v42, %v10088_v39  ;;  %5478 = vrot.lane.b32.xlu1 %v5464_v37, %s8226_s9  ;;  %7527 = vmatpush2.msk.msra.mxu0 %vm10946_vm2, %v6860_v43  ;;  %v6863_v46 = vld [vmem:[#allocation2 + $0x7a0] sm:$0x7]  ;;  %v5285_v33 = vcombine.high %v5273_v20, %v5273_v20 }
 0x5a8   : > { %6309 = vst [vmem:[#allocation2 + $0xa0] ss:$220 sps:$4 sm:$0x83] %v6289_v44   ;;  %6310 = vst [vmem:[#allocation2 + $0x568] ss:$-780 sps:$4 sm:$0x83] %v6290_v45   ;;  %5476 = vrot.lane.b32.xlu0 %v5463_v38, %s8226_s9  ;;  %7530 = vmatprep.subr.msk.mxu1 %vm10946_vm2, %v6863_v46 }
 0x5a9   : > { %7531 = vmatpush2.msk.msra.mxu1 %vm10946_vm2, %v6862_v47  ;;  %v6360_v50 = vpop.permute.xlu1 %6359  ;;  %v5293_v38 = vrot.slane %v10154_v32, 5  ;;  %v5292_v42 = vrot.slane %v5285_v33, 5  ;;  %v10165_v44 = vld [vmem:[%s8297_s25 + $0x8] sm:$0x77]  ;;  %vm6882_vm2 = vcmask 941056  }
 0x5aa   : > { %v6358_v52 = vpop.permute.xlu0 %6357  ;;  %v5058_v33 = vrot.slane %v10165_v44, 6 }
 0x5ab   : > { %v6378_v53 = vsel %vm4599_vm13, %v6358_v52, %v6360_v50  ;;  %5544 = vrot.lane.b32.xlu1 %v5524_v48, %s8227_s10  ;;  %v5289_v48 = vrot.slane %v5272_v14, 5 }
 0x5ac   : > { %6398 = vst [vmem:[#allocation2 + $0x238] sm:$0x1c] %v6378_v53  ;;  %5480 = vrot.lane.b32.xlu0 %v5465_v49, %s8226_s9  ;;  %v5042_v49 = vld [vmem:[%s8297_s25 + $0x10] sm:$0x77] }
 0x5ad   : > { %v10107_v56 = vpop.permute.xlu1 %6363 }
 0x5ae   : > { %v6362_v59 = vpop.permute.xlu0 %6361 }
 0x5af   : > { %v6379_v60 = vsel %vm4599_vm13, %v6360_v50, %v6362_v59  ;;  %v6380_v61 = vsel %vm4599_vm13, %v6362_v59, %v10107_v56  ;;  %5548 = vrot.lane.b32.xlu1 %v5525_v51, %s8227_s10  ;;  %v5053_v50 = vcombine.high %v10165_v44, %v10165_v44  ;;  %v5060_v59 = vrot.slane %v5042_v49, 6 }
 0x5b0   : > { %6399 = vst [vmem:[#allocation2 + $0xa0] sm:$0x1c] %v6379_v60  ;;  %6400 = vst [vmem:[#allocation2 + $0x568] sm:$0x1c] %v6380_v61  ;;  %5546 = vrot.lane.b32.xlu0 %v5537_v54, %s8227_s10  ;;  %v5043_v61 = vld [vmem:[%s8297_s25 + $0x18] sm:$0x77] }
 0x5b1   : > { %v6440_v63 = vpop.permute.xlu1 %6439  ;;  %v5059_v60 = vrot.slane %v5053_v50, 6 }
 0x5b2   : > { %v6438_v1 = vpop.permute.xlu0 %6437 }
 0x5b3   : > { %v6458_v3 = vsel %vm4680_vm1, %v6438_v1, %v6440_v63  ;;  %5381 = vrot.lane.b32.xlu1 %v5370_v55, %s8238_s28  ;;  %v5054_v55 = vcombine.high %v5042_v49, %v5042_v49 }
 0x5b4   : > { %6478 = vst [vmem:[#allocation2 + $0x238] sm:$0xe0] %v6458_v3  ;;  %5550 = vrot.lane.b32.xlu0 %v5538_v62, %s8227_s10  ;;  %v5062_v3 = vrot.slane %v5043_v61, 6 }
 0x5b5   : > { %v10124_v4 = vpop.permute.xlu1 %6443 }
 0x5b6   : > { %v6442_v6 = vpop.permute.xlu0 %6441 }
 0x5b7   : > { %v6459_v7 = vsel %vm4680_vm1, %v6440_v63, %v6442_v6  ;;  %v6460_v8 = vsel %vm4680_vm1, %v6442_v6, %v10124_v4  ;;  %5542 = vrot.lane.b32.xlu1 %v5536_v2, %s8227_s10  ;;  %v5121_v63 = vld [vmem:[%s8297_s25 + $0xc] sm:$0x77]  ;;  %v5122_v6 = vld [vmem:[%s8297_s25 + $0x14] sm:$0x77] }
 0x5b8   : > { %6479 = vst [vmem:[#allocation2 + $0xa0] sm:$0xe0] %v6459_v7  ;;  %6480 = vst [vmem:[#allocation2 + $0x568] sm:$0xe0] %v6460_v8  ;;  %5472 = vrot.lane.b32.xlu0 %v5461_v0, %s8226_s9  ;;  %v5061_v0 = vrot.slane %v5054_v55, 6 }
 0x5b9   : > { %v6356_v13 = vpop.permute.xlu1 %6355 }
 0x5ba   : > { %v6377_v15 = vsel %vm4599_vm13, %v6356_v13, %v6358_v52  ;;  %v6266_v16 = vpop.permute.xlu0 %6265  ;;  %v5140_v13 = vrot.slane %v5122_v6, 3 }
 0x5bb   : > { %6397 = vst [vmem:[#allocation2 + $0x6f0] sm:$0x1c] %v6377_v15  ;;  %v6287_v11 = vsel %vm4529_vm8, %v6266_v16, %v10081_v34  ;;  %5223 = vrot.lane.b32.xlu1 %v5203_v9, %s8239_s29  ;;  %v6851_v17 = vld [vmem:[#allocation2 + $0x238] sm:$0xff]  ;;  %v5134_v16 = vcombine.high %v5122_v6, %v5122_v6 }
 0x5bc   : > { %6307 = vst [vmem:[#allocation2 + $0x6f0] ss:$-276 sps:$4 sm:$0x83] %v6287_v11   ;;  %5221 = vrot.lane.b32.xlu0 %v5214_v12, %s8239_s29  ;;  %6956 = vmatprep.subr.mxu0 %v6851_v17  ;;  %v5123_v15 = vld [vmem:[%s8297_s25 + $0x1c] sm:$0x77] }
 0x5bd   : > { %v10147_v22 = vpop.permute.xlu1 %6025  ;;  %v5142_v21 = vrot.slane %v5123_v15, 3 }
 0x5be   : > { %v6436_v24 = vpop.permute.xlu0 %6435 }
 0x5bf   : > { %v6457_v25 = vsel %vm4680_vm1, %v6436_v24, %v6438_v1  ;;  %5227 = vrot.lane.b32.xlu1 %v10144_v19, %s8239_s29  ;;  %v6853_v27 = vld [vmem:[#allocation2 + $0x568] sm:$0xff]  ;;  %v6852_v29 = vld [vmem:[#allocation2 + $0xa0] sm:$0xff]  ;;  %v5141_v24 = vrot.slane %v5134_v16, 3 }
 0x5c0   : > { %6477 = vst [vmem:[#allocation2 + $0x6f0] sm:$0xe0] %v6457_v25  ;;  %5225 = vrot.lane.b32.xlu0 %v5215_v18, %s8239_s29  ;;  %7033 = vmatprep.subr.mxu1 %v6853_v27 }
 0x5c1   : > { %7034 = vmatpush2.msra.mxu1 %v6852_v29  ;;  %v6030_v34 = vpop.permute.xlu1 %6029 }
 0x5c2   : > { %v6028_v35 = vpop.permute.xlu0 %6027 }
 0x5c3   : > { %v6047_v36 = vsel %vm6045_vm3, %v10147_v22, %v6028_v35  ;;  %v6048_v37 = vsel %vm6045_vm3, %v6028_v35, %v6030_v34  ;;  %5304 = vrot.lane.b32.xlu1 %v5291_v30, %s8240_s5 }
 0x5c4   : > { %6067 = vst [vmem:[#allocation2 + $0x90] ss:$1236 sps:$4 sm:$0xc1] %v6047_v36   ;;  %6068 = vst [vmem:[#allocation2 + $0x178] ss:$1460 sps:$4 sm:$0xc1] %v6048_v37   ;;  %5302 = vrot.lane.b32.xlu0 %v5290_v31, %s8240_s5 }
 0x5c5   : > { %v10162_v43 = vpop.permute.xlu1 %6116  ;;  %v5138_v31 = vrot.slane %v5121_v63, 3 }
 0x5c6   : > { %v10167_v45 = vpop.permute.xlu0 %6031 }
 0x5c7   : > { %v6049_v46 = vsel %vm6045_vm3, %v6030_v34, %v10167_v45  ;;  %5308 = vrot.lane.b32.xlu1 %v5293_v38, %s8240_s5  ;;  %v6850_v47 = vld [vmem:[#allocation2 + $0x6f0] sm:$0xff]  ;;  %v8140_v38 = vld [vmem:[%s8297_s25 + $0x1c] sm:$0x77] }
 0x5c8   : > { %6069 = vst [vmem:[#allocation2 + $0x258] ss:$1660 sps:$4 sm:$0xc1] %v6049_v46   ;;  %5306 = vrot.lane.b32.xlu0 %v5292_v42, %s8240_s5  ;;  %6957 = vmatpush2.msra.mxu0 %v6850_v47  ;;  %v6501_v42 = vcombine.high %v8140_v38, %v8140_v38  ;;  %v6490_v46 = vld [vmem:[%s8297_s25 + $0x24] sm:$0x77] }
 0x5c9   : > { %v6121_v51 = vpop.permute.xlu1 %6120  ;;  %v8143_v38 = vld [vmem:[%s8297_s25 + $0x1c] sm:$0x77] }
 0x5ca   : > { %v6119_v52 = vpop.permute.xlu0 %6118 }
 0x5cb   : > { %v6138_v53 = vsel %vm10952_vm10, %v10162_v43, %v6119_v52  ;;  %v6139_v54 = vsel %vm10952_vm10, %v6119_v52, %v6121_v51  ;;  %5300 = vrot.lane.b32.xlu1 %v5289_v48, %s8240_s5  ;;  %v6491_v52 = vld [vmem:[%s8297_s25 + $0x2c] sm:$0x77] }
 0x5cc   : > { %6158 = vst [vmem:[#allocation2 + $0x90] sm:$0xe] %v6138_v53  ;;  %6159 = vst [vmem:[#allocation2 + $0x178] sm:$0xe] %v6139_v54  ;;  %5219 = vrot.lane.b32.xlu0 %v10127_v5, %s8239_s29  ;;  %v5133_v5 = vcombine.high %v5121_v63, %v5121_v63  ;;  %v6240_v53 = vld [vmem:[%s8297_s25 + $0x24] sm:$0x77] }
 0x5cd   : > { %v6188_v62 = vpop.permute.xlu1 %6187  ;;  %v8141_v54 = vld [vmem:[%s8297_s25 + $0x1c] sm:$0x77] }
 0x5ce   : > { %v10184_v1 = vpop.permute.xlu0 %6122  ;;  %v5139_v14 = vrot.slane %v5133_v5, 3  ;;  %v6557_v5 = vld [vmem:[%s10938_s1 + $0x8] sm:$0xff] }
 0x5cf   : > { %v6140_v2 = vsel %vm10952_vm10, %v6121_v51, %v10184_v1  ;;  %5073 = vrot.lane.b32.xlu1 %v5060_v59, %s10944_s22  ;;  %v6502_v51 = vcombine.high %v6490_v46, %v6490_v46  ;;  %v6251_v59 = vcombine.high %v8141_v54, %v8141_v54  ;;  %7532 = vmatprep.mubr.msk.f32.mxu1 %vm6882_vm2, %v6557_v5 }
 0x5d0   : > { %6160 = vst [vmem:[#allocation2 + $0x258] sm:$0xe] %v6140_v2  ;;  %5071 = vrot.lane.b32.xlu0 %v5059_v60, %s10944_s22  ;;  %v6241_v2 = vld [vmem:[%s8297_s25 + $0x2c] sm:$0x77]  ;;  %7528 = vmatprep.mubr.msk.f32.mxu0 %vm6882_vm2, %v6557_v5 }
 0x5d1   : > { %v6192_v7 = vpop.permute.xlu1 %6191  ;;  %v6259_v63 = vrot.slane %v6251_v59, 1 }
 0x5d2   : > { %v6190_v8 = vpop.permute.xlu0 %6189 }
 0x5d3   : > { %v6208_v9 = vsel %vm10951_vm7, %v6188_v62, %v6190_v8  ;;  %v6209_v12 = vsel %vm10951_vm7, %v6190_v8, %v6192_v7  ;;  %5077 = vrot.lane.b32.xlu1 %v5062_v3, %s10944_s22  ;;  %v6252_v3 = vcombine.high %v6240_v53, %v6240_v53 }
 0x5d4   : > { %6228 = vst [vmem:[#allocation2 + $0x90] sm:$0x70] %v6208_v9  ;;  %6229 = vst [vmem:[#allocation2 + $0x178] sm:$0x70] %v6209_v12  ;;  %5075 = vrot.lane.b32.xlu0 %v5061_v0, %s10944_s22  ;;  %v6262_v9 = vrot.slane %v6241_v2, 1 }
 0x5d5   : > { %v6024_v11 = vpop.permute.xlu1 %6023  ;;  %v6261_v12 = vrot.slane %v6252_v3, 1 }
 0x5d6   : > { %v6046_v17 = vsel %vm6045_vm3, %v6024_v11, %v10147_v22  ;;  %v10198_v18 = vpop.permute.xlu0 %6193 }
 0x5d7   : > { %6066 = vst [vmem:[#allocation2 + $0x5d8] ss:$412 sps:$4 sm:$0xc1] %v6046_v17   ;;  %v6210_v20 = vsel %vm10951_vm7, %v6192_v7, %v10198_v18  ;;  %5153 = vrot.lane.b32.xlu1 %v5140_v13, %s10942_s6  ;;  %v6330_v13 = vld [vmem:[%s8297_s25 + $0x24] sm:$0x77] }
 0x5d8   : > { %6230 = vst [vmem:[#allocation2 + $0x258] sm:$0x70] %v6210_v20  ;;  %5151 = vrot.lane.b32.xlu0 %v5139_v14, %s10942_s6  ;;  %v8142_v14 = vld [vmem:[%s8297_s25 + $0x1c] sm:$0x77] }
 0x5d9   : > { %v6186_v25 = vpop.permute.xlu1 %6185  ;;  %v6341_v15 = vcombine.high %v8142_v14, %v8142_v14 }
 0x5da   : > { %v6207_v27 = vsel %vm10951_vm7, %v6186_v25, %v6188_v62  ;;  %v6115_v29 = vpop.permute.xlu0 %6114  ;;  %v6260_v62 = vrot.slane %v6240_v53, 1 }
 0x5db   : > { %6227 = vst [vmem:[#allocation2 + $0x5d8] sm:$0x70] %v6207_v27  ;;  %v6137_v22 = vsel %vm10952_vm10, %v6115_v29, %v10162_v43  ;;  %5157 = vrot.lane.b32.xlu1 %v5142_v21, %s10942_s6  ;;  %v6841_v30 = vld [vmem:[#allocation2 + $0x90] sm:$0xff]  ;;  %v6842_v43 = vld [vmem:[#allocation2 + $0x178] sm:$0xff]  ;;  %v6349_v25 = vrot.slane %v6341_v15, 6  ;;  %v6342_v29 = vcombine.high %v6330_v13, %v6330_v13 }
 0x5dc   : > { %6157 = vst [vmem:[#allocation2 + $0x5d8] sm:$0xe] %v6137_v22  ;;  %5155 = vrot.lane.b32.xlu0 %v5141_v24, %s10942_s6  ;;  %6958 = vmatprep.subr.mxu0 %v6841_v30  ;;  %v6350_v24 = vrot.slane %v6330_v13, 6  ;;  %v6331_v27 = vld [vmem:[%s8297_s25 + $0x2c] sm:$0x77] }
 0x5dd   : > { %v5866_v34 = vpop.permute.xlu1 %5865 }
 0x5de   : > { %v5864_v35 = vpop.permute.xlu0 %5863 }
 0x5df   : > { %v5885_v36 = vsel %vm10953_vm11, %v5864_v35, %v5866_v34  ;;  %5149 = vrot.lane.b32.xlu1 %v5138_v31, %s10942_s6  ;;  %v6843_v37 = vld [vmem:[#allocation2 + $0x258] sm:$0xff]  ;;  %s10959_s6 = smov 78  }
 0x5e0   : > { %5905 = vst [vmem:[#allocation2 + $0x560] sm:$0x7] %v5885_v36  ;;  %5069 = vrot.lane.b32.xlu0 %v5058_v33, %s10944_s22  ;;  %7035 = vmatprep.subr.mxu1 %v6843_v37  ;;  %v6351_v36 = vrot.slane %v6342_v29, 6  ;;  %v6410_v37 = vld [vmem:[%s8297_s25 + $0x24] sm:$0x77]  ;;  %s10958_s22 = smov 4  }
 0x5e1   : > { %7036 = vmatpush2.msra.mxu1 %v6842_v43  ;;  %v10215_v44 = vpop.permute.xlu1 %5869  ;;  %v6422_v53 = vcombine.high %v6410_v37, %v6410_v37 }
 0x5e2   : > { %v5868_v47 = vpop.permute.xlu0 %5867 }
 0x5e3   : > { %v5886_v48 = vsel %vm10953_vm11, %v5866_v34, %v5868_v47  ;;  %v5887_v49 = vsel %vm10953_vm11, %v5868_v47, %v10215_v44  ;;  %6516 = vrot.lane.b32.xlu1 %v6490_v46, %s8222_s4  ;;  %v6840_v50 = vld [vmem:[#allocation2 + $0x5d8] sm:$0xff] }
 0x5e4   : > { %5906 = vst [vmem:[#allocation2 + $0x728] sm:$0x7] %v5886_v48  ;;  %5907 = vst [vmem:[#allocation2 + $0x8d0] sm:$0x7] %v5887_v49  ;;  %6514 = vrot.lane.b32.xlu0 %v6501_v42, %s8222_s4  ;;  %6959 = vmatpush2.msra.mxu0 %v6840_v50  ;;  %v6421_v42 = vcombine.high %v8143_v38, %v8143_v38  ;;  %v6430_v50 = vrot.slane %v6410_v37, 3 }
 0x5e5   : > { %v5947_v60 = vpop.permute.xlu1 %5946 }
 0x5e6   : > { %v5945_v61 = vpop.permute.xlu0 %5944 }
 0x5e7   : > { %v5966_v55 = vsel %vm5964_vm12, %v5945_v61, %v5947_v60  ;;  %6520 = vrot.lane.b32.xlu1 %v6491_v52, %s8222_s4  ;;  %v6411_v52 = vld [vmem:[%s8297_s25 + $0x2c] sm:$0x77] }
 0x5e8   : > { %5986 = vst [vmem:[#allocation2 + $0x560] sm:$0x38] %v5966_v55  ;;  %6518 = vrot.lane.b32.xlu0 %v6502_v51, %s8222_s4  ;;  %v6429_v51 = vrot.slane %v6421_v42, 3  ;;  %v6431_v55 = vrot.slane %v6422_v53, 3 }
 0x5e9   : > { %v10229_v0 = vpop.permute.xlu1 %5950 }
 0x5ea   : > { %v5949_v6 = vpop.permute.xlu0 %5948 }
 0x5eb   : > { %v5967_v7 = vsel %vm5964_vm12, %v5947_v60, %v5949_v6  ;;  %v5968_v8 = vsel %vm5964_vm12, %v5949_v6, %v10229_v0  ;;  %6277 = vrot.lane.b32.xlu1 %v6260_v62, %s8231_s7  ;;  %v5998_v62 = vld [vmem:[%s8297_s25 + $0x24] sm:$0x77] }
 0x5ec   : > { %5987 = vst [vmem:[#allocation2 + $0x728] sm:$0x38] %v5967_v7  ;;  %5988 = vst [vmem:[#allocation2 + $0x8d0] sm:$0x38] %v5968_v8  ;;  %6275 = vrot.lane.b32.xlu0 %v6259_v63, %s8231_s7  ;;  %v8144_v63 = vld [vmem:[%s8297_s25 + $0x1c] sm:$0x77]  ;;  %v6010_v13 = vcombine.high %v5998_v62, %v5998_v62 }
 0x5ed   : > { %v5943_v16 = vpop.permute.xlu1 %5942  ;;  %v6009_v2 = vcombine.high %v8144_v63, %v8144_v63  ;;  %v6018_v8 = vrot.slane %v5998_v62, 2 }
 0x5ee   : > { %v5965_v11 = vsel %vm5964_vm12, %v5943_v16, %v5945_v61  ;;  %v5862_v17 = vpop.permute.xlu0 %5861  ;;  %v6432_v61 = vrot.slane %v6411_v52, 3 }
 0x5ef   : > { %5985 = vst [vmem:[#allocation2 + $0x770] sm:$0x38] %v5965_v11  ;;  %v5884_v20 = vsel %vm10953_vm11, %v5862_v17, %v5864_v35  ;;  %6281 = vrot.lane.b32.xlu1 %v6262_v9, %s8231_s7  ;;  %v6831_v21 = vld [vmem:[#allocation2 + $0x560] sm:$0xff]  ;;  %v6352_v35 = vrot.slane %v6331_v27, 6  ;;  %v6017_v9 = vrot.slane %v6009_v2, 2  ;;  %v6019_v17 = vrot.slane %v6010_v13, 2 }
 0x5f0   : > { %5904 = vst [vmem:[#allocation2 + $0x770] sm:$0x7] %v5884_v20  ;;  %6279 = vrot.lane.b32.xlu0 %v6261_v12, %s8231_s7  ;;  %6960 = vmatprep.subr.mxu0 %v6831_v21  ;;  %v5999_v12 = vld [vmem:[%s8297_s25 + $0x2c] sm:$0x77]  ;;  %v6089_v20 = vld [vmem:[%s8297_s25 + $0x24] sm:$0x77] }
 0x5f1   : > { %v5627_v22 = vpop.permute.xlu1 %5626  ;;  %v6020_v11 = vrot.slane %v5999_v12, 2  ;;  %v8145_v21 = vld [vmem:[%s8297_s25 + $0x1c] sm:$0x77]  ;;  %v5847_v13 = vld [vmem:[%s8297_s25 + $0x24] sm:$0x77] }
 0x5f2   : > { %v10248_v30 = vpop.permute.xlu0 %5624  ;;  %v8146_v2 = vld [vmem:[%s8297_s25 + $0x1c] sm:$0x77] }
 0x5f3   : > { %v5645_v31 = vsel %vm3887_vm4, %v10248_v30, %v5627_v22  ;;  %6367 = vrot.lane.b32.xlu1 %v6350_v24, %s8232_s18  ;;  %v6833_v33 = vld [vmem:[#allocation2 + $0x8d0] sm:$0xff]  ;;  %v6832_v34 = vld [vmem:[#allocation2 + $0x728] sm:$0xff]  ;;  %v6100_v24 = vcombine.high %v8145_v21, %v8145_v21 }
 0x5f4   : > { %5665 = vst [vmem:[#allocation2 + $0x298] ss:$1644 sps:$4 sm:$0x83] %v5645_v31   ;;  %6365 = vrot.lane.b32.xlu0 %v6349_v25, %s8232_s18  ;;  %7037 = vmatprep.subr.mxu1 %v6833_v33  ;;  %v6109_v31 = vrot.slane %v6089_v20, 7  ;;  %v5917_v21 = vld [vmem:[%s8297_s25 + $0x24] sm:$0x77] }
 0x5f5   : > { %7038 = vmatpush2.msra.mxu1 %v6832_v34  ;;  %v10256_v43 = vpop.permute.xlu1 %5630  ;;  %v6108_v33 = vrot.slane %v6100_v24, 7  ;;  %v6090_v34 = vld [vmem:[%s8297_s25 + $0x2c] sm:$0x77]  ;;  %v8148_v24 = vld [vmem:[%s8297_s25 + $0x1c] sm:$0x77] }
 0x5f6   : > { %v5629_v46 = vpop.permute.xlu0 %5628 }
 0x5f7   : > { %v5646_v47 = vsel %vm3887_vm4, %v5627_v22, %v5629_v46  ;;  %v5647_v48 = vsel %vm3887_vm4, %v5629_v46, %v10256_v43  ;;  %6371 = vrot.lane.b32.xlu1 %v6352_v35, %s8232_s18  ;;  %v6830_v49 = vld [vmem:[#allocation2 + $0x770] sm:$0xff]  ;;  %v6101_v35 = vcombine.high %v6089_v20, %v6089_v20 }
 0x5f8   : > { %5666 = vst [vmem:[#allocation2 + $0x460] ss:$1332 sps:$4 sm:$0x83] %v5646_v47   ;;  %5667 = vst [vmem:[#allocation2 + $0x328] ss:$-196 sps:$4 sm:$0x83] %v5647_v48   ;;  %6369 = vrot.lane.b32.xlu0 %v6351_v36, %s8232_s18  ;;  %6961 = vmatpush2.msra.mxu0 %v6830_v49 }
 0x5f9   : > { %v5717_v54 = vpop.permute.xlu1 %5716  ;;  %v6111_v47 = vrot.slane %v6090_v34, 7  ;;  %v6110_v48 = vrot.slane %v6101_v35, 7  ;;  %v6170_v49 = vld [vmem:[%s8297_s25 + $0x24] sm:$0x77]  ;;  %v5848_v20 = vld [vmem:[%s8297_s25 + $0x2c] sm:$0x77] }
 0x5fa   : > { %v5715_v59 = vpop.permute.xlu0 %5714  ;;  %v5918_v35 = vld [vmem:[%s8297_s25 + $0x2c] sm:$0x77] }
 0x5fb   : > { %v5735_v60 = vsel %vm10947_vm6, %v5715_v59, %v5717_v54  ;;  %6447 = vrot.lane.b32.xlu1 %v6430_v50, %s8233_s21 }
 0x5fc   : > { %5755 = vst [vmem:[#allocation2 + $0x298] sm:$0x1c] %v5735_v60  ;;  %6445 = vrot.lane.b32.xlu0 %v6429_v51, %s8233_s21 }
 0x5fd   : > { %v10269_v3 = vpop.permute.xlu1 %5720 }
 0x5fe   : > { %v5719_v6 = vpop.permute.xlu0 %5718 }
 0x5ff   : > { %v5736_v5 = vsel %vm10947_vm6, %v5717_v54, %v5719_v6  ;;  %v5737_v7 = vsel %vm10947_vm6, %v5719_v6, %v10269_v3  ;;  %6451 = vrot.lane.b32.xlu1 %v6432_v61, %s8233_s21  ;;  %v6182_v54 = vcombine.low %v6170_v49, %v6170_v49 }
 0x600   : > { %5756 = vst [vmem:[#allocation2 + $0x460] sm:$0x1c] %v5736_v5  ;;  %5757 = vst [vmem:[#allocation2 + $0x328] sm:$0x1c] %v5737_v7  ;;  %6449 = vrot.lane.b32.xlu0 %v6431_v55, %s8233_s21 }
 0x601   : > { %v5797_v14 = vpop.permute.xlu1 %5796 }
 0x602   : > { %v5795_v15 = vpop.permute.xlu0 %5794 }
 0x603   : > { %v5815_v16 = vsel %vm2319_vm0, %v5795_v15, %v5797_v14  ;;  %6035 = vrot.lane.b32.xlu1 %v6018_v8, %s8234_s23 }
 0x604   : > { %5835 = vst [vmem:[#allocation2 + $0x298] sm:$0xe0] %v5815_v16  ;;  %6033 = vrot.lane.b32.xlu0 %v6017_v9, %s8234_s23  ;;  %v8147_v9 = vld [vmem:[%s8297_s25 + $0x1c] sm:$0x77] }
 0x605   : > { %v10282_v25 = vpop.permute.xlu1 %5800  ;;  %v5858_v12 = vcombine.high %v8147_v9, %v8147_v9  ;;  %v5687_v9 = vld [vmem:[%s8297_s25 + $0x24] sm:$0x77] }
 0x606   : > { %v5799_v27 = vpop.permute.xlu0 %5798 }
 0x607   : > { %v5816_v29 = vsel %vm2319_vm0, %v5797_v14, %v5799_v27  ;;  %v5817_v22 = vsel %vm2319_vm0, %v5799_v27, %v10282_v25  ;;  %6039 = vrot.lane.b32.xlu1 %v6020_v11, %s8234_s23  ;;  %v5928_v27 = vcombine.high %v8148_v24, %v8148_v24 }
 0x608   : > { %5836 = vst [vmem:[#allocation2 + $0x460] sm:$0xe0] %v5816_v29  ;;  %5837 = vst [vmem:[#allocation2 + $0x328] sm:$0xe0] %v5817_v22  ;;  %6037 = vrot.lane.b32.xlu0 %v6019_v17, %s8234_s23  ;;  %v5859_v17 = vcombine.high %v5847_v13, %v5847_v13 }
 0x609   : > { %v5713_v36 = vpop.permute.xlu1 %5712  ;;  %v5936_v34 = vrot.slane %v5928_v27, 5 }
 0x60a   : > { %v5734_v37 = vsel %vm10947_vm6, %v5713_v36, %v5715_v59  ;;  %v5623_v38 = vpop.permute.xlu0 %5622  ;;  %vm10948_vm6 = vcmask 613376   ;;  %v6171_v59 = vld [vmem:[%s8297_s25 + $0x2c] sm:$0x77]  ;;  %v5929_v36 = vcombine.high %v5917_v21, %v5917_v21 }
 0x60b   : > { %5754 = vst [vmem:[#allocation2 + $0x18] sm:$0x1c] %v5734_v37  ;;  %v5644_v42 = vsel %vm3887_vm4, %v5623_v38, %v10248_v30  ;;  %6126 = vrot.lane.b32.xlu1 %v6109_v31, %s8235_s24  ;;  %v6821_v46 = vld [vmem:[#allocation2 + $0x298] sm:$0xff]  ;;  %v6183_v63 = vcombine.low %v6171_v59, %v6171_v59 }
 0x60c   : > { %5664 = vst [vmem:[#allocation2 + $0x18] ss:$308 sps:$4 sm:$0x83] %v5644_v42   ;;  %6124 = vrot.lane.b32.xlu0 %v6108_v33, %s8235_s24  ;;  %6962 = vmatprep.subr.mxu0 %v6821_v46  ;;  %v5937_v33 = vrot.slane %v5917_v21, 5  ;;  %v5699_v21 = vcombine.high %v5687_v9, %v5687_v9 }
 0x60d   : > { %v10296_v50 = vpop.permute.xlu1 %5383 }
 0x60e   : > { %v5793_v51 = vpop.permute.xlu0 %5792 }
 0x60f   : > { %v5814_v52 = vsel %vm2319_vm0, %v5793_v51, %v5795_v15  ;;  %6130 = vrot.lane.b32.xlu1 %v6111_v47, %s8235_s24  ;;  %v6823_v53 = vld [vmem:[#allocation2 + $0x328] sm:$0xff]  ;;  %v6822_v30 = vld [vmem:[#allocation2 + $0x460] sm:$0xff]  ;;  %v5939_v47 = vrot.slane %v5918_v35, 5  ;;  %v5608_v51 = vcombine.high %v9999_v23, %v9999_v23 }
 0x610   : > { %5834 = vst [vmem:[#allocation2 + $0x18] sm:$0xe0] %v5814_v52  ;;  %6128 = vrot.lane.b32.xlu0 %v6110_v48, %s8235_s24  ;;  %7039 = vmatprep.subr.mxu1 %v6823_v53  ;;  %v5938_v48 = vrot.slane %v5929_v36, 5  ;;  %v5767_v35 = vld [vmem:[%s8297_s25 + $0x24] sm:$0x77]  ;;  %v5778_v36 = vcombine.high %v10035_v58, %v10035_v58 }
 0x611   : > { %7040 = vmatpush2.msra.mxu1 %v6822_v30  ;;  %v5388_v60 = vpop.permute.xlu1 %5387 }
 0x612   : > { %v5386_v61 = vpop.permute.xlu0 %5385 }
 0x613   : > { %v5405_v55 = vsel %vm10948_vm6, %v10296_v50, %v5386_v61  ;;  %v5406_v62 = vsel %vm10948_vm6, %v5386_v61, %v5388_v60  ;;  %6197 = vrot.lane.b32.xlu1 %v6182_v54, %s8230_s17  ;;  %v5598_v61 = vld [vmem:[%s8297_s25 + $0x2c] sm:$0x77] }
 0x614   : > { %5425 = vst [vmem:[#allocation2 + $0x900] ss:$172 sps:$4 sm:$0xc1] %v5405_v55   ;;  %5426 = vst [vmem:[#allocation2 + $0x990] ss:$-1348 sps:$4 sm:$0xc1] %v5406_v62   ;;  %6195 = vrot.lane.b32.xlu0 %v8146_v2, %s8230_s17 }
 0x615   : > { %v10308_v6 = vpop.permute.xlu1 %5474 }
 0x616   : > { %v10310_v5 = vpop.permute.xlu0 %5389 }
 0x617   : > { %v5407_v7 = vsel %vm10948_vm6, %v5388_v60, %v10310_v5  ;;  %6201 = vrot.lane.b32.xlu1 %v6183_v63, %s8230_s17  ;;  %v6820_v8 = vld [vmem:[#allocation2 + $0x18] sm:$0xff]  ;;  %v5616_v60 = vrot.slane %v5608_v51, 1 }
 0x618   : > { %5427 = vst [vmem:[#allocation2 + $0x260] ss:$-524 sps:$4 sm:$0xc1] %v5407_v7   ;;  %6199 = vrot.lane.b32.xlu0 %v6170_v49, %s8230_s17  ;;  %6963 = vmatpush2.msra.mxu0 %v6820_v8  ;;  %v5597_v49 = vld [vmem:[%s8297_s25 + $0x24] sm:$0x77]  ;;  %v5619_v7 = vrot.slane %v5598_v61, 1  ;;  %v5367_v61 = vcombine.high %v10071_v26, %v10071_v26 }
 0x619   : > { %v5479_v14 = vpop.permute.xlu1 %5478  ;;  %v5617_v59 = vrot.slane %v5597_v49, 1  ;;  %v5609_v23 = vcombine.high %v5597_v49, %v5597_v49  ;;  %v5779_v49 = vcombine.high %v5767_v35, %v5767_v35 }
 0x61a   : > { %v5477_v15 = vpop.permute.xlu0 %5476 }
 0x61b   : > { %v5495_v16 = vsel %vm3715_vm14, %v10308_v6, %v5477_v15  ;;  %v5496_v11 = vsel %vm3715_vm14, %v5477_v15, %v5479_v14  ;;  %5873 = vrot.lane.b32.xlu1 %v5847_v13, %s8236_s30  ;;  %v5618_v8 = vrot.slane %v5609_v23, 1 }
 0x61c   : > { %5515 = vst [vmem:[#allocation2 + $0x900] sm:$0xe] %v5495_v16  ;;  %5516 = vst [vmem:[#allocation2 + $0x990] sm:$0xe] %v5496_v11  ;;  %5871 = vrot.lane.b32.xlu0 %v5858_v12, %s8236_s30  ;;  %v5698_v12 = vcombine.high %v10017_v40, %v10017_v40  ;;  %v5707_v16 = vrot.slane %v5687_v9, 6 }
 0x61d   : > { %v5545_v29 = vpop.permute.xlu1 %5544 }
 0x61e   : > { %v10326_v22 = vpop.permute.xlu0 %5480 }
 0x61f   : > { %v5497_v31 = vsel %vm3715_vm14, %v5479_v14, %v10326_v22  ;;  %5877 = vrot.lane.b32.xlu1 %v5848_v20, %s8236_s30  ;;  %v5688_v20 = vld [vmem:[%s8297_s25 + $0x2c] sm:$0x77] }
 0x620   : > { %5517 = vst [vmem:[#allocation2 + $0x260] sm:$0xe] %v5497_v31  ;;  %5875 = vrot.lane.b32.xlu0 %v5859_v17, %s8236_s30  ;;  %v5706_v17 = vrot.slane %v5698_v12, 6 }
 0x621   : > { %v5549_v37 = vpop.permute.xlu1 %5548 }
 0x622   : > { %v5547_v38 = vpop.permute.xlu0 %5546 }
 0x623   : > { %v5565_v42 = vsel %vm10949_vm15, %v5545_v29, %v5547_v38  ;;  %v5566_v46 = vsel %vm10949_vm15, %v5547_v38, %v5549_v37  ;;  %5954 = vrot.lane.b32.xlu1 %v5937_v33, %s8237_s27  ;;  %v5709_v33 = vrot.slane %v5688_v20, 6 }
 0x624   : > { %5585 = vst [vmem:[#allocation2 + $0x900] sm:$0x70] %v5565_v42  ;;  %5586 = vst [vmem:[#allocation2 + $0x990] sm:$0x70] %v5566_v46  ;;  %5952 = vrot.lane.b32.xlu0 %v5936_v34, %s8237_s27  ;;  %v5708_v34 = vrot.slane %v5699_v21, 6  ;;  %v5787_v46 = vrot.slane %v5767_v35, 3 }
 0x625   : > { %v5382_v52 = vpop.permute.xlu1 %5381 }
 0x626   : > { %v5404_v53 = vsel %vm10948_vm6, %v5382_v52, %v10296_v50  ;;  %v10342_v30 = vpop.permute.xlu0 %5550  ;;  %vm10956_vm6 = vcmask 629760  }
 0x627   : > { %5424 = vst [vmem:[#allocation2 + $0x148] ss:$-92 sps:$4 sm:$0xc1] %v5404_v53   ;;  %v5567_v54 = vsel %vm10949_vm15, %v5549_v37, %v10342_v30  ;;  %5958 = vrot.lane.b32.xlu1 %v5939_v47, %s8237_s27  ;;  %v5786_v47 = vrot.slane %v5778_v36, 3 }
 0x628   : > { %5587 = vst [vmem:[#allocation2 + $0x260] sm:$0x70] %v5567_v54  ;;  %5956 = vrot.lane.b32.xlu0 %v5938_v48, %s8237_s27  ;;  %v5768_v48 = vld [vmem:[%s8297_s25 + $0x2c] sm:$0x77] }
 0x629   : > { %v5543_v55 = vpop.permute.xlu1 %5542  ;;  %v5789_v54 = vrot.slane %v5768_v48, 3 }
 0x62a   : > { %v5564_v62 = vsel %vm10949_vm15, %v5543_v55, %v5545_v29  ;;  %v5473_v50 = vpop.permute.xlu0 %5472  ;;  %vm10950_vm15 = vcmask 621568  }
 0x62b   : > { %5584 = vst [vmem:[#allocation2 + $0x148] sm:$0x70] %v5564_v62  ;;  %v5494_v63 = vsel %vm3715_vm14, %v5473_v50, %v10308_v6  ;;  %5634 = vrot.lane.b32.xlu1 %v5617_v59, %s8228_s11  ;;  %v6811_v2 = vld [vmem:[#allocation2 + $0x900] sm:$0xff]  ;;  %v6812_v11 = vld [vmem:[#allocation2 + $0x990] sm:$0xff]  ;;  %v5788_v59 = vrot.slane %v5779_v49, 3 }
 0x62c   : > { %5514 = vst [vmem:[#allocation2 + $0x148] sm:$0xe] %v5494_v63  ;;  %5632 = vrot.lane.b32.xlu0 %v5616_v60, %s8228_s11  ;;  %6964 = vmatprep.subr.mxu0 %v6811_v2  ;;  %v5356_v60 = vld [vmem:[%s8297_s25 + $0x24] sm:$0x77] }
 0x62d   : > { %v5224_v13 = vpop.permute.xlu1 %5223  ;;  %v5376_v2 = vrot.slane %v5356_v60, 2  ;;  %v5368_v9 = vcombine.high %v5356_v60, %v5356_v60 }
 0x62e   : > { %v5222_v14 = vpop.permute.xlu0 %5221 }
 0x62f   : > { %v5243_v15 = vsel %vm10956_vm6, %v5222_v14, %v5224_v13  ;;  %5638 = vrot.lane.b32.xlu1 %v5619_v7, %s8228_s11  ;;  %v6813_v6 = vld [vmem:[#allocation2 + $0x260] sm:$0xff]  ;;  %v5375_v7 = vrot.slane %v5367_v61, 2 }
 0x630   : > { %5263 = vst [vmem:[#allocation2 + $0x9a8] sm:$0x7] %v5243_v15  ;;  %5636 = vrot.lane.b32.xlu0 %v5618_v8, %s8228_s11  ;;  %7041 = vmatprep.subr.mxu1 %v6813_v6  ;;  %v5357_v8 = vld [vmem:[%s8297_s25 + $0x2c] sm:$0x77] }
 0x631   : > { %7042 = vmatpush2.msra.mxu1 %v6812_v11  ;;  %v10361_v24 = vpop.permute.xlu1 %5227  ;;  %v5378_v6 = vrot.slane %v5357_v8, 2  ;;  %v5447_v11 = vld [vmem:[%s8297_s25 + $0x24] sm:$0x77] }
 0x632   : > { %v5226_v40 = vpop.permute.xlu0 %5225 }
 0x633   : > { %v5244_v27 = vsel %vm10956_vm6, %v5224_v13, %v5226_v40  ;;  %v5245_v29 = vsel %vm10956_vm6, %v5226_v40, %v10361_v24  ;;  %5724 = vrot.lane.b32.xlu1 %v5707_v16, %s8229_s14  ;;  %v6810_v31 = vld [vmem:[#allocation2 + $0x148] sm:$0xff]  ;;  %v5377_v16 = vrot.slane %v5368_v9, 2  ;;  %v5216_v9 = vcombine.high %v10144_v19, %v10144_v19 }
 0x634   : > { %5264 = vst [vmem:[#allocation2 + $0x448] sm:$0x7] %v5244_v27  ;;  %5265 = vst [vmem:[#allocation2 + $0x50] sm:$0x7] %v5245_v29  ;;  %5722 = vrot.lane.b32.xlu0 %v5706_v17, %s8229_s14  ;;  %6965 = vmatpush2.msra.mxu0 %v6810_v31  ;;  %v5458_v17 = vcombine.high %v10091_v41, %v10091_v41  ;;  %v5467_v31 = vrot.slane %v5447_v11, 7 }
 0x635   : > { %v5305_v37 = vpop.permute.xlu1 %5304 }
 0x636   : > { %v5303_v38 = vpop.permute.xlu0 %5302  ;;  %v5466_v41 = vrot.slane %v5458_v17, 7  ;;  %v6772_v17 = vld [vmem:[#allocation2 + $0x198] sm:$0xff] }
 0x637   : > { %v5324_v42 = vsel %vm10950_vm15, %v5303_v38, %v5305_v37  ;;  %5728 = vrot.lane.b32.xlu1 %v5709_v33, %s8229_s14  ;;  %v5448_v33 = vld [vmem:[%s8297_s25 + $0x2c] sm:$0x77] }
 0x638   : > { %5344 = vst [vmem:[#allocation2 + $0x9a8] sm:$0x38] %v5324_v42  ;;  %5726 = vrot.lane.b32.xlu0 %v5708_v34, %s8229_s14  ;;  %v5459_v34 = vcombine.high %v5447_v11, %v5447_v11 }
 0x639   : > { %v10375_v51 = vpop.permute.xlu1 %5308 }
 0x63a   : > { %v5307_v52 = vpop.permute.xlu0 %5306  ;;  %v5468_v42 = vrot.slane %v5459_v34, 7  ;;  %v5286_v34 = vcombine.high %v10154_v32, %v10154_v32  ;;  %v6761_v32 = vld [vmem:[#allocation2 + $0x710] sm:$0xff] }
 0x63b   : > { %v5325_v53 = vsel %vm10950_vm15, %v5305_v37, %v5307_v52  ;;  %v5326_v58 = vsel %vm10950_vm15, %v5307_v52, %v10375_v51  ;;  %5804 = vrot.lane.b32.xlu1 %v5787_v46, %s8218_s26  ;;  %v5527_v46 = vld [vmem:[%s8297_s25 + $0x24] sm:$0x77] }
 0x63c   : > { %5345 = vst [vmem:[#allocation2 + $0x448] sm:$0x38] %v5325_v53  ;;  %5346 = vst [vmem:[#allocation2 + $0x50] sm:$0x38] %v5326_v58  ;;  %5802 = vrot.lane.b32.xlu0 %v5786_v47, %s8218_s26  ;;  %v5539_v53 = vcombine.low %v5527_v46, %v5527_v46  ;;  %v5528_v58 = vld [vmem:[%s8297_s25 + $0x2c] sm:$0x77] }
 0x63d   : > { %v5301_v23 = vpop.permute.xlu1 %5300 }
 0x63e   : > { %v5323_v55 = vsel %vm10950_vm15, %v5301_v23, %v5303_v38  ;;  %v5220_v62 = vpop.permute.xlu0 %5219  ;;  %vm5171_vm15 = vcmask 637952   ;;  %v5469_v38 = vrot.slane %v5448_v33, 7  ;;  %v5275_v33 = vld [vmem:[%s8297_s25 + $0x24] sm:$0x77] }
 0x63f   : > { %5343 = vst [vmem:[#allocation2 + $0xe8] sm:$0x38] %v5323_v55  ;;  %v5242_v50 = vsel %vm10956_vm6, %v5220_v62, %v5222_v14  ;;  %5808 = vrot.lane.b32.xlu1 %v5789_v54, %s8218_s26  ;;  %v6801_v63 = vld [vmem:[#allocation2 + $0x9a8] sm:$0xff]  ;;  %v5540_v55 = vcombine.low %v5528_v58, %v5528_v58 }
 0x640   : > { %5262 = vst [vmem:[#allocation2 + $0xe8] sm:$0x7] %v5242_v50  ;;  %5806 = vrot.lane.b32.xlu0 %v5788_v59, %s8218_s26  ;;  %6966 = vmatprep.subr.mxu0 %v6801_v63 }
 0x641   : > { %v5074_v26 = vpop.permute.xlu1 %5073 }
 0x642   : > { %v5072_v12 = vpop.permute.xlu0 %5071 }
 0x643   : > { %v5092_v13 = vsel %vm1621_vm5, %v5072_v12, %v5074_v26  ;;  %5393 = vrot.lane.b32.xlu1 %v5376_v2, %s8238_s28  ;;  %v6803_v15 = vld [vmem:[#allocation2 + $0x50] sm:$0xff]  ;;  %v6802_v14 = vld [vmem:[#allocation2 + $0x448] sm:$0xff] }
 0x644   : > { %5112 = vst [vmem:[#allocation2 + $0x1f0] sm:$0x1c] %v5092_v13  ;;  %5391 = vrot.lane.b32.xlu0 %v5375_v7, %s8238_s28  ;;  %7043 = vmatprep.subr.mxu1 %v6803_v15  ;;  %v6782_v13 = vld [vmem:[#allocation2 + $0x610] sm:$0xff] }
 0x645   : > { %7044 = vmatpush2.msra.mxu1 %v6802_v14  ;;  %v10396_v20 = vpop.permute.xlu1 %5077 }
 0x646   : > { %v5076_v21 = vpop.permute.xlu0 %5075 }
 0x647   : > { %v5093_v40 = vsel %vm1621_vm5, %v5074_v26, %v5076_v21  ;;  %v5094_v27 = vsel %vm1621_vm5, %v5076_v21, %v10396_v20  ;;  %5397 = vrot.lane.b32.xlu1 %v5378_v6, %s8238_s28  ;;  %v6800_v29 = vld [vmem:[#allocation2 + $0xe8] sm:$0xff]  ;;  %v6773_v6 = vld [vmem:[#allocation2 + $0xb8] sm:$0xff] }
 0x648   : > { %5113 = vst [vmem:[#allocation2 + $0x658] sm:$0x1c] %v5093_v40  ;;  %5114 = vst [vmem:[#allocation2 + $0x6b8] sm:$0x1c] %v5094_v27  ;;  %5395 = vrot.lane.b32.xlu0 %v5377_v16, %s8238_s28  ;;  %6967 = vmatpush2.msra.mxu0 %v6800_v29  ;;  %v6781_v16 = vld [vmem:[#allocation2 + $0x60] sm:$0xff]  ;;  %v6780_v40 = vld [vmem:[#allocation2 + $0x28] sm:$0xff] }
 0x649   : > { %v5154_v35 = vpop.permute.xlu1 %5153  ;;  %v5206_v27 = vld [vmem:[%s8297_s25 + $0x2c] sm:$0x77] }
 0x64a   : > { %v5152_v36 = vpop.permute.xlu0 %5151 }
 0x64b   : > { %v5173_v37 = vsel %vm5171_vm15, %v5152_v36, %v5154_v35  ;;  %5484 = vrot.lane.b32.xlu1 %v5467_v31, %s8226_s9  ;;  %v6763_v31 = vld [vmem:[#allocation2 + $0x58] sm:$0xff] }
 0x64c   : > { %5193 = vst [vmem:[#allocation2 + $0x1f0] sm:$0xe0] %v5173_v37  ;;  %5482 = vrot.lane.b32.xlu0 %v5466_v41, %s8226_s9  ;;  %v6771_v41 = vld [vmem:[#allocation2 + $0x248] sm:$0xff]  ;;  %v6762_v37 = vld [vmem:[#allocation2 + $0x120] sm:$0xff] }
 0x64d   : > { %v10408_v47 = vpop.permute.xlu1 %5157 }
 0x64e   : > { %v5156_v48 = vpop.permute.xlu0 %5155 }
 0x64f   : > { %v5174_v49 = vsel %vm5171_vm15, %v5154_v35, %v5156_v48  ;;  %v5175_v52 = vsel %vm5171_vm15, %v5156_v48, %v10408_v47  ;;  %5488 = vrot.lane.b32.xlu1 %v5469_v38, %s8226_s9  ;;  %v6770_v38 = vld [vmem:[#allocation2 + $0x30] sm:$0xff]  ;;  %v6752_v48 = vld [vmem:[#allocation2 + $0x760] sm:$0xff] }
 0x650   : > { %5194 = vst [vmem:[#allocation2 + $0x658] sm:$0xe0] %v5174_v49  ;;  %5195 = vst [vmem:[#allocation2 + $0x6b8] sm:$0xe0] %v5175_v52  ;;  %5486 = vrot.lane.b32.xlu0 %v5468_v42, %s8226_s9  ;;  %v6753_v42 = vld [vmem:[#allocation2 + $0x638] sm:$0xff]  ;;  %v6760_v52 = vld [vmem:[#allocation2 + $0x788] sm:$0xff] }
 0x651   : > { %v5150_v54 = vpop.permute.xlu1 %5149 }
 0x652   : > { %v5172_v59 = vsel %vm5171_vm15, %v5150_v54, %v5152_v36  ;;  %v5070_v60 = vpop.permute.xlu0 %5069 }
 0x653   : > { %5192 = vst [vmem:[#allocation2 + $0x250] sm:$0xe0] %v5172_v59  ;;  %v5091_v61 = vsel %vm1621_vm5, %v5070_v60, %v5072_v12  ;;  %5554 = vrot.lane.b32.xlu1 %v5539_v53, %s8227_s10  ;;  %v6791_v23 = vld [vmem:[#allocation2 + $0x1f0] sm:$0xff]  ;;  %v6783_v12 = vld [vmem:[#allocation2 + $0x608] sm:$0xff]  ;;  %v5294_v53 = vrot.slane %v5286_v34, 5  ;;  %v6720_v34 = vld [vmem:[#allocation2 + $0x678] sm:$0xff] }
 0x654   : > { %5111 = vst [vmem:[#allocation2 + $0x250] sm:$0x1c] %v5091_v61  ;;  %5552 = vrot.lane.b32.xlu0 %v10110_v57, %s8227_s10  ;;  %6968 = vmatprep.subr.mxu0 %v6791_v23  ;;  %v5205_v57 = vld [vmem:[%s8297_s25 + $0x24] sm:$0x77]  ;;  %v6751_v60 = vld [vmem:[#allocation2 + $0x830] sm:$0xff]  ;;  %v5287_v23 = vcombine.high %v5275_v33, %v5275_v33 }
 0x655   : > { %v6517_v62 = vpop.permute.xlu1 %6516  ;;  %v5217_v11 = vcombine.high %v5205_v57, %v5205_v57  ;;  %v6743_v59 = vld [vmem:[#allocation2 + $0x948] sm:$0xff] }
 0x656   : > { %v6515_v50 = vpop.permute.xlu0 %6514  ;;  %v10451_v61 = vld [vmem:[%s8297_s25 + $0x2c] sm:$0x77] }
 0x657   : > { %v6530_v63 = vsel %vm3032_vm9, %v10074_v28, %v6515_v50  ;;  %v6531_v2 = vsel %vm3032_vm9, %v6515_v50, %v6517_v62  ;;  %5558 = vrot.lane.b32.xlu1 %v5540_v55, %s8227_s10  ;;  %v6793_v7 = vld [vmem:[#allocation2 + $0x6b8] sm:$0xff]  ;;  %v6742_v55 = vld [vmem:[#allocation2 + $0x428] sm:$0xff] }
 0x658   : > { %v6792_v8 = vld [vmem:[#allocation2 + $0x658] sm:$0xff]  ;;  %6550 = vst [vmem:[#allocation2 + $0x590] sm:$0x7] %v6530_v63  ;;  %6551 = vst [vmem:[#allocation2 + $0x3d0] sm:$0x7] %v6531_v2  ;;  %5556 = vrot.lane.b32.xlu0 %v5527_v46, %s8227_s10  ;;  %7045 = vmatprep.subr.mxu1 %v6793_v7  ;;  %v6733_v63 = vld [vmem:[#allocation2 + $0x940] sm:$0xff] }
 0x659   : > { %7046 = vmatpush2.msra.mxu1 %v6792_v8  ;;  %v10429_v26 = vpop.permute.xlu1 %6520  ;;  %v6741_v2 = vld [vmem:[#allocation2 + $0x3f8] sm:$0xff]  ;;  %v5297_v8 = vrot.slane %v10451_v61, 5 }
 0x65a   : > { %v6519_v28 = vpop.permute.xlu0 %6518  ;;  %7047 = vmatprep.subr.mxu1 %v6783_v12 }
 0x65b   : > { %v6532_v15 = vsel %vm3032_vm9, %v6517_v62, %v6519_v28  ;;  %v6533_v14 = vsel %vm3032_vm9, %v6519_v28, %v10429_v26  ;;  %7048 = vmatpush2.msra.mxu1 %v6782_v13  ;;  %5231 = vrot.lane.b32.xlu1 %v5205_v57, %s8239_s29  ;;  %v6790_v19 = vld [vmem:[#allocation2 + $0x250] sm:$0xff]  ;;  %v6750_v62 = vld [vmem:[#allocation2 + $0x268] sm:$0xff]  ;;  %v5296_v13 = vrot.slane %v5287_v23, 5 }
 0x65c   : > { %6552 = vst [vmem:[#allocation2 + $0x398] sm:$0x7] %v6532_v15  ;;  %6553 = vst [vmem:[#allocation2 + $0x7b0] sm:$0x7] %v6533_v14  ;;  %5229 = vrot.lane.b32.xlu0 %v5216_v9, %s8239_s29  ;;  %6969 = vmatpush2.msra.mxu0 %v6790_v19  ;;  %v6732_v9 = vld [vmem:[#allocation2 + $0x3e8] sm:$0xff]  ;;  %v6740_v28 = vld [vmem:[#allocation2 + $0x850] sm:$0xff] }
 0x65d   : > { %7049 = vmatprep.subr.mxu1 %v6773_v6  ;;  %6970 = vmatprep.subr.mxu0 %v6781_v16  ;;  %v6278_v21 = vpop.permute.xlu1 %6277  ;;  %v6723_v15 = vld [vmem:[#allocation2 + $0x978] sm:$0xff]  ;;  %v6731_v14 = vld [vmem:[#allocation2 + $0x540] sm:$0xff] }
 0x65e   : > { %7050 = vmatpush2.msra.mxu1 %v6772_v17  ;;  %v6276_v29 = vpop.permute.xlu0 %6275  ;;  %6971 = vmatpush2.msra.mxu0 %v6780_v40  ;;  %v4954_v19 = vld [vmem:[%s8297_s25 + $0x20] sm:$0x77]  ;;  %v8149_v6 = vld [vmem:[%s8297_s25 + $0x18] sm:$0x77] }
 0x65f   : > { %v6291_v35 = vsel %vm4529_vm8, %v10088_v39, %v6276_v29  ;;  %v6292_v36 = vsel %vm4529_vm8, %v6276_v29, %v6278_v21  ;;  %7051 = vmatprep.subr.mxu1 %v6763_v31  ;;  %6972 = vmatprep.subr.mxu0 %v6771_v41  ;;  %v5295_v39 = vrot.slane %v5275_v33, 5  ;;  %v4965_v16 = vcombine.high %v8149_v6, %v8149_v6  ;;  %v6721_v29 = vld [vmem:[#allocation2 + $0xf0] sm:$0xff] }
 0x660   : > { %6311 = vst [vmem:[#allocation2 + $0x478] ss:$-276 sps:$4 sm:$0x83] %v6291_v35   ;;  %6312 = vst [vmem:[#allocation2 + $0x518] ss:$892 sps:$4 sm:$0x83] %v6292_v36   ;;  %7052 = vmatpush2.msra.mxu1 %v6762_v37  ;;  %5235 = vrot.lane.b32.xlu1 %v5206_v27, %s8239_s29 }
 0x661   : > { %5233 = vrot.lane.b32.xlu0 %v5217_v11, %s8239_s29  ;;  %6973 = vmatpush2.msra.mxu0 %v6770_v38  ;;  %v10445_v46 = vpop.permute.xlu1 %6281  ;;  %v6722_v11 = vld [vmem:[#allocation2 + $0x330] sm:$0xff]  ;;  %v4974_v33 = vrot.slane %v4954_v19, 1  ;;  %v4973_v35 = vrot.slane %v4965_v16, 1  ;;  %v6715_v37 = vld [vmem:[#allocation2 + $0x818] sm:$0xff] }
 0x662   : > { %7053 = vmatprep.subr.mxu1 %v6753_v42  ;;  %6974 = vmatprep.subr.mxu0 %v6761_v32  ;;  %v6280_v49 = vpop.permute.xlu0 %6279  ;;  %v6717_v27 = vld [vmem:[#allocation2 + $0x4b0] sm:$0xff]  ;;  %v6707_v42 = vld [vmem:[#allocation2 + $0x8c8] sm:$0xff] }
 0x663   : > { %7054 = vmatpush2.msra.mxu1 %v6752_v48  ;;  %v6293_v58 = vsel %vm4529_vm8, %v6278_v21, %v6280_v49  ;;  %v6294_v54 = vsel %vm4529_vm8, %v6280_v49, %v10445_v46  ;;  %6975 = vmatpush2.msra.mxu0 %v6760_v52  ;;  %v6556_v21 = vld [vmem:[%s10938_s1] sm:$0xff]  ;;  %v6716_v36 = vld [vmem:[#allocation2 + $0x490] sm:$0xff]  ;;  %v4966_v48 = vcombine.high %v4954_v19, %v4954_v19 }
 0x664   : > { %6313 = vst [vmem:[#allocation2 + $0x5b8] ss:$-636 sps:$4 sm:$0x83] %v6293_v58   ;;  %6314 = vst [vmem:[#allocation2 + $0x6a0] ss:$-1020 sps:$4 sm:$0x83] %v6294_v54   ;;  %7055 = vmatprep.subr.mxu1 %v6743_v59  ;;  %6976 = vmatprep.subr.mxu0 %v6751_v60 }
 0x665   : > { %7056 = vmatpush2.msra.mxu1 %v6742_v55  ;;  %5312 = vrot.lane.b32.xlu1 %v5295_v39, %s8240_s5  ;;  %v6368_v50 = vpop.permute.xlu1 %6367  ;;  %v10472_v39 = vld [vmem:[%s8297_s25 + $0x28] sm:$0x77]  ;;  %v6706_v49 = vld [vmem:[#allocation2 + $0x5f0] sm:$0xff]  ;;  %v6697_v58 = vld [vmem:[#allocation2 + $0x6e0] sm:$0xff] }
 0x666   : > { %5310 = vrot.lane.b32.xlu0 %v5294_v53, %s8240_s5  ;;  %6977 = vmatpush2.msra.mxu0 %v6750_v62  ;;  %v6366_v7 = vpop.permute.xlu0 %6365  ;;  %v6714_v54 = vld [vmem:[#allocation2 + $0x980] sm:$0xff]  ;;  %v6696_v59 = vld [vmem:[#allocation2 + $0x1e8] sm:$0xff]  ;;  %v4976_v60 = vrot.slane %v10472_v39, 1  ;;  %v4975_v62 = vrot.slane %v4966_v48, 1  ;;  %v6685_v19 = vld [vmem:[#allocation2 + $0x5b0] sm:$0xff] }
 0x667   : > { %7057 = vmatprep.subr.mxu1 %v6733_v63  ;;  %6978 = vmatprep.subr.mxu0 %v6741_v2  ;;  %v6381_v57 = vsel %vm4599_vm13, %v10107_v56, %v6366_v7  ;;  %v6382_v12 = vsel %vm4599_vm13, %v6366_v7, %v6368_v50  ;;  %v6730_v56 = vld [vmem:[#allocation2 + $0x68] sm:$0xff]  ;;  %v6687_v55 = vld [vmem:[#allocation2 + $0x780] sm:$0xff]  ;;  %v6704_v63 = vld [vmem:[#allocation2 + $0x218] sm:$0xff] }
 0x668   : > { %7058 = vmatpush2.msra.mxu1 %v6732_v9  ;;  %6401 = vst [vmem:[#allocation2 + $0x478] sm:$0x1c] %v6381_v57  ;;  %6402 = vst [vmem:[#allocation2 + $0x518] sm:$0x1c] %v6382_v12  ;;  %6979 = vmatpush2.msra.mxu0 %v6740_v28  ;;  %v6686_v2 = vld [vmem:[#allocation2 + $0x4e8] sm:$0xff]  ;;  %v6695_v28 = vld [vmem:[#allocation2 + $0x970] sm:$0xff] }
 0x669   : > { %7059 = vmatprep.subr.mxu1 %v6723_v15  ;;  %6980 = vmatprep.subr.mxu0 %v6731_v14  ;;  %v10461_v17 = vpop.permute.xlu1 %6371  ;;  %v5044_v9 = vld [vmem:[%s8297_s25 + $0x20] sm:$0x77]  ;;  %v8150_v57 = vld [vmem:[%s8297_s25 + $0x18] sm:$0x77] }
 0x66a   : > { %7060 = vmatpush2.msra.mxu1 %v6722_v11  ;;  %5316 = vrot.lane.b32.xlu1 %v5297_v8, %s8240_s5  ;;  %v6370_v40 = vpop.permute.xlu0 %6369  ;;  %v5055_v12 = vcombine.high %v8150_v57, %v8150_v57  ;;  %v6677_v14 = vld [vmem:[#allocation2 + $0x8b8] sm:$0xff]  ;;  %v5064_v6 = vrot.slane %v5044_v9, 6  ;;  %v6676_v11 = vld [vmem:[#allocation2 + $0x1c0] sm:$0xff] }
 0x66b   : > { %5314 = vrot.lane.b32.xlu0 %v5296_v13, %s8240_s5  ;;  %6981 = vmatpush2.msra.mxu0 %v6730_v56  ;;  %v6383_v31 = vsel %vm4599_vm13, %v6368_v50, %v6370_v40  ;;  %v6384_v41 = vsel %vm4599_vm13, %v6370_v40, %v10461_v17  ;;  %v6694_v13 = vld [vmem:[#allocation2 + $0x458] sm:$0xff]  ;;  %v6684_v56 = vld [vmem:[#allocation2 + $0x840] sm:$0xff] }
 0x66c   : > { %7151 = vmatprep.subr.mxu1 %v6717_v27  ;;  %6982 = vmatprep.subr.mxu0 %v6721_v29  ;;  %6403 = vst [vmem:[#allocation2 + $0x5b8] sm:$0x1c] %v6383_v31  ;;  %6404 = vst [vmem:[#allocation2 + $0x6a0] sm:$0x1c] %v6384_v41  ;;  %v6667_v29 = vld [vmem:[#allocation2 + $0x240] sm:$0xff] }
 0x66d   : > { %7062 = vmatmul.mubr.f32.vlgmr.msra.gmra.mxu1 %v6556_v21  ;;  %6983 = vmatpush2.msra.mxu0 %v6720_v34  ;;  %v6448_v38 = vpop.permute.xlu1 %6447  ;;  %v6675_v31 = vld [vmem:[#allocation2 + $0x820] sm:$0xff]  ;;  %v10493_v41 = vld [vmem:[%s8297_s25 + $0x28] sm:$0x77] }
 0x66e   : > { %7152 = vmatpush1.msra.mxu1 %v6716_v36  ;;  %7074 = vmatprep.subr.mxu0 %v6715_v37  ;;  %v6446_v32 = vpop.permute.xlu0 %6445  ;;  %v6666_v34 = vld [vmem:[#allocation2 + $0x860] sm:$0xff]  ;;  %v6657_v37 = vld [vmem:[#allocation2 + $0x1b8] sm:$0xff] }
 0x66f   : > { %7153 = vmatprep.subr.mxu1 %v6707_v42  ;;  %4991 = vrot.lane.b32.xlu1 %v4974_v33, %s10954_s8  ;;  %v6461_v52 = vsel %vm4680_vm1, %v10124_v4, %v6446_v32  ;;  %v6462_v53 = vsel %vm4680_vm1, %v6446_v32, %v6448_v38  ;;  %v6705_v4 = vld [vmem:[#allocation2 + $0x520] sm:$0xff]  ;;  %v5056_v33 = vcombine.high %v5044_v9, %v5044_v9  ;;  %v5066_v42 = vrot.slane %v10493_v41, 6 }
 0x670   : > { %7154 = vmatpush1.msra.mxu1 %v6706_v49  ;;  %4989 = vrot.lane.b32.xlu0 %v4973_v35, %s10954_s8  ;;  %6481 = vst [vmem:[#allocation2 + $0x478] sm:$0xe0] %v6461_v52  ;;  %6482 = vst [vmem:[#allocation2 + $0x518] sm:$0xe0] %v6462_v53  ;;  %v6656_v49 = vld [vmem:[#allocation2 + $0x558] sm:$0xff]  ;;  %v6664_v52 = vld [vmem:[#allocation2 + $0x5e8] sm:$0xff] }
 0x671   : > { %6985 = vmatmul.mubr.f32.vlgmr.msra.gmra.mxu0 %v6556_v21  ;;  %7155 = vmatprep.subr.mxu1 %v6697_v58  ;;  %v10480_v23 = vpop.permute.xlu1 %6451  ;;  %v5063_v21 = vrot.slane %v5055_v12, 6  ;;  %v5065_v53 = vrot.slane %v5056_v33, 6  ;;  %v6647_v58 = vld [vmem:[#allocation2 + $0x930] sm:$0xff]  ;;  %v6645_v9 = vld [vmem:[#allocation2 + $0x3c0] sm:$0xff] }
 0x672   : > { %7075 = vmatpush1.msra.mxu0 %v6714_v54  ;;  %7156 = vmatpush1.msra.mxu1 %v6696_v59  ;;  %v6450_v50 = vpop.permute.xlu0 %6449  ;;  %v6655_v54 = vld [vmem:[#allocation2 + $0x870] sm:$0xff]  ;;  %v5124_v59 = vld [vmem:[%s8297_s25 + $0x24] sm:$0x77] }
 0x673   : > { %7076 = vmatprep.subr.mxu0 %v6705_v4  ;;  %7157 = vmatprep.subr.mxu1 %v6687_v55  ;;  %v6463_v7 = vsel %vm4680_vm1, %v6448_v38, %v6450_v50  ;;  %v6464_v8 = vsel %vm4680_vm1, %v6450_v50, %v10480_v23  ;;  %v6665_v38 = vld [vmem:[#allocation2 + $0x390] sm:$0xff]  ;;  %v5144_v57 = vrot.slane %v5124_v59, 3  ;;  %v6636_v12 = vld [vmem:[#allocation2 + $0x660] sm:$0xff] }
 0x674   : > { %7077 = vmatpush1.msra.mxu0 %v6704_v63  ;;  %7158 = vmatpush1.msra.mxu1 %v6686_v2  ;;  %6483 = vst [vmem:[#allocation2 + $0x5b8] sm:$0xe0] %v6463_v7  ;;  %6484 = vst [vmem:[#allocation2 + $0x6a0] sm:$0xe0] %v6464_v8  ;;  %v6654_v63 = vld [vmem:[#allocation2 + $0x8a8] sm:$0xff]  ;;  %v6637_v8 = vld [vmem:[#allocation2 + $0x7b8] sm:$0xff] }
 0x675   : > { %7078 = vmatprep.subr.mxu0 %v6695_v28  ;;  %4995 = vrot.lane.b32.xlu1 %v4976_v60, %s10954_s8  ;;  %v6036_v15 = vpop.permute.xlu1 %6035  ;;  %v8151_v60 = vld [vmem:[%s8297_s25 + $0x1c] sm:$0x77]  ;;  %v6644_v28 = vld [vmem:[#allocation2 + $0x768] sm:$0xff] }
 0x676   : > { %4993 = vrot.lane.b32.xlu0 %v4975_v62, %s10954_s8  ;;  %7079 = vmatpush1.msra.mxu0 %v6694_v13  ;;  %v6034_v16 = vpop.permute.xlu0 %6033  ;;  %v5135_v4 = vcombine.high %v8151_v60, %v8151_v60  ;;  %v6646_v62 = vld [vmem:[#allocation2 + $0x938] sm:$0xff] }
 0x677   : > { %7159 = vmatprep.subr.mxu1 %v6677_v14  ;;  %7080 = vmatprep.subr.mxu0 %v6685_v19  ;;  %v6050_v40 = vsel %vm6045_vm3, %v10167_v45, %v6034_v16  ;;  %v6051_v27 = vsel %vm6045_vm3, %v6034_v16, %v6036_v15  ;;  %v6674_v45 = vld [vmem:[#allocation2 + $0x450] sm:$0xff] }
 0x678   : > { %7160 = vmatpush1.msra.mxu1 %v6676_v11  ;;  %7081 = vmatpush1.msra.mxu0 %v6684_v56  ;;  %6070 = vst [vmem:[#allocation2 + $0x360] ss:$-788 sps:$4 sm:$0xc1] %v6050_v40   ;;  %6071 = vst [vmem:[#allocation2 + $0x890] ss:$-1204 sps:$4 sm:$0xc1] %v6051_v27  }
 0x679   : > { %7161 = vmatprep.subr.mxu1 %v6667_v29  ;;  %7082 = vmatprep.subr.mxu0 %v6675_v31  ;;  %v10495_v35 = vpop.permute.xlu1 %6039  ;;  %v5143_v13 = vrot.slane %v5135_v4, 3  ;;  %v6635_v14 = vld [vmem:[#allocation2 + $0x310] sm:$0xff]  ;;  %v6626_v11 = vld [vmem:[#allocation2 + $0x5e0] sm:$0xff]  ;;  %v6634_v40 = vld [vmem:[#allocation2 + $0x1f8] sm:$0xff] }
 0x67a   : > { %7162 = vmatpush1.msra.mxu1 %v6666_v34  ;;  %5081 = vrot.lane.b32.xlu1 %v5064_v6, %s10958_s22  ;;  %v6038_v36 = vpop.permute.xlu0 %6037  ;;  %v10513_v19 = vld [vmem:[%s8297_s25 + $0x2c] sm:$0x77]  ;;  %v5136_v6 = vcombine.high %v5124_v59, %v5124_v59  ;;  %v6617_v27 = vld [vmem:[#allocation2 + $0x2e0] sm:$0xff]  ;;  %v6625_v29 = vld [vmem:[#allocation2 + $0xf8] sm:$0xff] }
 0x67b   : > { %5079 = vrot.lane.b32.xlu0 %v5063_v21, %s10958_s22  ;;  %7083 = vmatpush1.msra.mxu0 %v6674_v45  ;;  %v6052_v32 = vsel %vm6045_vm3, %v6036_v15, %v6038_v36  ;;  %v6053_v48 = vsel %vm6045_vm3, %v6038_v36, %v10495_v35  ;;  %v5146_v31 = vrot.slane %v10513_v19, 3  ;;  %v6616_v34 = vld [vmem:[#allocation2 + $0x1a8] sm:$0xff]  ;;  %v6624_v45 = vld [vmem:[#allocation2 + $0x538] sm:$0xff] }
 0x67c   : > { %7163 = vmatprep.subr.mxu1 %v6657_v37  ;;  %7084 = vmatprep.subr.mxu0 %v6665_v38  ;;  %6072 = vst [vmem:[#allocation2 + $0x338] ss:$-348 sps:$4 sm:$0xc1] %v6052_v32   ;;  %6073 = vst [vmem:[#allocation2 + $0x2a0] ss:$916 sps:$4 sm:$0xc1] %v6053_v48  }
 0x67d   : > { %7164 = vmatpush1.msra.mxu1 %v6656_v49  ;;  %7085 = vmatpush1.msra.mxu0 %v6664_v52  ;;  %v6127_v55 = vpop.permute.xlu1 %6126  ;;  %v5145_v36 = vrot.slane %v5136_v6, 3  ;;  %v6607_v38 = vld [vmem:[#allocation2 + $0x928] sm:$0xff]  ;;  %v6606_v49 = vld [vmem:[#allocation2 + $0x220] sm:$0xff]  ;;  %v6614_v52 = vld [vmem:[#allocation2 + $0x718] sm:$0xff] }
 0x67e   : > { %7165 = vmatprep.subr.mxu1 %v6647_v58  ;;  %7086 = vmatprep.subr.mxu0 %v6655_v54  ;;  %v6125_v50 = vpop.permute.xlu0 %6124  ;;  %v6597_v58 = vld [vmem:[#allocation2 + $0x730] sm:$0xff]  ;;  %v6596_v4 = vld [vmem:[#allocation2 + $0x908] sm:$0xff] }
 0x67f   : > { %7166 = vmatpush1.msra.mxu1 %v6646_v62  ;;  %5085 = vrot.lane.b32.xlu1 %v5066_v42, %s10958_s22  ;;  %v6141_v2 = vsel %vm10952_vm10, %v10184_v1, %v6125_v50  ;;  %v6142_v7 = vsel %vm10952_vm10, %v6125_v50, %v6127_v55  ;;  %v6627_v1 = vld [vmem:[#allocation2 + $0x138] sm:$0xff]  ;;  %v6615_v42 = vld [vmem:[#allocation2 + $0x130] sm:$0xff] }
 0x680   : > { %5083 = vrot.lane.b32.xlu0 %v5065_v53, %s10958_s22  ;;  %7087 = vmatpush1.msra.mxu0 %v6654_v63  ;;  %6161 = vst [vmem:[#allocation2 + $0x360] sm:$0xe] %v6141_v2  ;;  %6162 = vst [vmem:[#allocation2 + $0x890] sm:$0xe] %v6142_v7  ;;  %v8152_v59 = vld [vmem:[%s8297_s25 + $0x2c] sm:$0x77] }
 0x681   : > { %7167 = vmatprep.subr.mxu1 %v6637_v8  ;;  %7088 = vmatprep.subr.mxu0 %v6645_v9  ;;  %v10510_v15 = vpop.permute.xlu1 %6130  ;;  %v6503_v60 = vcombine.high %v8152_v59, %v8152_v59  ;;  %v6492_v62 = vld [vmem:[%s8297_s25 + $0x34] sm:$0x7]  ;;  %v6587_v2 = vld [vmem:[#allocation2 + $0x800] sm:$0xff]  ;;  %v6595_v7 = vld [vmem:[#allocation2 + $0x8] sm:$0xff] }
 0x682   : > { %7168 = vmatpush1.msra.mxu1 %v6636_v12  ;;  %7089 = vmatpush1.msra.mxu0 %v6644_v28  ;;  %v6129_v16 = vpop.permute.xlu0 %6128  ;;  %v6242_v8 = vld [vmem:[%s8297_s25 + $0x34] sm:$0x7]  ;;  %v8153_v9 = vld [vmem:[%s8297_s25 + $0x2c] sm:$0x77]  ;;  %v6586_v12 = vld [vmem:[#allocation2 + $0x838] sm:$0xff] }
 0x683   : > { %7169 = vmatprep.subr.mxu1 %v6627_v1  ;;  %7090 = vmatprep.subr.mxu0 %v6635_v14  ;;  %v6143_v56 = vsel %vm10952_vm10, %v6127_v55, %v6129_v16  ;;  %v6144_v21 = vsel %vm10952_vm10, %v6129_v16, %v10510_v15  ;;  %v6604_v55 = vld [vmem:[#allocation2 + $0x550] sm:$0xff]  ;;  %v6577_v14 = vld [vmem:[#allocation2 + $0x8e0] sm:$0xff]  ;;  %v6264_v16 = vrot.slane %v6242_v8, 1 }
 0x684   : > { %7170 = vmatpush1.msra.mxu1 %v6626_v11  ;;  %5161 = vrot.lane.b32.xlu1 %v5144_v57, %s10959_s6  ;;  %6163 = vst [vmem:[#allocation2 + $0x338] sm:$0xe] %v6143_v56  ;;  %6164 = vst [vmem:[#allocation2 + $0x2a0] sm:$0xe] %v6144_v21  ;;  %v6253_v57 = vcombine.high %v8153_v9, %v8153_v9  ;;  %v6585_v6 = vld [vmem:[#allocation2 + $0x370] sm:$0xff]  ;;  %v6576_v21 = vld [vmem:[#allocation2 + $0x3a8] sm:$0xff] }
 0x685   : > { %5159 = vrot.lane.b32.xlu0 %v5143_v13, %s10959_s6  ;;  %7091 = vmatpush1.msra.mxu0 %v6634_v40  ;;  %v6198_v33 = vpop.permute.xlu1 %6197  ;;  %v6594_v13 = vld [vmem:[#allocation2 + $0x5c0] sm:$0xff]  ;;  %v6584_v40 = vld [vmem:[#allocation2 + $0x98] sm:$0xff]  ;;  %v6412_v59 = vld [vmem:[%s8297_s25 + $0x34] sm:$0x7] }
 0x686   : > { %7171 = vmatprep.subr.mxu1 %v6617_v27  ;;  %7092 = vmatprep.subr.mxu0 %v6625_v29  ;;  %v6196_v37 = vpop.permute.xlu0 %6195  ;;  %v6263_v27 = vrot.slane %v6253_v57, 1  ;;  %v6567_v29 = vld [vmem:[#allocation2 + $0x4d0] sm:$0xff] }
 0x687   : > { %7172 = vmatpush1.msra.mxu1 %v6616_v34  ;;  %7093 = vmatpush1.msra.mxu0 %v6624_v45  ;;  %v6211_v32 = vsel %vm10951_vm7, %v10198_v18, %v6196_v37  ;;  %v6212_v48 = vsel %vm10951_vm7, %v6196_v37, %v6198_v33  ;;  %v6605_v18 = vld [vmem:[#allocation2 + $0x5c8] sm:$0xff]  ;;  %v6864_v57 = vld [vmem:[#allocation2 + $0x590] sm:$0x7] }
 0x688   : > { %7173 = vmatprep.subr.mxu1 %v6607_v38  ;;  %7094 = vmatprep.subr.mxu0 %v6615_v42  ;;  %6231 = vst [vmem:[#allocation2 + $0x360] sm:$0x70] %v6211_v32  ;;  %6232 = vst [vmem:[#allocation2 + $0x890] sm:$0x70] %v6212_v48  ;;  %v8154_v34 = vld [vmem:[%s8297_s25 + $0x2c] sm:$0x77] }
 0x689   : > { %7174 = vmatpush1.msra.mxu1 %v6606_v49  ;;  %5165 = vrot.lane.b32.xlu1 %v5146_v31, %s10959_s6  ;;  %v10525_v53 = vpop.permute.xlu1 %6201  ;;  %v6575_v31 = vld [vmem:[#allocation2 + $0x580] sm:$0xff]  ;;  %v6343_v45 = vcombine.high %v8154_v34, %v8154_v34  ;;  %v6574_v38 = vld [vmem:[#allocation2 + $0x570] sm:$0xff]  ;;  %v6565_v49 = vld [vmem:[#allocation2 + $0x438] sm:$0xff] }
 0x68a   : > { %5163 = vrot.lane.b32.xlu0 %v5145_v36, %s10959_s6  ;;  %7095 = vmatpush1.msra.mxu0 %v6614_v52  ;;  %v6200_v54 = vpop.permute.xlu0 %6199  ;;  %v6867_v48 = vld [vmem:[#allocation2 + $0x7b0] sm:$0x7] }
 0x68b   : > { %7175 = vmatprep.subr.mxu1 %v6597_v58  ;;  %7096 = vmatprep.subr.mxu0 %v6605_v18  ;;  %v6213_v50 = vsel %vm10951_vm7, %v6198_v33, %v6200_v54  ;;  %v6214_v63 = vsel %vm10951_vm7, %v6200_v54, %v10525_v53  ;;  %v6332_v33 = vld [vmem:[%s8297_s25 + $0x34] sm:$0x7]  ;;  %vm10960_vm7 = vcmask 1042432   ;;  %v6866_v58 = vld [vmem:[#allocation2 + $0x398] sm:$0x7]  ;;  %v6564_v18 = vld [vmem:[#allocation2 + $0x320] sm:$0xff] }
 0x68c   : > { %7176 = vmatpush1.msra.mxu1 %v6596_v4  ;;  %7097 = vmatpush1.msra.mxu0 %v6604_v55  ;;  %6233 = vst [vmem:[#allocation2 + $0x338] sm:$0x70] %v6213_v50  ;;  %6234 = vst [vmem:[#allocation2 + $0x2a0] sm:$0x70] %v6214_v63  ;;  %v6354_v52 = vrot.slane %v6332_v33, 6  ;;  %v6353_v54 = vrot.slane %v6343_v45, 6 }
 0x68d   : > { %7177 = vmatprep.subr.mxu1 %v6587_v2  ;;  %7098 = vmatprep.subr.mxu0 %v6595_v7  ;;  %v5874_v28 = vpop.permute.xlu1 %5873  ;;  %vm10961_vm10 = vmmov %vm10960_vm7  ;;  %v6865_v50 = vld [vmem:[#allocation2 + $0x3d0] sm:$0x7]  ;;  %v6856_v2 = vld [vmem:[#allocation2 + $0x5b8] sm:$0xff] }
 0x68e   : > { %7178 = vmatpush1.msra.mxu1 %v6586_v12  ;;  %6524 = vrot.lane.b32.xlu1 %v6492_v62, %s8222_s4  ;;  %v5872_v1 = vpop.permute.xlu0 %5871  ;;  %v6857_v62 = vld [vmem:[#allocation2 + $0x6a0] sm:$0xff]  ;;  %v6434_v12 = vrot.slane %v6412_v59, 3  ;;  %v6558_v34 = vld [vmem:[%s10938_s1 + $0x10] sm:$0xff] }
 0x68f   : > { %6522 = vrot.lane.b32.xlu0 %v6503_v60, %s8222_s4  ;;  %7099 = vmatpush1.msra.mxu0 %v6594_v13  ;;  %v5888_v11 = vsel %vm10953_vm11, %v10215_v44, %v5872_v1  ;;  %v5889_v56 = vsel %vm10953_vm11, %v5872_v1, %v5874_v28  ;;  %v6566_v44 = vld [vmem:[#allocation2 + $0x8f8] sm:$0xff]  ;;  %v8155_v60 = vld [vmem:[%s8297_s25 + $0x2c] sm:$0x77] }
 0x690   : > { %7179 = vmatprep.subr.mxu1 %v6577_v14  ;;  %7100 = vmatprep.subr.mxu0 %v6585_v6  ;;  %5908 = vst [vmem:[#allocation2 + $0x48] sm:$0x7] %v5888_v11  ;;  %5909 = vst [vmem:[#allocation2 + $0x3d8] sm:$0x7] %v5889_v56  ;;  %v6423_v4 = vcombine.high %v8155_v60, %v8155_v60  ;;  %v6855_v13 = vld [vmem:[#allocation2 + $0x518] sm:$0xff]  ;;  %v6845_v14 = vld [vmem:[#allocation2 + $0x890] sm:$0xff] }
 0x691   : > { %7180 = vmatpush1.msra.mxu1 %v6576_v21  ;;  %7101 = vmatpush1.msra.mxu0 %v6584_v40  ;;  %v10542_v36 = vpop.permute.xlu1 %5877  ;;  %v6000_v6 = vld [vmem:[%s8297_s25 + $0x34] sm:$0x7]  ;;  %v6854_v56 = vld [vmem:[#allocation2 + $0x478] sm:$0xff]  ;;  %v6844_v21 = vld [vmem:[#allocation2 + $0x360] sm:$0xff] }
 0x692   : > { %7181 = vmatprep.subr.mxu1 %v6567_v29  ;;  %7102 = vmatprep.subr.mxu0 %v6575_v31  ;;  %v5876_v37 = vpop.permute.xlu0 %5875  ;;  %v6433_v1 = vrot.slane %v6423_v4, 3  ;;  %v6559_v31 = vld [vmem:[%s10938_s1 + $0x18] sm:$0xff]  ;;  %v6022_v33 = vrot.slane %v6000_v6, 2  ;;  %v8158_v60 = vld [vmem:[%s10938_s1 + $0x8] sm:$0xff] }
 0x693   : > { %7182 = vmatpush1.msra.mxu1 %v6566_v44  ;;  %6285 = vrot.lane.b32.xlu1 %v6264_v16, %s8231_s7  ;;  %v5890_v42 = vsel %vm10953_vm11, %v5874_v28, %v5876_v37  ;;  %v5891_v32 = vsel %vm10953_vm11, %v5876_v37, %v10542_v36  ;;  %vm10962_vm11 = vmmov %vm10960_vm7  ;;  %v6847_v7 = vld [vmem:[#allocation2 + $0x2a0] sm:$0xff]  ;;  %v6846_v28 = vld [vmem:[#allocation2 + $0x338] sm:$0xff] }
 0x694   : > { %6283 = vrot.lane.b32.xlu0 %v6263_v27, %s8231_s7  ;;  %7103 = vmatpush1.msra.mxu0 %v6574_v38  ;;  %5910 = vst [vmem:[#allocation2 + $0x1d8] sm:$0x7] %v5890_v42  ;;  %5911 = vst [vmem:[#allocation2 + $0x630] sm:$0x7] %v5891_v32  ;;  %v8156_v16 = vld [vmem:[%s8297_s25 + $0x2c] sm:$0x77] }
 0x695   : > { %7538 = vmatprep.subr.msk.mxu1 %vm10960_vm7, %v6867_v48  ;;  %7104 = vmatprep.subr.mxu0 %v6565_v49  ;;  %v5955_v55 = vpop.permute.xlu1 %5954  ;;  %v6091_v44 = vld [vmem:[%s8297_s25 + $0x34] sm:$0x7]  ;;  %v8157_v37 = vld [vmem:[%s8297_s25 + $0x2c] sm:$0x77] }
 0x696   : > { %7539 = vmatpush2.msk.msra.mxu1 %vm10961_vm10, %v6866_v58  ;;  %7105 = vmatpush1.msra.mxu0 %v6564_v18  ;;  %v5953_v63 = vpop.permute.xlu0 %5952  ;;  %v6102_v38 = vcombine.high %v8157_v37, %v8157_v37  ;;  %v6113_v18 = vrot.slane %v6091_v44, 7  ;;  %vm10963_vm10 = vcmask 580608  }
 0x697   : > { %7187 = vmatprep.subr.mxu1 %v6857_v62  ;;  %7534 = vmatprep.subr.msk.mxu0 %vm10962_vm11, %v6865_v50  ;;  %v5969_v8 = vsel %vm5964_vm12, %v10229_v0, %v5953_v63  ;;  %v5970_v9 = vsel %vm5964_vm12, %v5953_v63, %v5955_v55  ;;  %v6011_v0 = vcombine.high %v8156_v16, %v8156_v16  ;;  %v8083_v63 = vld [vmem:[%s8297_s25 + $0x34] ss:$0 sps:$4 sm:$0x77]   ;;  %vm10964_vm11 = vmmov %vm10963_vm10 }
 0x698   : > { %7188 = vmatpush2.msra.mxu1 %v6856_v2  ;;  %6375 = vrot.lane.b32.xlu1 %v6354_v52, %s8232_s18  ;;  %5989 = vst [vmem:[#allocation2 + $0x48] sm:$0x38] %v5969_v8  ;;  %5990 = vst [vmem:[#allocation2 + $0x3d8] sm:$0x38] %v5970_v9 }
 0x699   : > { %6373 = vrot.lane.b32.xlu0 %v6353_v54, %s8232_s18  ;;  %7535 = vmatpush2.msk.msra.mxu0 %vm10960_vm7, %v6864_v57  ;;  %v10562_v11 = vpop.permute.xlu1 %5958  ;;  %v6021_v45 = vrot.slane %v6011_v0, 2  ;;  %v6112_v54 = vrot.slane %v6102_v38, 7  ;;  %v8159_v57 = vld [vmem:[%s8297_s25 + $0x2c] sm:$0x77]  ;;  %vm10965_vm7 = vmmov %vm10963_vm10 }
 0x69a   : > { %7110 = vmatprep.subr.mxu0 %v6855_v13  ;;  %7189 = vmatprep.subr.mxu1 %v6847_v7  ;;  %v5957_v40 = vpop.permute.xlu0 %5956  ;;  %v5849_v13 = vld [vmem:[%s8297_s25 + $0x34] sm:$0x7] }
 0x69b   : > { %7111 = vmatpush2.msra.mxu0 %v6854_v56  ;;  %7190 = vmatpush2.msra.mxu1 %v6846_v28  ;;  %v5971_v27 = vsel %vm5964_vm12, %v5955_v55, %v5957_v40  ;;  %v5972_v29 = vsel %vm5964_vm12, %v5957_v40, %v10562_v11  ;;  %v8160_v28 = vld [vmem:[%s8297_s25 + $0x2c] sm:$0x77] }
 0x69c   : > { %6455 = vrot.lane.b32.xlu1 %v6434_v12, %s8233_s21  ;;  %7112 = vmatprep.subr.mxu0 %v6845_v14  ;;  %5991 = vst [vmem:[#allocation2 + $0x1d8] sm:$0x38] %v5971_v27  ;;  %5992 = vst [vmem:[#allocation2 + $0x630] sm:$0x38] %v5972_v29  ;;  %v5860_v12 = vcombine.high %v8159_v57, %v8159_v57  ;;  %v8161_v14 = vld [vmem:[%s8297_s25 + $0x2c] sm:$0x77] }
 0x69d   : > { %6453 = vrot.lane.b32.xlu0 %v6433_v1, %s8233_s21  ;;  %7113 = vmatpush2.msra.mxu0 %v6844_v21  ;;  %v5635_v42 = vpop.permute.xlu1 %5634  ;;  %v5919_v1 = vld [vmem:[%s8297_s25 + $0x34] sm:$0x7]  ;;  %v5930_v6 = vcombine.high %v8161_v14, %v8161_v14  ;;  %v8162_v29 = vld [vmem:[%s8297_s25 + $0x2c] sm:$0x77] }
 0x69e   : > { %v5633_v32 = vpop.permute.xlu0 %5632  ;;  %7529 = vmatprep.mubr.msk.f32.mxu0 %vm6882_vm2, %v6559_v31  ;;  %7533 = vmatprep.mubr.msk.f32.mxu1 %vm6882_vm2, %v6559_v31  ;;  %v5941_v21 = vrot.slane %v5919_v1, 5  ;;  %v5599_v27 = vld [vmem:[%s8297_s25 + $0x34] sm:$0x7]  ;;  %v5610_v31 = vcombine.high %v8162_v29, %v8162_v29 }
 0x69f   : > { %v5648_v48 = vsel %vm3887_vm4, %v10256_v43, %v5633_v32  ;;  %v5649_v49 = vsel %vm3887_vm4, %v5633_v32, %v5635_v42  ;;  %v6835_v52 = vld [vmem:[#allocation2 + $0x3d8] sm:$0xff]  ;;  %v6834_v58 = vld [vmem:[#allocation2 + $0x48] sm:$0xff]  ;;  %6991 = vmatmul.mubr.f32.gmra.mxu0 %v6558_v34  ;;  %7068 = vmatmul.mubr.f32.gmra.mxu1 %v6558_v34  ;;  %v5940_v40 = vrot.slane %v5930_v6, 5  ;;  %v5621_v37 = vrot.slane %v5599_v27, 1 }
 0x6a0   : > { %6043 = vrot.lane.b32.xlu1 %v6022_v33, %s8234_s23  ;;  %5668 = vst [vmem:[#allocation2 + $0x5a0] ss:$788 sps:$4 sm:$0x83] %v5648_v48   ;;  %5669 = vst [vmem:[#allocation2 + $0x1c8] ss:$-132 sps:$4 sm:$0x83] %v5649_v49   ;;  %7114 = vmatprep.subr.mxu0 %v6835_v52 }
 0x6a1   : > { %6041 = vrot.lane.b32.xlu0 %v6021_v45, %s8234_s23  ;;  %7115 = vmatpush2.msra.mxu0 %v6834_v58  ;;  %v10584_v59 = vpop.permute.xlu1 %5638  ;;  %v5620_v38 = vrot.slane %v5610_v31, 1  ;;  %v8163_v32 = vld [vmem:[%s8297_s25 + $0x2c] sm:$0x77]  ;;  %v8242_v58 = vmov 0  }
 0x6a2   : > { %v5637_v43 = vpop.permute.xlu0 %5636  ;;  %7536 = vmatprep.mubr.msk.f32.mxu0 %vm6882_vm2, %v8158_v60  ;;  %7540 = vmatprep.mubr.msk.f32.mxu1 %vm6882_vm2, %v8158_v60  ;;  %v5700_v48 = vcombine.high %v8163_v32, %v8163_v32  ;;  %v5769_v60 = vld [vmem:[%s8297_s25 + $0x34] sm:$0x7]  ;;  %v8166_v27 = vld [vmem:[%s8297_s25 + $0x2c] sm:$0x77] }
 0x6a3   : > { %v5650_v4 = vsel %vm3887_vm4, %v5635_v42, %v5637_v43  ;;  %v5651_v55 = vsel %vm3887_vm4, %v5637_v43, %v10584_v59  ;;  %v6837_v62 = vld [vmem:[#allocation2 + $0x630] sm:$0xff]  ;;  %v6836_v50 = vld [vmem:[#allocation2 + $0x1d8] sm:$0xff]  ;;  %7684 = vset.pattern.permute.xlu0 %v8242_v58  ;;  %7685 = vset.pattern.permute.xlu1 %v8242_v58  ;;  %v5460_v29 = vcombine.high %v8166_v27, %v8166_v27 }
 0x6a4   : > { %6134 = vrot.lane.b32.xlu1 %v6113_v18, %s8235_s24  ;;  %5670 = vst [vmem:[#allocation2 + $0x9a0] ss:$-1308 sps:$4 sm:$0x83] %v5650_v4   ;;  %5671 = vst [vmem:[#allocation2 + $0x578] ss:$-636 sps:$4 sm:$0x83] %v5651_v55   ;;  %7191 = vmatprep.subr.mxu1 %v6837_v62 }
 0x6a5   : > { %6132 = vrot.lane.b32.xlu0 %v6112_v54, %s8235_s24  ;;  %7192 = vmatpush2.msra.mxu1 %v6836_v50  ;;  %v5725_v2 = vpop.permute.xlu1 %5724  ;;  %v5689_v42 = vld [vmem:[%s8297_s25 + $0x34] sm:$0x7]  ;;  %v5710_v43 = vrot.slane %v5700_v48, 6  ;;  %v8164_v4 = vld [vmem:[%s8297_s25 + $0x2c] sm:$0x77] }
 0x6a6   : > { %v5723_v7 = vpop.permute.xlu0 %5722  ;;  %v5711_v54 = vrot.slane %v5689_v42, 6  ;;  %v5780_v55 = vcombine.high %v8164_v4, %v8164_v4  ;;  %v8090_v48 = vld [vmem:[%s8297_s25 + $0x34] ss:$0 sps:$4 sm:$0x77]  }
 0x6a7   : > { %v5738_v8 = vsel %vm10963_vm10, %v10269_v3, %v5723_v7  ;;  %v5739_v9 = vsel %vm10964_vm11, %v5723_v7, %v5725_v2  ;;  %vm10966_vm10 = vmmov %vm10965_vm7  ;;  %vm10967_vm11 = vcmask 613376   ;;  %v5207_v4 = vld [vmem:[%s8297_s25 + $0x34] sm:$0x7] }
 0x6a8   : > { %6205 = vrot.lane.b32.xlu1 %v8083_v63, %s8230_s17  ;;  %5758 = vst [vmem:[#allocation2 + $0x5a0] sm:$0x1c] %v5738_v8  ;;  %5759 = vst [vmem:[#allocation2 + $0x1c8] sm:$0x1c] %v5739_v9  ;;  %v5791_v9 = vrot.slane %v5769_v60, 3  ;;  %v5790_v57 = vrot.slane %v5780_v55, 3 }
 0x6a9   : > { %6203 = vrot.lane.b32.xlu0 %v8160_v28, %s8230_s17  ;;  %v10607_v16 = vpop.permute.xlu1 %5728  ;;  %v8165_v28 = vld [vmem:[%s8297_s25 + $0x2c] sm:$0x77]  ;;  %v5277_v55 = vld [vmem:[%s8297_s25 + $0x34] sm:$0x7] }
 0x6aa   : > { %v5727_v3 = vpop.permute.xlu0 %5726  ;;  %v8168_v60 = vld [vmem:[%s8297_s25 + $0x2c] sm:$0x77] }
 0x6ab   : > { %v5740_v0 = vsel %vm10965_vm7, %v5725_v2, %v5727_v3  ;;  %v5741_v56 = vsel %vm10966_vm10, %v5727_v3, %v10607_v16  ;;  %vm10968_vm7 = vmmov %vm10967_vm11 }
 0x6ac   : > { %5881 = vrot.lane.b32.xlu1 %v5849_v13, %s8236_s30  ;;  %5760 = vst [vmem:[#allocation2 + $0x9a0] sm:$0x1c] %v5740_v0  ;;  %5761 = vst [vmem:[#allocation2 + $0x578] sm:$0x1c] %v5741_v56  ;;  %v5369_v13 = vcombine.high %v8165_v28, %v8165_v28 }
 0x6ad   : > { %5879 = vrot.lane.b32.xlu0 %v5860_v12, %s8236_s30  ;;  %v5805_v33 = vpop.permute.xlu1 %5804  ;;  %v5358_v12 = vld [vmem:[%s8297_s25 + $0x34] sm:$0x7]  ;;  %vm10969_vm10 = vmmov %vm10968_vm7 }
 0x6ae   : > { %v5803_v34 = vpop.permute.xlu0 %5802  ;;  %v5380_v56 = vrot.slane %v5358_v12, 2 }
 0x6af   : > { %v5818_v45 = vsel %vm2319_vm0, %v10282_v25, %v5803_v34  ;;  %v5819_v44 = vsel %vm2319_vm0, %v5803_v34, %v5805_v33 }
 0x6b0   : > { %5962 = vrot.lane.b32.xlu1 %v5941_v21, %s8237_s27  ;;  %5838 = vst [vmem:[#allocation2 + $0x5a0] sm:$0xe0] %v5818_v45  ;;  %5839 = vst [vmem:[#allocation2 + $0x1c8] sm:$0xe0] %v5819_v44  ;;  %v5379_v21 = vrot.slane %v5369_v13, 2 }
 0x6b1   : > { %5960 = vrot.lane.b32.xlu0 %v5940_v40, %s8237_s27  ;;  %v10623_v49 = vpop.permute.xlu1 %5808  ;;  %v5449_v40 = vld [vmem:[%s8297_s25 + $0x34] sm:$0x7] }
 0x6b2   : > { %v5807_v52 = vpop.permute.xlu0 %5806  ;;  %v5471_v44 = vrot.slane %v5449_v40, 7 }
 0x6b3   : > { %v5820_v25 = vsel %vm2319_vm0, %v5805_v33, %v5807_v52  ;;  %v5821_v18 = vsel %vm2319_vm0, %v5807_v52, %v10623_v49 }
 0x6b4   : > { %5642 = vrot.lane.b32.xlu1 %v5621_v37, %s8228_s11  ;;  %5840 = vst [vmem:[#allocation2 + $0x9a0] sm:$0xe0] %v5820_v25  ;;  %5841 = vst [vmem:[#allocation2 + $0x578] sm:$0xe0] %v5821_v18  ;;  %v5470_v37 = vrot.slane %v5460_v29, 7 }
 0x6b5   : > { %5640 = vrot.lane.b32.xlu0 %v5620_v38, %s8228_s11  ;;  %v5394_v62 = vpop.permute.xlu1 %5393 }
 0x6b6   : > { %v5392_v50 = vpop.permute.xlu0 %5391 }
 0x6b7   : > { %v5408_v63 = vsel %vm10967_vm11, %v10310_v5, %v5392_v50  ;;  %v5409_v2 = vsel %vm10968_vm7, %v5392_v50, %v5394_v62  ;;  %v6825_v7 = vld [vmem:[#allocation2 + $0x1c8] sm:$0xff]  ;;  %v6824_v8 = vld [vmem:[#allocation2 + $0x5a0] sm:$0xff]  ;;  %vm10970_vm11 = vmmov %vm10968_vm7  ;;  %vm10971_vm7 = vcmask 596992  }
 0x6b8   : > { %5732 = vrot.lane.b32.xlu1 %v5711_v54, %s8229_s14  ;;  %5428 = vst [vmem:[#allocation2 + $0x8b0] ss:$-788 sps:$4 sm:$0xc1] %v5408_v63   ;;  %5429 = vst [vmem:[#allocation2 + $0x140] ss:$580 sps:$4 sm:$0xc1] %v5409_v2   ;;  %7116 = vmatprep.subr.mxu0 %v6825_v7 }
 0x6b9   : > { %5730 = vrot.lane.b32.xlu0 %v5710_v43, %s8229_s14  ;;  %7117 = vmatpush2.msra.mxu0 %v6824_v8  ;;  %v10639_v5 = vpop.permute.xlu1 %5397  ;;  %v8167_v54 = vld [vmem:[%s8297_s25 + $0x2c] sm:$0x77]  ;;  %v5299_v7 = vrot.slane %v5277_v55, 5 }
 0x6ba   : > { %v5396_v1 = vpop.permute.xlu0 %5395  ;;  %v5218_v43 = vcombine.high %v8167_v54, %v8167_v54 }
 0x6bb   : > { %v5410_v14 = vsel %vm10969_vm10, %v5394_v62, %v5396_v1  ;;  %v5411_v6 = vsel %vm10970_vm11, %v5396_v1, %v10639_v5  ;;  %v6827_v3 = vld [vmem:[#allocation2 + $0x578] sm:$0xff]  ;;  %v6826_v0 = vld [vmem:[#allocation2 + $0x9a0] sm:$0xff]  ;;  %vm10972_vm10 = vmmov %vm10971_vm7  ;;  %v5288_v62 = vcombine.high %v10451_v61, %v10451_v61  ;;  %v4967_v61 = vcombine.high %v10472_v39, %v10472_v39 }
 0x6bc   : > { %5812 = vrot.lane.b32.xlu1 %v5791_v9, %s8218_s26  ;;  %5430 = vst [vmem:[#allocation2 + $0x480] ss:$-1012 sps:$4 sm:$0xc1] %v5410_v14   ;;  %5431 = vst [vmem:[#allocation2 + $0x2f8] ss:$1380 sps:$4 sm:$0xc1] %v5411_v6   ;;  %7193 = vmatprep.subr.mxu1 %v6827_v3 }
 0x6bd   : > { %5810 = vrot.lane.b32.xlu0 %v5790_v57, %s8218_s26  ;;  %7194 = vmatpush2.msra.mxu1 %v6826_v0  ;;  %v5485_v31 = vpop.permute.xlu1 %5484  ;;  %vm10973_vm11 = vmmov %vm10971_vm7  ;;  %v5298_v8 = vrot.slane %v5288_v62, 5  ;;  %v4956_v9 = vld [vmem:[%s8297_s25 + $0x30] sm:$0x7]  ;;  %v4977_v3 = vrot.slane %v4967_v61, 1  ;;  %v5057_v0 = vcombine.high %v10493_v41, %v10493_v41  ;;  %s10974_s26 = smov 5   ;;  %v5137_v41 = vcombine.high %v10513_v19, %v10513_v19 }
 0x6be   : > { %v5483_v33 = vpop.permute.xlu0 %5482  ;;  %v4978_v6 = vrot.slane %v4956_v9, 1  ;;  %v5046_v39 = vld [vmem:[%s8297_s25 + $0x30] sm:$0x7] }
 0x6bf   : > { %v5498_v34 = vsel %vm3715_vm14, %v10326_v22, %v5483_v33  ;;  %v5499_v45 = vsel %vm3715_vm14, %v5483_v33, %v5485_v31  ;;  %v5068_v27 = vrot.slane %v5046_v39, 6  ;;  %v5067_v33 = vrot.slane %v5057_v0, 6 }
 0x6c0   : > { %5401 = vrot.lane.b32.xlu1 %v5380_v56, %s8238_s28  ;;  %5518 = vst [vmem:[#allocation2 + $0x8b0] sm:$0xe] %v5498_v34  ;;  %5519 = vst [vmem:[#allocation2 + $0x140] sm:$0xe] %v5499_v45  ;;  %v5126_v34 = vld [vmem:[%s8297_s25 + $0x34] sm:$0x7] }
 0x6c1   : > { %5399 = vrot.lane.b32.xlu0 %v5379_v21, %s8238_s28  ;;  %v10653_v38 = vpop.permute.xlu1 %5488 }
 0x6c2   : > { %v5487_v42 = vpop.permute.xlu0 %5486 }
 0x6c3   : > { %v5500_v32 = vsel %vm3715_vm14, %v5485_v31, %v5487_v42  ;;  %v5501_v22 = vsel %vm3715_vm14, %v5487_v42, %v10653_v38  ;;  %v5147_v42 = vrot.slane %v5137_v41, 3 }
 0x6c4   : > { %5492 = vrot.lane.b32.xlu1 %v5471_v44, %s8226_s9  ;;  %5520 = vst [vmem:[#allocation2 + $0x480] sm:$0xe] %v5500_v32  ;;  %5521 = vst [vmem:[#allocation2 + $0x2f8] sm:$0xe] %v5501_v22  ;;  %v5148_v44 = vrot.slane %v5126_v34, 3 }
 0x6c5   : > { %5490 = vrot.lane.b32.xlu0 %v5470_v37, %s8226_s9  ;;  %v5555_v52 = vpop.permute.xlu1 %5554 }
 0x6c6   : > { %v5553_v58 = vpop.permute.xlu0 %5552 }
 0x6c7   : > { %v5568_v25 = vsel %vm10971_vm7, %v10342_v30, %v5553_v58  ;;  %v5569_v18 = vsel %vm10972_vm10, %v5553_v58, %v5555_v52  ;;  %vm10975_vm10 = vcmask 621568  }
 0x6c8   : > { %5562 = vrot.lane.b32.xlu1 %v8090_v48, %s8227_s10  ;;  %5588 = vst [vmem:[#allocation2 + $0x8b0] sm:$0x70] %v5568_v25  ;;  %5589 = vst [vmem:[#allocation2 + $0x140] sm:$0x70] %v5569_v18 }
 0x6c9   : > { %5560 = vrot.lane.b32.xlu0 %v8168_v60, %s8227_s10  ;;  %v10672_v50 = vpop.permute.xlu1 %5558 }
 0x6ca   : > { %v5557_v30 = vpop.permute.xlu0 %5556 }
 0x6cb   : > { %v5570_v63 = vsel %vm10973_vm11, %v5555_v52, %v5557_v30  ;;  %v5571_v2 = vsel %vm10971_vm7, %v5557_v30, %v10672_v50  ;;  %vm10976_vm11 = vmmov %vm10975_vm10 }
 0x6cc   : > { %5239 = vrot.lane.b32.xlu1 %v5207_v4, %s8239_s29  ;;  %5590 = vst [vmem:[#allocation2 + $0x480] sm:$0x70] %v5570_v63  ;;  %5591 = vst [vmem:[#allocation2 + $0x2f8] sm:$0x70] %v5571_v2 }
 0x6cd   : > { %5237 = vrot.lane.b32.xlu0 %v5218_v43, %s8239_s29  ;;  %v5232_v57 = vpop.permute.xlu1 %5231  ;;  %vm10977_vm7 = vmmov %vm10975_vm10 }
 0x6ce   : > { %v5230_v12 = vpop.permute.xlu0 %5229 }
 0x6cf   : > { %v5246_v28 = vsel %vm10956_vm6, %v10361_v24, %v5230_v12  ;;  %v5247_v13 = vsel %vm10956_vm6, %v5230_v12, %v5232_v57  ;;  %v6815_v1 = vld [vmem:[#allocation2 + $0x140] sm:$0xff]  ;;  %v6814_v14 = vld [vmem:[#allocation2 + $0x8b0] sm:$0xff] }
 0x6d0   : > { %5320 = vrot.lane.b32.xlu1 %v5299_v7, %s8240_s5  ;;  %5266 = vst [vmem:[#allocation2 + $0x598] sm:$0x7] %v5246_v28  ;;  %5267 = vst [vmem:[#allocation2 + $0x380] sm:$0x7] %v5247_v13  ;;  %7118 = vmatprep.subr.mxu0 %v6815_v1 }
 0x6d1   : > { %5318 = vrot.lane.b32.xlu0 %v5298_v8, %s8240_s5  ;;  %7119 = vmatpush2.msra.mxu0 %v6814_v14  ;;  %s157_s5 = sand.u32 1, %s8187_s12   ;;  %s7549_s12 = smul.u32 (%p8288_p4), 80, %s8276_s15 }
 0x6d2   : > { %v10690_v24 = vpop.permute.xlu1 %5235 }
 0x6d3   : > { %v5234_v56 = vpop.permute.xlu0 %5233  ;;  %v6817_v21 = vld [vmem:[#allocation2 + $0x2f8] sm:$0xff]  ;;  %v6816_v40 = vld [vmem:[#allocation2 + $0x480] sm:$0xff]  ;;  %s10891_s7 = scalar_lea.vmem (%p8288_p4), %s10940_s3, %s7549_s12 }
 0x6d4   : > { %4999 = vrot.lane.b32.xlu1 %v4978_v6, %s10974_s26  ;;  %v5248_v29 = vsel %vm10956_vm6, %v5232_v57, %v5234_v56  ;;  %v5249_v31 = vsel %vm10956_vm6, %v5234_v56, %v10690_v24  ;;  %7195 = vmatprep.subr.mxu1 %v6817_v21  ;;  %vm10978_vm6 = vmmov %vm10977_vm7 }
 0x6d5   : > { %4997 = vrot.lane.b32.xlu0 %v4977_v3, %s10974_s26  ;;  %5268 = vst [vmem:[#allocation2 + $0x88] sm:$0x7] %v5248_v29  ;;  %5269 = vst [vmem:[#allocation2 + $0x858] sm:$0x7] %v5249_v31  ;;  %7196 = vmatpush2.msra.mxu1 %v6816_v40 }
 0x6d7   : > { %v5313_v45 = vpop.permute.xlu1 %5312 }
 0x6d8   : > { %5089 = vrot.lane.b32.xlu1 %v5068_v27, %s10958_s22  ;;  %v5311_v37 = vpop.permute.xlu0 %5310 }
 0x6d9   : > { %5087 = vrot.lane.b32.xlu0 %v5067_v33, %s10958_s22  ;;  %v5327_v32 = vsel %vm10975_vm10, %v10375_v51, %v5311_v37  ;;  %v5328_v22 = vsel %vm10976_vm11, %v5311_v37, %v5313_v45  ;;  %v6870_v51 = vld [vmem:[%s10939_s2] sm:$0xff]  ;;  %vm10979_vm10 = vcmask 39936   ;;  %s7612_s22 = smul.u32 160, %s157_s5 }
 0x6da   : > { %5347 = vst [vmem:[#allocation2 + $0x598] sm:$0x38] %v5327_v32  ;;  %5348 = vst [vmem:[#allocation2 + $0x380] sm:$0x38] %v5328_v22 }
 0x6db   : > { %vm10980_vm11 = vmmov %vm10979_vm10 }
 0x6dc   : > { %5169 = vrot.lane.b32.xlu1 %v5148_v44, %s10959_s6  ;;  %v10706_v19 = vpop.permute.xlu1 %5316 }
 0x6dd   : > { %5167 = vrot.lane.b32.xlu0 %v5147_v42, %s10959_s6  ;;  %v5315_v48 = vpop.permute.xlu0 %5314  ;;  %v6774_v42 = vld [vmem:[#allocation2 + $0x500] sm:$0xff]  ;;  %s10845_s6 = scalar_lea.vmem [#allocation3], %s7612_s22 }
 0x6de   : > { %v5329_v52 = vsel %vm10977_vm7, %v5313_v45, %v5315_v48  ;;  %v5330_v58 = vsel %vm10978_vm6, %v5315_v48, %v10706_v19  ;;  %vm10981_vm6 = vmmov %vm10979_vm10  ;;  %v6775_v45 = vld [vmem:[#allocation2 + $0x528] sm:$0xff]  ;;  %v6765_v48 = vld [vmem:[#allocation2 + $0x6d0] sm:$0xff] }
 0x6df   : > { %5349 = vst [vmem:[#allocation2 + $0x88] sm:$0x38] %v5329_v52  ;;  %5350 = vst [vmem:[#allocation2 + $0x858] sm:$0x38] %v5330_v58 }
 0x6e0   : > { %vm10982_vm7 = vmmov %vm10981_vm6 }
 0x6e1   : > { %v4992_v25 = vpop.permute.xlu1 %4991  ;;  %v6805_v18 = vld [vmem:[#allocation2 + $0x380] sm:$0xff]  ;;  %v6804_v54 = vld [vmem:[#allocation2 + $0x598] sm:$0xff]  ;;  %6874 = vperm.xlu0 %7684, %v6870_v51  }
 0x6e2   : > { %v4990_v43 = vpop.permute.xlu0 %4989  ;;  %7120 = vmatprep.subr.mxu0 %v6805_v18  ;;  %v6764_v51 = vld [vmem:[#allocation2 + $0x4e0] sm:$0xff] }
 0x6e3   : > { %v5005_v60 = vsel %vm10979_vm10, %v10053_v10, %v4990_v43  ;;  %v5006_v4 = vsel %vm10980_vm11, %v4990_v43, %v4992_v25  ;;  %7121 = vmatpush2.msra.mxu0 %v6804_v54  ;;  %v6871_v10 = vld [vmem:[%s10939_s2 + $0x8] sm:$0xff]  ;;  %v6755_v18 = vld [vmem:[#allocation2 + $0x1e0] sm:$0xff]  ;;  %vm10991_vm11 = vcmask 1042432  }
 0x6e4   : > { %5025 = vst [vmem:[#allocation2 + $0x108] ss:$1028 sps:$4 sm:$0x83] %v5005_v60   ;;  %5026 = vst [vmem:[#allocation2 + $0x878] ss:$-1524 sps:$4 sm:$0x83] %v5006_v4   ;;  %6879 = vperm.xlu1 %7685, %v6871_v10  }
 0x6e5   : > { %v6777_v54 = vld [vmem:[#allocation2 + $0x6c0] sm:$0xff] }
 0x6e6   : > { %v6807_v55 = vld [vmem:[#allocation2 + $0x858] sm:$0xff]  ;;  %v6806_v62 = vld [vmem:[#allocation2 + $0x88] sm:$0xff]  ;;  %v6754_v43 = vld [vmem:[#allocation2 + $0x180] sm:$0xff] }
 0x6e7   : > { %v10718_v30 = vpop.permute.xlu1 %4995  ;;  %7197 = vmatprep.subr.mxu1 %v6807_v55  ;;  %v6745_v4 = vld [vmem:[#allocation2 + $0x4c0] sm:$0xff] }
 0x6e8   : > { %v4994_v63 = vpop.permute.xlu0 %4993  ;;  %7198 = vmatpush2.msra.mxu1 %v6806_v62  ;;  %v6767_v62 = vld [vmem:[#allocation2 + $0x828] sm:$0xff]  ;;  %v6766_v10 = vld [vmem:[#allocation2 + $0x160] sm:$0xff] }
 0x6e9   : > { %v5007_v2 = vsel %vm10981_vm6, %v4992_v25, %v4994_v63  ;;  %v5008_v7 = vsel %vm10982_vm7, %v4994_v63, %v10718_v30  ;;  %v6744_v63 = vld [vmem:[#allocation2 + $0xc8] sm:$0xff]  ;;  %vm10992_vm6 = vmmov %vm10991_vm11 }
 0x6ea   : > { %5027 = vst [vmem:[#allocation2 + $0x2c0] ss:$268 sps:$4 sm:$0x83] %v5007_v2   ;;  %5028 = vst [vmem:[#allocation2 + $0x920] ss:$76 sps:$4 sm:$0x83] %v5008_v7  }
 0x6eb   : > { %v6785_v34 = vld [vmem:[#allocation2 + $0x280] sm:$0xff]  ;;  %v6784_v41 = vld [vmem:[#allocation2 + $0x508] sm:$0xff] }
 0x6ec   : > { %v5082_v8 = vpop.permute.xlu1 %5081 }
 0x6ed   : > { %v5080_v9 = vpop.permute.xlu0 %5079 }
 0x6ee   : > { %v5095_v61 = vsel %vm1621_vm5, %v10396_v20, %v5080_v9  ;;  %v5096_v57 = vsel %vm1621_vm5, %v5080_v9, %v5082_v8  ;;  %v6757_v9 = vld [vmem:[#allocation2 + $0x6b0] sm:$0xff] }
 0x6ef   : > { %5115 = vst [vmem:[#allocation2 + $0x108] sm:$0x1c] %v5095_v61  ;;  %5116 = vst [vmem:[#allocation2 + $0x878] sm:$0x1c] %v5096_v57  ;;  %v6734_v61 = vld [vmem:[#allocation2 + $0x600] sm:$0xff] }
 0x6f1   : > { %v10729_v12 = vpop.permute.xlu1 %5085  ;;  %v6787_v58 = vld [vmem:[#allocation2 + $0x968] sm:$0xff] }
 0x6f2   : > { %v5084_v28 = vpop.permute.xlu0 %5083  ;;  %v6786_v25 = vld [vmem:[#allocation2 + $0x3c8] sm:$0xff] }
 0x6f3   : > { %v5097_v13 = vsel %vm1621_vm5, %v5082_v8, %v5084_v28  ;;  %v5098_v1 = vsel %vm1621_vm5, %v5084_v28, %v10729_v12  ;;  %v6735_v8 = vld [vmem:[#allocation2 + $0x388] sm:$0xff] }
 0x6f4   : > { %5117 = vst [vmem:[#allocation2 + $0x2c0] sm:$0x1c] %v5097_v13  ;;  %5118 = vst [vmem:[#allocation2 + $0x920] sm:$0x1c] %v5098_v1  ;;  %v6756_v28 = vld [vmem:[#allocation2 + $0x2e8] sm:$0xff]  ;;  %v6725_v13 = vld [vmem:[#allocation2 + $0x640] sm:$0xff] }
 0x6f6   : > { %v5162_v14 = vpop.permute.xlu1 %5161 }
 0x6f7   : > { %v5160_v6 = vpop.permute.xlu0 %5159 }
 0x6f8   : > { %v5176_v3 = vsel %vm5171_vm15, %v10408_v47, %v5160_v6  ;;  %v5177_v20 = vsel %vm5171_vm15, %v5160_v6, %v5162_v14 }
 0x6f9   : > { %5196 = vst [vmem:[#allocation2 + $0x108] sm:$0xe0] %v5176_v3  ;;  %5197 = vst [vmem:[#allocation2 + $0x878] sm:$0xe0] %v5177_v20  ;;  %v6746_v20 = vld [vmem:[#allocation2 + $0x6c8] sm:$0xff] }
 0x6fb   : > { %v10737_v39 = vpop.permute.xlu1 %5165 }
 0x6fc   : > { %v5164_v0 = vpop.permute.xlu0 %5163 }
 0x6fd   : > { %v5178_v56 = vsel %vm5171_vm15, %v5162_v14, %v5164_v0  ;;  %v5179_v21 = vsel %vm5171_vm15, %v5164_v0, %v10737_v39  ;;  %v6724_v14 = vld [vmem:[#allocation2] sm:$0xff]  ;;  %v6719_v0 = vld [vmem:[#allocation2 + $0x8f0] sm:$0xff] }
 0x6fe   : > { %5198 = vst [vmem:[#allocation2 + $0x2c0] sm:$0xe0] %v5178_v56  ;;  %5199 = vst [vmem:[#allocation2 + $0x920] sm:$0xe0] %v5179_v21  ;;  %v6737_v56 = vld [vmem:[#allocation2 + $0x918] sm:$0xff] }
 0x700   : > { %v6525_v40 = vpop.permute.xlu1 %6524  ;;  %v6795_v27 = vld [vmem:[#allocation2 + $0x878] sm:$0xff]  ;;  %v6794_v29 = vld [vmem:[#allocation2 + $0x108] sm:$0xff] }
 0x701   : > { %v6523_v31 = vpop.permute.xlu0 %6522  ;;  %7122 = vmatprep.subr.mxu0 %v6795_v27  ;;  %v6718_v27 = vld [vmem:[#allocation2 + $0x588] sm:$0xff] }
 0x702   : > { %v6534_v47 = vsel %vm3032_vm9, %v10429_v26, %v6523_v31  ;;  %v6535_v33 = vsel %vm3032_vm9, %v6523_v31, %v6525_v40  ;;  %7123 = vmatpush2.msra.mxu0 %v6794_v29  ;;  %v10757_v40 = vld [vmem:[%s10938_s1] sm:$0xff]  ;;  %vm10983_vm9 = vcmask 105472  }
 0x703   : > { %6554 = vst [vmem:[#allocation2 + $0x690] sm:$0x7] %v6534_v47  ;;  %6555 = vst [vmem:[#allocation2 + $0x118] sm:$0x7] %v6535_v33  ;;  %7124 = vmatprep.subr.mxu0 %v6785_v34  ;;  %v6727_v31 = vld [vmem:[#allocation2 + $0x1a0] sm:$0xff]  ;;  %v6709_v47 = vld [vmem:[#allocation2 + $0x168] sm:$0xff] }
 0x704   : > { %7125 = vmatpush2.msra.mxu0 %v6784_v41  ;;  %v6726_v41 = vld [vmem:[#allocation2 + $0x128] sm:$0xff] }
 0x705   : > { %v6286_v44 = vpop.permute.xlu1 %6285  ;;  %7126 = vmatprep.subr.mxu0 %v6775_v45  ;;  %v6797_v37 = vld [vmem:[#allocation2 + $0x920] sm:$0xff]  ;;  %v6708_v45 = vld [vmem:[#allocation2 + $0x4f0] sm:$0xff] }
 0x706   : > { %v6796_v32 = vld [vmem:[#allocation2 + $0x2c0] sm:$0xff]  ;;  %v6284_v22 = vpop.permute.xlu0 %6283  ;;  %7199 = vmatprep.subr.mxu1 %v6797_v37  ;;  %7127 = vmatpush2.msra.mxu0 %v6774_v42  ;;  %v6698_v42 = vld [vmem:[#allocation2 + $0x4a8] sm:$0xff] }
 0x707   : > { %v6295_v26 = vsel %vm4529_vm8, %v10445_v46, %v6284_v22  ;;  %v6296_v52 = vsel %vm4529_vm8, %v6284_v22, %v6286_v44  ;;  %7200 = vmatpush2.msra.mxu1 %v6796_v32  ;;  %7128 = vmatprep.subr.mxu0 %v6765_v48  ;;  %v6776_v46 = vld [vmem:[#allocation2 + $0xa8] sm:$0xff]  ;;  %v6699_v44 = vld [vmem:[#allocation2 + $0x278] sm:$0xff]  ;;  %vm10984_vm8 = vmmov %vm10983_vm9 }
 0x708   : > { %6315 = vst [vmem:[#allocation2 + $0x340] ss:$20 sps:$4 sm:$0x83] %v6295_v26   ;;  %6316 = vst [vmem:[#allocation2 + $0x510] ss:$-108 sps:$4 sm:$0x83] %v6296_v52   ;;  %7201 = vmatprep.subr.mxu1 %v6787_v58  ;;  %7129 = vmatpush2.msra.mxu0 %v6764_v51 }
 0x709   : > { %7202 = vmatpush2.msra.mxu1 %v6786_v25  ;;  %7130 = vmatprep.subr.mxu0 %v6755_v18  ;;  %v6688_v26 = vld [vmem:[#allocation2 + $0x308] sm:$0xff]  ;;  %v6679_v52 = vld [vmem:[#allocation2 + $0x290] sm:$0xff]  ;;  %v6678_v51 = vld [vmem:[#allocation2 + $0x6d8] sm:$0xff] }
 0x70a   : > { %v6376_v60 = vpop.permute.xlu1 %6375  ;;  %7203 = vmatprep.subr.mxu1 %v6777_v54  ;;  %7131 = vmatpush2.msra.mxu0 %v6754_v43  ;;  %v6669_v18 = vld [vmem:[#allocation2 + $0x628] sm:$0xff]  ;;  %v6668_v43 = vld [vmem:[#allocation2 + $0x10] sm:$0xff] }
 0x70b   : > { %v6374_v55 = vpop.permute.xlu0 %6373  ;;  %7204 = vmatpush2.msra.mxu1 %v6776_v46  ;;  %7132 = vmatprep.subr.mxu0 %v6745_v4  ;;  %v6658_v4 = vld [vmem:[#allocation2 + $0x2c8] sm:$0xff] }
 0x70c   : > { %v6385_v2 = vsel %vm4599_vm13, %v10461_v17, %v6374_v55  ;;  %v6386_v7 = vsel %vm4599_vm13, %v6374_v55, %v6376_v60  ;;  %7205 = vmatprep.subr.mxu1 %v6767_v62  ;;  %7133 = vmatpush2.msra.mxu0 %v6744_v63  ;;  %v6747_v17 = vld [vmem:[#allocation2 + $0x998] sm:$0xff]  ;;  %vm10985_vm13 = vcmask 97280   ;;  %v6649_v62 = vld [vmem:[#allocation2 + $0x468] sm:$0xff] }
 0x70d   : > { %6405 = vst [vmem:[#allocation2 + $0x340] sm:$0x1c] %v6385_v2  ;;  %6406 = vst [vmem:[#allocation2 + $0x510] sm:$0x1c] %v6386_v7  ;;  %7206 = vmatpush2.msra.mxu1 %v6766_v10  ;;  %7134 = vmatprep.subr.mxu0 %v6735_v8  ;;  %v6659_v60 = vld [vmem:[#allocation2 + $0x2d8] sm:$0xff]  ;;  %v6648_v2 = vld [vmem:[#allocation2 + $0x7a8] sm:$0xff] }
 0x70e   : > { %v6456_v57 = vpop.permute.xlu1 %6455  ;;  %7207 = vmatprep.subr.mxu1 %v6757_v9  ;;  %7135 = vmatpush2.msra.mxu0 %v6734_v61  ;;  %v6639_v7 = vld [vmem:[#allocation2 + $0x8d8] sm:$0xff]  ;;  %v6638_v8 = vld [vmem:[#allocation2 + $0x8e8] sm:$0xff]  ;;  %v6629_v61 = vld [vmem:[#allocation2 + $0xc0] sm:$0xff] }
 0x70f   : > { %v6454_v1 = vpop.permute.xlu0 %6453  ;;  %7208 = vmatpush2.msra.mxu1 %v6756_v28  ;;  %7136 = vmatprep.subr.mxu0 %v6725_v13  ;;  %v6628_v28 = vld [vmem:[#allocation2 + $0x848] sm:$0xff] }
 0x710   : > { %v6465_v6 = vsel %vm4680_vm1, %v10480_v23, %v6454_v1  ;;  %v6466_v3 = vsel %vm4680_vm1, %v6454_v1, %v6456_v57  ;;  %7209 = vmatprep.subr.mxu1 %v6747_v17  ;;  %7137 = vmatpush2.msra.mxu0 %v6724_v14  ;;  %v6736_v23 = vld [vmem:[#allocation2 + $0x20] sm:$0xff]  ;;  %vm10986_vm1 = vmmov %vm10985_vm13  ;;  %v6619_v13 = vld [vmem:[#allocation2 + $0x748] sm:$0xff] }
 0x711   : > { %6485 = vst [vmem:[#allocation2 + $0x340] sm:$0xe0] %v6465_v6  ;;  %6486 = vst [vmem:[#allocation2 + $0x510] sm:$0xe0] %v6466_v3  ;;  %7210 = vmatpush2.msra.mxu1 %v6746_v20  ;;  %7228 = vmatprep.subr.mxu0 %v6719_v0  ;;  %v6618_v17 = vld [vmem:[#allocation2 + $0x368] sm:$0xff]  ;;  %v6609_v6 = vld [vmem:[#allocation2 + $0x790] sm:$0xff] }
 0x712   : > { %v6044_v21 = vpop.permute.xlu1 %6043  ;;  %7211 = vmatprep.subr.mxu1 %v6737_v56  ;;  %7139 = vmatmul.mubr.f32.vlgmr.msra.gmra.mxu0 %v10757_v40  ;;  %v6608_v20 = vld [vmem:[#allocation2 + $0x688] sm:$0xff] }
 0x713   : > { %v6042_v29 = vpop.permute.xlu0 %6041  ;;  %7212 = vmatpush2.msra.mxu1 %v6736_v23  ;;  %7229 = vmatpush1.msra.mxu0 %v6718_v27 }
 0x714   : > { %v6054_v33 = vsel %vm6045_vm3, %v10495_v35, %v6042_v29  ;;  %v6055_v34 = vsel %vm6045_vm3, %v6042_v29, %v6044_v21  ;;  %7213 = vmatprep.subr.mxu1 %v6727_v31  ;;  %7230 = vmatprep.subr.mxu0 %v6709_v47  ;;  %v6689_v35 = vld [vmem:[#allocation2 + $0x698] sm:$0xff]  ;;  %vm10987_vm3 = vcmask 130048   ;;  %v6588_v31 = vld [vmem:[#allocation2 + $0x270] sm:$0xff] }
 0x715   : > { %6074 = vst [vmem:[#allocation2 + $0x350] ss:$-164 sps:$4 sm:$0xc1] %v6054_v33   ;;  %6075 = vst [vmem:[#allocation2 + $0x4a0] ss:$-652 sps:$4 sm:$0xc1] %v6055_v34   ;;  %7214 = vmatpush2.msra.mxu1 %v6726_v41  ;;  %7231 = vmatpush1.msra.mxu0 %v6708_v45 }
 0x716   : > { %v6135_v37 = vpop.permute.xlu1 %6134  ;;  %7550 = vmatprep.subr.mxu1 %v6719_v0  ;;  %7232 = vmatprep.subr.mxu0 %v6699_v44  ;;  %vm10988_vm10 = vmmov %vm10987_vm3  ;;  %v6599_v0 = vld [vmem:[#allocation2 + $0xe0] sm:$0xff]  ;;  %v6598_v21 = vld [vmem:[#allocation2 + $0x618] sm:$0xff] }
 0x717   : > { %v6133_v32 = vpop.permute.xlu0 %6132  ;;  %7216 = vmatmul.mubr.f32.vlgmr.msra.gmra.mxu1 %v10757_v40  ;;  %7233 = vmatpush1.msra.mxu0 %v6698_v42  ;;  %v6578_v34 = vld [vmem:[#allocation2 + $0x960] sm:$0xff] }
 0x718   : > { %v6145_v22 = vsel %vm10983_vm9, %v10510_v15, %v6133_v32  ;;  %v6146_v48 = vsel %vm10984_vm8, %v6133_v32, %v6135_v37  ;;  %7581 = vmatpush1.msra.mxu1 %v6718_v27  ;;  %7234 = vmatprep.subr.mxu0 %v6689_v35  ;;  %v6589_v27 = vld [vmem:[#allocation2 + $0x650] sm:$0xff]  ;;  %v6568_v37 = vld [vmem:[#allocation2 + $0x6e8] sm:$0xff]  ;;  %vm10995_vm9 = vmmov %vm10992_vm6 }
 0x719   : > { %6165 = vst [vmem:[#allocation2 + $0x350] sm:$0xe] %v6145_v22  ;;  %6166 = vst [vmem:[#allocation2 + $0x4a0] sm:$0xe] %v6146_v48  ;;  %7551 = vmatprep.subr.mxu1 %v6709_v47  ;;  %7235 = vmatpush1.msra.mxu0 %v6688_v26  ;;  %v6579_v47 = vld [vmem:[#allocation2 + $0x898] sm:$0xff] }
 0x71a   : > { %v6206_v58 = vpop.permute.xlu1 %6205  ;;  %7582 = vmatpush1.msra.mxu1 %v6708_v45  ;;  %7236 = vmatprep.subr.mxu0 %v6679_v52  ;;  %v6569_v45 = vld [vmem:[#allocation2 + $0x6a8] sm:$0xff]  ;;  %vm10996_vm8 = vmmov %vm10992_vm6 }
 0x71b   : > { %v6204_v25 = vpop.permute.xlu0 %6203  ;;  %7552 = vmatprep.subr.mxu1 %v6699_v44  ;;  %7237 = vmatpush1.msra.mxu0 %v6678_v51 }
 0x71c   : > { %v6215_v15 = vsel %vm10985_vm13, %v10525_v53, %v6204_v25  ;;  %v6216_v54 = vsel %vm10986_vm1, %v6204_v25, %v6206_v58  ;;  %7583 = vmatpush1.msra.mxu1 %v6698_v42  ;;  %7238 = vmatprep.subr.mxu0 %v6669_v18  ;;  %v6869_v42 = vld [vmem:[#allocation2 + $0x118] sm:$0x7]  ;;  %vm10997_vm13 = vcmask 596992   ;;  %vm10999_vm1 = vcmask 629760  }
 0x71d   : > { %6235 = vst [vmem:[#allocation2 + $0x350] sm:$0x70] %v6215_v15  ;;  %6236 = vst [vmem:[#allocation2 + $0x4a0] sm:$0x70] %v6216_v54  ;;  %7553 = vmatprep.subr.mxu1 %v6689_v35  ;;  %7239 = vmatpush1.msra.mxu0 %v6668_v43  ;;  %v6868_v35 = vld [vmem:[#allocation2 + $0x690] sm:$0x7] }
 0x71e   : > { %v5882_v46 = vpop.permute.xlu1 %5881  ;;  %7584 = vmatpush1.msra.mxu1 %v6688_v26  ;;  %7240 = vmatprep.subr.mxu0 %v6659_v60 }
 0x71f   : > { %v5880_v55 = vpop.permute.xlu0 %5879  ;;  %7554 = vmatprep.subr.mxu1 %v6679_v52  ;;  %7241 = vmatpush1.msra.mxu0 %v6658_v4  ;;  %v6858_v52 = vld [vmem:[#allocation2 + $0x340] sm:$0xff] }
 0x720   : > { %v5892_v53 = vsel %vm10987_vm3, %v10542_v36, %v5880_v55  ;;  %v5893_v63 = vsel %vm10988_vm10, %v5880_v55, %v5882_v46  ;;  %7585 = vmatpush1.msra.mxu1 %v6678_v51  ;;  %7242 = vmatprep.subr.mxu0 %v6649_v62  ;;  %vm11000_vm3 = vmmov %vm10999_vm1  ;;  %vm11001_vm10 = vcmask 621568  }
 0x721   : > { %5912 = vst [vmem:[#allocation2 + $0x2a8] sm:$0x7] %v5892_v53  ;;  %5913 = vst [vmem:[#allocation2 + $0x210] sm:$0x7] %v5893_v63  ;;  %7555 = vmatprep.subr.mxu1 %v6669_v18  ;;  %7243 = vmatpush1.msra.mxu0 %v6648_v2  ;;  %v8170_v53 = vld [vmem:[%s10938_s1 + $0x18] sm:$0xff] }
 0x722   : > { %v5963_v10 = vpop.permute.xlu1 %5962  ;;  %7586 = vmatpush1.msra.mxu1 %v6668_v43  ;;  %7244 = vmatprep.subr.mxu0 %v6639_v7 }
 0x723   : > { %v5961_v9 = vpop.permute.xlu0 %5960  ;;  %7556 = vmatprep.subr.mxu1 %v6659_v60  ;;  %7245 = vmatpush1.msra.mxu0 %v6638_v8 }
 0x724   : > { %v5973_v36 = vsel %vm5964_vm12, %v10562_v11, %v5961_v9  ;;  %v5974_v57 = vsel %vm5964_vm12, %v5961_v9, %v5963_v10  ;;  %7587 = vmatpush1.msra.mxu1 %v6658_v4  ;;  %7246 = vmatprep.subr.mxu0 %v6629_v61  ;;  %vm10989_vm12 = vcmask 580608   ;;  %v6849_v58 = vld [vmem:[#allocation2 + $0x4a0] sm:$0xff]  ;;  %v6848_v25 = vld [vmem:[#allocation2 + $0x350] sm:$0xff] }
 0x725   : > { %5993 = vst [vmem:[#allocation2 + $0x2a8] sm:$0x38] %v5973_v36  ;;  %5994 = vst [vmem:[#allocation2 + $0x210] sm:$0x38] %v5974_v57  ;;  %7557 = vmatprep.subr.mxu1 %v6649_v62  ;;  %7247 = vmatpush1.msra.mxu0 %v6628_v28 }
 0x726   : > { %v5643_v1 = vpop.permute.xlu1 %5642  ;;  %7588 = vmatpush1.msra.mxu1 %v6648_v2  ;;  %7248 = vmatprep.subr.mxu0 %v6619_v13 }
 0x727   : > { %v5641_v14 = vpop.permute.xlu0 %5640  ;;  %7558 = vmatprep.subr.mxu1 %v6639_v7  ;;  %7249 = vmatpush1.msra.mxu0 %v6618_v17 }
 0x728   : > { %v5652_v11 = vsel %vm3887_vm4, %v10584_v59, %v5641_v14  ;;  %v5653_v3 = vsel %vm3887_vm4, %v5641_v14, %v5643_v1  ;;  %7589 = vmatpush1.msra.mxu1 %v6638_v8  ;;  %7250 = vmatprep.subr.mxu0 %v6609_v6  ;;  %vm10990_vm4 = vmmov %vm10989_vm12  ;;  %v8172_v8 = vld [vmem:[%s10938_s1 + $0x8] sm:$0xff] }
 0x729   : > { %5672 = vst [vmem:[#allocation2 + $0x410] ss:$956 sps:$4 sm:$0x83] %v5652_v11   ;;  %5673 = vst [vmem:[#allocation2 + $0x910] ss:$-1796 sps:$4 sm:$0x83] %v5653_v3   ;;  %7559 = vmatprep.subr.mxu1 %v6629_v61  ;;  %7251 = vmatpush1.msra.mxu0 %v6608_v20 }
 0x72a   : > { %v5733_v56 = vpop.permute.xlu1 %5732  ;;  %7590 = vmatpush1.msra.mxu1 %v6628_v28  ;;  %7252 = vmatprep.subr.mxu0 %v6599_v0 }
 0x72b   : > { %v5731_v23 = vpop.permute.xlu0 %5730  ;;  %7560 = vmatprep.subr.mxu1 %v6619_v13  ;;  %7253 = vmatpush1.msra.mxu0 %v6598_v21 }
 0x72c   : > { %v5742_v59 = vsel %vm10989_vm12, %v10607_v16, %v5731_v23  ;;  %v5743_v29 = vsel %vm10990_vm4, %v5731_v23, %v5733_v56  ;;  %7591 = vmatpush1.msra.mxu1 %v6618_v17  ;;  %7254 = vmatprep.subr.mxu0 %v6589_v27  ;;  %v6839_v15 = vld [vmem:[#allocation2 + $0x210] sm:$0xff]  ;;  %v6838_v43 = vld [vmem:[#allocation2 + $0x2a8] sm:$0xff]  ;;  %vm11002_vm12 = vmmov %vm11001_vm10  ;;  %vm11003_vm4 = vcmask 39936  }
 0x72d   : > { %5762 = vst [vmem:[#allocation2 + $0x410] sm:$0x1c] %v5742_v59  ;;  %5763 = vst [vmem:[#allocation2 + $0x910] sm:$0x1c] %v5743_v29  ;;  %7561 = vmatprep.subr.mxu1 %v6609_v6  ;;  %7255 = vmatpush1.msra.mxu0 %v6588_v31 }
 0x72e   : > { %v5813_v33 = vpop.permute.xlu1 %5812  ;;  %7592 = vmatpush1.msra.mxu1 %v6608_v20  ;;  %7256 = vmatprep.subr.mxu0 %v6579_v47 }
 0x72f   : > { %v5811_v41 = vpop.permute.xlu0 %5810  ;;  %7562 = vmatprep.subr.mxu1 %v6599_v0  ;;  %7257 = vmatpush1.msra.mxu0 %v6578_v34 }
 0x730   : > { %v5822_v16 = vsel %vm2319_vm0, %v10623_v49, %v5811_v41  ;;  %v5823_v44 = vsel %vm2319_vm0, %v5811_v41, %v5813_v33  ;;  %7593 = vmatpush1.msra.mxu1 %v6598_v21  ;;  %7258 = vmatprep.subr.mxu0 %v6569_v45  ;;  %v6859_v49 = vld [vmem:[#allocation2 + $0x510] sm:$0xff]  ;;  %vm10993_vm0 = vcmask 613376  }
 0x731   : > { %5842 = vst [vmem:[#allocation2 + $0x410] sm:$0xe0] %v5822_v16  ;;  %5843 = vst [vmem:[#allocation2 + $0x910] sm:$0xe0] %v5823_v44  ;;  %7563 = vmatprep.subr.mxu1 %v6589_v27  ;;  %7259 = vmatpush1.msra.mxu0 %v6568_v37  ;;  %v7063_v27 = vpop.f32.mrf.mxu1 }
 0x732   : > { %v5402_v32 = vpop.permute.xlu1 %5401  ;;  %7594 = vmatpush1.msra.mxu1 %v6588_v31  ;;  %7542 = vmatprep.subr.msk.mxu0 %vm10991_vm11, %v6869_v42  ;;  %vm10994_vm7 = vmmov %vm10993_vm0 }
 0x733   : > { %v5400_v22 = vpop.permute.xlu0 %5399  ;;  %7564 = vmatprep.subr.mxu1 %v6579_v47  ;;  %7543 = vmatpush2.msk.msra.mxu0 %vm10992_vm6, %v6868_v35 }
 0x734   : > { %v5412_v48 = vsel %vm10993_vm0, %v10639_v5, %v5400_v22  ;;  %v5413_v26 = vsel %vm10994_vm7, %v5400_v22, %v5402_v32  ;;  %7595 = vmatpush1.msra.mxu1 %v6578_v34  ;;  %7264 = vmatprep.subr.mxu0 %v6859_v49  ;;  %v7065_v34 = vpop.f32.mrf.mxu1 }
 0x735   : > { %5432 = vst [vmem:[#allocation2 + $0x7c8] ss:$-164 sps:$4 sm:$0xc1] %v5412_v48   ;;  %5433 = vst [vmem:[#allocation2 + $0x208] ss:$1660 sps:$4 sm:$0xc1] %v5413_v26   ;;  %7565 = vmatprep.subr.mxu1 %v6569_v45  ;;  %7265 = vmatpush2.msra.mxu0 %v6858_v52 }
 0x736   : > { %v5493_v51 = vpop.permute.xlu1 %5492  ;;  %7596 = vmatpush1.msra.mxu1 %v6568_v37  ;;  %7266 = vmatprep.subr.mxu0 %v6849_v58  ;;  %v6778_v45 = vld [vmem:[#allocation2 + $0x700] sm:$0xff] }
 0x737   : > { %v5491_v18 = vpop.permute.xlu0 %5490  ;;  %7566 = vmatprep.subr.msk.mxu1 %vm10995_vm9, %v6869_v42  ;;  %7267 = vmatpush2.msra.mxu0 %v6848_v25  ;;  %v6769_v42 = vld [vmem:[#allocation2 + $0x798] sm:$0xff] }
 0x738   : > { %v5502_v5 = vsel %vm3715_vm14, %v10653_v38, %v5491_v18  ;;  %v5503_v54 = vsel %vm3715_vm14, %v5491_v18, %v5493_v51  ;;  %7597 = vmatpush2.msk.msra.mxu1 %vm10996_vm8, %v6868_v35  ;;  %7268 = vmatprep.subr.mxu0 %v6839_v15  ;;  %v6829_v60 = vld [vmem:[#allocation2 + $0x910] sm:$0xff]  ;;  %vm10998_vm14 = vmmov %vm10997_vm13 }
 0x739   : > { %5522 = vst [vmem:[#allocation2 + $0x7c8] sm:$0xe] %v5502_v5  ;;  %5523 = vst [vmem:[#allocation2 + $0x208] sm:$0xe] %v5503_v54  ;;  %7567 = vmatprep.subr.mxu1 %v6859_v49  ;;  %7269 = vmatpush2.msra.mxu0 %v6838_v43  ;;  %v6828_v4 = vld [vmem:[#allocation2 + $0x410] sm:$0xff]  ;;  %v6739_v54 = vld [vmem:[#allocation2 + $0x3e0] sm:$0xff] }
 0x73a   : > { %v5563_v46 = vpop.permute.xlu1 %5562  ;;  %7598 = vmatpush2.msra.mxu1 %v6858_v52  ;;  %7270 = vmatprep.subr.mxu0 %v6829_v60  ;;  %v6768_v35 = vld [vmem:[#allocation2 + $0x170] sm:$0xff]  ;;  %v6759_v52 = vld [vmem:[#allocation2 + $0x418] sm:$0xff] }
 0x73b   : > { %v5561_v55 = vpop.permute.xlu0 %5560  ;;  %7568 = vmatprep.subr.mxu1 %v6849_v58  ;;  %7271 = vmatpush2.msra.mxu0 %v6828_v4  ;;  %v6749_v18 = vld [vmem:[#allocation2 + $0x190] sm:$0xff] }
 0x73c   : > { %v5572_v38 = vsel %vm10997_vm13, %v10672_v50, %v5561_v55  ;;  %v5573_v62 = vsel %vm10998_vm14, %v5561_v55, %v5563_v46  ;;  %7599 = vmatpush2.msra.mxu1 %v6848_v25  ;;  %7537 = vmatprep.mubr.msk.f32.mxu0 %vm6882_vm2, %v8170_v53  ;;  %v10806_v50 = vld [vmem:[%s10938_s1 + $0x10] sm:$0xff]  ;;  %v6758_v25 = vld [vmem:[#allocation2 + $0x440] sm:$0xff] }
 0x73d   : > { %5592 = vst [vmem:[#allocation2 + $0x7c8] sm:$0x70] %v5572_v38  ;;  %5593 = vst [vmem:[#allocation2 + $0x208] sm:$0x70] %v5573_v62  ;;  %7569 = vmatprep.subr.mxu1 %v6839_v15  ;;  %7541 = vmatprep.mubr.msk.f32.mxu1 %vm6882_vm2, %v8170_v53  ;;  %v6748_v15 = vld [vmem:[#allocation2 + $0x470] sm:$0xff] }
 0x73e   : > { %v5240_v63 = vpop.permute.xlu1 %5239  ;;  %7600 = vmatpush2.msra.mxu1 %v6838_v43  ;;  %7145 = vmatmul.mubr.f32.gmra.mxu0 %v10806_v50 }
 0x73f   : > { %v5238_v2 = vpop.permute.xlu0 %5237  ;;  %7570 = vmatprep.subr.mxu1 %v6829_v60  ;;  %7222 = vmatmul.mubr.f32.gmra.mxu1 %v10806_v50  ;;  %v6738_v60 = vld [vmem:[#allocation2 + $0x4b8] sm:$0xff] }
 0x740   : > { %v5250_v7 = vsel %vm10999_vm1, %v10690_v24, %v5238_v2  ;;  %v5251_v10 = vsel %vm11000_vm3, %v5238_v2, %v5240_v63  ;;  %7601 = vmatpush2.msra.mxu1 %v6828_v4  ;;  %7544 = vmatprep.mubr.msk.f32.mxu0 %vm6882_vm2, %v8172_v8  ;;  %v6729_v4 = vld [vmem:[#allocation2 + $0x100] sm:$0xff] }
 0x741   : > { %5270 = vst [vmem:[#allocation2 + $0x720] sm:$0x7] %v5250_v7  ;;  %5271 = vst [vmem:[#allocation2 + $0x880] sm:$0x7] %v5251_v10  ;;  %7545 = vmatprep.mubr.msk.f32.mxu1 %vm6882_vm2, %v8170_v53  ;;  %v6728_v53 = vld [vmem:[#allocation2 + $0x3f0] sm:$0xff] }
 0x742   : > { %v5321_v9 = vpop.permute.xlu1 %5320  ;;  %vm11004_vm2 = vmmov %vm11003_vm4 }
 0x743   : > { %v5319_v61 = vpop.permute.xlu0 %5318 }
 0x744   : > { %v5331_v36 = vsel %vm11001_vm10, %v10706_v19, %v5319_v61  ;;  %v5332_v24 = vsel %vm11002_vm12, %v5319_v61, %v5321_v9  ;;  %v6819_v57 = vld [vmem:[#allocation2 + $0x208] sm:$0xff] }
 0x745   : > { %v6818_v28 = vld [vmem:[#allocation2 + $0x7c8] sm:$0xff]  ;;  %5351 = vst [vmem:[#allocation2 + $0x720] sm:$0x38] %v5331_v36  ;;  %5352 = vst [vmem:[#allocation2 + $0x880] sm:$0x38] %v5332_v24  ;;  %7272 = vmatprep.subr.mxu0 %v6819_v57  ;;  %7571 = vmatprep.subr.mxu1 %v6819_v57 }
 0x746   : > { %7273 = vmatpush2.msra.mxu0 %v6818_v28  ;;  %7602 = vmatpush2.msra.mxu1 %v6818_v28  ;;  %v5000_v13 = vpop.permute.xlu1 %4999 }
 0x747   : > { %v4998_v1 = vpop.permute.xlu0 %4997 }
 0x748   : > { %v5009_v17 = vsel %vm11003_vm4, %v10718_v30, %v4998_v1  ;;  %v5010_v14 = vsel %vm11004_vm2, %v4998_v1, %v5000_v13 }
 0x749   : > { %5029 = vst [vmem:[#allocation2 + $0x358] ss:$812 sps:$4 sm:$0x83] %v5009_v17   ;;  %5030 = vst [vmem:[#allocation2 + $0x7e8] ss:$-996 sps:$4 sm:$0x83] %v5010_v14  }
 0x74a   : > { %v5090_v19 = vpop.permute.xlu1 %5089 }
 0x74b   : > { %v5088_v6 = vpop.permute.xlu0 %5087 }
 0x74c   : > { %v5099_v11 = vsel %vm1621_vm5, %v10729_v12, %v5088_v6  ;;  %v5100_v3 = vsel %vm1621_vm5, %v5088_v6, %v5090_v19  ;;  %v6809_v20 = vld [vmem:[#allocation2 + $0x880] sm:$0xff]  ;;  %v6986_v12 = vpop.f32.mrf.mxu0 }
 0x74d   : > { %v6808_v0 = vld [vmem:[#allocation2 + $0x720] sm:$0xff]  ;;  %5119 = vst [vmem:[#allocation2 + $0x358] sm:$0x1c] %v5099_v11  ;;  %5120 = vst [vmem:[#allocation2 + $0x7e8] sm:$0x1c] %v5100_v3  ;;  %7274 = vmatprep.subr.mxu0 %v6809_v20  ;;  %7572 = vmatprep.subr.mxu1 %v6809_v20 }
 0x74e   : > { %7275 = vmatpush2.msra.mxu0 %v6808_v0  ;;  %7603 = vmatpush2.msra.mxu1 %v6808_v0  ;;  %v5170_v30 = vpop.permute.xlu1 %5169  ;;  %v6988_v47 = vpop.f32.mrf.mxu0 }
 0x74f   : > { %v5168_v56 = vpop.permute.xlu0 %5167 }
 0x750   : > { %v5180_v21 = vsel %vm5171_vm15, %v10737_v39, %v5168_v56  ;;  %v5181_v23 = vsel %vm5171_vm15, %v5168_v56, %v5170_v30  ;;  %v6789_v31 = vld [vmem:[#allocation2 + $0x400] sm:$0xff]  ;;  %v6779_v39 = vld [vmem:[#allocation2 + $0xd8] sm:$0xff] }
 0x751   : > { %5200 = vst [vmem:[#allocation2 + $0x358] sm:$0xe0] %v5180_v21  ;;  %5201 = vst [vmem:[#allocation2 + $0x7e8] sm:$0xe0] %v5181_v23  ;;  %v6788_v33 = vld [vmem:[#allocation2 + $0x680] sm:$0xff] }
 0x758   : > { %v6799_v59 = vld [vmem:[#allocation2 + $0x7e8] sm:$0xff]  ;;  %v6798_v29 = vld [vmem:[#allocation2 + $0x358] sm:$0xff] }
 0x759   : > { %7276 = vmatprep.subr.mxu0 %v6799_v59  ;;  %7573 = vmatprep.subr.mxu1 %v6799_v59 }
 0x75a   : > { %7277 = vmatpush2.msra.mxu0 %v6798_v29  ;;  %7604 = vmatpush2.msra.mxu1 %v6798_v29 }
 0x75b   : > { %7278 = vmatprep.subr.mxu0 %v6789_v31  ;;  %7574 = vmatprep.subr.mxu1 %v6789_v31 }
 0x75c   : > { %7279 = vmatpush2.msra.mxu0 %v6788_v33  ;;  %7605 = vmatpush2.msra.mxu1 %v6788_v33  ;;  %v10830_v41 = vpop.permute.xlu0 %6874 }
 0x75d   : > { %7280 = vmatprep.subr.mxu0 %v6779_v39  ;;  %7575 = vmatprep.subr.mxu1 %v6779_v39  ;;  %v6987_v16 = vadd.f32 %v6986_v12, %v10830_v41  ;;  %v7064_v44 = vadd.f32 %v7063_v27, %v10830_v41  ;;  %v6989_v37 = vadd.f32 %v6988_v47, %v10830_v41 }
 0x75e   : > { %7281 = vmatpush2.msra.mxu0 %v6778_v45  ;;  %7606 = vmatpush2.msra.mxu1 %v6778_v45  ;;  %v7066_v32 = vadd.f32 %v7065_v34, %v10830_v41 }
 0x75f   : > { %7282 = vmatprep.subr.mxu0 %v6769_v42  ;;  %7576 = vmatprep.subr.mxu1 %v6769_v42  ;;  %v7305_v22 = vmul.f32 0.5, %v6987_v16  ;;  %v7307_v49 = vmul.f32 0.5, %v7064_v44  ;;  %v7306_v48 = vmul.f32 0.5, %v6989_v37  ;;  %v6992_v26 = vpop.f32.mrf.mxu0  ;;  %v7069_v51 = vpop.f32.mrf.mxu1 }
 0x760   : > { %7283 = vmatpush2.msra.mxu0 %v6768_v35  ;;  %7607 = vmatpush2.msra.mxu1 %v6768_v35  ;;  %v7308_v58 = vmul.f32 0.5, %v7066_v32  ;;  %v10836_v46 = vpop.permute.xlu1 %6879 }
 0x761   : > { %7284 = vmatprep.subr.mxu0 %v6759_v52  ;;  %7577 = vmatprep.subr.mxu1 %v6759_v52  ;;  %8100 = vtanh.f32 %v7305_v22  ;;  %v6994_v5 = vpop.f32.mrf.mxu0  ;;  %v7071_v43 = vpop.f32.mrf.mxu1  ;;  %v6993_v55 = vadd.f32 %v6992_v26, %v10836_v46  ;;  %v7070_v38 = vadd.f32 %v7069_v51, %v10836_v46 }
 0x762   : > { %7285 = vmatpush2.msra.mxu0 %v6758_v25  ;;  %7608 = vmatpush2.msra.mxu1 %v6758_v25  ;;  %8102 = vtanh.f32 %v7307_v49  ;;  %v6995_v62 = vadd.f32 %v6994_v5, %v10836_v46  ;;  %v7072_v63 = vadd.f32 %v7071_v43, %v10836_v46 }
 0x763   : > { %7286 = vmatprep.subr.mxu0 %v6749_v18  ;;  %7578 = vmatprep.subr.mxu1 %v6749_v18  ;;  %8104 = vtanh.f32 %v7306_v48  ;;  %v7315_v2 = vmul.f32 0.5, %v6993_v55  ;;  %v7317_v7 = vmul.f32 0.5, %v7070_v38 }
 0x764   : > { %7287 = vmatpush2.msra.mxu0 %v6748_v15  ;;  %7609 = vmatpush2.msra.mxu1 %v6748_v15  ;;  %8106 = vtanh.f32 %v7308_v58  ;;  %v7316_v10 = vmul.f32 0.5, %v6995_v62  ;;  %v7318_v8 = vmul.f32 0.5, %v7072_v63 }
 0x765   : > { %7288 = vmatprep.subr.mxu0 %v6739_v54  ;;  %7579 = vmatprep.subr.mxu1 %v6739_v54  ;;  %8108 = vtanh.f32 %v7315_v2 }
 0x766   : > { %7289 = vmatpush2.msra.mxu0 %v6738_v60  ;;  %7610 = vmatpush2.msra.mxu1 %v6738_v60  ;;  %8110 = vtanh.f32 %v7317_v7 }
 0x767   : > { %7290 = vmatprep.subr.mxu0 %v6729_v4  ;;  %7580 = vmatprep.subr.mxu1 %v6729_v4  ;;  %8112 = vtanh.f32 %v7316_v10 }
 0x768   : > { %7291 = vmatpush2.msra.mxu0 %v6728_v53  ;;  %7611 = vmatpush2.msra.mxu1 %v6728_v53  ;;  %8114 = vtanh.f32 %v7318_v8 }
 0x769   : > { %7293 = vmatmul.mubr.f32.vlgmr.msra.gmra.mxu0 %v10757_v40  ;;  %7299 = vmatmul.mubr.f32.vlgmr.msra.gmra.mxu1 %v10806_v50 }
 0x76e   : > { %v8101_v9 = vpop.eup %8100 }
 0x76f   : > { %v8103_v61 = vpop.eup %8102  ;;  %v7345_v36 = vmul.f32 0.5, %v8101_v9 }
 0x770   : > { %v8105_v24 = vpop.eup %8104  ;;  %v7347_v57 = vmul.f32 0.5, %v8103_v61 }
 0x771   : > { %v8107_v28 = vpop.eup %8106  ;;  %v7365_v13 = vadd.f32 0.5, %v7345_v36  ;;  %v7346_v1 = vmul.f32 0.5, %v8105_v24 }
 0x772   : > { %v7367_v17 = vadd.f32 0.5, %v7347_v57  ;;  %v7348_v14 = vmul.f32 0.5, %v8107_v28  ;;  %v8109_v19 = vpop.eup %8108 }
 0x773   : > { %7385 = vst [vmem:[%s10845_s6] sm:$0xff] %v7365_v13  ;;  %v7366_v40 = vadd.f32 0.5, %v7346_v1  ;;  %v8111_v6 = vpop.eup %8110  ;;  %v7355_v11 = vmul.f32 0.5, %v8109_v19 }
 0x774   : > { %7387 = vst [vmem:[%s10845_s6 + $0x10] sm:$0xff] %v7367_v17  ;;  %v7368_v50 = vadd.f32 0.5, %v7348_v14  ;;  %v8113_v3 = vpop.eup %8112  ;;  %v7357_v20 = vmul.f32 0.5, %v8111_v6 }
 0x775   : > { %7386 = vst [vmem:[%s10845_s6 + $0x8] sm:$0xff] %v7366_v40  ;;  %v8115_v0 = vpop.eup %8114  ;;  %v7375_v30 = vadd.f32 0.5, %v7355_v11  ;;  %v7356_v56 = vmul.f32 0.5, %v8113_v3 }
 0x776   : > { %7388 = vst [vmem:[%s10845_s6 + $0x18] sm:$0xff] %v7368_v50  ;;  %v7377_v21 = vadd.f32 0.5, %v7357_v20  ;;  %v7358_v23 = vmul.f32 0.5, %v8115_v0 }
 0x777   : > { %7395 = vst [vmem:[%s10845_s6 + $0x50] sm:$0xff] %v7375_v30  ;;  %v7376_v12 = vadd.f32 0.5, %v7356_v56 }
 0x778   : > { %7397 = vst [vmem:[%s10845_s6 + $0x60] sm:$0xff] %v7377_v21  ;;  %v7378_v27 = vadd.f32 0.5, %v7358_v23 }
 0x779   : > { %7396 = vst [vmem:[%s10845_s6 + $0x58] sm:$0xff] %v7376_v12 }
 0x77a   : > { %7398 = vst [vmem:[%s10845_s6 + $0x68] sm:$0xff] %v7378_v27 }
 0x7d2   : > { %v7140_v59 = vpop.f32.mrf.mxu0 }
 0x7d3   : > { %v7141_v29 = vadd.f32 %v7140_v59, %v10830_v41 }
 0x7d4   : > { %v7142_v31 = vpop.f32.mrf.mxu0 }
 0x7d5   : > { %v7309_v47 = vmul.f32 0.5, %v7141_v29  ;;  %v7143_v33 = vadd.f32 %v7142_v31, %v10830_v41 }
 0x7d7   : > { %8116 = vtanh.f32 %v7309_v47  ;;  %v7217_v34 = vpop.f32.mrf.mxu1  ;;  %v7310_v39 = vmul.f32 0.5, %v7143_v33 }
 0x7d8   : > { %v7218_v45 = vadd.f32 %v7217_v34, %v10830_v41 }
 0x7d9   : > { %8118 = vtanh.f32 %v7310_v39  ;;  %v7219_v16 = vpop.f32.mrf.mxu1 }
 0x7da   : > { %v7311_v44 = vmul.f32 0.5, %v7218_v45  ;;  %v7220_v37 = vadd.f32 %v7219_v16, %v10830_v41  ;;  %v7427_v16 = vld [vmem:[%s10845_s6] sm:$0xff] (%p8288_p4) }
 0x7db   : > { %7428 = vst [vmem:[%s10891_s7] sm:$0xff] (%p8288_p4), %v7427_v16 }
 0x7dc   : > { %8120 = vtanh.f32 %v7311_v44  ;;  %v7312_v42 = vmul.f32 0.5, %v7220_v37  ;;  %v7429_v44 = vld [vmem:[%s10845_s6 + $0x8] sm:$0xff] (%p8288_p4)  ;;  %v7431_v37 = vld [vmem:[%s10845_s6 + $0x10] sm:$0xff] (%p8288_p4) }
 0x7dd   : > { %7430 = vst [vmem:[%s10891_s7 + $0x8] sm:$0xff] (%p8288_p4), %v7429_v44  ;;  %7432 = vst [vmem:[%s10891_s7 + $0x10] sm:$0xff] (%p8288_p4), %v7431_v37 }
 0x7de   : > { %8122 = vtanh.f32 %v7312_v42  ;;  %v7433_v42 = vld [vmem:[%s10845_s6 + $0x18] sm:$0xff] (%p8288_p4) }
 0x7df   : > { %7434 = vst [vmem:[%s10891_s7 + $0x18] sm:$0xff] (%p8288_p4), %v7433_v42 }
 0x7e4   : > { %v8117_v32 = vpop.eup %8116 }
 0x7e5   : > { %v7349_v35 = vmul.f32 0.5, %v8117_v32 }
 0x7e6   : > { %v8119_v22 = vpop.eup %8118 }
 0x7e7   : > { %v7369_v49 = vadd.f32 0.5, %v7349_v35  ;;  %v7350_v48 = vmul.f32 0.5, %v8119_v22 }
 0x7e9   : > { %v8121_v26 = vpop.eup %8120  ;;  %7389 = vst [vmem:[%s10845_s6 + $0x20] sm:$0xff] %v7369_v49  ;;  %v7370_v52 = vadd.f32 0.5, %v7350_v48 }
 0x7ea   : > { %v7351_v58 = vmul.f32 0.5, %v8121_v26 }
 0x7eb   : > { %v8123_v51 = vpop.eup %8122  ;;  %7390 = vst [vmem:[%s10845_s6 + $0x28] sm:$0xff] %v7370_v52  ;;  %v7447_v52 = vld [vmem:[%s10845_s6 + $0x50] sm:$0xff] (%p8288_p4) }
 0x7ec   : > { %v7371_v25 = vadd.f32 0.5, %v7351_v58  ;;  %v7352_v18 = vmul.f32 0.5, %v8123_v51  ;;  %v7449_v58 = vld [vmem:[%s10845_s6 + $0x58] sm:$0xff] (%p8288_p4)  ;;  %7448 = vst [vmem:[%s10891_s7 + $0xa0] sm:$0xff] (%p8288_p4), %v7447_v52  ;;  %v7451_v51 = vld [vmem:[%s10845_s6 + $0x60] sm:$0xff] (%p8288_p4) }
 0x7ed   : > { %7450 = vst [vmem:[%s10891_s7 + $0xa8] sm:$0xff] (%p8288_p4), %v7449_v58  ;;  %7452 = vst [vmem:[%s10891_s7 + $0xb0] sm:$0xff] (%p8288_p4), %v7451_v51 }
 0x7ee   : > { %7391 = vst [vmem:[%s10845_s6 + $0x30] sm:$0xff] %v7371_v25  ;;  %v7372_v15 = vadd.f32 0.5, %v7352_v18  ;;  %v7453_v25 = vld [vmem:[%s10845_s6 + $0x68] sm:$0xff] (%p8288_p4) }
 0x7ef   : > { %7454 = vst [vmem:[%s10891_s7 + $0xb8] sm:$0xff] (%p8288_p4), %v7453_v25 }
 0x7f0   : > { %7392 = vst [vmem:[%s10845_s6 + $0x38] sm:$0xff] %v7372_v15  ;;  %v7435_v32 = vld [vmem:[%s10845_s6 + $0x20] sm:$0xff] (%p8288_p4) }
 0x7f1   : > { %7436 = vst [vmem:[%s10891_s7 + $0x20] sm:$0xff] (%p8288_p4), %v7435_v32 }
 0x7f2   : > { %v7437_v35 = vld [vmem:[%s10845_s6 + $0x28] sm:$0xff] (%p8288_p4) }
 0x7f3   : > { %7438 = vst [vmem:[%s10891_s7 + $0x28] sm:$0xff] (%p8288_p4), %v7437_v35 }
 0x7f5   : > { %v7439_v22 = vld [vmem:[%s10845_s6 + $0x30] sm:$0xff] (%p8288_p4) }
 0x7f6   : > { %7440 = vst [vmem:[%s10891_s7 + $0x30] sm:$0xff] (%p8288_p4), %v7439_v22 }
 0x7f7   : > { %v7441_v49 = vld [vmem:[%s10845_s6 + $0x38] sm:$0xff] (%p8288_p4) }
 0x7f8   : > { %7442 = vst [vmem:[%s10891_s7 + $0x38] sm:$0xff] (%p8288_p4), %v7441_v49 }
 0x7fe   : > { %v7146_v5 = vpop.f32.mrf.mxu0 }
 0x7ff   : > { %v7147_v54 = vadd.f32 %v7146_v5, %v10836_v46  ;;  %v7223_v43 = vpop.f32.mrf.mxu1 }
 0x800   : > { %v7224_v60 = vadd.f32 %v7223_v43, %v10836_v46  ;;  %v7148_v4 = vpop.f32.mrf.mxu0 }
 0x801   : > { %v7319_v55 = vmul.f32 0.5, %v7147_v54  ;;  %v7149_v38 = vadd.f32 %v7148_v4, %v10836_v46  ;;  %v7225_v62 = vpop.f32.mrf.mxu1 }
 0x802   : > { %v7321_v53 = vmul.f32 0.5, %v7224_v60  ;;  %v7226_v63 = vadd.f32 %v7225_v62, %v10836_v46 }
 0x803   : > { %8124 = vtanh.f32 %v7319_v55  ;;  %v7320_v2 = vmul.f32 0.5, %v7149_v38 }
 0x804   : > { %8126 = vtanh.f32 %v7321_v53  ;;  %v7322_v7 = vmul.f32 0.5, %v7226_v63 }
 0x805   : > { %8128 = vtanh.f32 %v7320_v2 }
 0x806   : > { %8130 = vtanh.f32 %v7322_v7 }
 0x810   : > { %v8125_v10 = vpop.eup %8124 }
 0x811   : > { %v8127_v8 = vpop.eup %8126  ;;  %v7359_v9 = vmul.f32 0.5, %v8125_v10 }
 0x812   : > { %v8129_v61 = vpop.eup %8128  ;;  %v7361_v36 = vmul.f32 0.5, %v8127_v8 }
 0x813   : > { %v8131_v24 = vpop.eup %8130  ;;  %v7379_v57 = vadd.f32 0.5, %v7359_v9  ;;  %v7360_v28 = vmul.f32 0.5, %v8129_v61 }
 0x814   : > { %v7381_v13 = vadd.f32 0.5, %v7361_v36  ;;  %v7362_v1 = vmul.f32 0.5, %v8131_v24 }
 0x815   : > { %7399 = vst [vmem:[%s10845_s6 + $0x70] sm:$0xff] %v7379_v57  ;;  %v7380_v17 = vadd.f32 0.5, %v7360_v28 }
 0x816   : > { %7401 = vst [vmem:[%s10845_s6 + $0x80] sm:$0xff] %v7381_v13  ;;  %v7382_v14 = vadd.f32 0.5, %v7362_v1 }
 0x817   : > { %7400 = vst [vmem:[%s10845_s6 + $0x78] sm:$0xff] %v7380_v17 }
 0x818   : > { %7402 = vst [vmem:[%s10845_s6 + $0x88] sm:$0xff] %v7382_v14 }
 0x81c   : > { %v7455_v18 = vld [vmem:[%s10845_s6 + $0x70] sm:$0xff] (%p8288_p4) }
 0x81d   : > { %7456 = vst [vmem:[%s10891_s7 + $0xc0] sm:$0xff] (%p8288_p4), %v7455_v18  ;;  %v7459_v5 = vld [vmem:[%s10845_s6 + $0x80] sm:$0xff] (%p8288_p4) }
 0x81e   : > { %v7457_v15 = vld [vmem:[%s10845_s6 + $0x78] sm:$0xff] (%p8288_p4)  ;;  %7460 = vst [vmem:[%s10891_s7 + $0xd0] sm:$0xff] (%p8288_p4), %v7459_v5 }
 0x81f   : > { %v7461_v54 = vld [vmem:[%s10845_s6 + $0x88] sm:$0xff] (%p8288_p4)  ;;  %7458 = vst [vmem:[%s10891_s7 + $0xc8] sm:$0xff] (%p8288_p4), %v7457_v15 }
 0x820   : > { %7462 = vst [vmem:[%s10891_s7 + $0xd8] sm:$0xff] (%p8288_p4), %v7461_v54 }
 0x829   : > { %v7294_v40 = vpop.f32.mrf.mxu0  ;;  %v7300_v50 = vpop.f32.mrf.mxu1 }
 0x82a   : > { %v7295_v19 = vadd.f32 %v7294_v40, %v10830_v41  ;;  %v7301_v6 = vadd.f32 %v7300_v50, %v10836_v46 }
 0x82b   : > { %v7296_v11 = vpop.f32.mrf.mxu0  ;;  %v7302_v3 = vpop.f32.mrf.mxu1 }
 0x82c   : > { %v7313_v20 = vmul.f32 0.5, %v7295_v19  ;;  %v7323_v0 = vmul.f32 0.5, %v7301_v6  ;;  %v7297_v30 = vadd.f32 %v7296_v11, %v10830_v41  ;;  %v7303_v56 = vadd.f32 %v7302_v3, %v10836_v46 }
 0x82e   : > { %8132 = vtanh.f32 %v7313_v20  ;;  %v7314_v21 = vmul.f32 0.5, %v7297_v30  ;;  %v7324_v23 = vmul.f32 0.5, %v7303_v56 }
 0x82f   : > { %8134 = vtanh.f32 %v7323_v0 }
 0x830   : > { %8136 = vtanh.f32 %v7314_v21 }
 0x831   : > { %8138 = vtanh.f32 %v7324_v23 }
 0x83b   : > { %v8133_v12 = vpop.eup %8132 }
 0x83c   : > { %v8135_v27 = vpop.eup %8134  ;;  %v7353_v59 = vmul.f32 0.5, %v8133_v12 }
 0x83d   : > { %v8137_v29 = vpop.eup %8136  ;;  %v7363_v31 = vmul.f32 0.5, %v8135_v27 }
 0x83e   : > { %v8139_v47 = vpop.eup %8138  ;;  %v7373_v33 = vadd.f32 0.5, %v7353_v59  ;;  %v7354_v41 = vmul.f32 0.5, %v8137_v29 }
 0x83f   : > { %v7383_v34 = vadd.f32 0.5, %v7363_v31  ;;  %v7364_v46 = vmul.f32 0.5, %v8139_v47  ;;  %7411 = sbr.rel (!%p8288_p4) target bundleno = 2124 (0x84c), region = 36 }
 0x840   : > { %7393 = vst [vmem:[%s10845_s6 + $0x40] sm:$0xff] %v7373_v33  ;;  %v7374_v39 = vadd.f32 0.5, %v7354_v41 }
 0x841   : > { %7403 = vst [vmem:[%s10845_s6 + $0x90] sm:$0xff] %v7383_v34  ;;  %v7384_v45 = vadd.f32 0.5, %v7364_v46 }
 0x842   : > { %7394 = vst [vmem:[%s10845_s6 + $0x48] sm:$0xff] %v7374_v39 }
 0x843   : > { %7404 = vst [vmem:[%s10845_s6 + $0x98] sm:$0xff] %v7384_v45 }
 0x847   : > { %v7443_v48 = vld [vmem:[%s10845_s6 + $0x40] sm:$0xff] }
 0x848   : > { %7444 = vst [vmem:[%s10891_s7 + $0x40] sm:$0xff] %v7443_v48  ;;  %v7463_v43 = vld [vmem:[%s10845_s6 + $0x90] sm:$0xff] }
 0x849   : > { %v7445_v26 = vld [vmem:[%s10845_s6 + $0x48] sm:$0xff]  ;;  %7464 = vst [vmem:[%s10891_s7 + $0xe0] sm:$0xff] %v7463_v43 }
 0x84a   : > { %7446 = vst [vmem:[%s10891_s7 + $0x48] sm:$0xff] %v7445_v26  ;;  %v7465_v60 = vld [vmem:[%s10845_s6 + $0x98] sm:$0xff] }
 0x84b   : > { %7466 = vst [vmem:[%s10891_s7 + $0xe8] sm:$0xff] %v7465_v60 }
 0x84c PF: > { %p10_p8 = scmp.ge.s32.totalorder %s8278_s16, 4   ;;  %s11005_s12 = smov %s8191_s13 }
 0x84d   : > { %s11006_s13 = smov %s8286_s19  ;;  %s11007_s14 = smov %s8278_s16 }
 0x84e   :  { %12 = sbr.rel (!%p10_p8) target bundleno = 2 (0x2), region = 85 }

</bundles_post_ra>
